<compile_context>
chip_gen: v7x
topology: tpu7x:2x2x1
jax: 0.10.0
libtpu: 0.0.40
codegen_flags: <defaults>
</compile_context>

<pallas_src>
import numpy as np
import jax
import jax.numpy as jnp
from jax import lax
from jax.experimental import pallas as pl
from jax.experimental.pallas import tpu as pltpu

R = 8           # number of rotations
BASE = 16
BN_EPS = 1e-5
LANES = 128


def _round_up(x, m):
    return (x + m - 1) // m * m


# ------------------------- Pallas kernels (fused GEMM + epilogue) -------------------------

def _conv_bn_relu_kernel(x_ref, w_ref, b_ref, g_ref, bt_ref, o_ref):
    """GEMM (bf16 in / f32 acc) + bias + training-mode BN (per column) + ReLU."""
    acc = jnp.dot(x_ref[...], w_ref[...], preferred_element_type=jnp.float32)
    acc = acc + b_ref[...]
    mean = jnp.mean(acc, axis=0, keepdims=True)
    var = jnp.maximum(jnp.mean(acc * acc, axis=0, keepdims=True) - mean * mean, 0.0)
    y = (acc - mean) * lax.rsqrt(var + BN_EPS) * g_ref[...] + bt_ref[...]
    y = jnp.maximum(y, 0.0)
    o_ref[...] = y.astype(o_ref.dtype)


def _conv_bn_relu_nms_kernel(x_ref, w_ref, b_ref, g_ref, bt_ref, o_ref, n_ref):
    """Same as above, plus the model's `nms` reduction fused on the f32 activation."""
    acc = jnp.dot(x_ref[...], w_ref[...], preferred_element_type=jnp.float32)
    acc = acc + b_ref[...]
    mean = jnp.mean(acc, axis=0, keepdims=True)
    var = jnp.maximum(jnp.mean(acc * acc, axis=0, keepdims=True) - mean * mean, 0.0)
    y = (acc - mean) * lax.rsqrt(var + BN_EPS) * g_ref[...] + bt_ref[...]
    y = jnp.maximum(y, 0.0)
    o_ref[...] = y.astype(o_ref.dtype)

    # nms: view channels as (C // R, R); groups are contiguous column blocks of width R.
    M, C = y.shape
    total = 0.0
    for gstart in range(0, C, R):
        grp = y[:, gstart:gstart + R]
        mx = jnp.max(grp, axis=1, keepdims=True)
        msk = (mx != grp).astype(jnp.float32)        # zero out the per-position maxima
        total = total + jnp.sum(grp * msk)
    n_ref[0, 0] = total / float(M * C)


def _conv_bias_kernel(x_ref, w_ref, b_ref, o_ref):
    acc = jnp.dot(x_ref[...], w_ref[...], preferred_element_type=jnp.float32)
    o_ref[...] = (acc + b_ref[...]).astype(o_ref.dtype)


# ------------------------- wrappers -------------------------

def _pad_k(a, axis):
    """Zero-pad the contraction axis to a multiple of 128 (keeps MXU tiles exact)."""
    k = a.shape[axis]
    kp = _round_up(k, LANES)
    if kp == k:
        return a
    pads = [(0, 0)] * a.ndim
    pads[axis] = (0, kp - k)
    return jnp.pad(a, pads)


def conv_bn_relu(patches, w, bias, gamma, beta, out_dtype=jnp.bfloat16):
    """One fused conv layer: (M,K)@(K,C) + bias + batch-stat BN + ReLU -> (M,C)."""
    M = patches.shape[0]
    C = w.shape[1]
    xp = _pad_k(patches, 1).astype(jnp.bfloat16)
    wp = _pad_k(w, 0).astype(jnp.bfloat16)
    return pl.pallas_call(
        _conv_bn_relu_kernel,
        out_shape=jax.ShapeDtypeStruct((M, C), out_dtype),
    )(xp, wp,
      bias.reshape(1, C).astype(jnp.float32),
      gamma.reshape(1, C).astype(jnp.float32),
      beta.reshape(1, C).astype(jnp.float32))


def conv_bn_relu_nms(patches, w, bias, gamma, beta, out_dtype=jnp.bfloat16):
    """Fused conv layer + nms scalar (rconv2)."""
    M = patches.shape[0]
    C = w.shape[1]
    xp = _pad_k(patches, 1).astype(jnp.bfloat16)
    wp = _pad_k(w, 0).astype(jnp.bfloat16)
    feat, n = pl.pallas_call(
        _conv_bn_relu_nms_kernel,
        out_shape=(jax.ShapeDtypeStruct((M, C), out_dtype),
                   jax.ShapeDtypeStruct((1, 1), jnp.float32)),
        out_specs=(pl.BlockSpec(memory_space=pltpu.MemorySpace.VMEM),
                   pl.BlockSpec(memory_space=pltpu.MemorySpace.SMEM)),
    )(xp, wp,
      bias.reshape(1, C).astype(jnp.float32),
      gamma.reshape(1, C).astype(jnp.float32),
      beta.reshape(1, C).astype(jnp.float32))
    return feat, n[0, 0]


def conv_bias(patches, w, bias, out_dtype=jnp.float32):
    """Fused conv layer with bias only (conv6)."""
    M = patches.shape[0]
    C = w.shape[1]
    xp = _pad_k(patches, 1).astype(jnp.bfloat16)
    wp = _pad_k(w, 0).astype(jnp.bfloat16)
    return pl.pallas_call(
        _conv_bias_kernel,
        out_shape=jax.ShapeDtypeStruct((M, C), out_dtype),
    )(xp, wp, bias.reshape(1, C).astype(jnp.float32))


# ------------------------- im2col / weight construction (trace-time) -------------------------

# standard 3x3 "same" offsets, index = (dy+1)*3 + (dx+1)  (== kh*3 + kw with dy=kh-1, dx=kw-1)
_STD_OFFS = [(dy, dx) for dy in (-1, 0, 1) for dx in (-1, 0, 1)]


def im2col3x3(x_nhwc):
    """(N,H,W,C) -> (N*H*W, 9*C), column k = tap*C + c, zero padded borders."""
    N, H, W, C = x_nhwc.shape
    xp = jnp.pad(x_nhwc, ((0, 0), (1, 1), (1, 1), (0, 0)))
    cols = [xp[:, 1 + dy:1 + dy + H, 1 + dx:1 + dx + W, :] for dy, dx in _STD_OFFS]
    return jnp.concatenate(cols, axis=-1).reshape(N * H * W, 9 * C)


def _rot_tap_perms():
    """perm[r][j_std] = original tap j whose rotated+rounded offset equals std offset j_std.

    Reproduces cal_rot_pad: padded-conv-then-crop == gather at (dy,dx)=(-l[j,1],-l[j,0]),
    and the rounded 45-degree rotations permute the 3x3 taps (all offsets stay in {-1,0,1})."""
    perms = []
    for r in range(R):
        th = 2 * np.pi / R * r
        rot = np.array([[np.cos(th), -np.sin(th)], [np.sin(th), np.cos(th)]])
        perm = np.full(9, -1, dtype=np.int64)
        for kh in range(3):
            for kw in range(3):
                j = kh * 3 + kw
                l = np.around(np.array([kw - 1.0, kh - 1.0]) @ rot)
                dy, dx = -int(l[1]), -int(l[0])
                perm[(dy + 1) * 3 + (dx + 1)] = j
        assert sorted(perm.tolist()) == list(range(9))
        perms.append(perm)
    return perms


_TAP_PERMS = _rot_tap_perms()


def _rconv_weight_matrix(w, rotate_channels):
    """Rotate_Conv weight as one standard-im2col GEMM weight: (9*Cin, R*Cout_per).

    w: (Cout_per, Cin, 3, 3).  Output column = rot*Cout_per + oc (torch concat order)."""
    cout, cin = w.shape[0], w.shape[1]
    cols = []
    for r in range(R):
        if rotate_channels:
            idx = np.arange(cin)
            grp, sub = idx // (cin // R), idx % (cin // R)
            perm_c = ((grp - r) % R) * (cin // R) + sub       # rotateChannel applied r times
            wr = w[:, jnp.asarray(perm_c), :, :]
        else:
            wr = w                                            # seperate=True: same weight
        wt = jnp.transpose(wr, (2, 3, 1, 0)).reshape(9, cin, cout)   # rows = original tap order
        wt = wt[jnp.asarray(_TAP_PERMS[r])]                   # rows -> standard offset order
        cols.append(wt.reshape(9 * cin, cout))
    return jnp.concatenate(cols, axis=1)


def _conv_weight_matrix(w):
    """nn.Conv2d weight (Cout,Cin,3,3) -> (9*Cin, Cout) in standard im2col order."""
    cout, cin = w.shape[0], w.shape[1]
    return jnp.transpose(w, (2, 3, 1, 0)).reshape(9 * cin, cout)


def max_pool2(x_nhwc):
    N, H, W, C = x_nhwc.shape
    return jnp.max(x_nhwc.reshape(N, H // 2, 2, W // 2, 2, C), axis=(2, 4))


# ------------------------- model -------------------------

def init_params(key):
    ks = jax.random.split(key, 10)
    p = {}
    p["w1"] = 0.4 * jax.random.normal(ks[0], (2, 1, 3, 3), jnp.float32)
    p["bn1_g"], p["bn1_b"] = jnp.ones((2,), jnp.float32), jnp.zeros((2,), jnp.float32)
    p["w2"] = 0.15 * jax.random.normal(ks[1], (2, BASE, 3, 3), jnp.float32)
    p["bn2_g"], p["bn2_b"] = jnp.ones((2,), jnp.float32), jnp.zeros((2,), jnp.float32)
    p["w3"] = 0.1 * jax.random.normal(ks[2], (32, 16, 3, 3), jnp.float32)
    p["b3"] = 0.05 * jax.random.normal(ks[3], (32,), jnp.float32)
    p["bn3_g"], p["bn3_b"] = jnp.ones((32,), jnp.float32), jnp.zeros((32,), jnp.float32)
    p["w4"] = 0.1 * jax.random.normal(ks[4], (32, 32, 3, 3), jnp.float32)
    p["b4"] = 0.05 * jax.random.normal(ks[5], (32,), jnp.float32)
    p["bn4_g"], p["bn4_b"] = jnp.ones((32,), jnp.float32), jnp.zeros((32,), jnp.float32)
    p["w5"] = 0.1 * jax.random.normal(ks[6], (64, 32, 3, 3), jnp.float32)
    p["b5"] = 0.05 * jax.random.normal(ks[7], (64,), jnp.float32)
    p["bn5_g"], p["bn5_b"] = jnp.ones((64,), jnp.float32), jnp.zeros((64,), jnp.float32)
    p["w6"] = 0.1 * jax.random.normal(ks[8], (10, 64, 3, 3), jnp.float32)
    p["b6"] = 0.05 * jax.random.normal(ks[9], (10,), jnp.float32)
    return p


def forward(params, x_nchw):
    x = jnp.transpose(x_nchw, (0, 2, 3, 1)).astype(jnp.bfloat16)   # NCHW -> NHWC
    N, H, W, _ = x.shape
    zeros16 = jnp.zeros((2 * R,), jnp.float32)   # Rotate_Conv ignores the conv bias

    # rconv1: Rotate_Conv(1, 16, 3, seperate=True) -> one fused GEMM + grouped BN + ReLU
    w1m = _rconv_weight_matrix(params["w1"], rotate_channels=False)           # (9, 16)
    o = conv_bn_relu(im2col3x3(x), w1m, zeros16,
                     jnp.tile(params["bn1_g"], R), jnp.tile(params["bn1_b"], R))

    # rconv2: Rotate_Conv(16, 16, 3) with the nms reduction fused into the epilogue
    w2m = _rconv_weight_matrix(params["w2"], rotate_channels=True)            # (144, 16)
    feat, n_val = conv_bn_relu_nms(im2col3x3(o.reshape(N, H, W, R * 2)), w2m, zeros16,
                                   jnp.tile(params["bn2_g"], R), jnp.tile(params["bn2_b"], R))
    feat = feat.reshape(N, H, W, R * 2)

    # max_pool2d(2) -> conv3 -> conv4 -> max_pool2d(2) -> conv5 -> conv6 -> global max
    p = max_pool2(feat)
    H2, W2 = H // 2, W // 2
    o = conv_bn_relu(im2col3x3(p), _conv_weight_matrix(params["w3"]), params["b3"],
                     params["bn3_g"], params["bn3_b"])
    o = conv_bn_relu(im2col3x3(o.reshape(N, H2, W2, 32)), _conv_weight_matrix(params["w4"]),
                     params["b4"], params["bn4_g"], params["bn4_b"])
    p = max_pool2(o.reshape(N, H2, W2, 32))
    H3, W3 = H2 // 2, W2 // 2
    o = conv_bn_relu(im2col3x3(p), _conv_weight_matrix(params["w5"]), params["b5"],
                     params["bn5_g"], params["bn5_b"])
    o = conv_bias(im2col3x3(o.reshape(N, H3, W3, 64)), _conv_weight_matrix(params["w6"]),
                  params["b6"])                                              # (N*H3*W3, 10) f32

    out = jnp.max(o.reshape(N, H3, W3, 10), axis=(1, 2))                     # global max pool
    return out, n_val


if __name__ == "__main__":
    key = jax.random.PRNGKey(0)
    pkey, xkey = jax.random.split(key)
    params = init_params(pkey)
    x = jax.random.normal(xkey, (2, 1, 16, 16), jnp.float32)   # NCHW, like the torch input
    out, n_val = jax.jit(forward)(params, x)
    jax.block_until_ready((out, n_val))
    assert out.shape == (2, 10)
    assert n_val.shape == ()
    assert bool(jnp.all(jnp.isfinite(out))) and bool(jnp.isfinite(n_val))
    print("KERNEL_OK")
</pallas_src>

<mosaic_0001>
module attributes {stable_mosaic.version = 11 : i64} {
  func.func @_conv_bn_relu_kernel(%arg0: memref<512x128xbf16, #tpu.memory_space<vmem>>, %arg1: memref<128x16xbf16, #tpu.memory_space<vmem>>, %arg2: memref<1x16xf32, #tpu.memory_space<vmem>>, %arg3: memref<1x16xf32, #tpu.memory_space<vmem>>, %arg4: memref<1x16xf32, #tpu.memory_space<vmem>>, %arg5: memref<512x16xbf16, #tpu.memory_space<vmem>>) attributes {dimension_semantics = [], scalar_prefetch = 0 : i64, scratch_operands = 0 : i64, tpu.core_type = #tpu.core_type<tc>} {
    %c0 = arith.constant 0 : index
    %c0_0 = arith.constant 0 : index
    %0 = vector.load %arg0[%c0, %c0_0] : memref<512x128xbf16, #tpu.memory_space<vmem>>, vector<512x128xbf16>
    %c0_1 = arith.constant 0 : index
    %c0_2 = arith.constant 0 : index
    %1 = vector.load %arg1[%c0_1, %c0_2] : memref<128x16xbf16, #tpu.memory_space<vmem>>, vector<128x16xbf16>
    %cst = arith.constant dense<0.000000e+00> : vector<512x16xf32>
    %2 = tpu.matmul %0, %1, %cst {dimension_numbers = #tpu.dot_dimension_numbers<[1], [0], [0], [1], [0, 0, 1, 1], [], []>} : vector<512x128xbf16>, vector<128x16xbf16>, vector<512x16xf32> -> vector<512x16xf32>
    %c0_3 = arith.constant 0 : index
    %c0_4 = arith.constant 0 : index
    %3 = vector.load %arg2[%c0_3, %c0_4] : memref<1x16xf32, #tpu.memory_space<vmem>>, vector<1x16xf32>
    %4 = vector.broadcast %3 : vector<1x16xf32> to vector<512x16xf32>
    %5 = arith.addf %2, %4 : vector<512x16xf32>
    %cst_5 = arith.constant dense<0.000000e+00> : vector<16xf32>
    %6 = vector.multi_reduction <add>, %5, %cst_5 [0] : vector<512x16xf32> to vector<16xf32>
    %7 = vector.shape_cast %6 : vector<16xf32> to vector<1x16xf32>
    %cst_6 = arith.constant 5.120000e+02 : f32
    %8 = vector.broadcast %cst_6 : f32 to vector<1x16xf32>
    %9 = arith.divf %7, %8 : vector<1x16xf32>
    %10 = arith.mulf %5, %5 : vector<512x16xf32>
    %cst_7 = arith.constant dense<0.000000e+00> : vector<16xf32>
    %11 = vector.multi_reduction <add>, %10, %cst_7 [0] : vector<512x16xf32> to vector<16xf32>
    %12 = vector.shape_cast %11 : vector<16xf32> to vector<1x16xf32>
    %cst_8 = arith.constant 5.120000e+02 : f32
    %13 = vector.broadcast %cst_8 : f32 to vector<1x16xf32>
    %14 = arith.divf %12, %13 : vector<1x16xf32>
    %15 = arith.mulf %9, %9 : vector<1x16xf32>
    %16 = arith.subf %14, %15 : vector<1x16xf32>
    %cst_9 = arith.constant 0.000000e+00 : f32
    %17 = vector.broadcast %cst_9 : f32 to vector<1x16xf32>
    %18 = arith.maximumf %16, %17 : vector<1x16xf32>
    %19 = vector.broadcast %9 : vector<1x16xf32> to vector<512x16xf32>
    %20 = arith.subf %5, %19 : vector<512x16xf32>
    %cst_10 = arith.constant 9.99999974E-6 : f32
    %21 = vector.broadcast %cst_10 : f32 to vector<1x16xf32>
    %22 = arith.addf %18, %21 : vector<1x16xf32>
    %23 = math.rsqrt %22 : vector<1x16xf32>
    %24 = vector.broadcast %23 : vector<1x16xf32> to vector<512x16xf32>
    %25 = arith.mulf %20, %24 : vector<512x16xf32>
    %c0_11 = arith.constant 0 : index
    %c0_12 = arith.constant 0 : index
    %26 = vector.load %arg3[%c0_11, %c0_12] : memref<1x16xf32, #tpu.memory_space<vmem>>, vector<1x16xf32>
    %27 = vector.broadcast %26 : vector<1x16xf32> to vector<512x16xf32>
    %28 = arith.mulf %25, %27 : vector<512x16xf32>
    %c0_13 = arith.constant 0 : index
    %c0_14 = arith.constant 0 : index
    %29 = vector.load %arg4[%c0_13, %c0_14] : memref<1x16xf32, #tpu.memory_space<vmem>>, vector<1x16xf32>
    %30 = vector.broadcast %29 : vector<1x16xf32> to vector<512x16xf32>
    %31 = arith.addf %28, %30 : vector<512x16xf32>
    %cst_15 = arith.constant 0.000000e+00 : f32
    %32 = vector.broadcast %cst_15 : f32 to vector<512x16xf32>
    %33 = arith.maximumf %31, %32 : vector<512x16xf32>
    %34 = arith.truncf %33 : vector<512x16xf32> to vector<512x16xbf16>
    %c0_16 = arith.constant 0 : index
    %c0_17 = arith.constant 0 : index
    %35 = vector.load %arg5[%c0_16, %c0_17] : memref<512x16xbf16, #tpu.memory_space<vmem>>, vector<512x16xbf16>
    tpu.vector_store %arg5[%c0_16, %c0_17], %34 {strides = array<i32>} : memref<512x16xbf16, #tpu.memory_space<vmem>>, vector<512x16xbf16>,
    return
  }
}

module attributes {stable_mosaic.version = 11 : i64} {
  func.func @_conv_bn_relu_nms_kernel(%arg0: memref<512x256xbf16, #tpu.memory_space<vmem>>, %arg1: memref<256x16xbf16, #tpu.memory_space<vmem>>, %arg2: memref<1x16xf32, #tpu.memory_space<vmem>>, %arg3: memref<1x16xf32, #tpu.memory_space<vmem>>, %arg4: memref<1x16xf32, #tpu.memory_space<vmem>>, %arg5: memref<512x16xbf16, #tpu.memory_space<vmem>>, %arg6: memref<1x1xf32, #tpu.memory_space<smem>>) attributes {dimension_semantics = [], scalar_prefetch = 0 : i64, scratch_operands = 0 : i64, tpu.core_type = #tpu.core_type<tc>} {
    %c0 = arith.constant 0 : index
    %c0_0 = arith.constant 0 : index
    %0 = vector.load %arg0[%c0, %c0_0] : memref<512x256xbf16, #tpu.memory_space<vmem>>, vector<512x256xbf16>
    %c0_1 = arith.constant 0 : index
    %c0_2 = arith.constant 0 : index
    %1 = vector.load %arg1[%c0_1, %c0_2] : memref<256x16xbf16, #tpu.memory_space<vmem>>, vector<256x16xbf16>
    %cst = arith.constant dense<0.000000e+00> : vector<512x16xf32>
    %2 = tpu.matmul %0, %1, %cst {dimension_numbers = #tpu.dot_dimension_numbers<[1], [0], [0], [1], [0, 0, 1, 1], [], []>} : vector<512x256xbf16>, vector<256x16xbf16>, vector<512x16xf32> -> vector<512x16xf32>
    %c0_3 = arith.constant 0 : index
    %c0_4 = arith.constant 0 : index
    %3 = vector.load %arg2[%c0_3, %c0_4] : memref<1x16xf32, #tpu.memory_space<vmem>>, vector<1x16xf32>
    %4 = vector.broadcast %3 : vector<1x16xf32> to vector<512x16xf32>
    %5 = arith.addf %2, %4 : vector<512x16xf32>
    %cst_5 = arith.constant dense<0.000000e+00> : vector<16xf32>
    %6 = vector.multi_reduction <add>, %5, %cst_5 [0] : vector<512x16xf32> to vector<16xf32>
    %7 = vector.shape_cast %6 : vector<16xf32> to vector<1x16xf32>
    %cst_6 = arith.constant 5.120000e+02 : f32
    %8 = vector.broadcast %cst_6 : f32 to vector<1x16xf32>
    %9 = arith.divf %7, %8 : vector<1x16xf32>
    %10 = arith.mulf %5, %5 : vector<512x16xf32>
    %cst_7 = arith.constant dense<0.000000e+00> : vector<16xf32>
    %11 = vector.multi_reduction <add>, %10, %cst_7 [0] : vector<512x16xf32> to vector<16xf32>
    %12 = vector.shape_cast %11 : vector<16xf32> to vector<1x16xf32>
    %cst_8 = arith.constant 5.120000e+02 : f32
    %13 = vector.broadcast %cst_8 : f32 to vector<1x16xf32>
    %14 = arith.divf %12, %13 : vector<1x16xf32>
    %15 = arith.mulf %9, %9 : vector<1x16xf32>
    %16 = arith.subf %14, %15 : vector<1x16xf32>
    %cst_9 = arith.constant 0.000000e+00 : f32
    %17 = vector.broadcast %cst_9 : f32 to vector<1x16xf32>
    %18 = arith.maximumf %16, %17 : vector<1x16xf32>
    %19 = vector.broadcast %9 : vector<1x16xf32> to vector<512x16xf32>
    %20 = arith.subf %5, %19 : vector<512x16xf32>
    %cst_10 = arith.constant 9.99999974E-6 : f32
    %21 = vector.broadcast %cst_10 : f32 to vector<1x16xf32>
    %22 = arith.addf %18, %21 : vector<1x16xf32>
    %23 = math.rsqrt %22 : vector<1x16xf32>
    %24 = vector.broadcast %23 : vector<1x16xf32> to vector<512x16xf32>
    %25 = arith.mulf %20, %24 : vector<512x16xf32>
    %c0_11 = arith.constant 0 : index
    %c0_12 = arith.constant 0 : index
    %26 = vector.load %arg3[%c0_11, %c0_12] : memref<1x16xf32, #tpu.memory_space<vmem>>, vector<1x16xf32>
    %27 = vector.broadcast %26 : vector<1x16xf32> to vector<512x16xf32>
    %28 = arith.mulf %25, %27 : vector<512x16xf32>
    %c0_13 = arith.constant 0 : index
    %c0_14 = arith.constant 0 : index
    %29 = vector.load %arg4[%c0_13, %c0_14] : memref<1x16xf32, #tpu.memory_space<vmem>>, vector<1x16xf32>
    %30 = vector.broadcast %29 : vector<1x16xf32> to vector<512x16xf32>
    %31 = arith.addf %28, %30 : vector<512x16xf32>
    %cst_15 = arith.constant 0.000000e+00 : f32
    %32 = vector.broadcast %cst_15 : f32 to vector<512x16xf32>
    %33 = arith.maximumf %31, %32 : vector<512x16xf32>
    %34 = arith.truncf %33 : vector<512x16xf32> to vector<512x16xbf16>
    %c0_16 = arith.constant 0 : index
    %c0_17 = arith.constant 0 : index
    %35 = vector.load %arg5[%c0_16, %c0_17] : memref<512x16xbf16, #tpu.memory_space<vmem>>, vector<512x16xbf16>
    tpu.vector_store %arg5[%c0_16, %c0_17], %34 {strides = array<i32>} : memref<512x16xbf16, #tpu.memory_space<vmem>>, vector<512x16xbf16>,
    %36 = vector.extract_strided_slice %33 {offsets = [0, 0], sizes = [512, 8], strides = [1, 1]} : vector<512x16xf32> to vector<512x8xf32>
    %cst_18 = arith.constant dense<0xFF800000> : vector<512xf32>
    %37 = vector.multi_reduction <maximumf>, %36, %cst_18 [1] : vector<512x8xf32> to vector<512xf32>
    %38 = vector.shape_cast %37 : vector<512xf32> to vector<512x1xf32>
    %39 = vector.broadcast %38 : vector<512x1xf32> to vector<512x8xf32>
    %40 = arith.cmpf one, %39, %36 : vector<512x8xf32>
    %41 = arith.extui %40 : vector<512x8xi1> to vector<512x8xi32>
    %42 = arith.sitofp %41 : vector<512x8xi32> to vector<512x8xf32>
    %43 = arith.mulf %36, %42 : vector<512x8xf32>
    %44 = vector.shape_cast %43 : vector<512x8xf32> to vector<1x512x8xf32>
    %cst_19 = arith.constant dense<0.000000e+00> : vector<1xf32>
    %45 = vector.multi_reduction <add>, %44, %cst_19 [1, 2] : vector<1x512x8xf32> to vector<1xf32>
    %46 = vector.shape_cast %45 : vector<1xf32> to vector<1x1x1xf32>
    %47 = vector.extract %46[0, 0, 0] : f32 from vector<1x1x1xf32>
    %cst_20 = arith.constant 0.000000e+00 : f32
    %48 = arith.addf %cst_20, %47 : f32
    %49 = vector.extract_strided_slice %33 {offsets = [0, 8], sizes = [512, 8], strides = [1, 1]} : vector<512x16xf32> to vector<512x8xf32>
    %cst_21 = arith.constant dense<0xFF800000> : vector<512xf32>
    %50 = vector.multi_reduction <maximumf>, %49, %cst_21 [1] : vector<512x8xf32> to vector<512xf32>
    %51 = vector.shape_cast %50 : vector<512xf32> to vector<512x1xf32>
    %52 = vector.broadcast %51 : vector<512x1xf32> to vector<512x8xf32>
    %53 = arith.cmpf one, %52, %49 : vector<512x8xf32>
    %54 = arith.extui %53 : vector<512x8xi1> to vector<512x8xi32>
    %55 = arith.sitofp %54 : vector<512x8xi32> to vector<512x8xf32>
    %56 = arith.mulf %49, %55 : vector<512x8xf32>
    %57 = vector.shape_cast %56 : vector<512x8xf32> to vector<1x512x8xf32>
    %cst_22 = arith.constant dense<0.000000e+00> : vector<1xf32>
    %58 = vector.multi_reduction <add>, %57, %cst_22 [1, 2] : vector<1x512x8xf32> to vector<1xf32>
    %59 = vector.shape_cast %58 : vector<1xf32> to vector<1x1x1xf32>
    %60 = vector.extract %59[0, 0, 0] : f32 from vector<1x1x1xf32>
    %61 = arith.addf %48, %60 : f32
    %cst_23 = arith.constant 8.192000e+03 : f32
    %62 = arith.divf %61, %cst_23 : f32
    %c0_24 = arith.constant 0 : index
    %c0_25 = arith.constant 0 : index
    %63 = memref.load %arg6[%c0_24, %c0_25] : memref<1x1xf32, #tpu.memory_space<smem>>
    memref.store %62, %arg6[%c0_24, %c0_25] : memref<1x1xf32, #tpu.memory_space<smem>>
    return
  }
}

module attributes {stable_mosaic.version = 11 : i64} {
  func.func @_conv_bn_relu_kernel(%arg0: memref<128x256xbf16, #tpu.memory_space<vmem>>, %arg1: memref<256x32xbf16, #tpu.memory_space<vmem>>, %arg2: memref<1x32xf32, #tpu.memory_space<vmem>>, %arg3: memref<1x32xf32, #tpu.memory_space<vmem>>, %arg4: memref<1x32xf32, #tpu.memory_space<vmem>>, %arg5: memref<128x32xbf16, #tpu.memory_space<vmem>>) attributes {dimension_semantics = [], scalar_prefetch = 0 : i64, scratch_operands = 0 : i64, tpu.core_type = #tpu.core_type<tc>} {
    %c0 = arith.constant 0 : index
    %c0_0 = arith.constant 0 : index
    %0 = vector.load %arg0[%c0, %c0_0] : memref<128x256xbf16, #tpu.memory_space<vmem>>, vector<128x256xbf16>
    %c0_1 = arith.constant 0 : index
    %c0_2 = arith.constant 0 : index
    %1 = vector.load %arg1[%c0_1, %c0_2] : memref<256x32xbf16, #tpu.memory_space<vmem>>, vector<256x32xbf16>
    %cst = arith.constant dense<0.000000e+00> : vector<128x32xf32>
    %2 = tpu.matmul %0, %1, %cst {dimension_numbers = #tpu.dot_dimension_numbers<[1], [0], [0], [1], [0, 0, 1, 1], [], []>} : vector<128x256xbf16>, vector<256x32xbf16>, vector<128x32xf32> -> vector<128x32xf32>
    %c0_3 = arith.constant 0 : index
    %c0_4 = arith.constant 0 : index
    %3 = vector.load %arg2[%c0_3, %c0_4] : memref<1x32xf32, #tpu.memory_space<vmem>>, vector<1x32xf32>
    %4 = vector.broadcast %3 : vector<1x32xf32> to vector<128x32xf32>
    %5 = arith.addf %2, %4 : vector<128x32xf32>
    %cst_5 = arith.constant dense<0.000000e+00> : vector<32xf32>
    %6 = vector.multi_reduction <add>, %5, %cst_5 [0] : vector<128x32xf32> to vector<32xf32>
    %7 = vector.shape_cast %6 : vector<32xf32> to vector<1x32xf32>
    %cst_6 = arith.constant 1.280000e+02 : f32
    %8 = vector.broadcast %cst_6 : f32 to vector<1x32xf32>
    %9 = arith.divf %7, %8 : vector<1x32xf32>
    %10 = arith.mulf %5, %5 : vector<128x32xf32>
    %cst_7 = arith.constant dense<0.000000e+00> : vector<32xf32>
    %11 = vector.multi_reduction <add>, %10, %cst_7 [0] : vector<128x32xf32> to vector<32xf32>
    %12 = vector.shape_cast %11 : vector<32xf32> to vector<1x32xf32>
    %cst_8 = arith.constant 1.280000e+02 : f32
    %13 = vector.broadcast %cst_8 : f32 to vector<1x32xf32>
    %14 = arith.divf %12, %13 : vector<1x32xf32>
    %15 = arith.mulf %9, %9 : vector<1x32xf32>
    %16 = arith.subf %14, %15 : vector<1x32xf32>
    %cst_9 = arith.constant 0.000000e+00 : f32
    %17 = vector.broadcast %cst_9 : f32 to vector<1x32xf32>
    %18 = arith.maximumf %16, %17 : vector<1x32xf32>
    %19 = vector.broadcast %9 : vector<1x32xf32> to vector<128x32xf32>
    %20 = arith.subf %5, %19 : vector<128x32xf32>
    %cst_10 = arith.constant 9.99999974E-6 : f32
    %21 = vector.broadcast %cst_10 : f32 to vector<1x32xf32>
    %22 = arith.addf %18, %21 : vector<1x32xf32>
    %23 = math.rsqrt %22 : vector<1x32xf32>
    %24 = vector.broadcast %23 : vector<1x32xf32> to vector<128x32xf32>
    %25 = arith.mulf %20, %24 : vector<128x32xf32>
    %c0_11 = arith.constant 0 : index
    %c0_12 = arith.constant 0 : index
    %26 = vector.load %arg3[%c0_11, %c0_12] : memref<1x32xf32, #tpu.memory_space<vmem>>, vector<1x32xf32>
    %27 = vector.broadcast %26 : vector<1x32xf32> to vector<128x32xf32>
    %28 = arith.mulf %25, %27 : vector<128x32xf32>
    %c0_13 = arith.constant 0 : index
    %c0_14 = arith.constant 0 : index
    %29 = vector.load %arg4[%c0_13, %c0_14] : memref<1x32xf32, #tpu.memory_space<vmem>>, vector<1x32xf32>
    %30 = vector.broadcast %29 : vector<1x32xf32> to vector<128x32xf32>
    %31 = arith.addf %28, %30 : vector<128x32xf32>
    %cst_15 = arith.constant 0.000000e+00 : f32
    %32 = vector.broadcast %cst_15 : f32 to vector<128x32xf32>
    %33 = arith.maximumf %31, %32 : vector<128x32xf32>
    %34 = arith.truncf %33 : vector<128x32xf32> to vector<128x32xbf16>
    %c0_16 = arith.constant 0 : index
    %c0_17 = arith.constant 0 : index
    %35 = vector.load %arg5[%c0_16, %c0_17] : memref<128x32xbf16, #tpu.memory_space<vmem>>, vector<128x32xbf16>
    tpu.vector_store %arg5[%c0_16, %c0_17], %34 {strides = array<i32>} : memref<128x32xbf16, #tpu.memory_space<vmem>>, vector<128x32xbf16>,
    return
  }
}

module attributes {stable_mosaic.version = 11 : i64} {
  func.func @_conv_bn_relu_kernel(%arg0: memref<128x384xbf16, #tpu.memory_space<vmem>>, %arg1: memref<384x32xbf16, #tpu.memory_space<vmem>>, %arg2: memref<1x32xf32, #tpu.memory_space<vmem>>, %arg3: memref<1x32xf32, #tpu.memory_space<vmem>>, %arg4: memref<1x32xf32, #tpu.memory_space<vmem>>, %arg5: memref<128x32xbf16, #tpu.memory_space<vmem>>) attributes {dimension_semantics = [], scalar_prefetch = 0 : i64, scratch_operands = 0 : i64, tpu.core_type = #tpu.core_type<tc>} {
    %c0 = arith.constant 0 : index
    %c0_0 = arith.constant 0 : index
    %0 = vector.load %arg0[%c0, %c0_0] : memref<128x384xbf16, #tpu.memory_space<vmem>>, vector<128x384xbf16>
    %c0_1 = arith.constant 0 : index
    %c0_2 = arith.constant 0 : index
    %1 = vector.load %arg1[%c0_1, %c0_2] : memref<384x32xbf16, #tpu.memory_space<vmem>>, vector<384x32xbf16>
    %cst = arith.constant dense<0.000000e+00> : vector<128x32xf32>
    %2 = tpu.matmul %0, %1, %cst {dimension_numbers = #tpu.dot_dimension_numbers<[1], [0], [0], [1], [0, 0, 1, 1], [], []>} : vector<128x384xbf16>, vector<384x32xbf16>, vector<128x32xf32> -> vector<128x32xf32>
    %c0_3 = arith.constant 0 : index
    %c0_4 = arith.constant 0 : index
    %3 = vector.load %arg2[%c0_3, %c0_4] : memref<1x32xf32, #tpu.memory_space<vmem>>, vector<1x32xf32>
    %4 = vector.broadcast %3 : vector<1x32xf32> to vector<128x32xf32>
    %5 = arith.addf %2, %4 : vector<128x32xf32>
    %cst_5 = arith.constant dense<0.000000e+00> : vector<32xf32>
    %6 = vector.multi_reduction <add>, %5, %cst_5 [0] : vector<128x32xf32> to vector<32xf32>
    %7 = vector.shape_cast %6 : vector<32xf32> to vector<1x32xf32>
    %cst_6 = arith.constant 1.280000e+02 : f32
    %8 = vector.broadcast %cst_6 : f32 to vector<1x32xf32>
    %9 = arith.divf %7, %8 : vector<1x32xf32>
    %10 = arith.mulf %5, %5 : vector<128x32xf32>
    %cst_7 = arith.constant dense<0.000000e+00> : vector<32xf32>
    %11 = vector.multi_reduction <add>, %10, %cst_7 [0] : vector<128x32xf32> to vector<32xf32>
    %12 = vector.shape_cast %11 : vector<32xf32> to vector<1x32xf32>
    %cst_8 = arith.constant 1.280000e+02 : f32
    %13 = vector.broadcast %cst_8 : f32 to vector<1x32xf32>
    %14 = arith.divf %12, %13 : vector<1x32xf32>
    %15 = arith.mulf %9, %9 : vector<1x32xf32>
    %16 = arith.subf %14, %15 : vector<1x32xf32>
    %cst_9 = arith.constant 0.000000e+00 : f32
    %17 = vector.broadcast %cst_9 : f32 to vector<1x32xf32>
    %18 = arith.maximumf %16, %17 : vector<1x32xf32>
    %19 = vector.broadcast %9 : vector<1x32xf32> to vector<128x32xf32>
    %20 = arith.subf %5, %19 : vector<128x32xf32>
    %cst_10 = arith.constant 9.99999974E-6 : f32
    %21 = vector.broadcast %cst_10 : f32 to vector<1x32xf32>
    %22 = arith.addf %18, %21 : vector<1x32xf32>
    %23 = math.rsqrt %22 : vector<1x32xf32>
    %24 = vector.broadcast %23 : vector<1x32xf32> to vector<128x32xf32>
    %25 = arith.mulf %20, %24 : vector<128x32xf32>
    %c0_11 = arith.constant 0 : index
    %c0_12 = arith.constant 0 : index
    %26 = vector.load %arg3[%c0_11, %c0_12] : memref<1x32xf32, #tpu.memory_space<vmem>>, vector<1x32xf32>
    %27 = vector.broadcast %26 : vector<1x32xf32> to vector<128x32xf32>
    %28 = arith.mulf %25, %27 : vector<128x32xf32>
    %c0_13 = arith.constant 0 : index
    %c0_14 = arith.constant 0 : index
    %29 = vector.load %arg4[%c0_13, %c0_14] : memref<1x32xf32, #tpu.memory_space<vmem>>, vector<1x32xf32>
    %30 = vector.broadcast %29 : vector<1x32xf32> to vector<128x32xf32>
    %31 = arith.addf %28, %30 : vector<128x32xf32>
    %cst_15 = arith.constant 0.000000e+00 : f32
    %32 = vector.broadcast %cst_15 : f32 to vector<128x32xf32>
    %33 = arith.maximumf %31, %32 : vector<128x32xf32>
    %34 = arith.truncf %33 : vector<128x32xf32> to vector<128x32xbf16>
    %c0_16 = arith.constant 0 : index
    %c0_17 = arith.constant 0 : index
    %35 = vector.load %arg5[%c0_16, %c0_17] : memref<128x32xbf16, #tpu.memory_space<vmem>>, vector<128x32xbf16>
    tpu.vector_store %arg5[%c0_16, %c0_17], %34 {strides = array<i32>} : memref<128x32xbf16, #tpu.memory_space<vmem>>, vector<128x32xbf16>,
    return
  }
}

module attributes {stable_mosaic.version = 11 : i64} {
  func.func @_conv_bn_relu_kernel(%arg0: memref<32x384xbf16, #tpu.memory_space<vmem>>, %arg1: memref<384x64xbf16, #tpu.memory_space<vmem>>, %arg2: memref<1x64xf32, #tpu.memory_space<vmem>>, %arg3: memref<1x64xf32, #tpu.memory_space<vmem>>, %arg4: memref<1x64xf32, #tpu.memory_space<vmem>>, %arg5: memref<32x64xbf16, #tpu.memory_space<vmem>>) attributes {dimension_semantics = [], scalar_prefetch = 0 : i64, scratch_operands = 0 : i64, tpu.core_type = #tpu.core_type<tc>} {
    %c0 = arith.constant 0 : index
    %c0_0 = arith.constant 0 : index
    %0 = vector.load %arg0[%c0, %c0_0] : memref<32x384xbf16, #tpu.memory_space<vmem>>, vector<32x384xbf16>
    %c0_1 = arith.constant 0 : index
    %c0_2 = arith.constant 0 : index
    %1 = vector.load %arg1[%c0_1, %c0_2] : memref<384x64xbf16, #tpu.memory_space<vmem>>, vector<384x64xbf16>
    %cst = arith.constant dense<0.000000e+00> : vector<32x64xf32>
    %2 = tpu.matmul %0, %1, %cst {dimension_numbers = #tpu.dot_dimension_numbers<[1], [0], [0], [1], [0, 0, 1, 1], [], []>} : vector<32x384xbf16>, vector<384x64xbf16>, vector<32x64xf32> -> vector<32x64xf32>
    %c0_3 = arith.constant 0 : index
    %c0_4 = arith.constant 0 : index
    %3 = vector.load %arg2[%c0_3, %c0_4] : memref<1x64xf32, #tpu.memory_space<vmem>>, vector<1x64xf32>
    %4 = vector.broadcast %3 : vector<1x64xf32> to vector<32x64xf32>
    %5 = arith.addf %2, %4 : vector<32x64xf32>
    %cst_5 = arith.constant dense<0.000000e+00> : vector<64xf32>
    %6 = vector.multi_reduction <add>, %5, %cst_5 [0] : vector<32x64xf32> to vector<64xf32>
    %7 = vector.shape_cast %6 : vector<64xf32> to vector<1x64xf32>
    %cst_6 = arith.constant 3.200000e+01 : f32
    %8 = vector.broadcast %cst_6 : f32 to vector<1x64xf32>
    %9 = arith.divf %7, %8 : vector<1x64xf32>
    %10 = arith.mulf %5, %5 : vector<32x64xf32>
    %cst_7 = arith.constant dense<0.000000e+00> : vector<64xf32>
    %11 = vector.multi_reduction <add>, %10, %cst_7 [0] : vector<32x64xf32> to vector<64xf32>
    %12 = vector.shape_cast %11 : vector<64xf32> to vector<1x64xf32>
    %cst_8 = arith.constant 3.200000e+01 : f32
    %13 = vector.broadcast %cst_8 : f32 to vector<1x64xf32>
    %14 = arith.divf %12, %13 : vector<1x64xf32>
    %15 = arith.mulf %9, %9 : vector<1x64xf32>
    %16 = arith.subf %14, %15 : vector<1x64xf32>
    %cst_9 = arith.constant 0.000000e+00 : f32
    %17 = vector.broadcast %cst_9 : f32 to vector<1x64xf32>
    %18 = arith.maximumf %16, %17 : vector<1x64xf32>
    %19 = vector.broadcast %9 : vector<1x64xf32> to vector<32x64xf32>
    %20 = arith.subf %5, %19 : vector<32x64xf32>
    %cst_10 = arith.constant 9.99999974E-6 : f32
    %21 = vector.broadcast %cst_10 : f32 to vector<1x64xf32>
    %22 = arith.addf %18, %21 : vector<1x64xf32>
    %23 = math.rsqrt %22 : vector<1x64xf32>
    %24 = vector.broadcast %23 : vector<1x64xf32> to vector<32x64xf32>
    %25 = arith.mulf %20, %24 : vector<32x64xf32>
    %c0_11 = arith.constant 0 : index
    %c0_12 = arith.constant 0 : index
    %26 = vector.load %arg3[%c0_11, %c0_12] : memref<1x64xf32, #tpu.memory_space<vmem>>, vector<1x64xf32>
    %27 = vector.broadcast %26 : vector<1x64xf32> to vector<32x64xf32>
    %28 = arith.mulf %25, %27 : vector<32x64xf32>
    %c0_13 = arith.constant 0 : index
    %c0_14 = arith.constant 0 : index
    %29 = vector.load %arg4[%c0_13, %c0_14] : memref<1x64xf32, #tpu.memory_space<vmem>>, vector<1x64xf32>
    %30 = vector.broadcast %29 : vector<1x64xf32> to vector<32x64xf32>
    %31 = arith.addf %28, %30 : vector<32x64xf32>
    %cst_15 = arith.constant 0.000000e+00 : f32
    %32 = vector.broadcast %cst_15 : f32 to vector<32x64xf32>
    %33 = arith.maximumf %31, %32 : vector<32x64xf32>
    %34 = arith.truncf %33 : vector<32x64xf32> to vector<32x64xbf16>
    %c0_16 = arith.constant 0 : index
    %c0_17 = arith.constant 0 : index
    %35 = vector.load %arg5[%c0_16, %c0_17] : memref<32x64xbf16, #tpu.memory_space<vmem>>, vector<32x64xbf16>
    tpu.vector_store %arg5[%c0_16, %c0_17], %34 {strides = array<i32>} : memref<32x64xbf16, #tpu.memory_space<vmem>>, vector<32x64xbf16>,
    return
  }
}

module attributes {stable_mosaic.version = 11 : i64} {
  func.func @_conv_bias_kernel(%arg0: memref<32x640xbf16, #tpu.memory_space<vmem>>, %arg1: memref<640x10xbf16, #tpu.memory_space<vmem>>, %arg2: memref<1x10xf32, #tpu.memory_space<vmem>>, %arg3: memref<32x10xf32, #tpu.memory_space<vmem>>) attributes {dimension_semantics = [], scalar_prefetch = 0 : i64, scratch_operands = 0 : i64, tpu.core_type = #tpu.core_type<tc>} {
    %c0 = arith.constant 0 : index
    %c0_0 = arith.constant 0 : index
    %0 = vector.load %arg0[%c0, %c0_0] : memref<32x640xbf16, #tpu.memory_space<vmem>>, vector<32x640xbf16>
    %c0_1 = arith.constant 0 : index
    %c0_2 = arith.constant 0 : index
    %1 = vector.load %arg1[%c0_1, %c0_2] : memref<640x10xbf16, #tpu.memory_space<vmem>>, vector<640x10xbf16>
    %cst = arith.constant dense<0.000000e+00> : vector<32x10xf32>
    %2 = tpu.matmul %0, %1, %cst {dimension_numbers = #tpu.dot_dimension_numbers<[1], [0], [0], [1], [0, 0, 1, 1], [], []>} : vector<32x640xbf16>, vector<640x10xbf16>, vector<32x10xf32> -> vector<32x10xf32>
    %c0_3 = arith.constant 0 : index
    %c0_4 = arith.constant 0 : index
    %3 = vector.load %arg2[%c0_3, %c0_4] : memref<1x10xf32, #tpu.memory_space<vmem>>, vector<1x10xf32>
    %4 = vector.broadcast %3 : vector<1x10xf32> to vector<32x10xf32>
    %5 = arith.addf %2, %4 : vector<32x10xf32>
    %c0_5 = arith.constant 0 : index
    %c0_6 = arith.constant 0 : index
    %6 = vector.load %arg3[%c0_5, %c0_6] : memref<32x10xf32, #tpu.memory_space<vmem>>, vector<32x10xf32>
    tpu.vector_store %arg3[%c0_5, %c0_6], %5 {strides = array<i32>} : memref<32x10xf32, #tpu.memory_space<vmem>>, vector<32x10xf32>,
    return
  }
}

</mosaic_0001>

<bundles_post_ra>
// kernel: tile.23
= control target key start
LH: loop header
LB: loop body
LE: loop exit
PB: predicated region body
PF: predicated region fallthrough
CT: control target
= control target key end

     0   :  { %s22_s0 = inlined_call_operand.vmem [shape: f32[2], index: 0, kind: input, shape index: {}]   ;;  %s23_s1 = inlined_call_operand.vmem [shape: f32[8,2], index: 1, kind: output, shape index: {}]  }
   0x1   :  { %v4_v0 = vld [vmem:[%s22_s0] ss:$0 sm:$0xff] }
   0x2   :  { %5 = vst [vmem:[%s23_s1] sm:$0xff] %v4_v0 }

// kernel: tile.28
= control target key start
LH: loop header
LB: loop body
LE: loop exit
PB: predicated region body
PF: predicated region fallthrough
CT: control target
= control target key end

     0   :  { %s67_s10 = smov 14   ;;  %s68_s11 = smov 10   ;;  %vm3_vm0 = vcmask 15360   ;;  %vm9_vm1 = vcmask 130160   ;;  %vm15_vm2 = vcmask 113760   ;;  %vm21_vm3 = vcmask 97360   ;;  %s111_s0 = inlined_call_operand.vmem [shape: f32[8,2], index: 0, kind: input, shape index: {}]   ;;  %s112_s1 = inlined_call_operand.vmem [shape: f32[1,16], index: 1, kind: output, shape index: {}]  }
   0x1   :  { %v53_v0 = vld [vmem:[%s111_s0 + $0x7] sm:$0x1]   ;;  %v55_v1 = vld [vmem:[%s111_s0 + $0x5] sm:$0x1]   ;;  %v54_v2 = vld [vmem:[%s111_s0 + $0x6] sm:$0x1]  }
   0x2   :  { %7 = vrot.lane.b32.xlu0 %v53_v0, %s67_s10  ;;  %19 = vrot.lane.b32.xlu1 %v55_v1, %s68_s11  ;;  %v56_v3 = vld [vmem:[%s111_s0 + $0x4] sm:$0x1]   ;;  %v2_v4 = vld [vmem:[%s111_s0] sm:$0x1]   ;;  %s69_s18 = smov 12   ;;  %s70_s19 = smov 8  }
   0x3   :  { %4 = vst.msk [vmem:[#allocation0] sm:$0x1] %vm3_vm0, %v2_v4   ;;  %v57_v5 = vld [vmem:[%s111_s0 + $0x3] sm:$0x1]   ;;  %v58_v6 = vld [vmem:[%s111_s0 + $0x2] sm:$0x1]  }
   0x4   :  { %s71_s24 = smov 6   ;;  %s72_s25 = smov 4   ;;  %v59_v7 = vld [vmem:[%s111_s0 + $0x1] sm:$0x1]   ;;  %vm27_vm4 = vcmask 80960   ;;  %vm33_vm5 = vcmask 64560  }
   0x5   :  { %s73_s0 = smov 2   ;;  %vm39_vm6 = vcmask 48160   ;;  %vm45_vm7 = vcmask 31760  }
   0x6   :  { %13 = vrot.lane.b32.xlu0 %v54_v2, %s69_s18  ;;  %25 = vrot.lane.b32.xlu1 %v56_v3, %s70_s19 }
   0xa   :  { %31 = vrot.lane.b32.xlu0 %v57_v5, %s71_s24  ;;  %37 = vrot.lane.b32.xlu1 %v58_v6, %s72_s25 }
   0xe   :  { %43 = vrot.lane.b32.xlu0 %v59_v7, %s73_s0 }
  0x74   :  { %v8_v8 = vpop.permute.xlu0 %7   ;;  %v20_v9 = vpop.permute.xlu1 %19  }
  0x75   :  { %10 = vst.msk [vmem:[#allocation0] sm:$0x1] %vm9_vm1, %v8_v8  }
  0x78   :  { %v14_v10 = vpop.permute.xlu0 %13   ;;  %v26_v11 = vpop.permute.xlu1 %25  }
  0x79   :  { %16 = vst.msk [vmem:[#allocation0] sm:$0x1] %vm15_vm2, %v14_v10  }
  0x7a   :  { %22 = vst.msk [vmem:[#allocation0] sm:$0x1] %vm21_vm3, %v20_v9  }
  0x7b   :  { %28 = vst.msk [vmem:[#allocation0] sm:$0x1] %vm27_vm4, %v26_v11  }
  0x7c   :  { %v32_v12 = vpop.permute.xlu0 %31   ;;  %v38_v13 = vpop.permute.xlu1 %37  }
  0x7d   :  { %34 = vst.msk [vmem:[#allocation0] sm:$0x1] %vm33_vm5, %v32_v12  }
  0x7e   :  { %40 = vst.msk [vmem:[#allocation0] sm:$0x1] %vm39_vm6, %v38_v13  }
  0x80   :  { %v44_v14 = vpop.permute.xlu0 %43  }
  0x81   :  { %46 = vst.msk [vmem:[#allocation0] sm:$0x1] %vm45_vm7, %v44_v14  }
  0x88   :  { %v50_v15 = vld [vmem:[#allocation0] sm:$0x1] }
  0x89   :  { %52 = vst [vmem:[%s112_s1] sm:$0x1] %v50_v15 }

// kernel: forward.6
= control target key start
LH: loop header
LB: loop body
LE: loop exit
PB: predicated region body
PF: predicated region fallthrough
CT: control target
= control target key end

     0   :  { %vm637_vm0 = vcmask 130048   ;;  %vm1566_vm1 = vcmask 125952   ;;  %s4149_s1 = inlined_call_operand.vmem [shape: bf16[128,16], index: 1, kind: input, shape index: {}]   ;;  %s4150_s0 = inlined_call_operand.vmem [shape: bf16[512,128], index: 0, kind: input, shape index: {}]   ;;  %s4151_s2 = inlined_call_operand.vmem [shape: f32[1,16], index: 2, kind: input, shape index: {}]   ;;  %s4152_s3 = inlined_call_operand.vmem [shape: f32[1,16], index: 3, kind: input, shape index: {}]   ;;  %s4153_s4 = inlined_call_operand.vmem [shape: f32[1,16], index: 4, kind: input, shape index: {}]   ;;  %s4154_s5 = inlined_call_operand.vmem [shape: bf16[512,16], index: 5, kind: output, shape index: {}]  }
   0x1   :  { %v1942_v0 = vld [vmem:[%s4149_s1] sm:$0xff]   ;;  %v1943_v1 = vld [vmem:[%s4149_s1 + $0x8] sm:$0xff]   ;;  %v1944_v2 = vld [vmem:[%s4149_s1 + $0x10] sm:$0xff]  }
   0x2   :  { %1846 = vmatprep.subr.bf16.mxu0 %v1942_v0  ;;  %1926 = vmatprep.subr.bf16.mxu1 %v1942_v0  ;;  %v1945_v3 = vld [vmem:[%s4149_s1 + $0x18] sm:$0xff]   ;;  %v1950_v4 = vld [vmem:[%s4150_s0] sm:$0xff]   ;;  %v1947_v6 = vld [vmem:[%s4149_s1 + $0x28] sm:$0xff]  }
   0x3   :  { %1847 = vmatpush3.bf16.msra.mxu0 %v1942_v0  ;;  %1934 = vmatpush3.bf16.msra.mxu1 %v1942_v0  ;;  %v1946_v5 = vld [vmem:[%s4149_s1 + $0x20] sm:$0xff]   ;;  %v1948_v7 = vld [vmem:[%s4149_s1 + $0x30] sm:$0xff]   ;;  %v1949_v8 = vld [vmem:[%s4149_s1 + $0x38] sm:$0xff]  }
   0x4   :  { %1848 = vmatprep.subr.bf16.mxu0 %v1943_v1  ;;  %1927 = vmatprep.subr.bf16.mxu1 %v1943_v1  ;;  %v1966_v9 = vld [vmem:[%s4150_s0 + $0x80] sm:$0xff]   ;;  %v1951_v10 = vld [vmem:[%s4150_s0 + $0x8] sm:$0xff]   ;;  %v1952_v11 = vld [vmem:[%s4150_s0 + $0x10] sm:$0xff]  }
   0x5   :  { %1862 = vmatprep.mubr.bf16.mxu0 %v1950_v4  ;;  %1894 = vmatprep.mubr.bf16.mxu1 %v1966_v9  ;;  %v1967_v12 = vld [vmem:[%s4150_s0 + $0x88] sm:$0xff]   ;;  %v1968_v13 = vld [vmem:[%s4150_s0 + $0x90] sm:$0xff]   ;;  %v1953_v14 = vld [vmem:[%s4150_s0 + $0x18] sm:$0xff]  }
   0x6   :  { %v1954_v15 = vld [vmem:[%s4150_s0 + $0x20] sm:$0xff]   ;;  %v1969_v16 = vld [vmem:[%s4150_s0 + $0x98] sm:$0xff]   ;;  %v1955_v18 = vld [vmem:[%s4150_s0 + $0x28] sm:$0xff]  }
   0x7   :  { %1849 = vmatpush3.bf16.msra.mxu0 %v1943_v1  ;;  %1935 = vmatpush3.bf16.msra.mxu1 %v1943_v1  ;;  %v1970_v17 = vld [vmem:[%s4150_s0 + $0xa0] sm:$0xff]   ;;  %v1971_v19 = vld [vmem:[%s4150_s0 + $0xa8] sm:$0xff]   ;;  %v1956_v20 = vld [vmem:[%s4150_s0 + $0x30] sm:$0xff]  }
   0x8   :  { %1850 = vmatprep.subr.bf16.mxu0 %v1944_v2  ;;  %1928 = vmatprep.subr.bf16.mxu1 %v1944_v2  ;;  %v1972_v21 = vld [vmem:[%s4150_s0 + $0xb0] sm:$0xff]   ;;  %v1957_v22 = vld [vmem:[%s4150_s0 + $0x38] sm:$0xff]   ;;  %v1958_v24 = vld [vmem:[%s4150_s0 + $0x40] sm:$0xff]  }
   0x9   :  { %v1973_v23 = vld [vmem:[%s4150_s0 + $0xb8] sm:$0xff]   ;;  %v1974_v25 = vld [vmem:[%s4150_s0 + $0xc0] sm:$0xff]   ;;  %v1959_v26 = vld [vmem:[%s4150_s0 + $0x48] sm:$0xff]  }
   0xa   :  { %v1975_v27 = vld [vmem:[%s4150_s0 + $0xc8] sm:$0xff]   ;;  %v1960_v28 = vld [vmem:[%s4150_s0 + $0x50] sm:$0xff]   ;;  %v1961_v30 = vld [vmem:[%s4150_s0 + $0x58] sm:$0xff]  }
   0xb   :  { %1851 = vmatpush3.bf16.msra.mxu0 %v1944_v2  ;;  %1936 = vmatpush3.bf16.msra.mxu1 %v1944_v2  ;;  %v1976_v29 = vld [vmem:[%s4150_s0 + $0xd0] sm:$0xff]   ;;  %v1977_v31 = vld [vmem:[%s4150_s0 + $0xd8] sm:$0xff]   ;;  %v1962_v32 = vld [vmem:[%s4150_s0 + $0x60] sm:$0xff]  }
   0xc   :  { %1852 = vmatprep.subr.bf16.mxu0 %v1945_v3  ;;  %1929 = vmatprep.subr.bf16.mxu1 %v1945_v3  ;;  %v1978_v33 = vld [vmem:[%s4150_s0 + $0xe0] sm:$0xff]   ;;  %v1963_v34 = vld [vmem:[%s4150_s0 + $0x68] sm:$0xff]   ;;  %v1964_v36 = vld [vmem:[%s4150_s0 + $0x70] sm:$0xff]  }
   0xd   :  { %v1979_v35 = vld [vmem:[%s4150_s0 + $0xe8] sm:$0xff]   ;;  %v1980_v37 = vld [vmem:[%s4150_s0 + $0xf0] sm:$0xff]   ;;  %v1965_v38 = vld [vmem:[%s4150_s0 + $0x78] sm:$0xff]  }
   0xe   :  { %v1981_v39 = vld [vmem:[%s4150_s0 + $0xf8] sm:$0xff]   ;;  %v2137_v40 = vld [vmem:[%s4151_s2] ss:$0 sm:$0xff] }
   0xf   :  { %1853 = vmatpush3.bf16.msra.mxu0 %v1945_v3  ;;  %1937 = vmatpush3.bf16.msra.mxu1 %v1945_v3 }
  0x10   :  { %1854 = vmatprep.subr.bf16.mxu0 %v1946_v5  ;;  %1930 = vmatprep.subr.bf16.mxu1 %v1946_v5 }
  0x13   :  { %1855 = vmatpush3.bf16.msra.mxu0 %v1946_v5  ;;  %1938 = vmatpush3.bf16.msra.mxu1 %v1946_v5 }
  0x14   :  { %1856 = vmatprep.subr.bf16.mxu0 %v1947_v6  ;;  %1931 = vmatprep.subr.bf16.mxu1 %v1947_v6 }
  0x17   :  { %1857 = vmatpush3.bf16.msra.mxu0 %v1947_v6  ;;  %1939 = vmatpush3.bf16.msra.mxu1 %v1947_v6 }
  0x18   :  { %1858 = vmatprep.subr.bf16.mxu0 %v1948_v7  ;;  %1932 = vmatprep.subr.bf16.mxu1 %v1948_v7 }
  0x1b   :  { %1859 = vmatpush3.bf16.msra.mxu0 %v1948_v7  ;;  %1940 = vmatpush3.bf16.msra.mxu1 %v1948_v7 }
  0x1c   :  { %1860 = vmatprep.subr.bf16.mxu0 %v1949_v8  ;;  %1933 = vmatprep.subr.bf16.mxu1 %v1949_v8 }
  0x1f   :  { %1861 = vmatpush3.bf16.msra.mxu0 %v1949_v8  ;;  %1941 = vmatpush3.bf16.msra.mxu1 %v1949_v8 }
  0x22   :  { %1863 = vmatmul.mubr.bf16.vlgmr.msra.gmra.mrb[0].mxu0 %v1951_v10  ;;  %1895 = vmatmul.mubr.bf16.vlgmr.msra.gmra.mrb[0].mxu1 %v1967_v12 }
  0x23   :  { %1866 = vmatprep.mubr.bf16.mxu0 %v1952_v11  ;;  %1898 = vmatprep.mubr.bf16.mxu1 %v1968_v13 }
  0x2a   :  { %1867 = vmatmul.mubr.bf16.gmra.mrb[4].mxu0 %v1953_v14  ;;  %1899 = vmatmul.mubr.bf16.gmra.mrb[4].mxu1 %v1969_v16 }
  0x2b   :  { %1870 = vmatprep.mubr.bf16.mxu0 %v1954_v15  ;;  %1902 = vmatprep.mubr.bf16.mxu1 %v1970_v17 }
  0x32   :  { %1871 = vmatmul.mubr.bf16.gmra.mrb[8].mxu0 %v1955_v18  ;;  %1903 = vmatmul.mubr.bf16.gmra.mrb[8].mxu1 %v1971_v19 }
  0x33   :  { %1874 = vmatprep.mubr.bf16.mxu0 %v1956_v20  ;;  %1906 = vmatprep.mubr.bf16.mxu1 %v1972_v21 }
  0x3a   :  { %1875 = vmatmul.mubr.bf16.gmra.mrb[12].mxu0 %v1957_v22  ;;  %1907 = vmatmul.mubr.bf16.gmra.mrb[12].mxu1 %v1973_v23 }
  0x3b   :  { %1878 = vmatprep.mubr.bf16.mxu0 %v1958_v24  ;;  %1910 = vmatprep.mubr.bf16.mxu1 %v1974_v25 }
  0x42   :  { %1879 = vmatmul.mubr.bf16.gmra.mrb[16].mxu0 %v1959_v26  ;;  %1911 = vmatmul.mubr.bf16.gmra.mrb[16].mxu1 %v1975_v27 }
  0x43   :  { %1882 = vmatprep.mubr.bf16.mxu0 %v1960_v28  ;;  %1914 = vmatprep.mubr.bf16.mxu1 %v1976_v29 }
  0x4a   :  { %1883 = vmatmul.mubr.bf16.gmra.mrb[20].mxu0 %v1961_v30  ;;  %1915 = vmatmul.mubr.bf16.gmra.mrb[20].mxu1 %v1977_v31 }
  0x4b   :  { %1886 = vmatprep.mubr.bf16.mxu0 %v1962_v32  ;;  %1918 = vmatprep.mubr.bf16.mxu1 %v1978_v33 }
  0x52   :  { %1887 = vmatmul.mubr.bf16.gmra.mrb[24].mxu0 %v1963_v34  ;;  %1919 = vmatmul.mubr.bf16.gmra.mrb[24].mxu1 %v1979_v35 }
  0x53   :  { %1890 = vmatprep.mubr.bf16.mxu0 %v1964_v36  ;;  %1922 = vmatprep.mubr.bf16.mxu1 %v1980_v37 }
  0x5a   :  { %1891 = vmatmul.mubr.bf16.gmra.mrb[28].mxu0 %v1965_v38  ;;  %1923 = vmatmul.mubr.bf16.gmra.mrb[28].mxu1 %v1981_v39 }
  0xf5   :  { %v1864_v41 = vpop.f32.mrb[0].mxu0  ;;  %v2139_v42 = vpop.f32.mrb[0].mxu1 }
  0xf6   :  { %v382_v43 = vpop.f32.mrb[1].mxu0  ;;  %v2141_v44 = vpop.f32.mrb[1].mxu1  ;;  %v2144_v45 = vadd.f32 %v1864_v41, %v2137_v40 }
  0xf7   :  { %v2147_v46 = vadd.f32 %v2137_v40, %v382_v43  ;;  %v1865_v47 = vpop.f32.mrb[2].mxu0  ;;  %v2149_v48 = vpop.f32.mrb[2].mxu1 }
  0xf8   :  { %v385_v49 = vpop.f32.mrb[3].mxu0  ;;  %v2151_v50 = vpop.f32.mrb[3].mxu1  ;;  %v2156_v52 = vadd.f32 %v1865_v47, %v2137_v40  ;;  %v775_v54 = vmul.f32 %v2144_v45, %v2144_v45  ;;  %v641_v59 = vsel %vm637_vm0, %v2144_v45, 0.0 }
  0xf9   :  { %v773_v51 = vmul.f32 %v2147_v46, %v2147_v46  ;;  %v2159_v53 = vadd.f32 %v2137_v40, %v385_v49  ;;  %v638_v55 = vsel %vm637_vm0, %v2147_v46, 0.0 }
  0xfa   :  { %v776_v61 = vmul.f32 %v2156_v52, %v2156_v52  ;;  %v840_v5 = vsel %vm637_vm0, %v775_v54, 0.0  ;;  %v643_v6 = vsel %vm637_vm0, %v2156_v52, 0.0 }
  0xfb   :  { %v639_v56 = vsel %vm637_vm0, %v2159_v53, 0.0  ;;  %v774_v57 = vmul.f32 %v2159_v53, %v2159_v53  ;;  %v837_v60 = vsel %vm637_vm0, %v773_v51, 0.0 }
  0xfc   :  { %v640_v58 = vadd.f32 %v639_v56, %v638_v55  ;;  %v842_v15 = vsel %vm637_vm0, %v776_v61, 0.0 }
  0xfd   :  { %v838_v62 = vsel %vm637_vm0, %v774_v57, 0.0  ;;  %v1868_v63 = vpop.f32.mrb[4].mxu0  ;;  %v2175_v0 = vpop.f32.mrb[4].mxu1 }
  0xfe   :  { %v642_v1 = vadd.f32 %v641_v59, %v640_v58  ;;  %v839_v2 = vadd.f32 %v838_v62, %v837_v60  ;;  %v398_v3 = vpop.f32.mrb[5].mxu0  ;;  %v2177_v4 = vpop.f32.mrb[5].mxu1  ;;  %v2188_v11 = vadd.f32 %v1868_v63, %v2137_v40 }
  0xff   :  { %v2183_v7 = vadd.f32 %v2137_v40, %v398_v3  ;;  %v1869_v8 = vpop.f32.mrb[6].mxu0  ;;  %v2185_v9 = vpop.f32.mrb[6].mxu1 }
 0x100   :  { %v841_v10 = vadd.f32 %v840_v5, %v839_v2  ;;  %v644_v12 = vadd.f32 %v643_v6, %v642_v1  ;;  %v401_v13 = vpop.f32.mrb[7].mxu0  ;;  %v2190_v14 = vpop.f32.mrb[7].mxu1  ;;  %v2201_v21 = vadd.f32 %v1869_v8, %v2137_v40  ;;  %v779_v24 = vmul.f32 %v2188_v11, %v2188_v11 }
 0x101   :  { %v645_v16 = vsel %vm637_vm0, %v2183_v7, 0.0  ;;  %v777_v17 = vmul.f32 %v2183_v7, %v2183_v7  ;;  %v2198_v18 = vadd.f32 %v2137_v40, %v401_v13  ;;  %v649_v28 = vsel %vm637_vm0, %v2188_v11, 0.0 }
 0x102   :  { %v646_v19 = vadd.f32 %v645_v16, %v644_v12  ;;  %v843_v20 = vadd.f32 %v842_v15, %v841_v10  ;;  %v780_v31 = vmul.f32 %v2201_v21, %v2201_v21  ;;  %v651_v36 = vsel %vm637_vm0, %v2201_v21, 0.0 }
 0x103   :  { %v844_v22 = vsel %vm637_vm0, %v777_v17, 0.0  ;;  %v647_v23 = vsel %vm637_vm0, %v2198_v18, 0.0  ;;  %v778_v27 = vmul.f32 %v2198_v18, %v2198_v18  ;;  %v848_v43 = vsel %vm637_vm0, %v779_v24, 0.0 }
 0x104   :  { %v845_v25 = vadd.f32 %v844_v22, %v843_v20  ;;  %v648_v26 = vadd.f32 %v647_v23, %v646_v19  ;;  %v850_v59 = vsel %vm637_vm0, %v780_v31, 0.0 }
 0x105   :  { %v1872_v29 = vpop.f32.mrb[8].mxu0  ;;  %v2212_v30 = vpop.f32.mrb[8].mxu1  ;;  %v846_v33 = vsel %vm637_vm0, %v778_v27, 0.0 }
 0x106   :  { %v650_v32 = vadd.f32 %v649_v28, %v648_v26  ;;  %v414_v34 = vpop.f32.mrb[9].mxu0  ;;  %v2217_v35 = vpop.f32.mrb[9].mxu1  ;;  %v847_v37 = vadd.f32 %v846_v33, %v845_v25  ;;  %v2228_v47 = vadd.f32 %v1872_v29, %v2137_v40 }
 0x107   :  { %v2222_v38 = vadd.f32 %v2137_v40, %v414_v34  ;;  %v1873_v39 = vpop.f32.mrb[10].mxu0  ;;  %v2224_v41 = vpop.f32.mrb[10].mxu1 }
 0x108   :  { %v652_v49 = vadd.f32 %v651_v36, %v650_v32  ;;  %v417_v51 = vpop.f32.mrb[11].mxu0  ;;  %v2230_v54 = vpop.f32.mrb[11].mxu1  ;;  %v849_v55 = vadd.f32 %v848_v43, %v847_v37  ;;  %v2241_v61 = vadd.f32 %v1873_v39, %v2137_v40  ;;  %v783_v3 = vmul.f32 %v2228_v47, %v2228_v47 }
 0x109   :  { %v653_v56 = vsel %vm637_vm0, %v2222_v38, 0.0  ;;  %v781_v57 = vmul.f32 %v2222_v38, %v2222_v38  ;;  %v2237_v58 = vadd.f32 %v2137_v40, %v417_v51  ;;  %v657_v6 = vsel %vm637_vm0, %v2228_v47, 0.0 }
 0x10a   :  { %v654_v60 = vadd.f32 %v653_v56, %v652_v49  ;;  %v851_v62 = vadd.f32 %v850_v59, %v849_v55  ;;  %v784_v15 = vmul.f32 %v2241_v61, %v2241_v61  ;;  %v659_v20 = vsel %vm637_vm0, %v2241_v61, 0.0 }
 0x10b   :  { %v852_v63 = vsel %vm637_vm0, %v781_v57, 0.0  ;;  %v655_v1 = vsel %vm637_vm0, %v2237_v58, 0.0  ;;  %v782_v2 = vmul.f32 %v2237_v58, %v2237_v58  ;;  %v856_v26 = vsel %vm637_vm0, %v783_v3, 0.0 }
 0x10c   :  { %v656_v5 = vadd.f32 %v655_v1, %v654_v60  ;;  %v853_v8 = vadd.f32 %v852_v63, %v851_v62  ;;  %v858_v37 = vsel %vm637_vm0, %v784_v15, 0.0 }
 0x10d   :  { %v854_v10 = vsel %vm637_vm0, %v782_v2, 0.0  ;;  %v1876_v12 = vpop.f32.mrb[12].mxu0  ;;  %v2253_v13 = vpop.f32.mrb[12].mxu1 }
 0x10e   :  { %v658_v16 = vadd.f32 %v657_v6, %v656_v5  ;;  %v430_v17 = vpop.f32.mrb[13].mxu0  ;;  %v2257_v19 = vpop.f32.mrb[13].mxu1  ;;  %v855_v22 = vadd.f32 %v854_v10, %v853_v8  ;;  %v2268_v27 = vadd.f32 %v1876_v12, %v2137_v40 }
 0x10f   :  { %v2262_v23 = vadd.f32 %v2137_v40, %v430_v17  ;;  %v1877_v24 = vpop.f32.mrb[14].mxu0  ;;  %v2264_v25 = vpop.f32.mrb[14].mxu1 }
 0x110   :  { %4206 = vst [vmem:[#allocation2_spill] sm:$0xff] %v2268_v27  ;;  %v660_v28 = vadd.f32 %v659_v20, %v658_v16  ;;  %v433_v29 = vpop.f32.mrb[15].mxu0  ;;  %v2270_v31 = vpop.f32.mrb[15].mxu1  ;;  %v857_v32 = vadd.f32 %v856_v26, %v855_v22  ;;  %v2281_v43 = vadd.f32 %v1877_v24, %v2137_v40  ;;  %v787_v57 = vmul.f32 %v2268_v27, %v2268_v27 }
 0x111   :  { %v661_v33 = vsel %vm637_vm0, %v2262_v23, 0.0  ;;  %v785_v34 = vmul.f32 %v2262_v23, %v2262_v23  ;;  %v2277_v36 = vadd.f32 %v2137_v40, %v433_v29  ;;  %v665_v60 = vsel %vm637_vm0, %v2268_v27, 0.0 }
 0x112   :  { %v662_v39 = vadd.f32 %v661_v33, %v660_v28  ;;  %4207 = vst [vmem:[#allocation3_spill] sm:$0xff] %v2281_v43  ;;  %v859_v49 = vadd.f32 %v858_v37, %v857_v32  ;;  %v788_v3 = vmul.f32 %v2281_v43, %v2281_v43  ;;  %v667_v10 = vsel %vm637_vm0, %v2281_v43, 0.0 }
 0x113   :  { %v860_v51 = vsel %vm637_vm0, %v785_v34, 0.0  ;;  %v663_v55 = vsel %vm637_vm0, %v2277_v36, 0.0  ;;  %v786_v56 = vmul.f32 %v2277_v36, %v2277_v36  ;;  %v864_v20 = vsel %vm637_vm0, %v787_v57, 0.0 }
 0x114   :  { %v664_v59 = vadd.f32 %v663_v55, %v662_v39  ;;  %v861_v62 = vadd.f32 %v860_v51, %v859_v49  ;;  %v866_v37 = vsel %vm637_vm0, %v788_v3, 0.0 }
 0x115   :  { %v862_v63 = vsel %vm637_vm0, %v786_v56, 0.0  ;;  %v1880_v1 = vpop.f32.mrb[16].mxu0  ;;  %v2293_v2 = vpop.f32.mrb[16].mxu1 }
 0x116   :  { %v666_v5 = vadd.f32 %v665_v60, %v664_v59  ;;  %v446_v6 = vpop.f32.mrb[17].mxu0  ;;  %v2297_v8 = vpop.f32.mrb[17].mxu1  ;;  %v863_v12 = vadd.f32 %v862_v63, %v861_v62  ;;  %v2308_v22 = vadd.f32 %v1880_v1, %v2137_v40 }
 0x117   :  { %v2302_v15 = vadd.f32 %v2137_v40, %v446_v6  ;;  %v1881_v16 = vpop.f32.mrb[18].mxu0  ;;  %v2304_v17 = vpop.f32.mrb[18].mxu1 }
 0x118   :  { %4209 = vst [vmem:[#allocation5_spill] sm:$0xff] %v2308_v22  ;;  %v668_v24 = vadd.f32 %v667_v10, %v666_v5  ;;  %v449_v26 = vpop.f32.mrb[19].mxu0  ;;  %v2310_v28 = vpop.f32.mrb[19].mxu1  ;;  %v865_v29 = vadd.f32 %v864_v20, %v863_v12  ;;  %v2321_v49 = vadd.f32 %v1881_v16, %v2137_v40  ;;  %v791_v59 = vmul.f32 %v2308_v22, %v2308_v22 }
 0x119   :  { %4208 = vst [vmem:[#allocation4_spill] sm:$0xff] %v2302_v15  ;;  %v669_v32 = vsel %vm637_vm0, %v2302_v15, 0.0  ;;  %v789_v33 = vmul.f32 %v2302_v15, %v2302_v15  ;;  %v2317_v34 = vadd.f32 %v2137_v40, %v449_v26  ;;  %v673_v62 = vsel %vm637_vm0, %v2308_v22, 0.0 }
 0x11a   :  { %v670_v39 = vadd.f32 %v669_v32, %v668_v24  ;;  %4211 = vst [vmem:[#allocation7_spill] sm:$0xff] %v2321_v49  ;;  %v867_v51 = vadd.f32 %v866_v37, %v865_v29  ;;  %v792_v6 = vmul.f32 %v2321_v49, %v2321_v49  ;;  %v675_v20 = vsel %vm637_vm0, %v2321_v49, 0.0 }
 0x11b   :  { %4210 = vst [vmem:[#allocation6_spill] sm:$0xff] %v2317_v34  ;;  %v868_v55 = vsel %vm637_vm0, %v789_v33, 0.0  ;;  %v671_v56 = vsel %vm637_vm0, %v2317_v34, 0.0  ;;  %v790_v57 = vmul.f32 %v2317_v34, %v2317_v34  ;;  %v872_v33 = vsel %vm637_vm0, %v791_v59, 0.0 }
 0x11c   :  { %v672_v60 = vadd.f32 %v671_v56, %v670_v39  ;;  %v869_v63 = vadd.f32 %v868_v55, %v867_v51 }
 0x11d   :  { %v870_v1 = vsel %vm637_vm0, %v790_v57, 0.0  ;;  %v1884_v3 = vpop.f32.mrb[20].mxu0  ;;  %v2333_v5 = vpop.f32.mrb[20].mxu1 }
 0x11e   :  { %v674_v10 = vadd.f32 %v673_v62, %v672_v60  ;;  %v462_v12 = vpop.f32.mrb[21].mxu0  ;;  %v2337_v16 = vpop.f32.mrb[21].mxu1  ;;  %v871_v24 = vadd.f32 %v870_v1, %v869_v63  ;;  %v2348_v37 = vadd.f32 %v1884_v3, %v2137_v40  ;;  %v874_v63 = vsel %vm637_vm0, %v792_v6, 0.0 }
 0x11f   :  { %v2342_v26 = vadd.f32 %v2137_v40, %v462_v12  ;;  %v1885_v29 = vpop.f32.mrb[22].mxu0  ;;  %v2344_v32 = vpop.f32.mrb[22].mxu1 }
 0x120   :  { %4213 = vst [vmem:[#allocation9_spill] sm:$0xff] %v2348_v37  ;;  %v676_v39 = vadd.f32 %v675_v20, %v674_v10  ;;  %v465_v51 = vpop.f32.mrb[23].mxu0  ;;  %v2350_v55 = vpop.f32.mrb[23].mxu1  ;;  %v873_v56 = vadd.f32 %v872_v33, %v871_v24  ;;  %v2361_v1 = vadd.f32 %v1885_v29, %v2137_v40  ;;  %v795_v24 = vmul.f32 %v2348_v37, %v2348_v37 }
 0x121   :  { %4212 = vst [vmem:[#allocation8_spill] sm:$0xff] %v2342_v26  ;;  %v677_v57 = vsel %vm637_vm0, %v2342_v26, 0.0  ;;  %v793_v60 = vmul.f32 %v2342_v26, %v2342_v26  ;;  %v2357_v62 = vadd.f32 %v2137_v40, %v465_v51  ;;  %v681_v6 = vsel %vm637_vm0, %v2348_v37, 0.0 }
 0x122   :  { %v678_v59 = vadd.f32 %v677_v57, %v676_v39  ;;  %4215 = vst [vmem:[#allocation11_spill] sm:$0xff] %v2361_v1  ;;  %v875_v3 = vadd.f32 %v874_v63, %v873_v56  ;;  %v796_v57 = vmul.f32 %v2361_v1, %v2361_v1 }
 0x123   :  { %4214 = vst [vmem:[#allocation10_spill] sm:$0xff] %v2357_v62  ;;  %v876_v10 = vsel %vm637_vm0, %v793_v60, 0.0  ;;  %v679_v12 = vsel %vm637_vm0, %v2357_v62, 0.0  ;;  %v794_v20 = vmul.f32 %v2357_v62, %v2357_v62  ;;  %v683_v62 = vsel %vm637_vm0, %v2361_v1, 0.0 }
 0x124   :  { %v680_v33 = vadd.f32 %v679_v12, %v678_v59  ;;  %v877_v39 = vadd.f32 %v876_v10, %v875_v3 }
 0x125   :  { %v878_v29 = vsel %vm637_vm0, %v794_v20, 0.0  ;;  %v1888_v51 = vpop.f32.mrb[24].mxu0  ;;  %v2373_v56 = vpop.f32.mrb[24].mxu1  ;;  %v880_v20 = vsel %vm637_vm0, %v795_v24, 0.0 }
 0x126   :  { %v682_v60 = vadd.f32 %v681_v6, %v680_v33  ;;  %v478_v63 = vpop.f32.mrb[25].mxu0  ;;  %v2377_v26 = vpop.f32.mrb[25].mxu1  ;;  %v879_v59 = vadd.f32 %v878_v29, %v877_v39  ;;  %v2388_v37 = vadd.f32 %v1888_v51, %v2137_v40 }
 0x127   :  { %v2382_v12 = vadd.f32 %v2137_v40, %v478_v63  ;;  %v1889_v3 = vpop.f32.mrb[26].mxu0  ;;  %v2384_v10 = vpop.f32.mrb[26].mxu1  ;;  %v882_v63 = vsel %vm637_vm0, %v796_v57, 0.0 }
 0x128   :  { %4217 = vst [vmem:[#allocation13_spill] sm:$0xff] %v2388_v37  ;;  %v684_v49 = vadd.f32 %v683_v62, %v682_v60  ;;  %v481_v33 = vpop.f32.mrb[27].mxu0  ;;  %v2390_v6 = vpop.f32.mrb[27].mxu1  ;;  %v881_v22 = vadd.f32 %v880_v20, %v879_v59  ;;  %v2401_v51 = vadd.f32 %v1889_v3, %v2137_v40  ;;  %v689_v57 = vsel %vm637_vm0, %v2388_v37, 0.0 }
 0x129   :  { %4216 = vst [vmem:[#allocation12_spill] sm:$0xff] %v2382_v12  ;;  %v685_v1 = vsel %vm637_vm0, %v2382_v12, 0.0  ;;  %v797_v39 = vmul.f32 %v2382_v12, %v2382_v12  ;;  %v2397_v29 = vadd.f32 %v2137_v40, %v481_v33  ;;  %v799_v12 = vmul.f32 %v2388_v37, %v2388_v37 }
 0x12a   :  { %v686_v24 = vadd.f32 %v685_v1, %v684_v49  ;;  %4219 = vst [vmem:[#allocation15_spill] sm:$0xff] %v2401_v51  ;;  %v883_v62 = vadd.f32 %v882_v63, %v881_v22 }
 0x12b   :  { %4218 = vst [vmem:[#allocation14_spill] sm:$0xff] %v2397_v29  ;;  %v884_v60 = vsel %vm637_vm0, %v797_v39, 0.0  ;;  %v687_v59 = vsel %vm637_vm0, %v2397_v29, 0.0  ;;  %v798_v20 = vmul.f32 %v2397_v29, %v2397_v29  ;;  %v800_v39 = vmul.f32 %v2401_v51, %v2401_v51 }
 0x12c   :  { %v688_v33 = vadd.f32 %v687_v59, %v686_v24  ;;  %v885_v49 = vadd.f32 %v884_v60, %v883_v62  ;;  %v691_v29 = vsel %vm637_vm0, %v2401_v51, 0.0 }
 0x12d   :  { %v886_v1 = vsel %vm637_vm0, %v798_v20, 0.0  ;;  %v1892_v3 = vpop.f32.mrb[28].mxu0  ;;  %v2413_v22 = vpop.f32.mrb[28].mxu1  ;;  %v888_v20 = vsel %vm637_vm0, %v799_v12, 0.0 }
 0x12e   :  { %v690_v63 = vadd.f32 %v689_v57, %v688_v33  ;;  %v494_v34 = vpop.f32.mrb[29].mxu0  ;;  %v2417_v15 = vpop.f32.mrb[29].mxu1  ;;  %v887_v24 = vadd.f32 %v886_v1, %v885_v49  ;;  %v2428_v37 = vadd.f32 %v1892_v3, %v2137_v40  ;;  %v2432_v57 = vadd.f32 %v2137_v40, %v2141_v44 }
 0x12f   :  { %v2422_v59 = vadd.f32 %v2137_v40, %v494_v34  ;;  %v1893_v62 = vpop.f32.mrb[30].mxu0  ;;  %v2424_v60 = vpop.f32.mrb[30].mxu1  ;;  %v890_v3 = vsel %vm637_vm0, %v800_v39, 0.0 }
 0x130   :  { %4221 = vst [vmem:[#allocation17_spill] sm:$0xff] %v2428_v37  ;;  %v692_v43 = vadd.f32 %v691_v29, %v690_v63  ;;  %v497_v33 = vpop.f32.mrb[31].mxu0  ;;  %v2434_v27 = vpop.f32.mrb[31].mxu1  ;;  %v889_v49 = vadd.f32 %v888_v20, %v887_v24  ;;  %v2445_v63 = vadd.f32 %v1893_v62, %v2137_v40  ;;  %v697_v39 = vsel %vm637_vm0, %v2428_v37, 0.0 }
 0x131   :  { %4220 = vst [vmem:[#allocation16_spill] sm:$0xff] %v2422_v59  ;;  %v693_v34 = vsel %vm637_vm0, %v2422_v59, 0.0  ;;  %v801_v1 = vmul.f32 %v2422_v59, %v2422_v59  ;;  %v2441_v12 = vadd.f32 %v2137_v40, %v497_v33  ;;  %v803_v59 = vmul.f32 %v2428_v37, %v2428_v37 }
 0x132   :  { %v694_v29 = vadd.f32 %v693_v34, %v692_v43  ;;  %v891_v44 = vadd.f32 %v890_v3, %v889_v49  ;;  %v805_v49 = vmul.f32 %v2432_v57, %v2432_v57  ;;  %v804_v34 = vmul.f32 %v2445_v63, %v2445_v63 }
 0x133   :  { %4222 = vst [vmem:[#allocation18_spill] sm:$0xff] %v2441_v12  ;;  %v892_v51 = vsel %vm637_vm0, %v801_v1, 0.0  ;;  %v695_v24 = vsel %vm637_vm0, %v2441_v12, 0.0  ;;  %v802_v20 = vmul.f32 %v2441_v12, %v2441_v12  ;;  %v2463_v3 = vadd.f32 %v2137_v40, %v2151_v50 }
 0x134   :  { %v696_v33 = vadd.f32 %v695_v24, %v694_v29  ;;  %v893_v43 = vadd.f32 %v892_v51, %v891_v44  ;;  %v699_v29 = vsel %vm637_vm0, %v2445_v63, 0.0  ;;  %v701_v51 = vsel %vm637_vm0, %v2432_v57, 0.0 }
 0x135   :  { %v894_v62 = vsel %vm637_vm0, %v802_v20, 0.0  ;;  %v896_v44 = vsel %vm637_vm0, %v803_v59, 0.0  ;;  %v2472_v20 = vadd.f32 %v2139_v42, %v2137_v40  ;;  %v2477_v50 = vadd.f32 %v2149_v48, %v2137_v40 }
 0x136   :  { %v698_v1 = vadd.f32 %v697_v39, %v696_v33  ;;  %v895_v24 = vadd.f32 %v894_v62, %v893_v43  ;;  %v900_v33 = vsel %vm637_vm0, %v805_v49, 0.0  ;;  %v898_v39 = vsel %vm637_vm0, %v804_v34, 0.0 }
 0x137   :  { %v806_v62 = vmul.f32 %v2463_v3, %v2463_v3  ;;  %v2484_v59 = vadd.f32 %v2137_v40, %v2177_v4  ;;  %v807_v49 = vmul.f32 %v2472_v20, %v2472_v20  ;;  %v705_v48 = vsel %vm637_vm0, %v2472_v20, 0.0 }
 0x138   :  { %v700_v37 = vadd.f32 %v699_v29, %v698_v1  ;;  %v897_v12 = vadd.f32 %v896_v44, %v895_v24  ;;  %v703_v1 = vsel %vm637_vm0, %v2463_v3, 0.0  ;;  %v707_v44 = vsel %vm637_vm0, %v2477_v50, 0.0 }
 0x139   :  { %v809_v4 = vmul.f32 %v2484_v59, %v2484_v59 }
 0x13a   :  { %v702_v43 = vadd.f32 %v701_v51, %v700_v37  ;;  %v899_v42 = vadd.f32 %v898_v39, %v897_v12  ;;  %v808_v37 = vmul.f32 %v2477_v50, %v2477_v50  ;;  %v902_v51 = vsel %vm637_vm0, %v806_v62, 0.0 }
 0x13b   :  { %v2499_v12 = vadd.f32 %v2137_v40, %v2190_v14  ;;  %v2513_v14 = vadd.f32 %v2185_v9, %v2137_v40 }
 0x13c   :  { %v704_v29 = vadd.f32 %v703_v1, %v702_v43  ;;  %v901_v34 = vadd.f32 %v900_v33, %v899_v42  ;;  %v709_v33 = vsel %vm637_vm0, %v2484_v59, 0.0  ;;  %v904_v43 = vsel %vm637_vm0, %v807_v49, 0.0 }
 0x13d   :  { %v2508_v42 = vadd.f32 %v2175_v0, %v2137_v40  ;;  %v906_v1 = vsel %vm637_vm0, %v808_v37, 0.0  ;;  %v2520_v49 = vadd.f32 %v2137_v40, %v2217_v35 }
 0x13e   :  { %v706_v24 = vadd.f32 %v705_v48, %v704_v29  ;;  %v903_v39 = vadd.f32 %v902_v51, %v901_v34  ;;  %v908_v34 = vsel %vm637_vm0, %v809_v4, 0.0  ;;  %v810_v51 = vmul.f32 %v2499_v12, %v2499_v12 }
 0x13f   :  { %v811_v37 = vmul.f32 %v2508_v42, %v2508_v42  ;;  %v713_v9 = vsel %vm637_vm0, %v2508_v42, 0.0  ;;  %v812_v4 = vmul.f32 %v2513_v14, %v2513_v14  ;;  %v813_v35 = vmul.f32 %v2520_v49, %v2520_v49 }
 0x140   :  { %v708_v62 = vadd.f32 %v707_v44, %v706_v24  ;;  %v905_v29 = vadd.f32 %v904_v43, %v903_v39  ;;  %v711_v24 = vsel %vm637_vm0, %v2499_v12, 0.0  ;;  %v910_v43 = vsel %vm637_vm0, %v810_v51, 0.0 }
 0x142   :  { %v710_v48 = vadd.f32 %v709_v33, %v708_v62  ;;  %v907_v0 = vadd.f32 %v906_v1, %v905_v29  ;;  %v2535_v62 = vadd.f32 %v2137_v40, %v2230_v54  ;;  %v715_v1 = vsel %vm637_vm0, %v2513_v14, 0.0 }
 0x143   :  { %v2549_v54 = vadd.f32 %v2224_v41, %v2137_v40 }
 0x144   :  { %v712_v44 = vadd.f32 %v711_v24, %v710_v48  ;;  %v909_v39 = vadd.f32 %v908_v34, %v907_v0  ;;  %v717_v48 = vsel %vm637_vm0, %v2520_v49, 0.0  ;;  %v912_v34 = vsel %vm637_vm0, %v811_v37, 0.0 }
 0x145   :  { %v2544_v0 = vadd.f32 %v2212_v30, %v2137_v40  ;;  %v914_v24 = vsel %vm637_vm0, %v812_v4, 0.0  ;;  %v2556_v37 = vadd.f32 %v2137_v40, %v2257_v19 }
 0x146   :  { %v714_v33 = vadd.f32 %v713_v9, %v712_v44  ;;  %v911_v29 = vadd.f32 %v910_v43, %v909_v39  ;;  %v916_v39 = vsel %vm637_vm0, %v813_v35, 0.0  ;;  %v814_v43 = vmul.f32 %v2535_v62, %v2535_v62 }
 0x147   :  { %v815_v4 = vmul.f32 %v2544_v0, %v2544_v0  ;;  %v721_v41 = vsel %vm637_vm0, %v2544_v0, 0.0  ;;  %v816_v35 = vmul.f32 %v2549_v54, %v2549_v54  ;;  %v817_v19 = vmul.f32 %v2556_v37, %v2556_v37 }
 0x148   :  { %v716_v51 = vadd.f32 %v715_v1, %v714_v33  ;;  %v913_v44 = vadd.f32 %v912_v34, %v911_v29  ;;  %v719_v33 = vsel %vm637_vm0, %v2535_v62, 0.0  ;;  %v918_v34 = vsel %vm637_vm0, %v814_v43, 0.0 }
 0x14a   :  { %v718_v9 = vadd.f32 %v717_v48, %v716_v51  ;;  %v915_v30 = vadd.f32 %v914_v24, %v913_v44  ;;  %v2571_v51 = vadd.f32 %v2137_v40, %v2270_v31  ;;  %v723_v24 = vsel %vm637_vm0, %v2549_v54, 0.0 }
 0x14b   :  { %v2585_v31 = vadd.f32 %v2264_v25, %v2137_v40 }
 0x14c   :  { %v720_v1 = vadd.f32 %v719_v33, %v718_v9  ;;  %v917_v29 = vadd.f32 %v916_v39, %v915_v30  ;;  %v725_v9 = vsel %vm637_vm0, %v2556_v37, 0.0  ;;  %v920_v39 = vsel %vm637_vm0, %v815_v4, 0.0 }
 0x14d   :  { %v2580_v30 = vadd.f32 %v2253_v13, %v2137_v40  ;;  %v922_v33 = vsel %vm637_vm0, %v816_v35, 0.0  ;;  %v2592_v4 = vadd.f32 %v2137_v40, %v2297_v8 }
 0x14e   :  { %v722_v48 = vadd.f32 %v721_v41, %v720_v1  ;;  %v919_v44 = vadd.f32 %v918_v34, %v917_v29  ;;  %v924_v29 = vsel %vm637_vm0, %v817_v19, 0.0  ;;  %v818_v34 = vmul.f32 %v2571_v51, %v2571_v51 }
 0x14f   :  { %4223 = vst [vmem:[#allocation19_spill] sm:$0xff] %v2592_v4  ;;  %v819_v35 = vmul.f32 %v2580_v30, %v2580_v30  ;;  %v729_v25 = vsel %vm637_vm0, %v2580_v30, 0.0  ;;  %v820_v19 = vmul.f32 %v2585_v31, %v2585_v31  ;;  %v821_v8 = vmul.f32 %v2592_v4, %v2592_v4 }
 0x150   :  { %v724_v43 = vadd.f32 %v723_v24, %v722_v48  ;;  %v921_v1 = vadd.f32 %v920_v39, %v919_v44  ;;  %v727_v48 = vsel %vm637_vm0, %v2571_v51, 0.0  ;;  %v926_v39 = vsel %vm637_vm0, %v818_v34, 0.0 }
 0x152   :  { %v726_v41 = vadd.f32 %v725_v9, %v724_v43  ;;  %v923_v13 = vadd.f32 %v922_v33, %v921_v1  ;;  %v2607_v43 = vadd.f32 %v2137_v40, %v2310_v28  ;;  %v731_v33 = vsel %vm637_vm0, %v2585_v31, 0.0 }
 0x153   :  { %v2621_v28 = vadd.f32 %v2304_v17, %v2137_v40 }
 0x154   :  { %v728_v24 = vadd.f32 %v727_v48, %v726_v41  ;;  %v925_v44 = vadd.f32 %v924_v29, %v923_v13  ;;  %4224 = vst [vmem:[#allocation20_spill] sm:$0xff] %v2607_v43  ;;  %v733_v41 = vsel %vm637_vm0, %v2592_v4, 0.0  ;;  %v928_v29 = vsel %vm637_vm0, %v819_v35, 0.0 }
 0x155   :  { %v2616_v13 = vadd.f32 %v2293_v2, %v2137_v40  ;;  %v930_v48 = vsel %vm637_vm0, %v820_v19, 0.0  ;;  %4226 = vst [vmem:[#allocation22_spill] sm:$0xff] %v2621_v28  ;;  %v2628_v35 = vadd.f32 %v2137_v40, %v2337_v16 }
 0x156   :  { %v730_v9 = vadd.f32 %v729_v25, %v728_v24  ;;  %v927_v1 = vadd.f32 %v926_v39, %v925_v44  ;;  %v932_v44 = vsel %vm637_vm0, %v821_v8, 0.0  ;;  %v822_v39 = vmul.f32 %v2607_v43, %v2607_v43 }
 0x157   :  { %4225 = vst [vmem:[#allocation21_spill] sm:$0xff] %v2616_v13  ;;  %4227 = vst [vmem:[#allocation23_spill] sm:$0xff] %v2628_v35  ;;  %v823_v19 = vmul.f32 %v2616_v13, %v2616_v13  ;;  %v737_v17 = vsel %vm637_vm0, %v2616_v13, 0.0  ;;  %v824_v8 = vmul.f32 %v2621_v28, %v2621_v28  ;;  %v825_v16 = vmul.f32 %v2628_v35, %v2628_v35 }
 0x158   :  { %v732_v34 = vadd.f32 %v731_v33, %v730_v9  ;;  %v929_v24 = vadd.f32 %v928_v29, %v927_v1  ;;  %v735_v9 = vsel %vm637_vm0, %v2607_v43, 0.0  ;;  %v934_v29 = vsel %vm637_vm0, %v822_v39, 0.0 }
 0x15a   :  { %v734_v25 = vadd.f32 %v733_v41, %v732_v34  ;;  %v931_v2 = vadd.f32 %v930_v48, %v929_v24  ;;  %v2643_v34 = vadd.f32 %v2137_v40, %v2350_v55  ;;  %v739_v48 = vsel %vm637_vm0, %v2621_v28, 0.0 }
 0x15b   :  { %v2657_v55 = vadd.f32 %v2344_v32, %v2137_v40 }
 0x15c   :  { %v736_v33 = vadd.f32 %v735_v9, %v734_v25  ;;  %v933_v1 = vadd.f32 %v932_v44, %v931_v2  ;;  %4228 = vst [vmem:[#allocation24_spill] sm:$0xff] %v2643_v34  ;;  %v741_v25 = vsel %vm637_vm0, %v2628_v35, 0.0  ;;  %v936_v44 = vsel %vm637_vm0, %v823_v19, 0.0 }
 0x15d   :  { %v2652_v2 = vadd.f32 %v2333_v5, %v2137_v40  ;;  %v938_v9 = vsel %vm637_vm0, %v824_v8, 0.0  ;;  %4230 = vst [vmem:[#allocation26_spill] sm:$0xff] %v2657_v55  ;;  %v2664_v19 = vadd.f32 %v2137_v40, %v2377_v26 }
 0x15e   :  { %v738_v41 = vadd.f32 %v737_v17, %v736_v33  ;;  %v935_v24 = vadd.f32 %v934_v29, %v933_v1  ;;  %v940_v1 = vsel %vm637_vm0, %v825_v16, 0.0  ;;  %v826_v29 = vmul.f32 %v2643_v34, %v2643_v34 }
 0x15f   :  { %4229 = vst [vmem:[#allocation25_spill] sm:$0xff] %v2652_v2  ;;  %4231 = vst [vmem:[#allocation27_spill] sm:$0xff] %v2664_v19  ;;  %v827_v8 = vmul.f32 %v2652_v2, %v2652_v2  ;;  %v745_v32 = vsel %vm637_vm0, %v2652_v2, 0.0  ;;  %v828_v16 = vmul.f32 %v2657_v55, %v2657_v55  ;;  %v829_v26 = vmul.f32 %v2664_v19, %v2664_v19 }
 0x160   :  { %v740_v39 = vadd.f32 %v739_v48, %v738_v41  ;;  %v937_v33 = vadd.f32 %v936_v44, %v935_v24  ;;  %v743_v41 = vsel %vm637_vm0, %v2643_v34, 0.0  ;;  %v942_v44 = vsel %vm637_vm0, %v826_v29, 0.0 }
 0x161   :  { %v2730_v2 = vadd.f32 %v2424_v60, %v2137_v40 }
 0x162   :  { %v742_v17 = vadd.f32 %v741_v25, %v740_v39  ;;  %v939_v5 = vadd.f32 %v938_v9, %v937_v33  ;;  %v2679_v39 = vadd.f32 %v2137_v40, %v2390_v6  ;;  %v747_v9 = vsel %vm637_vm0, %v2657_v55, 0.0 }
 0x163   :  { %v2693_v6 = vadd.f32 %v2384_v10, %v2137_v40  ;;  %4238 = vst [vmem:[#allocation34_spill] sm:$0xff] %v2730_v2 }
 0x164   :  { %v744_v48 = vadd.f32 %v743_v41, %v742_v17  ;;  %v941_v24 = vadd.f32 %v940_v1, %v939_v5  ;;  %4232 = vst [vmem:[#allocation28_spill] sm:$0xff] %v2679_v39  ;;  %v749_v17 = vsel %vm637_vm0, %v2664_v19, 0.0  ;;  %v944_v1 = vsel %vm637_vm0, %v827_v8, 0.0 }
 0x165   :  { %v2688_v5 = vadd.f32 %v2373_v56, %v2137_v40  ;;  %v946_v41 = vsel %vm637_vm0, %v828_v16, 0.0  ;;  %4234 = vst [vmem:[#allocation30_spill] sm:$0xff] %v2693_v6  ;;  %v2700_v8 = vadd.f32 %v2137_v40, %v2417_v15 }
 0x166   :  { %v746_v25 = vadd.f32 %v745_v32, %v744_v48  ;;  %v943_v33 = vadd.f32 %v942_v44, %v941_v24  ;;  %v948_v24 = vsel %vm637_vm0, %v829_v26, 0.0  ;;  %v830_v44 = vmul.f32 %v2679_v39, %v2679_v39  ;;  %v4262_v19 = vld [vmem:[#allocation25_spill] sm:$0xff] }
 0x167   :  { %4233 = vst [vmem:[#allocation29_spill] sm:$0xff] %v2688_v5  ;;  %4235 = vst [vmem:[#allocation31_spill] sm:$0xff] %v2700_v8  ;;  %v831_v16 = vmul.f32 %v2688_v5, %v2688_v5  ;;  %v753_v10 = vsel %vm637_vm0, %v2688_v5, 0.0  ;;  %v832_v26 = vmul.f32 %v2693_v6, %v2693_v6  ;;  %v833_v15 = vmul.f32 %v2700_v8, %v2700_v8  ;;  %v4260_v5 = vld [vmem:[#allocation23_spill] sm:$0xff] }
 0x168   :  { %v748_v29 = vadd.f32 %v747_v9, %v746_v25  ;;  %v945_v48 = vadd.f32 %v944_v1, %v943_v33  ;;  %v751_v25 = vsel %vm637_vm0, %v2679_v39, 0.0  ;;  %v950_v1 = vsel %vm637_vm0, %v830_v44, 0.0  ;;  %v4261_v39 = vld [vmem:[#allocation24_spill] sm:$0xff] }
 0x16a   :  { %v750_v32 = vadd.f32 %v749_v17, %v748_v29  ;;  %v947_v56 = vadd.f32 %v946_v41, %v945_v48  ;;  %v2715_v29 = vadd.f32 %v2137_v40, %v2434_v27  ;;  %v755_v41 = vsel %vm637_vm0, %v2693_v6, 0.0 }
 0x16b   :  { %v956_v27 = vsel %vm637_vm0, %v833_v15, 0.0  ;;  %v836_v15 = vmul.f32 %v2730_v2, %v2730_v2 }
 0x16c   :  { %v752_v9 = vadd.f32 %v751_v25, %v750_v32  ;;  %v949_v33 = vadd.f32 %v948_v24, %v947_v56  ;;  %4236 = vst [vmem:[#allocation32_spill] sm:$0xff] %v2715_v29  ;;  %v757_v32 = vsel %vm637_vm0, %v2700_v8, 0.0  ;;  %v952_v24 = vsel %vm637_vm0, %v831_v16, 0.0 }
 0x16d   :  { %v2724_v56 = vadd.f32 %v2413_v22, %v2137_v40  ;;  %v954_v25 = vsel %vm637_vm0, %v832_v26, 0.0  ;;  %v759_v16 = vsel %vm637_vm0, %v2715_v29, 0.0 }
 0x16e   :  { %v754_v17 = vadd.f32 %v753_v10, %v752_v9  ;;  %v951_v48 = vadd.f32 %v950_v1, %v949_v33  ;;  %v834_v33 = vmul.f32 %v2715_v29, %v2715_v29 }
 0x16f   :  { %4237 = vst [vmem:[#allocation33_spill] sm:$0xff] %v2724_v56  ;;  %v835_v22 = vmul.f32 %v2724_v56, %v2724_v56  ;;  %v761_v26 = vsel %vm637_vm0, %v2724_v56, 0.0 }
 0x170   :  { %v756_v44 = vadd.f32 %v755_v41, %v754_v17  ;;  %v953_v9 = vadd.f32 %v952_v24, %v951_v48  ;;  %v958_v60 = vsel %vm637_vm0, %v834_v33, 0.0  ;;  %v763_v48 = vsel %vm637_vm0, %v2730_v2, 0.0 }
 0x171   :  { %v960_v24 = vsel %vm637_vm0, %v835_v22, 0.0 }
 0x172   :  { %v758_v10 = vadd.f32 %v757_v32, %v756_v44  ;;  %v955_v1 = vadd.f32 %v954_v25, %v953_v9  ;;  %v962_v9 = vsel %vm637_vm0, %v836_v15, 0.0 }
 0x174   :  { %v760_v17 = vadd.f32 %v759_v16, %v758_v10  ;;  %v957_v41 = vadd.f32 %v956_v27, %v955_v1 }
 0x176   :  { %v762_v40 = vadd.f32 %v761_v26, %v760_v17  ;;  %v959_v32 = vadd.f32 %v958_v60, %v957_v41 }
 0x178   :  { %v764_v44 = vadd.f32 %v763_v48, %v762_v40  ;;  %v961_v25 = vadd.f32 %v960_v24, %v959_v32 }
 0x17a   :  { %v765_v10 = vrot.slane %v764_v44, 4  ;;  %v963_v16 = vadd.f32 %v962_v9, %v961_v25 }
 0x17c   :  { %v766_v34 = vadd.f32 %v765_v10, %v764_v44  ;;  %v964_v27 = vrot.slane %v963_v16, 4 }
 0x17e   :  { %v767_v1 = vrot.slane %v766_v34, 2  ;;  %v965_v35 = vadd.f32 %v964_v27, %v963_v16 }
 0x180   :  { %v768_v28 = vadd.f32 %v767_v1, %v766_v34  ;;  %v966_v17 = vrot.slane %v965_v35, 2 }
 0x182   :  { %v769_v26 = vrot.slane %v768_v28, 1  ;;  %v967_v33 = vadd.f32 %v966_v17, %v965_v35 }
 0x184   :  { %v770_v13 = vadd.f32 %v769_v26, %v768_v28  ;;  %v968_v43 = vrot.slane %v967_v33, 1 }
 0x186   :  { %v2747_v4 = vmul.f32 0.001953125, %v770_v13  ;;  %v969_v41 = vadd.f32 %v968_v43, %v967_v33 }
 0x188   :  { %v971_v22 = vmul.f32 %v2747_v4, %v2747_v4  ;;  %v970_v40 = vmul.f32 0.001953125, %v969_v41  ;;  %v979_v1 = vsub.f32 %v2198_v18, %v2747_v4  ;;  %v980_v17 = vsub.f32 %v2188_v11, %v2747_v4 }
 0x189   :  { %v981_v26 = vsub.f32 %v2201_v21, %v2747_v4  ;;  %v982_v41 = vsub.f32 %v2222_v38, %v2747_v4  ;;  %v986_v18 = vsub.f32 %v2262_v23, %v2747_v4  ;;  %v987_v11 = vsub.f32 %v2277_v36, %v2747_v4  ;;  %v4239_v21 = vld [vmem:[#allocation2_spill] sm:$0xff]  ;;  %v4240_v38 = vld [vmem:[#allocation3_spill] sm:$0xff]  ;;  %v4245_v36 = vld [vmem:[#allocation8_spill] sm:$0xff] }
 0x18a   :  { %v972_v15 = vsub.f32 %v970_v40, %v971_v22  ;;  %v983_v22 = vsub.f32 %v2237_v58, %v2747_v4  ;;  %v984_v40 = vsub.f32 %v2228_v47, %v2747_v4  ;;  %v989_v27 = vsub.f32 %v4240_v38, %v2747_v4  ;;  %v4241_v58 = vld [vmem:[#allocation4_spill] sm:$0xff]  ;;  %v4242_v47 = vld [vmem:[#allocation6_spill] sm:$0xff]  ;;  %v4244_v23 = vld [vmem:[#allocation7_spill] sm:$0xff] }
 0x18b   :  { %v990_v16 = vsub.f32 %v4241_v58, %v2747_v4  ;;  %v991_v10 = vsub.f32 %v4242_v47, %v2747_v4  ;;  %v993_v25 = vsub.f32 %v4244_v23, %v2747_v4  ;;  %v994_v44 = vsub.f32 %v4245_v36, %v2747_v4  ;;  %v4247_v38 = vld [vmem:[#allocation9_spill] sm:$0xff]  ;;  %v4248_v58 = vld [vmem:[#allocation11_spill] sm:$0xff]  ;;  %v4249_v47 = vld [vmem:[#allocation12_spill] sm:$0xff] }
 0x18c   :  { %v973_v60 = vmax.f32 %v972_v15, 0.0  ;;  %v985_v15 = vsub.f32 %v2241_v61, %v2747_v4  ;;  %v4243_v61 = vld [vmem:[#allocation5_spill] sm:$0xff]  ;;  %v996_v24 = vsub.f32 %v4247_v38, %v2747_v4  ;;  %v997_v32 = vsub.f32 %v4248_v58, %v2747_v4  ;;  %v4252_v36 = vld [vmem:[#allocation15_spill] sm:$0xff]  ;;  %v4254_v38 = vld [vmem:[#allocation18_spill] sm:$0xff] }
 0x18d   :  { %v992_v9 = vsub.f32 %v4243_v61, %v2747_v4  ;;  %v998_v28 = vsub.f32 %v4249_v47, %v2747_v4  ;;  %v4250_v61 = vld [vmem:[#allocation14_spill] sm:$0xff]  ;;  %v4251_v23 = vld [vmem:[#allocation13_spill] sm:$0xff]  ;;  %v1001_v35 = vsub.f32 %v4252_v36, %v2747_v4  ;;  %v1003_v48 = vsub.f32 %v4254_v38, %v2747_v4 }
 0x18e   :  { %v1038_v33 = vadd.f32 1e-05, %v973_v60  ;;  %v988_v60 = vsub.f32 %v4239_v21, %v2747_v4  ;;  %v999_v43 = vsub.f32 %v4250_v61, %v2747_v4  ;;  %v1000_v13 = vsub.f32 %v4251_v23, %v2747_v4  ;;  %v4255_v58 = vld [vmem:[#allocation17_spill] sm:$0xff] }
 0x18f   :  { %v1004_v2 = vsub.f32 %v4255_v58, %v2747_v4  ;;  %v1005_v47 = vsub.f32 %v2445_v63, %v2747_v4  ;;  %v1006_v61 = vsub.f32 %v2432_v57, %v2747_v4  ;;  %v1007_v23 = vsub.f32 %v2463_v3, %v2747_v4 }
 0x190   :  { %1982 = vrsqrt.f32 %v1038_v33  ;;  %v4246_v33 = vld [vmem:[#allocation10_spill] sm:$0xff]  ;;  %v1008_v36 = vsub.f32 %v2472_v20, %v2747_v4  ;;  %v1010_v38 = vsub.f32 %v2484_v59, %v2747_v4  ;;  %v1011_v58 = vsub.f32 %v2499_v12, %v2747_v4 }
 0x191   :  { %v995_v21 = vsub.f32 %v4246_v33, %v2747_v4  ;;  %v4253_v33 = vld [vmem:[#allocation16_spill] sm:$0xff]  ;;  %v1012_v63 = vsub.f32 %v2508_v42, %v2747_v4  ;;  %v1013_v57 = vsub.f32 %v2513_v14, %v2747_v4  ;;  %v1014_v3 = vsub.f32 %v2520_v49, %v2747_v4 }
 0x192   :  { %v1002_v34 = vsub.f32 %v4253_v33, %v2747_v4  ;;  %v1009_v33 = vsub.f32 %v2477_v50, %v2747_v4  ;;  %v1015_v20 = vsub.f32 %v2535_v62, %v2747_v4  ;;  %v1016_v50 = vsub.f32 %v2544_v0, %v2747_v4  ;;  %v4256_v62 = vld [vmem:[#allocation19_spill] sm:$0xff]  ;;  %v4257_v0 = vld [vmem:[#allocation20_spill] sm:$0xff] }
 0x193   :  { %v1017_v59 = vsub.f32 %v2549_v54, %v2747_v4  ;;  %v1018_v12 = vsub.f32 %v2556_v37, %v2747_v4  ;;  %v1019_v42 = vsub.f32 %v2571_v51, %v2747_v4  ;;  %v1020_v14 = vsub.f32 %v2580_v30, %v2747_v4  ;;  %v4258_v54 = vld [vmem:[#allocation21_spill] sm:$0xff]  ;;  %v4259_v37 = vld [vmem:[#allocation22_spill] sm:$0xff] }
 0x194   :  { %v1021_v49 = vsub.f32 %v2585_v31, %v2747_v4  ;;  %v1022_v56 = vsub.f32 %v4256_v62, %v2747_v4  ;;  %v1023_v29 = vsub.f32 %v4257_v0, %v2747_v4  ;;  %v1024_v8 = vsub.f32 %v4258_v54, %v2747_v4 }
 0x195   :  { %v1025_v51 = vsub.f32 %v4259_v37, %v2747_v4  ;;  %v1026_v30 = vsub.f32 %v4260_v5, %v2747_v4  ;;  %v1027_v31 = vsub.f32 %v4261_v39, %v2747_v4  ;;  %v1028_v62 = vsub.f32 %v4262_v19, %v2747_v4 }
 0x196   :  { %v4263_v0 = vsub.f32 %v2147_v46, %v2747_v4  ;;  %v4264_v54 = vsub.f32 %v2159_v53, %v2747_v4  ;;  %v4265_v5 = vsub.f32 %v2144_v45, %v2747_v4  ;;  %v4266_v19 = vsub.f32 %v2156_v52, %v2747_v4 }
 0x19a   :  { %v2871_v6 = vpop.eup %1982 }
 0x19b   :  { %v2885_v55 = vmul.f32 %v2871_v6, %v4263_v0  ;;  %v2891_v37 = vmul.f32 %v2871_v6, %v4264_v54  ;;  %v2897_v39 = vmul.f32 %v2871_v6, %v4265_v5  ;;  %v2903_v46 = vmul.f32 %v2871_v6, %v4266_v19 }
 0x19c   :  { %v4267_v0 = vsub.f32 %v2183_v7, %v2747_v4  ;;  %v2912_v54 = vmul.f32 %v2871_v6, %v979_v1  ;;  %v2915_v45 = vmul.f32 %v2871_v6, %v980_v17  ;;  %v2918_v5 = vmul.f32 %v2871_v6, %v981_v26 }
 0x19d   :  { %v2921_v52 = vmul.f32 %v2871_v6, %v982_v41  ;;  %v2924_v19 = vmul.f32 %v2871_v6, %v983_v22  ;;  %v2927_v7 = vmul.f32 %v2871_v6, %v984_v40  ;;  %v2933_v1 = vmul.f32 %v2871_v6, %v986_v18 }
 0x19e   :  { %v2909_v53 = vmul.f32 %v2871_v6, %v4267_v0  ;;  %v2930_v0 = vmul.f32 %v2871_v6, %v985_v15  ;;  %v2936_v17 = vmul.f32 %v2871_v6, %v987_v11  ;;  %v2939_v26 = vmul.f32 %v2871_v6, %v988_v60 }
 0x19f   :  { %v2942_v41 = vmul.f32 %v2871_v6, %v989_v27  ;;  %v2945_v22 = vmul.f32 %v2871_v6, %v990_v16  ;;  %v2948_v40 = vmul.f32 %v2871_v6, %v991_v10  ;;  %v2951_v15 = vmul.f32 %v2871_v6, %v992_v9 }
 0x1a0   :  { %v2954_v18 = vmul.f32 %v2871_v6, %v993_v25  ;;  %v2957_v11 = vmul.f32 %v2871_v6, %v994_v44  ;;  %v2960_v60 = vmul.f32 %v2871_v6, %v995_v21  ;;  %v2963_v27 = vmul.f32 %v2871_v6, %v996_v24 }
 0x1a1   :  { %v2966_v16 = vmul.f32 %v2871_v6, %v997_v32  ;;  %v2969_v10 = vmul.f32 %v2871_v6, %v998_v28  ;;  %v2972_v9 = vmul.f32 %v2871_v6, %v999_v43  ;;  %v2975_v25 = vmul.f32 %v2871_v6, %v1000_v13 }
 0x1a2   :  { %v2978_v44 = vmul.f32 %v2871_v6, %v1001_v35  ;;  %v2981_v21 = vmul.f32 %v2871_v6, %v1002_v34  ;;  %v2984_v24 = vmul.f32 %v2871_v6, %v1003_v48  ;;  %v2987_v32 = vmul.f32 %v2871_v6, %v1004_v2 }
 0x1a3   :  { %v2990_v28 = vmul.f32 %v2871_v6, %v1005_v47  ;;  %v2993_v43 = vmul.f32 %v2871_v6, %v1006_v61  ;;  %v2996_v13 = vmul.f32 %v2871_v6, %v1007_v23  ;;  %v2999_v35 = vmul.f32 %v2871_v6, %v1008_v36 }
 0x1a4   :  { %v3002_v34 = vmul.f32 %v2871_v6, %v1009_v33  ;;  %v3005_v48 = vmul.f32 %v2871_v6, %v1010_v38  ;;  %v3008_v2 = vmul.f32 %v2871_v6, %v1011_v58  ;;  %v3011_v47 = vmul.f32 %v2871_v6, %v1012_v63 }
 0x1a5   :  { %v3014_v61 = vmul.f32 %v2871_v6, %v1013_v57  ;;  %v3017_v23 = vmul.f32 %v2871_v6, %v1014_v3  ;;  %v3020_v36 = vmul.f32 %v2871_v6, %v1015_v20  ;;  %v3023_v33 = vmul.f32 %v2871_v6, %v1016_v50 }
 0x1a6   :  { %v3026_v38 = vmul.f32 %v2871_v6, %v1017_v59  ;;  %v3029_v58 = vmul.f32 %v2871_v6, %v1018_v12  ;;  %v3032_v63 = vmul.f32 %v2871_v6, %v1019_v42  ;;  %v3035_v57 = vmul.f32 %v2871_v6, %v1020_v14 }
 0x1a7   :  { %v3038_v3 = vmul.f32 %v2871_v6, %v1021_v49  ;;  %v3041_v20 = vmul.f32 %v2871_v6, %v1022_v56  ;;  %v3044_v50 = vmul.f32 %v2871_v6, %v1023_v29  ;;  %v3047_v59 = vmul.f32 %v2871_v6, %v1024_v8  ;;  %v4273_v56 = vld [vmem:[#allocation26_spill] sm:$0xff] }
 0x1a8   :  { %v3050_v12 = vmul.f32 %v2871_v6, %v1025_v51  ;;  %v3053_v42 = vmul.f32 %v2871_v6, %v1026_v30  ;;  %v3056_v14 = vmul.f32 %v2871_v6, %v1027_v31  ;;  %v3059_v49 = vmul.f32 %v2871_v6, %v1028_v62  ;;  %v3070_v8 = vld [vmem:[%s4152_s3] ss:$0 sm:$0xff]  ;;  %v4276_v51 = vld [vmem:[#allocation27_spill] sm:$0xff] }
 0x1a9   :  { %4268 = vst [vmem:[#allocation2_spill] sm:$0xff] %v3041_v20  ;;  %v4274_v20 = vsub.f32 %v4273_v56, %v2747_v4  ;;  %v4277_v30 = vsub.f32 %v4276_v51, %v2747_v4  ;;  %v4282_v56 = vld [vmem:[#allocation29_spill] sm:$0xff] }
 0x1aa   :  { %4269 = vst [vmem:[#allocation3_spill] sm:$0xff] %v3050_v12  ;;  %4270 = vst [vmem:[#allocation4_spill] sm:$0xff] %v3053_v42  ;;  %v4285_v42 = vld [vmem:[#allocation30_spill] sm:$0xff] }
 0x1ab   :  { %4271 = vst [vmem:[#allocation6_spill] sm:$0xff] %v3056_v14  ;;  %4272 = vst [vmem:[#allocation5_spill] sm:$0xff] %v3059_v49  ;;  %v3065_v29 = vmul.f32 %v2871_v6, %v4274_v20  ;;  %v3076_v31 = vmul.f32 %v2871_v6, %v4277_v30  ;;  %v4279_v14 = vld [vmem:[#allocation28_spill] sm:$0xff]  ;;  %v4283_v20 = vsub.f32 %v4282_v56, %v2747_v4  ;;  %v4288_v30 = vld [vmem:[#allocation31_spill] sm:$0xff] }
 0x1ac   :  { %v4280_v62 = vsub.f32 %v4279_v14, %v2747_v4  ;;  %v4286_v12 = vsub.f32 %v4285_v42, %v2747_v4 }
 0x1ad   :  { %4275 = vst [vmem:[#allocation7_spill] sm:$0xff] %v3065_v29  ;;  %4278 = vst [vmem:[#allocation8_spill] sm:$0xff] %v3076_v31  ;;  %v3088_v29 = vmul.f32 %v2871_v6, %v4283_v20  ;;  %v4289_v31 = vsub.f32 %v4288_v30, %v2747_v4  ;;  %v4292_v20 = vld [vmem:[#allocation33_spill] sm:$0xff] }
 0x1ae   :  { %v3082_v49 = vmul.f32 %v2871_v6, %v4280_v62  ;;  %v3094_v51 = vmul.f32 %v2871_v6, %v4286_v12  ;;  %v4290_v62 = vld [vmem:[#allocation32_spill] sm:$0xff]  ;;  %v4294_v12 = vld [vmem:[#allocation34_spill] sm:$0xff] }
 0x1af   :  { %4284 = vst [vmem:[#allocation9_spill] sm:$0xff] %v3088_v29  ;;  %v3100_v14 = vmul.f32 %v2871_v6, %v4289_v31  ;;  %v4293_v29 = vsub.f32 %v4292_v20, %v2747_v4  ;;  %v3122_v31 = vmul.f32 %v3070_v8, %v2885_v55  ;;  %v3142_v55 = vmul.f32 %v3070_v8, %v2912_v54 }
 0x1b0   :  { %4281 = vst [vmem:[#allocation10_spill] sm:$0xff] %v3082_v49  ;;  %4287 = vst [vmem:[#allocation11_spill] sm:$0xff] %v3094_v51  ;;  %v4291_v49 = vsub.f32 %v4290_v62, %v2747_v4  ;;  %v4295_v51 = vsub.f32 %v4294_v12, %v2747_v4  ;;  %v3130_v62 = vmul.f32 %v3070_v8, %v2897_v39 }
 0x1b1   :  { %v3112_v42 = vmul.f32 %v2871_v6, %v4293_v29  ;;  %v3134_v29 = vmul.f32 %v3070_v8, %v2903_v46  ;;  %v3138_v4 = vmul.f32 %v3070_v8, %v2909_v53  ;;  %v3154_v39 = vmul.f32 %v3070_v8, %v2921_v52  ;;  %v4301_v20 = vld [vmem:[#allocation4_spill] sm:$0xff] }
 0x1b2   :  { %v3106_v56 = vmul.f32 %v2871_v6, %v4291_v49  ;;  %v3118_v30 = vmul.f32 %v2871_v6, %v4295_v51  ;;  %v3126_v49 = vmul.f32 %v3070_v8, %v2891_v37  ;;  %v3146_v6 = vmul.f32 %v3070_v8, %v2915_v45  ;;  %v4299_v51 = vld [vmem:[#allocation3_spill] sm:$0xff]  ;;  %v4303_v12 = vld [vmem:[#allocation6_spill] sm:$0xff] }
 0x1b3   :  { %v3150_v37 = vmul.f32 %v3070_v8, %v2918_v5  ;;  %v3158_v46 = vmul.f32 %v3070_v8, %v2924_v19  ;;  %v3162_v53 = vmul.f32 %v3070_v8, %v2927_v7  ;;  %v3166_v54 = vmul.f32 %v3070_v8, %v2930_v0 }
 0x1b4   :  { %v3170_v45 = vmul.f32 %v3070_v8, %v2933_v1  ;;  %v3174_v5 = vmul.f32 %v3070_v8, %v2936_v17  ;;  %v3178_v52 = vmul.f32 %v3070_v8, %v2939_v26  ;;  %v3182_v19 = vmul.f32 %v3070_v8, %v2942_v41 }
 0x1b5   :  { %v3186_v7 = vmul.f32 %v3070_v8, %v2945_v22  ;;  %v3190_v0 = vmul.f32 %v3070_v8, %v2948_v40  ;;  %v3194_v1 = vmul.f32 %v3070_v8, %v2951_v15  ;;  %v3198_v17 = vmul.f32 %v3070_v8, %v2954_v18 }
 0x1b6   :  { %v3202_v26 = vmul.f32 %v3070_v8, %v2957_v11  ;;  %v3206_v41 = vmul.f32 %v3070_v8, %v2960_v60  ;;  %v3210_v22 = vmul.f32 %v3070_v8, %v2963_v27  ;;  %v3214_v40 = vmul.f32 %v3070_v8, %v2966_v16 }
 0x1b7   :  { %v3218_v15 = vmul.f32 %v3070_v8, %v2969_v10  ;;  %v3222_v18 = vmul.f32 %v3070_v8, %v2972_v9  ;;  %v3226_v11 = vmul.f32 %v3070_v8, %v2975_v25  ;;  %v3230_v60 = vmul.f32 %v3070_v8, %v2978_v44 }
 0x1b8   :  { %v3234_v27 = vmul.f32 %v3070_v8, %v2981_v21  ;;  %v3238_v16 = vmul.f32 %v3070_v8, %v2984_v24  ;;  %v3242_v10 = vmul.f32 %v3070_v8, %v2987_v32  ;;  %v3246_v9 = vmul.f32 %v3070_v8, %v2990_v28 }
 0x1b9   :  { %v3250_v25 = vmul.f32 %v3070_v8, %v2993_v43  ;;  %v3254_v44 = vmul.f32 %v3070_v8, %v2996_v13  ;;  %v3258_v21 = vmul.f32 %v3070_v8, %v2999_v35  ;;  %v3262_v24 = vmul.f32 %v3070_v8, %v3002_v34 }
 0x1ba   :  { %v3266_v32 = vmul.f32 %v3070_v8, %v3005_v48  ;;  %v3270_v28 = vmul.f32 %v3070_v8, %v3008_v2  ;;  %v3274_v43 = vmul.f32 %v3070_v8, %v3011_v47  ;;  %v3278_v13 = vmul.f32 %v3070_v8, %v3014_v61 }
 0x1bb   :  { %v3282_v35 = vmul.f32 %v3070_v8, %v3017_v23  ;;  %v3286_v34 = vmul.f32 %v3070_v8, %v3020_v36  ;;  %v3290_v48 = vmul.f32 %v3070_v8, %v3023_v33  ;;  %v3294_v2 = vmul.f32 %v3070_v8, %v3026_v38  ;;  %v4296_v33 = vld [vmem:[#allocation2_spill] sm:$0xff] }
 0x1bc   :  { %v3298_v47 = vmul.f32 %v3070_v8, %v3029_v58  ;;  %v3302_v61 = vmul.f32 %v3070_v8, %v3032_v63  ;;  %v3306_v23 = vmul.f32 %v3070_v8, %v3035_v57  ;;  %v3310_v36 = vmul.f32 %v3070_v8, %v3038_v3 }
 0x1bd   :  { %v3314_v38 = vmul.f32 %v3070_v8, %v4296_v33  ;;  %v3318_v58 = vmul.f32 %v3070_v8, %v3044_v50  ;;  %v3322_v63 = vmul.f32 %v3070_v8, %v3047_v59  ;;  %v3326_v57 = vmul.f32 %v3070_v8, %v4299_v51  ;;  %v3347_v51 = vld [vmem:[%s4153_s4] ss:$0 sm:$0xff] }
 0x1be   :  { %v3330_v3 = vmul.f32 %v3070_v8, %v4301_v20  ;;  %v3334_v33 = vmul.f32 %v3070_v8, %v4303_v12 }
 0x1bf   :  { %4297 = vst [vmem:[#allocation12_spill] sm:$0xff] %v3314_v38  ;;  %4298 = vst [vmem:[#allocation14_spill] sm:$0xff] %v3318_v58  ;;  %v4305_v38 = vld [vmem:[#allocation5_spill] sm:$0xff]  ;;  %v4307_v58 = vld [vmem:[#allocation7_spill] sm:$0xff] }
 0x1c0   :  { %4300 = vst [vmem:[#allocation13_spill] sm:$0xff] %v3326_v57  ;;  %4302 = vst [vmem:[#allocation15_spill] sm:$0xff] %v3330_v3  ;;  %v3338_v50 = vmul.f32 %v3070_v8, %v4305_v38  ;;  %v3342_v59 = vmul.f32 %v3070_v8, %v4307_v58  ;;  %v4309_v57 = vld [vmem:[#allocation8_spill] sm:$0xff]  ;;  %v4310_v3 = vld [vmem:[#allocation10_spill] sm:$0xff] }
 0x1c1   :  { %4304 = vst [vmem:[#allocation16_spill] sm:$0xff] %v3334_v33  ;;  %v3351_v20 = vmul.f32 %v3070_v8, %v4309_v57  ;;  %v3355_v12 = vmul.f32 %v3070_v8, %v4310_v3  ;;  %v4311_v33 = vld [vmem:[#allocation9_spill] sm:$0xff]  ;;  %v3371_v57 = vmul.f32 %v3070_v8, %v3106_v56  ;;  %v3375_v3 = vmul.f32 %v3070_v8, %v3112_v42 }
 0x1c2   :  { %4306 = vst [vmem:[#allocation18_spill] sm:$0xff] %v3338_v50  ;;  %4308 = vst [vmem:[#allocation17_spill] sm:$0xff] %v3342_v59  ;;  %v3359_v38 = vmul.f32 %v3070_v8, %v4311_v33  ;;  %v4312_v50 = vld [vmem:[#allocation11_spill] sm:$0xff]  ;;  %v3367_v59 = vmul.f32 %v3070_v8, %v3100_v14  ;;  %v3379_v33 = vmul.f32 %v3070_v8, %v3118_v30 }
 0x1c3   :  { %v3363_v58 = vmul.f32 %v3070_v8, %v4312_v50  ;;  %v3383_v50 = vadd.f32 %v3347_v51, %v3122_v31  ;;  %v3387_v14 = vadd.f32 %v3347_v51, %v3126_v49  ;;  %v3391_v56 = vadd.f32 %v3347_v51, %v3130_v62 }
 0x1c4   :  { %v3395_v42 = vadd.f32 %v3347_v51, %v3134_v29  ;;  %v3399_v8 = vadd.f32 %v3347_v51, %v3138_v4  ;;  %v3403_v30 = vadd.f32 %v3347_v51, %v3142_v55  ;;  %v3407_v31 = vadd.f32 %v3347_v51, %v3146_v6 }
 0x1c5   :  { %v3411_v49 = vadd.f32 %v3347_v51, %v3150_v37  ;;  %v3415_v62 = vadd.f32 %v3347_v51, %v3154_v39  ;;  %v3419_v29 = vadd.f32 %v3347_v51, %v3158_v46  ;;  %v3423_v4 = vadd.f32 %v3347_v51, %v3162_v53 }
 0x1c6   :  { %v3427_v55 = vadd.f32 %v3347_v51, %v3166_v54  ;;  %v3431_v6 = vadd.f32 %v3347_v51, %v3170_v45  ;;  %v3435_v37 = vadd.f32 %v3347_v51, %v3174_v5  ;;  %v3439_v39 = vadd.f32 %v3347_v51, %v3178_v52 }
 0x1c7   :  { %v3443_v46 = vadd.f32 %v3347_v51, %v3182_v19  ;;  %v3447_v53 = vadd.f32 %v3347_v51, %v3186_v7  ;;  %v3451_v54 = vadd.f32 %v3347_v51, %v3190_v0  ;;  %v3455_v45 = vadd.f32 %v3347_v51, %v3194_v1 }
 0x1c8   :  { %v3459_v5 = vadd.f32 %v3347_v51, %v3198_v17  ;;  %v3463_v52 = vadd.f32 %v3347_v51, %v3202_v26  ;;  %v3467_v19 = vadd.f32 %v3347_v51, %v3206_v41  ;;  %v3471_v7 = vadd.f32 %v3347_v51, %v3210_v22 }
 0x1c9   :  { %v3475_v0 = vadd.f32 %v3347_v51, %v3214_v40  ;;  %v3479_v1 = vadd.f32 %v3347_v51, %v3218_v15  ;;  %v3483_v17 = vadd.f32 %v3347_v51, %v3222_v18  ;;  %v3487_v26 = vadd.f32 %v3347_v51, %v3226_v11 }
 0x1ca   :  { %v3491_v41 = vadd.f32 %v3347_v51, %v3230_v60  ;;  %v3495_v22 = vadd.f32 %v3347_v51, %v3234_v27  ;;  %v3499_v40 = vadd.f32 %v3347_v51, %v3238_v16  ;;  %v3503_v15 = vadd.f32 %v3347_v51, %v3242_v10 }
 0x1cb   :  { %v3507_v18 = vadd.f32 %v3347_v51, %v3246_v9  ;;  %v3511_v11 = vadd.f32 %v3347_v51, %v3250_v25  ;;  %v3515_v60 = vadd.f32 %v3347_v51, %v3254_v44  ;;  %v3519_v27 = vadd.f32 %v3347_v51, %v3258_v21 }
 0x1cc   :  { %v3523_v16 = vadd.f32 %v3347_v51, %v3262_v24  ;;  %v3527_v10 = vadd.f32 %v3347_v51, %v3266_v32  ;;  %v3531_v9 = vadd.f32 %v3347_v51, %v3270_v28  ;;  %v3535_v25 = vadd.f32 %v3347_v51, %v3274_v43 }
 0x1cd   :  { %4313 = vst [vmem:[#allocation19_spill] sm:$0xff] %v3519_v27  ;;  %v3539_v44 = vadd.f32 %v3347_v51, %v3278_v13  ;;  %v3543_v21 = vadd.f32 %v3347_v51, %v3282_v35  ;;  %v3547_v24 = vadd.f32 %v3347_v51, %v3286_v34  ;;  %v3551_v32 = vadd.f32 %v3347_v51, %v3290_v48  ;;  %v4322_v48 = vld [vmem:[#allocation12_spill] sm:$0xff] }
 0x1ce   :  { %4314 = vst [vmem:[#allocation20_spill] sm:$0xff] %v3523_v16  ;;  %4315 = vst [vmem:[#allocation21_spill] sm:$0xff] %v3527_v10  ;;  %v3555_v28 = vadd.f32 %v3347_v51, %v3294_v2  ;;  %v3559_v43 = vadd.f32 %v3347_v51, %v3298_v47  ;;  %v3563_v13 = vadd.f32 %v3347_v51, %v3302_v61 }
 0x1cf   :  { %4316 = vst [vmem:[#allocation22_spill] sm:$0xff] %v3531_v9  ;;  %4317 = vst [vmem:[#allocation23_spill] sm:$0xff] %v3535_v25  ;;  %v3567_v35 = vadd.f32 %v3347_v51, %v3306_v23  ;;  %v3571_v34 = vadd.f32 %v3347_v51, %v3310_v36  ;;  %v3575_v2 = vadd.f32 %v3347_v51, %v4322_v48 }
 0x1d0   :  { %4318 = vst [vmem:[#allocation24_spill] sm:$0xff] %v3555_v28  ;;  %4319 = vst [vmem:[#allocation25_spill] sm:$0xff] %v3563_v13  ;;  %v4324_v28 = vld [vmem:[#allocation14_spill] sm:$0xff]  ;;  %v3583_v61 = vadd.f32 %v3347_v51, %v3322_v63  ;;  %v4327_v13 = vld [vmem:[#allocation13_spill] sm:$0xff] }
 0x1d1   :  { %4320 = vst [vmem:[#allocation26_spill] sm:$0xff] %v3567_v35  ;;  %4321 = vst [vmem:[#allocation27_spill] sm:$0xff] %v3571_v34  ;;  %v3579_v47 = vadd.f32 %v3347_v51, %v4324_v28  ;;  %v3587_v23 = vadd.f32 %v3347_v51, %v4327_v13  ;;  %v4329_v35 = vld [vmem:[#allocation15_spill] sm:$0xff]  ;;  %v4330_v34 = vld [vmem:[#allocation16_spill] sm:$0xff]  ;;  %v3607_v13 = vadd.f32 %v3347_v51, %v3351_v20 }
 0x1d2   :  { %4323 = vst [vmem:[#allocation28_spill] sm:$0xff] %v3575_v2  ;;  %4326 = vst [vmem:[#allocation30_spill] sm:$0xff] %v3583_v61  ;;  %v3591_v36 = vadd.f32 %v3347_v51, %v4329_v35  ;;  %v3595_v48 = vadd.f32 %v3347_v51, %v4330_v34  ;;  %v4331_v2 = vld [vmem:[#allocation18_spill] sm:$0xff]  ;;  %v3611_v35 = vadd.f32 %v3347_v51, %v3355_v12 }
 0x1d3   :  { %4325 = vst [vmem:[#allocation29_spill] sm:$0xff] %v3579_v47  ;;  %4328 = vst [vmem:[#allocation31_spill] sm:$0xff] %v3587_v23  ;;  %v3599_v28 = vadd.f32 %v3347_v51, %v4331_v2  ;;  %v4332_v47 = vld [vmem:[#allocation17_spill] sm:$0xff]  ;;  %v3615_v34 = vadd.f32 %v3347_v51, %v3359_v38  ;;  %v3619_v2 = vadd.f32 %v3347_v51, %v3363_v58 }
 0x1d4   :  { %v3603_v63 = vadd.f32 %v3347_v51, %v4332_v47  ;;  %v3623_v47 = vadd.f32 %v3347_v51, %v3367_v59  ;;  %v3627_v20 = vadd.f32 %v3347_v51, %v3371_v57  ;;  %v3631_v12 = vadd.f32 %v3347_v51, %v3375_v3 }
 0x1d5   :  { %4333 = vst [vmem:[#allocation32_spill] sm:$0xff] %v3615_v34  ;;  %4334 = vst [vmem:[#allocation33_spill] sm:$0xff] %v3619_v2  ;;  %v3635_v38 = vadd.f32 %v3347_v51, %v3379_v33  ;;  %v4345_v9 = vmov %v3619_v2  ;;  %v4352_v33 = vmax.f32 %v3395_v42, 0.0  ;;  %v4353_v2 = vmax.f32 %v3399_v8, 0.0 }
 0x1d6   :  { %4335 = vst [vmem:[#allocation34_spill] sm:$0xff] %v3623_v47  ;;  %4336 = vst [vmem:[#allocation2_spill] sm:$0xff] %v3627_v20  ;;  %v4346_v25 = vmov %v3623_v47  ;;  %v4347_v61 = vmov %v3627_v20  ;;  %v4348_v23 = vmov %v3631_v12  ;;  %v4349_v47 = vmax.f32 %v3383_v50, 0.0 }
 0x1d7   :  { %4337 = vst [vmem:[#allocation3_spill] sm:$0xff] %v3631_v12  ;;  %v4338_v34 = vld [vmem:[#allocation24_spill] sm:$0xff]  ;;  %v4339_v27 = vld [vmem:[#allocation25_spill] sm:$0xff]  ;;  %v4350_v20 = vmax.f32 %v3387_v14, 0.0  ;;  %v4351_v12 = vmax.f32 %v3391_v56, 0.0  ;;  %v1745_v58 = vpack.c.bf16 %v4352_v33, %v4352_v33  ;;  %v1746_v59 = vpack.c.bf16 %v4353_v2, %v4353_v2 }
 0x1d8   :  { %v4340_v16 = vld [vmem:[#allocation26_spill] sm:$0xff]  ;;  %v1742_v57 = vpack.c.bf16 %v4349_v47, %v4349_v47  ;;  %v4354_v50 = vmax.f32 %v3403_v30, 0.0  ;;  %v4355_v14 = vmax.f32 %v3407_v31, 0.0  ;;  %v4356_v56 = vmax.f32 %v3411_v49, 0.0 }
 0x1d9   :  { %v1743_v3 = vpack.c.bf16 %v4350_v20, %v4350_v20  ;;  %v1744_v51 = vpack.c.bf16 %v4351_v12, %v4351_v12  ;;  %v4357_v42 = vmax.f32 %v3415_v62, 0.0  ;;  %v4358_v8 = vmax.f32 %v3419_v29, 0.0  ;;  %1570 = vst.msk [vmem:[%s4154_s5 + $0xc] sm:$0xf] %vm1566_vm1, %v1745_v58  ;;  %1571 = vst.msk [vmem:[%s4154_s5 + $0x10] sm:$0xf] %vm1566_vm1, %v1746_v59 }
 0x1da   :  { %v1747_v47 = vpack.c.bf16 %v4354_v50, %v4354_v50  ;;  %v1748_v20 = vpack.c.bf16 %v4355_v14, %v4355_v14  ;;  %v1749_v12 = vpack.c.bf16 %v4356_v56, %v4356_v56  ;;  %v4359_v30 = vmax.f32 %v3423_v4, 0.0  ;;  %1567 = vst.msk [vmem:[%s4154_s5] sm:$0xf] %vm1566_vm1, %v1742_v57 }
 0x1db   :  { %v1750_v33 = vpack.c.bf16 %v4357_v42, %v4357_v42  ;;  %v1751_v2 = vpack.c.bf16 %v4358_v8, %v4358_v8  ;;  %v4360_v31 = vmax.f32 %v3427_v55, 0.0  ;;  %1568 = vst.msk [vmem:[%s4154_s5 + $0x4] sm:$0xf] %vm1566_vm1, %v1743_v3  ;;  %1569 = vst.msk [vmem:[%s4154_s5 + $0x8] sm:$0xf] %vm1566_vm1, %v1744_v51  ;;  %v4361_v49 = vmax.f32 %v3431_v6, 0.0 }
 0x1dc   :  { %v4344_v10 = vld [vmem:[#allocation32_spill] sm:$0xff]  ;;  %v1752_v50 = vpack.c.bf16 %v4359_v30, %v4359_v30  ;;  %v4362_v29 = vmax.f32 %v3435_v37, 0.0  ;;  %v4363_v55 = vmax.f32 %v3439_v39, 0.0  ;;  %v4364_v3 = vmax.f32 %v3443_v46, 0.0  ;;  %1572 = vst.msk [vmem:[%s4154_s5 + $0x14] sm:$0xf] %vm1566_vm1, %v1747_v47 }
 0x1dd   :  { %v1753_v14 = vpack.c.bf16 %v4360_v31, %v4360_v31  ;;  %v1754_v62 = vpack.c.bf16 %v4361_v49, %v4361_v49  ;;  %1573 = vst.msk [vmem:[%s4154_s5 + $0x18] sm:$0xf] %vm1566_vm1, %v1748_v20  ;;  %1574 = vst.msk [vmem:[%s4154_s5 + $0x1c] sm:$0xf] %vm1566_vm1, %v1749_v12  ;;  %v4365_v6 = vmax.f32 %v3447_v53, 0.0  ;;  %v4366_v39 = vmax.f32 %v3451_v54, 0.0 }
 0x1de   :  { %v1755_v4 = vpack.c.bf16 %v4362_v29, %v4362_v29  ;;  %v1756_v57 = vpack.c.bf16 %v4363_v55, %v4363_v55  ;;  %v1757_v51 = vpack.c.bf16 %v4364_v3, %v4364_v3  ;;  %v4367_v58 = vmax.f32 %v3455_v45, 0.0  ;;  %1575 = vst.msk [vmem:[%s4154_s5 + $0x20] sm:$0xf] %vm1566_vm1, %v1750_v33  ;;  %1576 = vst.msk [vmem:[%s4154_s5 + $0x24] sm:$0xf] %vm1566_vm1, %v1751_v2  ;;  %v4383_v29 = vld [vmem:[#allocation19_spill] sm:$0xff] }
 0x1df   :  { %v1758_v37 = vpack.c.bf16 %v4365_v6, %v4365_v6  ;;  %v1759_v46 = vpack.c.bf16 %v4366_v39, %v4366_v39  ;;  %v4368_v47 = vmax.f32 %v3459_v5, 0.0  ;;  %1577 = vst.msk [vmem:[%s4154_s5 + $0x28] sm:$0xf] %vm1566_vm1, %v1752_v50  ;;  %1578 = vst.msk [vmem:[%s4154_s5 + $0x2c] sm:$0xf] %vm1566_vm1, %v1753_v14  ;;  %v4369_v53 = vmax.f32 %v3463_v52, 0.0 }
 0x1e0   :  { %v1760_v59 = vpack.c.bf16 %v4367_v58, %v4367_v58  ;;  %v4370_v45 = vmax.f32 %v3467_v19, 0.0  ;;  %v4371_v56 = vmax.f32 %v3471_v7, 0.0  ;;  %v4372_v42 = vmax.f32 %v3475_v0, 0.0  ;;  %1579 = vst.msk [vmem:[%s4154_s5 + $0x30] sm:$0xf] %vm1566_vm1, %v1754_v62  ;;  %v4391_v58 = vld [vmem:[#allocation23_spill] sm:$0xff] }
 0x1e1   :  { %v1761_v20 = vpack.c.bf16 %v4368_v47, %v4368_v47  ;;  %v1762_v54 = vpack.c.bf16 %v4369_v53, %v4369_v53  ;;  %1580 = vst.msk [vmem:[%s4154_s5 + $0x34] sm:$0xf] %vm1566_vm1, %v1755_v4  ;;  %1581 = vst.msk [vmem:[%s4154_s5 + $0x38] sm:$0xf] %vm1566_vm1, %v1756_v57  ;;  %v4373_v52 = vmax.f32 %v3479_v1, 0.0  ;;  %v4374_v7 = vmax.f32 %v3483_v17, 0.0 }
 0x1e2   :  { %v1763_v5 = vpack.c.bf16 %v4370_v45, %v4370_v45  ;;  %v1764_v12 = vpack.c.bf16 %v4371_v56, %v4371_v56  ;;  %v1765_v33 = vpack.c.bf16 %v4372_v42, %v4372_v42  ;;  %1582 = vst.msk [vmem:[%s4154_s5 + $0x3c] sm:$0xf] %vm1566_vm1, %v1757_v51  ;;  %v4375_v8 = vmax.f32 %v3487_v26, 0.0  ;;  %1583 = vst.msk [vmem:[%s4154_s5 + $0x40] sm:$0xf] %vm1566_vm1, %v1758_v37  ;;  %v4385_v57 = vld [vmem:[#allocation20_spill] sm:$0xff] }
 0x1e3   :  { %v1766_v19 = vpack.c.bf16 %v4373_v52, %v4373_v52  ;;  %v1767_v0 = vpack.c.bf16 %v4374_v7, %v4374_v7  ;;  %v4376_v30 = vmax.f32 %v3491_v41, 0.0  ;;  %1584 = vst.msk [vmem:[%s4154_s5 + $0x44] sm:$0xf] %vm1566_vm1, %v1759_v46  ;;  %1585 = vst.msk [vmem:[%s4154_s5 + $0x48] sm:$0xf] %vm1566_vm1, %v1760_v59  ;;  %v4377_v1 = vmax.f32 %v3495_v22, 0.0 }
 0x1e4   :  { %v1768_v2 = vpack.c.bf16 %v4375_v8, %v4375_v8  ;;  %1586 = vst.msk [vmem:[%s4154_s5 + $0x4c] sm:$0xf] %vm1566_vm1, %v1761_v20  ;;  %v4378_v26 = vmax.f32 %v3499_v40, 0.0  ;;  %v4379_v31 = vmax.f32 %v3503_v15, 0.0  ;;  %v4380_v49 = vmax.f32 %v3507_v18, 0.0  ;;  %v4389_v37 = vld [vmem:[#allocation22_spill] sm:$0xff] }
 0x1e5   :  { %v1769_v50 = vpack.c.bf16 %v4376_v30, %v4376_v30  ;;  %v1770_v17 = vpack.c.bf16 %v4377_v1, %v4377_v1  ;;  %1587 = vst.msk [vmem:[%s4154_s5 + $0x50] sm:$0xf] %vm1566_vm1, %v1762_v54  ;;  %1588 = vst.msk [vmem:[%s4154_s5 + $0x54] sm:$0xf] %vm1566_vm1, %v1763_v5  ;;  %v4381_v22 = vmax.f32 %v3511_v11, 0.0  ;;  %v4382_v15 = vmax.f32 %v3515_v60, 0.0 }
 0x1e6   :  { %v1771_v41 = vpack.c.bf16 %v4378_v26, %v4378_v26  ;;  %v1772_v14 = vpack.c.bf16 %v4379_v31, %v4379_v31  ;;  %v1773_v62 = vpack.c.bf16 %v4380_v49, %v4380_v49  ;;  %1589 = vst.msk [vmem:[%s4154_s5 + $0x58] sm:$0xf] %vm1566_vm1, %v1764_v12  ;;  %1590 = vst.msk [vmem:[%s4154_s5 + $0x5c] sm:$0xf] %vm1566_vm1, %v1765_v33  ;;  %v4384_v4 = vmax.f32 %v4383_v29, 0.0  ;;  %v4387_v11 = vld [vmem:[#allocation21_spill] sm:$0xff] }
 0x1e7   :  { %v1774_v40 = vpack.c.bf16 %v4381_v22, %v4381_v22  ;;  %v1775_v18 = vpack.c.bf16 %v4382_v15, %v4382_v15  ;;  %v4386_v3 = vmax.f32 %v4385_v57, 0.0  ;;  %1591 = vst.msk [vmem:[%s4154_s5 + $0x60] sm:$0xf] %vm1566_vm1, %v1766_v19  ;;  %1592 = vst.msk [vmem:[%s4154_s5 + $0x64] sm:$0xf] %vm1566_vm1, %v1767_v0  ;;  %v4388_v60 = vmax.f32 %v4387_v11, 0.0 }
 0x1e8   :  { %v1776_v55 = vpack.c.bf16 %v4384_v4, %v4384_v4  ;;  %1593 = vst.msk [vmem:[%s4154_s5 + $0x68] sm:$0xf] %vm1566_vm1, %v1768_v2  ;;  %1594 = vst.msk [vmem:[%s4154_s5 + $0x6c] sm:$0xf] %vm1566_vm1, %v1769_v50  ;;  %v4390_v39 = vmax.f32 %v4389_v37, 0.0  ;;  %v4392_v59 = vmax.f32 %v4391_v58, 0.0 }
 0x1e9   :  { %v1777_v51 = vpack.c.bf16 %v4386_v3, %v4386_v3  ;;  %v1778_v6 = vpack.c.bf16 %v4388_v60, %v4388_v60  ;;  %v4393_v20 = vmax.f32 %v3539_v44, 0.0  ;;  %1595 = vst.msk [vmem:[%s4154_s5 + $0x70] sm:$0xf] %vm1566_vm1, %v1770_v17  ;;  %1596 = vst.msk [vmem:[%s4154_s5 + $0x74] sm:$0xf] %vm1566_vm1, %v1771_v41  ;;  %v4394_v44 = vmax.f32 %v3543_v21, 0.0 }
 0x1ea   :  { %v1779_v46 = vpack.c.bf16 %v4390_v39, %v4390_v39  ;;  %v1780_v47 = vpack.c.bf16 %v4392_v59, %v4392_v59  ;;  %1597 = vst.msk [vmem:[%s4154_s5 + $0x78] sm:$0xf] %vm1566_vm1, %v1772_v14  ;;  %1598 = vst.msk [vmem:[%s4154_s5 + $0x7c] sm:$0xf] %vm1566_vm1, %v1773_v62  ;;  %v4395_v45 = vmax.f32 %v3547_v24, 0.0  ;;  %v4396_v56 = vmax.f32 %v3551_v32, 0.0 }
 0x1eb   :  { %v1781_v53 = vpack.c.bf16 %v4393_v20, %v4393_v20  ;;  %v1782_v54 = vpack.c.bf16 %v4394_v44, %v4394_v44  ;;  %v4397_v42 = vmax.f32 %v4338_v34, 0.0  ;;  %1599 = vst.msk [vmem:[%s4154_s5 + $0x80] sm:$0xf] %vm1566_vm1, %v1774_v40  ;;  %1600 = vst.msk [vmem:[%s4154_s5 + $0x84] sm:$0xf] %vm1566_vm1, %v1775_v18  ;;  %v4398_v21 = vmax.f32 %v3559_v43, 0.0 }
 0x1ec   :  { %v1783_v5 = vpack.c.bf16 %v4395_v45, %v4395_v45  ;;  %v1784_v12 = vpack.c.bf16 %v4396_v56, %v4396_v56  ;;  %1601 = vst.msk [vmem:[%s4154_s5 + $0x88] sm:$0xf] %vm1566_vm1, %v1776_v55  ;;  %1602 = vst.msk [vmem:[%s4154_s5 + $0x8c] sm:$0xf] %vm1566_vm1, %v1777_v51  ;;  %v4399_v32 = vmax.f32 %v4339_v27, 0.0  ;;  %v4400_v52 = vmax.f32 %v4340_v16, 0.0 }
 0x1ed   :  { %v1785_v33 = vpack.c.bf16 %v4397_v42, %v4397_v42  ;;  %v1786_v24 = vpack.c.bf16 %v4398_v21, %v4398_v21  ;;  %v4401_v7 = vld [vmem:[#allocation27_spill] sm:$0xff]  ;;  %1603 = vst.msk [vmem:[%s4154_s5 + $0x90] sm:$0xf] %vm1566_vm1, %v1778_v6  ;;  %1604 = vst.msk [vmem:[%s4154_s5 + $0x94] sm:$0xf] %vm1566_vm1, %v1779_v46  ;;  %v4403_v27 = vld [vmem:[#allocation28_spill] sm:$0xff] }
 0x1ee   :  { %v1787_v34 = vpack.c.bf16 %v4399_v32, %v4399_v32  ;;  %v1788_v19 = vpack.c.bf16 %v4400_v52, %v4400_v52  ;;  %v4402_v0 = vmax.f32 %v4401_v7, 0.0  ;;  %1605 = vst.msk [vmem:[%s4154_s5 + $0x98] sm:$0xf] %vm1566_vm1, %v1780_v47  ;;  %1606 = vst.msk [vmem:[%s4154_s5 + $0x9c] sm:$0xf] %vm1566_vm1, %v1781_v53  ;;  %v4404_v16 = vmax.f32 %v4403_v27, 0.0 }
 0x1ef   :  { %v4405_v2 = vld [vmem:[#allocation29_spill] sm:$0xff]  ;;  %v4407_v1 = vld [vmem:[#allocation30_spill] sm:$0xff]  ;;  %v4409_v41 = vld [vmem:[#allocation31_spill] sm:$0xff]  ;;  %1607 = vst.msk [vmem:[%s4154_s5 + $0xa0] sm:$0xf] %vm1566_vm1, %v1782_v54  ;;  %v4411_v49 = vmax.f32 %v3591_v36, 0.0 }
 0x1f0   :  { %v1789_v8 = vpack.c.bf16 %v4402_v0, %v4402_v0  ;;  %v1790_v43 = vpack.c.bf16 %v4404_v16, %v4404_v16  ;;  %v4406_v30 = vmax.f32 %v4405_v2, 0.0  ;;  %v4408_v17 = vmax.f32 %v4407_v1, 0.0  ;;  %1608 = vst.msk [vmem:[%s4154_s5 + $0xa4] sm:$0xf] %vm1566_vm1, %v1783_v5  ;;  %1609 = vst.msk [vmem:[%s4154_s5 + $0xa8] sm:$0xf] %vm1566_vm1, %v1784_v12 }
 0x1f1   :  { %v4410_v31 = vmax.f32 %v4409_v41, 0.0  ;;  %1610 = vst.msk [vmem:[%s4154_s5 + $0xac] sm:$0xf] %vm1566_vm1, %v1785_v33  ;;  %v1794_v62 = vpack.c.bf16 %v4411_v49, %v4411_v49  ;;  %v4412_v22 = vmax.f32 %v3595_v48, 0.0  ;;  %v4413_v15 = vmax.f32 %v3599_v28, 0.0 }
 0x1f2   :  { %v1791_v50 = vpack.c.bf16 %v4406_v30, %v4406_v30  ;;  %v1792_v26 = vpack.c.bf16 %v4408_v17, %v4408_v17  ;;  %v4414_v29 = vmax.f32 %v3603_v63, 0.0  ;;  %1611 = vst.msk [vmem:[%s4154_s5 + $0xb0] sm:$0xf] %vm1566_vm1, %v1786_v24  ;;  %1612 = vst.msk [vmem:[%s4154_s5 + $0xb4] sm:$0xf] %vm1566_vm1, %v1787_v34  ;;  %v4415_v36 = vmax.f32 %v3607_v13, 0.0 }
 0x1f3   :  { %v1793_v14 = vpack.c.bf16 %v4410_v31, %v4410_v31  ;;  %v1795_v40 = vpack.c.bf16 %v4412_v22, %v4412_v22  ;;  %v1796_v18 = vpack.c.bf16 %v4413_v15, %v4413_v15  ;;  %1613 = vst.msk [vmem:[%s4154_s5 + $0xb8] sm:$0xf] %vm1566_vm1, %v1788_v19  ;;  %1614 = vst.msk [vmem:[%s4154_s5 + $0xbc] sm:$0xf] %vm1566_vm1, %v1789_v8  ;;  %v4416_v28 = vmax.f32 %v3611_v35, 0.0 }
 0x1f4   :  { %v1797_v4 = vpack.c.bf16 %v4414_v29, %v4414_v29  ;;  %v1798_v48 = vpack.c.bf16 %v4415_v36, %v4415_v36  ;;  %v4417_v55 = vmax.f32 %v4344_v10, 0.0  ;;  %v4418_v3 = vmax.f32 %v4345_v9, 0.0  ;;  %1615 = vst.msk [vmem:[%s4154_s5 + $0xc0] sm:$0xf] %vm1566_vm1, %v1790_v43  ;;  %1616 = vst.msk [vmem:[%s4154_s5 + $0xc4] sm:$0xf] %vm1566_vm1, %v1791_v50 }
 0x1f5   :  { %v1799_v63 = vpack.c.bf16 %v4416_v28, %v4416_v28  ;;  %1617 = vst.msk [vmem:[%s4154_s5 + $0xc8] sm:$0xf] %vm1566_vm1, %v1792_v26  ;;  %1618 = vst.msk [vmem:[%s4154_s5 + $0xcc] sm:$0xf] %vm1566_vm1, %v1793_v14  ;;  %v4419_v10 = vmax.f32 %v4346_v25, 0.0  ;;  %v4420_v13 = vmax.f32 %v4347_v61, 0.0 }
 0x1f6   :  { %v1800_v57 = vpack.c.bf16 %v4417_v55, %v4417_v55  ;;  %v1801_v51 = vpack.c.bf16 %v4418_v3, %v4418_v3  ;;  %v4421_v11 = vmax.f32 %v4348_v23, 0.0  ;;  %v4422_v6 = vmax.f32 %v3635_v38, 0.0  ;;  %1619 = vst.msk [vmem:[%s4154_s5 + $0xd0] sm:$0xf] %vm1566_vm1, %v1794_v62  ;;  %1620 = vst.msk [vmem:[%s4154_s5 + $0xd4] sm:$0xf] %vm1566_vm1, %v1795_v40 }
 0x1f7   :  { %v1802_v9 = vpack.c.bf16 %v4419_v10, %v4419_v10  ;;  %v1803_v35 = vpack.c.bf16 %v4420_v13, %v4420_v13  ;;  %1621 = vst.msk [vmem:[%s4154_s5 + $0xd8] sm:$0xf] %vm1566_vm1, %v1796_v18  ;;  %1622 = vst.msk [vmem:[%s4154_s5 + $0xdc] sm:$0xf] %vm1566_vm1, %v1797_v4 }
 0x1f8   :  { %v1804_v60 = vpack.c.bf16 %v4421_v11, %v4421_v11  ;;  %v1805_v37 = vpack.c.bf16 %v4422_v6, %v4422_v6  ;;  %1623 = vst.msk [vmem:[%s4154_s5 + $0xe0] sm:$0xf] %vm1566_vm1, %v1798_v48  ;;  %1624 = vst.msk [vmem:[%s4154_s5 + $0xe4] sm:$0xf] %vm1566_vm1, %v1799_v63 }
 0x1f9   :  { %1625 = vst.msk [vmem:[%s4154_s5 + $0xe8] sm:$0xf] %vm1566_vm1, %v1800_v57  ;;  %1626 = vst.msk [vmem:[%s4154_s5 + $0xec] sm:$0xf] %vm1566_vm1, %v1801_v51 }
 0x1fa   :  { %1627 = vst.msk [vmem:[%s4154_s5 + $0xf0] sm:$0xf] %vm1566_vm1, %v1802_v9  ;;  %1628 = vst.msk [vmem:[%s4154_s5 + $0xf4] sm:$0xf] %vm1566_vm1, %v1803_v35 }
 0x1fb   :  { %1629 = vst.msk [vmem:[%s4154_s5 + $0xf8] sm:$0xf] %vm1566_vm1, %v1804_v60  ;;  %1630 = vst.msk [vmem:[%s4154_s5 + $0xfc] sm:$0xf] %vm1566_vm1, %v1805_v37 }

// kernel: forward.8
= control target key start
LH: loop header
LB: loop body
LE: loop exit
PB: predicated region body
PF: predicated region fallthrough
CT: control target
= control target key end

     0   :  { %vm349_vm0 = vcmask 261120   ;;  %vm606_vm1 = vcmask 257024   ;;  %s1170_s1 = inlined_call_operand.vmem [shape: bf16[256,32], index: 1, kind: input, shape index: {}]   ;;  %s1171_s0 = inlined_call_operand.vmem [shape: bf16[128,256], index: 0, kind: input, shape index: {}]   ;;  %s1172_s2 = inlined_call_operand.vmem [shape: f32[1,32], index: 2, kind: input, shape index: {}]   ;;  %s1173_s3 = inlined_call_operand.vmem [shape: f32[1,32], index: 3, kind: input, shape index: {}]   ;;  %s1174_s4 = inlined_call_operand.vmem [shape: f32[1,32], index: 4, kind: input, shape index: {}]   ;;  %s1175_s5 = inlined_call_operand.vmem [shape: bf16[128,32], index: 5, kind: output, shape index: {}]  }
   0x1   :  { %v774_v0 = vld [vmem:[%s1170_s1 + $0x40] sm:$0xff]   ;;  %v776_v2 = vld [vmem:[%s1170_s1 + $0x48] sm:$0xff]   ;;  %v778_v4 = vld [vmem:[%s1170_s1 + $0x50] sm:$0xff]  }
   0x2   :  { %v775_v1 = vld [vmem:[%s1170_s1] sm:$0xff]   ;;  %694 = vmatprep.subr.bf16.mxu0 %v774_v0  ;;  %758 = vmatprep.subr.bf16.mxu1 %v774_v0  ;;  %v777_v3 = vld [vmem:[%s1170_s1 + $0x8] sm:$0xff]   ;;  %v779_v5 = vld [vmem:[%s1170_s1 + $0x10] sm:$0xff]  }
   0x3   :  { %695 = vmatpush3.bf16.msra.mxu0 %v775_v1  ;;  %766 = vmatpush3.bf16.msra.mxu1 %v775_v1  ;;  %v780_v6 = vld [vmem:[%s1170_s1 + $0x58] sm:$0xff]   ;;  %v782_v8 = vld [vmem:[%s1170_s1 + $0x60] sm:$0xff]   ;;  %v784_v10 = vld [vmem:[%s1170_s1 + $0x68] sm:$0xff]  }
   0x4   :  { %696 = vmatprep.subr.bf16.mxu0 %v776_v2  ;;  %759 = vmatprep.subr.bf16.mxu1 %v776_v2  ;;  %v781_v7 = vld [vmem:[%s1170_s1 + $0x18] sm:$0xff]   ;;  %v783_v9 = vld [vmem:[%s1170_s1 + $0x20] sm:$0xff]   ;;  %v785_v12 = vld [vmem:[%s1170_s1 + $0x28] sm:$0xff]  }
   0x5   :  { %v792_v11 = vld [vmem:[%s1171_s0 + $0x4] ss:$8 sps:$4 sm:$0xff]   ;;  %v786_v14 = vld [vmem:[%s1170_s1 + $0x70] sm:$0xff]   ;;  %v788_v16 = vld [vmem:[%s1170_s1 + $0x78] sm:$0xff]  }
   0x6   :  { %v798_v13 = vld [vmem:[%s1171_s0 + $0x44] ss:$8 sps:$4 sm:$0xff]   ;;  %284 = vmatprep.mubr.bf16.mxu0 %v792_v11  ;;  %v787_v15 = vld [vmem:[%s1170_s1 + $0x30] sm:$0xff]   ;;  %v789_v17 = vld [vmem:[%s1170_s1 + $0x38] sm:$0xff]  }
   0x7   :  { %697 = vmatpush3.bf16.msra.mxu0 %v777_v3  ;;  %767 = vmatpush3.bf16.msra.mxu1 %v777_v3  ;;  %v790_v18 = vld [vmem:[%s1171_s0] ss:$8 sps:$4 sm:$0xff]   ;;  %v793_v20 = vld [vmem:[%s1171_s0 + $0x14] ss:$8 sps:$4 sm:$0xff]   ;;  %v795_v22 = vld [vmem:[%s1171_s0 + $0x10] ss:$8 sps:$4 sm:$0xff]  }
   0x8   :  { %698 = vmatprep.subr.bf16.mxu0 %v778_v4  ;;  %760 = vmatprep.subr.bf16.mxu1 %v778_v4  ;;  %v796_v19 = vld [vmem:[%s1171_s0 + $0x40] ss:$8 sps:$4 sm:$0xff]   ;;  %v802_v21 = vld [vmem:[%s1171_s0 + $0x54] ss:$8 sps:$4 sm:$0xff]   ;;  %v804_v23 = vld [vmem:[%s1171_s0 + $0x50] ss:$8 sps:$4 sm:$0xff]  }
   0x9   :  { %316 = vmatprep.mubr.bf16.mxu1 %v798_v13  ;;  %v799_v24 = vld [vmem:[%s1171_s0 + $0x24] ss:$8 sps:$4 sm:$0xff]   ;;  %v801_v26 = vld [vmem:[%s1171_s0 + $0x20] ss:$8 sps:$4 sm:$0xff]   ;;  %v805_v28 = vld [vmem:[%s1171_s0 + $0x34] ss:$8 sps:$4 sm:$0xff]  }
   0xa   :  { %v808_v25 = vld [vmem:[%s1171_s0 + $0x64] ss:$8 sps:$4 sm:$0xff]   ;;  %v810_v27 = vld [vmem:[%s1171_s0 + $0x60] ss:$8 sps:$4 sm:$0xff]   ;;  %v811_v29 = vld [vmem:[%s1171_s0 + $0x74] ss:$8 sps:$4 sm:$0xff]  }
   0xb   :  { %699 = vmatpush3.bf16.msra.mxu0 %v779_v5  ;;  %768 = vmatpush3.bf16.msra.mxu1 %v779_v5  ;;  %v807_v30 = vld [vmem:[%s1171_s0 + $0x30] ss:$8 sps:$4 sm:$0xff]   ;;  %v945_v34 = vld [vmem:[%s1172_s2] ss:$0 sm:$0xff] }
   0xc   :  { %700 = vmatprep.subr.bf16.mxu0 %v780_v6  ;;  %761 = vmatprep.subr.bf16.mxu1 %v780_v6  ;;  %v813_v31 = vld [vmem:[%s1171_s0 + $0x70] ss:$8 sps:$4 sm:$0xff]  }
   0xf   :  { %701 = vmatpush3.bf16.msra.mxu0 %v781_v7  ;;  %769 = vmatpush3.bf16.msra.mxu1 %v781_v7 }
  0x10   :  { %702 = vmatprep.subr.bf16.mxu0 %v782_v8  ;;  %762 = vmatprep.subr.bf16.mxu1 %v782_v8 }
  0x13   :  { %703 = vmatpush3.bf16.msra.mxu0 %v783_v9  ;;  %770 = vmatpush3.bf16.msra.mxu1 %v783_v9 }
  0x14   :  { %704 = vmatprep.subr.bf16.mxu0 %v784_v10  ;;  %763 = vmatprep.subr.bf16.mxu1 %v784_v10 }
  0x17   :  { %705 = vmatpush3.bf16.msra.mxu0 %v785_v12  ;;  %771 = vmatpush3.bf16.msra.mxu1 %v785_v12 }
  0x18   :  { %706 = vmatprep.subr.bf16.mxu0 %v786_v14  ;;  %764 = vmatprep.subr.bf16.mxu1 %v786_v14 }
  0x1b   :  { %707 = vmatpush3.bf16.msra.mxu0 %v787_v15  ;;  %772 = vmatpush3.bf16.msra.mxu1 %v787_v15 }
  0x1c   :  { %708 = vmatprep.subr.bf16.mxu0 %v788_v16  ;;  %765 = vmatprep.subr.bf16.mxu1 %v788_v16 }
  0x1f   :  { %709 = vmatpush3.bf16.msra.mxu0 %v789_v17  ;;  %773 = vmatpush3.bf16.msra.mxu1 %v789_v17 }
  0x22   :  { %285 = vmatmul.mubr.bf16.vlgmr.msra.gmra.mrb[0].mxu0 %v790_v18  ;;  %317 = vmatmul.mubr.bf16.vlgmr.msra.gmra.mrb[0].mxu1 %v796_v19 }
  0x23   :  { %292 = vmatprep.mubr.bf16.mxu0 %v793_v20  ;;  %324 = vmatprep.mubr.bf16.mxu1 %v802_v21 }
  0x2a   :  { %293 = vmatmul.mubr.bf16.gmra.mrb[4].mxu0 %v795_v22  ;;  %325 = vmatmul.mubr.bf16.gmra.mrb[4].mxu1 %v804_v23 }
  0x2b   :  { %300 = vmatprep.mubr.bf16.mxu0 %v799_v24  ;;  %332 = vmatprep.mubr.bf16.mxu1 %v808_v25 }
  0x32   :  { %301 = vmatmul.mubr.bf16.gmra.mrb[8].mxu0 %v801_v26  ;;  %333 = vmatmul.mubr.bf16.gmra.mrb[8].mxu1 %v810_v27 }
  0x33   :  { %308 = vmatprep.mubr.bf16.mxu0 %v805_v28  ;;  %340 = vmatprep.mubr.bf16.mxu1 %v811_v29 }
  0x3a   :  { %309 = vmatmul.mubr.bf16.gmra.mrb[12].mxu0 %v807_v30  ;;  %341 = vmatmul.mubr.bf16.gmra.mrb[12].mxu1 %v813_v31 }
  0xf5   :  { %v710_v32 = vpop.f32.mrb[0].mxu0  ;;  %v734_v33 = vpop.f32.mrb[0].mxu1 }
  0xf6   :  { %v711_v35 = vpop.f32.mrb[1].mxu0  ;;  %v735_v36 = vpop.f32.mrb[1].mxu1 }
  0xf7   :  { %v712_v37 = vadd.f32 %v711_v35, %v710_v32  ;;  %v713_v38 = vpop.f32.mrb[2].mxu0  ;;  %v947_v39 = vadd.f32 %v735_v36, %v734_v33  ;;  %v737_v40 = vpop.f32.mrb[2].mxu1 }
  0xf8   :  { %v714_v41 = vpop.f32.mrb[3].mxu0  ;;  %v738_v42 = vpop.f32.mrb[3].mxu1 }
  0xf9   :  { %v950_v43 = vadd.f32 %v712_v37, %v945_v34  ;;  %v715_v44 = vadd.f32 %v714_v41, %v713_v38  ;;  %v952_v45 = vadd.f32 %v738_v42, %v737_v40 }
  0xfb   :  { %v389_v46 = vmul.f32 %v950_v43, %v950_v43  ;;  %v957_v47 = vadd.f32 %v715_v44, %v945_v34  ;;  %v350_v48 = vsel %vm349_vm0, %v950_v43, 0.0 }
  0xfd   :  { %v351_v49 = vsel %vm349_vm0, %v957_v47, 0.0  ;;  %v390_v50 = vmul.f32 %v957_v47, %v957_v47  ;;  %v716_v51 = vpop.f32.mrb[4].mxu0  ;;  %v740_v52 = vpop.f32.mrb[4].mxu1  ;;  %v405_v56 = vsel %vm349_vm0, %v389_v46, 0.0 }
  0xfe   :  { %v352_v53 = vadd.f32 %v351_v49, %v350_v48  ;;  %v717_v54 = vpop.f32.mrb[5].mxu0  ;;  %v741_v55 = vpop.f32.mrb[5].mxu1 }
  0xff   :  { %v406_v57 = vsel %vm349_vm0, %v390_v50, 0.0  ;;  %v718_v58 = vadd.f32 %v717_v54, %v716_v51  ;;  %v719_v59 = vpop.f32.mrb[6].mxu0  ;;  %v967_v60 = vadd.f32 %v741_v55, %v740_v52  ;;  %v743_v61 = vpop.f32.mrb[6].mxu1  ;;  %v1003_v51 = vadd.f32 %v947_v39, %v945_v34 }
 0x100   :  { %v407_v62 = vadd.f32 %v406_v57, %v405_v56  ;;  %v720_v63 = vpop.f32.mrb[7].mxu0  ;;  %v744_v0 = vpop.f32.mrb[7].mxu1 }
 0x101   :  { %v970_v1 = vadd.f32 %v718_v58, %v945_v34  ;;  %v721_v2 = vadd.f32 %v720_v63, %v719_v59  ;;  %v745_v3 = vadd.f32 %v744_v0, %v743_v61  ;;  %v1010_v58 = vadd.f32 %v952_v45, %v945_v34 }
 0x102   :  { %v1023_v0 = vadd.f32 %v967_v60, %v945_v34 }
 0x103   :  { %v353_v4 = vsel %vm349_vm0, %v970_v1, 0.0  ;;  %v391_v5 = vmul.f32 %v970_v1, %v970_v1  ;;  %v977_v6 = vadd.f32 %v721_v2, %v945_v34  ;;  %v398_v60 = vmul.f32 %v1010_v58, %v1010_v58 }
 0x104   :  { %v354_v7 = vadd.f32 %v353_v4, %v352_v53 }
 0x105   :  { %v408_v8 = vsel %vm349_vm0, %v391_v5, 0.0  ;;  %v355_v9 = vsel %vm349_vm0, %v977_v6, 0.0  ;;  %v392_v10 = vmul.f32 %v977_v6, %v977_v6  ;;  %v722_v11 = vpop.f32.mrb[8].mxu0  ;;  %v746_v12 = vpop.f32.mrb[8].mxu1  ;;  %v1031_v5 = vadd.f32 %v745_v3, %v945_v34 }
 0x106   :  { %v409_v13 = vadd.f32 %v408_v8, %v407_v62  ;;  %v356_v14 = vadd.f32 %v355_v9, %v354_v7  ;;  %v723_v15 = vpop.f32.mrb[9].mxu0  ;;  %v747_v16 = vpop.f32.mrb[9].mxu1  ;;  %v397_v62 = vmul.f32 %v1003_v51, %v1003_v51  ;;  %v365_v9 = vsel %vm349_vm0, %v1003_v51, 0.0 }
 0x107   :  { %v410_v17 = vsel %vm349_vm0, %v392_v10, 0.0  ;;  %v724_v18 = vadd.f32 %v723_v15, %v722_v11  ;;  %v725_v19 = vpop.f32.mrb[10].mxu0  ;;  %v748_v20 = vadd.f32 %v747_v16, %v746_v12  ;;  %v749_v21 = vpop.f32.mrb[10].mxu1  ;;  %v399_v3 = vmul.f32 %v1023_v0, %v1023_v0 }
 0x108   :  { %v411_v22 = vadd.f32 %v410_v17, %v409_v13  ;;  %v726_v23 = vpop.f32.mrb[11].mxu0  ;;  %v750_v24 = vpop.f32.mrb[11].mxu1  ;;  %v420_v13 = vsel %vm349_vm0, %v397_v62, 0.0  ;;  %v400_v16 = vmul.f32 %v1031_v5, %v1031_v5 }
 0x109   :  { %v986_v25 = vadd.f32 %v724_v18, %v945_v34  ;;  %v727_v26 = vadd.f32 %v726_v23, %v725_v19  ;;  %v751_v27 = vadd.f32 %v750_v24, %v749_v21  ;;  %v1044_v15 = vadd.f32 %v748_v20, %v945_v34 }
 0x10a   :  { %v422_v19 = vsel %vm349_vm0, %v398_v60, 0.0  ;;  %v369_v21 = vsel %vm349_vm0, %v1023_v0, 0.0  ;;  %v424_v20 = vsel %vm349_vm0, %v399_v3, 0.0 }
 0x10b   :  { %v357_v28 = vsel %vm349_vm0, %v986_v25, 0.0  ;;  %v393_v29 = vmul.f32 %v986_v25, %v986_v25  ;;  %v993_v30 = vadd.f32 %v727_v26, %v945_v34 }
 0x10c   :  { %v358_v31 = vadd.f32 %v357_v28, %v356_v14  ;;  %v367_v14 = vsel %vm349_vm0, %v1010_v58, 0.0  ;;  %v371_v28 = vsel %vm349_vm0, %v1031_v5, 0.0 }
 0x10d   :  { %v412_v32 = vsel %vm349_vm0, %v393_v29, 0.0  ;;  %v359_v33 = vsel %vm349_vm0, %v993_v30, 0.0  ;;  %v394_v35 = vmul.f32 %v993_v30, %v993_v30  ;;  %v728_v36 = vpop.f32.mrb[12].mxu0  ;;  %v752_v37 = vpop.f32.mrb[12].mxu1  ;;  %v401_v29 = vmul.f32 %v1044_v15, %v1044_v15 }
 0x10e   :  { %v413_v38 = vadd.f32 %v412_v32, %v411_v22  ;;  %v360_v40 = vadd.f32 %v359_v33, %v358_v31  ;;  %v729_v41 = vpop.f32.mrb[13].mxu0  ;;  %v753_v42 = vpop.f32.mrb[13].mxu1  ;;  %v1052_v22 = vadd.f32 %v751_v27, %v945_v34  ;;  %v426_v31 = vsel %vm349_vm0, %v400_v16, 0.0 }
 0x10f   :  { %v414_v44 = vsel %vm349_vm0, %v394_v35, 0.0  ;;  %v730_v46 = vadd.f32 %v729_v41, %v728_v36  ;;  %v731_v48 = vpop.f32.mrb[14].mxu0  ;;  %v754_v49 = vadd.f32 %v753_v42, %v752_v37  ;;  %v755_v50 = vpop.f32.mrb[14].mxu1  ;;  %v373_v27 = vsel %vm349_vm0, %v1044_v15, 0.0 }
 0x110   :  { %v415_v52 = vadd.f32 %v414_v44, %v413_v38  ;;  %v732_v53 = vpop.f32.mrb[15].mxu0  ;;  %v756_v54 = vpop.f32.mrb[15].mxu1  ;;  %v402_v35 = vmul.f32 %v1052_v22, %v1052_v22  ;;  %v428_v41 = vsel %vm349_vm0, %v401_v29, 0.0  ;;  %v375_v42 = vsel %vm349_vm0, %v1052_v22, 0.0 }
 0x111   :  { %v1006_v55 = vadd.f32 %v730_v46, %v945_v34  ;;  %v733_v56 = vadd.f32 %v732_v53, %v731_v48  ;;  %v757_v57 = vadd.f32 %v756_v54, %v755_v50  ;;  %v1055_v23 = vadd.f32 %v754_v49, %v945_v34 }
 0x112   :  { %v430_v49 = vsel %vm349_vm0, %v402_v35, 0.0 }
 0x113   :  { %v361_v59 = vsel %vm349_vm0, %v1006_v55, 0.0  ;;  %v395_v61 = vmul.f32 %v1006_v55, %v1006_v55  ;;  %v1017_v39 = vadd.f32 %v733_v56, %v945_v34  ;;  %v403_v36 = vmul.f32 %v1055_v23, %v1055_v23 }
 0x114   :  { %v362_v63 = vadd.f32 %v361_v59, %v360_v40  ;;  %v1070_v37 = vadd.f32 %v757_v57, %v945_v34  ;;  %v377_v44 = vsel %vm349_vm0, %v1055_v23, 0.0 }
 0x115   :  { %v416_v45 = vsel %vm349_vm0, %v395_v61, 0.0  ;;  %v363_v2 = vsel %vm349_vm0, %v1017_v39, 0.0  ;;  %v396_v4 = vmul.f32 %v1017_v39, %v1017_v39  ;;  %v432_v50 = vsel %vm349_vm0, %v403_v36, 0.0 }
 0x116   :  { %v417_v7 = vadd.f32 %v416_v45, %v415_v52  ;;  %v364_v8 = vadd.f32 %v363_v2, %v362_v63  ;;  %v404_v34 = vmul.f32 %v1070_v37, %v1070_v37  ;;  %v379_v54 = vsel %vm349_vm0, %v1070_v37, 0.0 }
 0x117   :  { %v418_v10 = vsel %vm349_vm0, %v396_v4, 0.0 }
 0x118   :  { %v366_v11 = vadd.f32 %v365_v9, %v364_v8  ;;  %v419_v12 = vadd.f32 %v418_v10, %v417_v7  ;;  %v434_v59 = vsel %vm349_vm0, %v404_v34, 0.0 }
 0x11a   :  { %v368_v17 = vadd.f32 %v367_v14, %v366_v11  ;;  %v421_v18 = vadd.f32 %v420_v13, %v419_v12 }
 0x11c   :  { %v423_v24 = vadd.f32 %v422_v19, %v421_v18  ;;  %v370_v26 = vadd.f32 %v369_v21, %v368_v17 }
 0x11e   :  { %v372_v32 = vadd.f32 %v371_v28, %v370_v26  ;;  %v425_v33 = vadd.f32 %v424_v20, %v423_v24 }
 0x120   :  { %v374_v38 = vadd.f32 %v373_v27, %v372_v32  ;;  %v427_v40 = vadd.f32 %v426_v31, %v425_v33 }
 0x122   :  { %v429_v46 = vadd.f32 %v428_v41, %v427_v40  ;;  %v376_v48 = vadd.f32 %v375_v42, %v374_v38 }
 0x124   :  { %v431_v52 = vadd.f32 %v430_v49, %v429_v46  ;;  %v378_v53 = vadd.f32 %v377_v44, %v376_v48 }
 0x126   :  { %v433_v56 = vadd.f32 %v432_v50, %v431_v52  ;;  %v380_v57 = vadd.f32 %v379_v54, %v378_v53 }
 0x128   :  { %v381_v61 = vrot.slane %v380_v57, 4  ;;  %v435_v62 = vadd.f32 %v434_v59, %v433_v56  ;;  %v661_v56 = vld [vmem:[%s1174_s4] ss:$0 sm:$0xff] }
 0x12a   :  { %v382_v63 = vadd.f32 %v381_v61, %v380_v57  ;;  %v436_v45 = vrot.slane %v435_v62, 4 }
 0x12c   :  { %v383_v2 = vrot.slane %v382_v63, 2  ;;  %v437_v4 = vadd.f32 %v436_v45, %v435_v62 }
 0x12e   :  { %v384_v7 = vadd.f32 %v383_v2, %v382_v63  ;;  %v438_v8 = vrot.slane %v437_v4, 2 }
 0x130   :  { %v385_v9 = vrot.slane %v384_v7, 1  ;;  %v439_v60 = vadd.f32 %v438_v8, %v437_v4 }
 0x132   :  { %v386_v10 = vadd.f32 %v385_v9, %v384_v7  ;;  %v440_v11 = vrot.slane %v439_v60, 1 }
 0x134   :  { %v388_v12 = vmul.f32 0.0078125, %v386_v10  ;;  %v441_v13 = vadd.f32 %v440_v11, %v439_v60 }
 0x136   :  { %v442_v14 = vmul.f32 0.0078125, %v441_v13  ;;  %v443_v3 = vmul.f32 %v388_v12, %v388_v12  ;;  %v446_v16 = vsub.f32 %v950_v43, %v388_v12  ;;  %v447_v17 = vsub.f32 %v957_v47, %v388_v12 }
 0x137   :  { %v448_v18 = vsub.f32 %v970_v1, %v388_v12  ;;  %v449_v19 = vsub.f32 %v977_v6, %v388_v12  ;;  %v450_v21 = vsub.f32 %v986_v25, %v388_v12  ;;  %v451_v24 = vsub.f32 %v993_v30, %v388_v12 }
 0x138   :  { %v444_v26 = vsub.f32 %v442_v14, %v443_v3  ;;  %v452_v20 = vsub.f32 %v1006_v55, %v388_v12  ;;  %v453_v28 = vsub.f32 %v1017_v39, %v388_v12  ;;  %v454_v29 = vsub.f32 %v1003_v51, %v388_v12 }
 0x139   :  { %v455_v31 = vsub.f32 %v1010_v58, %v388_v12  ;;  %v456_v43 = vsub.f32 %v1023_v0, %v388_v12  ;;  %v457_v47 = vsub.f32 %v1031_v5, %v388_v12  ;;  %v458_v1 = vsub.f32 %v1044_v15, %v388_v12  ;;  %v660_v15 = vld [vmem:[%s1173_s3] ss:$0 sm:$0xff] }
 0x13a   :  { %v445_v6 = vmax.f32 %v444_v26, 0.0  ;;  %v459_v25 = vsub.f32 %v1052_v22, %v388_v12  ;;  %v460_v30 = vsub.f32 %v1055_v23, %v388_v12  ;;  %v461_v32 = vsub.f32 %v1070_v37, %v388_v12 }
 0x13c   :  { %v462_v55 = vadd.f32 1e-05, %v445_v6 }
 0x13e   :  { %814 = vrsqrt.f32 %v462_v55 }
 0x148   :  { %v815_v39 = vpop.eup %814 }
 0x149   :  { %v464_v33 = vmul.f32 %v815_v39, %v446_v16  ;;  %v465_v51 = vmul.f32 %v815_v39, %v447_v17  ;;  %v466_v27 = vmul.f32 %v815_v39, %v448_v18  ;;  %v467_v58 = vmul.f32 %v815_v39, %v449_v19 }
 0x14a   :  { %v468_v35 = vmul.f32 %v815_v39, %v450_v21  ;;  %v469_v0 = vmul.f32 %v815_v39, %v451_v24  ;;  %v470_v36 = vmul.f32 %v815_v39, %v452_v20  ;;  %v471_v5 = vmul.f32 %v815_v39, %v453_v28 }
 0x14b   :  { %v472_v22 = vmul.f32 %v815_v39, %v454_v29  ;;  %v473_v38 = vmul.f32 %v815_v39, %v455_v31  ;;  %v474_v23 = vmul.f32 %v815_v39, %v456_v43  ;;  %v475_v40 = vmul.f32 %v815_v39, %v457_v47 }
 0x14c   :  { %v476_v37 = vmul.f32 %v815_v39, %v458_v1  ;;  %v477_v41 = vmul.f32 %v815_v39, %v459_v25  ;;  %v478_v42 = vmul.f32 %v815_v39, %v460_v30  ;;  %v479_v44 = vmul.f32 %v815_v39, %v461_v32 }
 0x14d   :  { %v487_v46 = vmul.f32 %v660_v15, %v464_v33  ;;  %v488_v48 = vmul.f32 %v660_v15, %v465_v51  ;;  %v489_v49 = vmul.f32 %v660_v15, %v466_v27  ;;  %v490_v50 = vmul.f32 %v660_v15, %v467_v58 }
 0x14e   :  { %v491_v34 = vmul.f32 %v660_v15, %v468_v35  ;;  %v492_v52 = vmul.f32 %v660_v15, %v469_v0  ;;  %v493_v53 = vmul.f32 %v660_v15, %v470_v36  ;;  %v494_v54 = vmul.f32 %v660_v15, %v471_v5 }
 0x14f   :  { %v495_v57 = vmul.f32 %v660_v15, %v472_v22  ;;  %v496_v59 = vmul.f32 %v660_v15, %v473_v38  ;;  %v497_v61 = vmul.f32 %v660_v15, %v474_v23  ;;  %v498_v62 = vmul.f32 %v660_v15, %v475_v40 }
 0x150   :  { %v499_v63 = vmul.f32 %v660_v15, %v476_v37  ;;  %v500_v45 = vmul.f32 %v660_v15, %v477_v41  ;;  %v501_v2 = vmul.f32 %v660_v15, %v478_v42  ;;  %v502_v4 = vmul.f32 %v660_v15, %v479_v44 }
 0x151   :  { %v510_v7 = vadd.f32 %v661_v56, %v487_v46  ;;  %v511_v8 = vadd.f32 %v661_v56, %v488_v48  ;;  %v512_v9 = vadd.f32 %v661_v56, %v489_v49  ;;  %v513_v60 = vadd.f32 %v661_v56, %v490_v50 }
 0x152   :  { %v514_v10 = vadd.f32 %v661_v56, %v491_v34  ;;  %v515_v11 = vadd.f32 %v661_v56, %v492_v52  ;;  %v516_v12 = vadd.f32 %v661_v56, %v493_v53  ;;  %v517_v13 = vadd.f32 %v661_v56, %v494_v54 }
 0x153   :  { %v518_v14 = vadd.f32 %v661_v56, %v495_v57  ;;  %v519_v3 = vadd.f32 %v661_v56, %v496_v59  ;;  %v520_v16 = vadd.f32 %v661_v56, %v497_v61  ;;  %v521_v17 = vadd.f32 %v661_v56, %v498_v62 }
 0x154   :  { %v522_v18 = vadd.f32 %v661_v56, %v499_v63  ;;  %v523_v19 = vadd.f32 %v661_v56, %v500_v45  ;;  %v524_v21 = vadd.f32 %v661_v56, %v501_v2  ;;  %v525_v24 = vadd.f32 %v661_v56, %v502_v4 }
 0x155   :  { %v526_v26 = vmax.f32 %v510_v7, 0.0  ;;  %v527_v20 = vmax.f32 %v511_v8, 0.0  ;;  %v528_v28 = vmax.f32 %v512_v9, 0.0  ;;  %v529_v29 = vmax.f32 %v513_v60, 0.0 }
 0x156   :  { %v530_v31 = vmax.f32 %v514_v10, 0.0  ;;  %v531_v43 = vmax.f32 %v515_v11, 0.0  ;;  %v532_v47 = vmax.f32 %v516_v12, 0.0  ;;  %v533_v1 = vmax.f32 %v517_v13, 0.0 }
 0x157   :  { %v534_v6 = vmax.f32 %v518_v14, 0.0  ;;  %v535_v25 = vmax.f32 %v519_v3, 0.0  ;;  %v536_v30 = vmax.f32 %v520_v16, 0.0  ;;  %v537_v32 = vmax.f32 %v521_v17, 0.0 }
 0x158   :  { %v538_v55 = vmax.f32 %v522_v18, 0.0  ;;  %v539_v39 = vmax.f32 %v523_v19, 0.0  ;;  %v540_v33 = vmax.f32 %v524_v21, 0.0  ;;  %v541_v51 = vmax.f32 %v525_v24, 0.0 }
 0x159   :  { %v678_v27 = vpack.c.bf16 %v526_v26, %v526_v26  ;;  %v679_v58 = vpack.c.bf16 %v527_v20, %v527_v20  ;;  %v680_v35 = vpack.c.bf16 %v528_v28, %v528_v28  ;;  %v681_v0 = vpack.c.bf16 %v529_v29, %v529_v29 }
 0x15a   :  { %v682_v36 = vpack.c.bf16 %v530_v31, %v530_v31  ;;  %v683_v5 = vpack.c.bf16 %v531_v43, %v531_v43  ;;  %v684_v15 = vpack.c.bf16 %v532_v47, %v532_v47  ;;  %v685_v22 = vpack.c.bf16 %v533_v1, %v533_v1 }
 0x15b   :  { %v686_v38 = vpack.c.bf16 %v534_v6, %v534_v6  ;;  %v687_v23 = vpack.c.bf16 %v535_v25, %v535_v25  ;;  %v688_v40 = vpack.c.bf16 %v536_v30, %v536_v30  ;;  %v689_v37 = vpack.c.bf16 %v537_v32, %v537_v32  ;;  %607 = vst.msk [vmem:[%s1175_s5] sm:$0xf] %vm606_vm1, %v678_v27 }
 0x15c   :  { %608 = vst.msk [vmem:[%s1175_s5 + $0x4] sm:$0xf] %vm606_vm1, %v679_v58  ;;  %609 = vst.msk [vmem:[%s1175_s5 + $0x8] sm:$0xf] %vm606_vm1, %v680_v35  ;;  %v690_v41 = vpack.c.bf16 %v538_v55, %v538_v55  ;;  %v691_v42 = vpack.c.bf16 %v539_v39, %v539_v39  ;;  %v692_v44 = vpack.c.bf16 %v540_v33, %v540_v33 }
 0x15d   :  { %610 = vst.msk [vmem:[%s1175_s5 + $0xc] sm:$0xf] %vm606_vm1, %v681_v0  ;;  %v693_v46 = vpack.c.bf16 %v541_v51, %v541_v51  ;;  %611 = vst.msk [vmem:[%s1175_s5 + $0x10] sm:$0xf] %vm606_vm1, %v682_v36 }
 0x15e   :  { %612 = vst.msk [vmem:[%s1175_s5 + $0x14] sm:$0xf] %vm606_vm1, %v683_v5  ;;  %613 = vst.msk [vmem:[%s1175_s5 + $0x18] sm:$0xf] %vm606_vm1, %v684_v15 }
 0x15f   :  { %614 = vst.msk [vmem:[%s1175_s5 + $0x1c] sm:$0xf] %vm606_vm1, %v685_v22  ;;  %615 = vst.msk [vmem:[%s1175_s5 + $0x20] sm:$0xf] %vm606_vm1, %v686_v38 }
 0x160   :  { %616 = vst.msk [vmem:[%s1175_s5 + $0x24] sm:$0xf] %vm606_vm1, %v687_v23  ;;  %617 = vst.msk [vmem:[%s1175_s5 + $0x28] sm:$0xf] %vm606_vm1, %v688_v40 }
 0x161   :  { %618 = vst.msk [vmem:[%s1175_s5 + $0x2c] sm:$0xf] %vm606_vm1, %v689_v37  ;;  %619 = vst.msk [vmem:[%s1175_s5 + $0x30] sm:$0xf] %vm606_vm1, %v690_v41 }
 0x162   :  { %620 = vst.msk [vmem:[%s1175_s5 + $0x34] sm:$0xf] %vm606_vm1, %v691_v42  ;;  %621 = vst.msk [vmem:[%s1175_s5 + $0x38] sm:$0xf] %vm606_vm1, %v692_v44 }
 0x163   :  { %622 = vst.msk [vmem:[%s1175_s5 + $0x3c] sm:$0xf] %vm606_vm1, %v693_v46 }

// kernel: forward.7
= control target key start
LH: loop header
LB: loop body
LE: loop exit
PB: predicated region body
PF: predicated region fallthrough
CT: control target
= control target key end

     0   :  { %v3781_v1 = vmov 0   ;;  %s7510_s0 = inlined_call_operand.vmem [shape: bf16[512,256], index: 0, kind: input, shape index: {}]   ;;  %s7511_s1 = inlined_call_operand.vmem [shape: bf16[256,16], index: 1, kind: input, shape index: {}]   ;;  %s7512_s2 = inlined_call_operand.vmem [shape: f32[1,16], index: 2, kind: input, shape index: {}]   ;;  %s7513_s3 = inlined_call_operand.vmem [shape: f32[1,16], index: 3, kind: input, shape index: {}]   ;;  %s7514_s4 = inlined_call_operand.vmem [shape: f32[1,16], index: 4, kind: input, shape index: {}]   ;;  %s7515_s5 = inlined_call_operand.vmem [shape: bf16[512,16], index: 5, kind: output, shape index: {0}]   ;;  %s7516_s6 = inlined_call_operand.hbm [shape: f32[1,1], index: 6, kind: output, shape index: {1}]  }
   0x1   :  { %v3655_v0 = vld [vmem:[%s7511_s1] sm:$0xff]   ;;  %543 = vmatprep.subr.bf16.mxu0 %v3781_v1  ;;  %3615 = vmatprep.subr.bf16.mxu1 %v3781_v1  ;;  %v3656_v2 = vld [vmem:[%s7511_s1 + $0x8] sm:$0xff]   ;;  %v3657_v3 = vld [vmem:[%s7511_s1 + $0x10] sm:$0xff]  }
   0x2   :  { %544 = vmatpush1.bf16.msra.mxu0 %v3655_v0  ;;  %3631 = vmatpush1.bf16.msra.mxu1 %v3655_v0  ;;  %v3658_v4 = vld [vmem:[%s7511_s1 + $0x18] sm:$0xff]   ;;  %v3659_v5 = vld [vmem:[%s7511_s1 + $0x20] sm:$0xff]   ;;  %v3660_v7 = vld [vmem:[%s7511_s1 + $0x28] sm:$0xff]  }
   0x3   :  { %545 = vmatprep.subr.bf16.mxu0 %v3781_v1  ;;  %3616 = vmatprep.subr.bf16.mxu1 %v3781_v1  ;;  %v3673_v6 = vld [vmem:[%s7510_s0 + $0x4] ss:$8 sps:$4 sm:$0xff]   ;;  %v3661_v8 = vld [vmem:[%s7511_s1 + $0x30] sm:$0xff]   ;;  %v3662_v9 = vld [vmem:[%s7511_s1 + $0x38] sm:$0xff]  }
   0x4   :  { %575 = vmatprep.mubr.bf16.mxu0 %v3673_v6  ;;  %v3697_v10 = vld [vmem:[%s7510_s0 + $0x104] ss:$8 sps:$4 sm:$0xff]   ;;  %v3665_v13 = vld [vmem:[%s7511_s1 + $0x50] sm:$0xff]   ;;  %v3666_v14 = vld [vmem:[%s7511_s1 + $0x58] sm:$0xff]  }
   0x5   :  { %703 = vmatprep.mubr.bf16.mxu1 %v3697_v10  ;;  %v3663_v11 = vld [vmem:[%s7511_s1 + $0x40] sm:$0xff]   ;;  %v3664_v12 = vld [vmem:[%s7511_s1 + $0x48] sm:$0xff]  }
   0x6   :  { %546 = vmatpush1.bf16.msra.mxu0 %v3656_v2  ;;  %3632 = vmatpush1.bf16.msra.mxu1 %v3656_v2  ;;  %v3667_v15 = vld [vmem:[%s7511_s1 + $0x60] sm:$0xff]   ;;  %v3668_v16 = vld [vmem:[%s7511_s1 + $0x68] sm:$0xff]  }
   0x7   :  { %547 = vmatprep.subr.bf16.mxu0 %v3781_v1  ;;  %3617 = vmatprep.subr.bf16.mxu1 %v3781_v1 }
   0xa   :  { %548 = vmatpush1.bf16.msra.mxu0 %v3657_v3  ;;  %3633 = vmatpush1.bf16.msra.mxu1 %v3657_v3 }
   0xb   :  { %549 = vmatprep.subr.bf16.mxu0 %v3781_v1  ;;  %3618 = vmatprep.subr.bf16.mxu1 %v3781_v1 }
   0xe   :  { %550 = vmatpush1.bf16.msra.mxu0 %v3658_v4  ;;  %3634 = vmatpush1.bf16.msra.mxu1 %v3658_v4 }
   0xf   :  { %551 = vmatprep.subr.bf16.mxu0 %v3781_v1  ;;  %3619 = vmatprep.subr.bf16.mxu1 %v3781_v1 }
  0x12   :  { %552 = vmatpush1.bf16.msra.mxu0 %v3659_v5  ;;  %3635 = vmatpush1.bf16.msra.mxu1 %v3659_v5 }
  0x13   :  { %553 = vmatprep.subr.bf16.mxu0 %v3781_v1  ;;  %3620 = vmatprep.subr.bf16.mxu1 %v3781_v1 }
  0x16   :  { %554 = vmatpush1.bf16.msra.mxu0 %v3660_v7  ;;  %3636 = vmatpush1.bf16.msra.mxu1 %v3660_v7 }
  0x17   :  { %555 = vmatprep.subr.bf16.mxu0 %v3781_v1  ;;  %3621 = vmatprep.subr.bf16.mxu1 %v3781_v1 }
  0x1a   :  { %556 = vmatpush1.bf16.msra.mxu0 %v3661_v8  ;;  %3637 = vmatpush1.bf16.msra.mxu1 %v3661_v8 }
  0x1b   :  { %557 = vmatprep.subr.bf16.mxu0 %v3781_v1  ;;  %3622 = vmatprep.subr.bf16.mxu1 %v3781_v1 }
  0x1e   :  { %558 = vmatpush1.bf16.msra.mxu0 %v3662_v9  ;;  %3638 = vmatpush1.bf16.msra.mxu1 %v3662_v9 }
  0x1f   :  { %559 = vmatprep.subr.bf16.mxu0 %v3781_v1  ;;  %3623 = vmatprep.subr.bf16.mxu1 %v3781_v1 }
  0x22   :  { %560 = vmatpush1.bf16.msra.mxu0 %v3663_v11  ;;  %3639 = vmatpush1.bf16.msra.mxu1 %v3663_v11 }
  0x23   :  { %561 = vmatprep.subr.bf16.mxu0 %v3781_v1  ;;  %3624 = vmatprep.subr.bf16.mxu1 %v3781_v1 }
  0x26   :  { %562 = vmatpush1.bf16.msra.mxu0 %v3664_v12  ;;  %3640 = vmatpush1.bf16.msra.mxu1 %v3664_v12 }
  0x27   :  { %563 = vmatprep.subr.bf16.mxu0 %v3781_v1  ;;  %3625 = vmatprep.subr.bf16.mxu1 %v3781_v1 }
  0x2a   :  { %564 = vmatpush1.bf16.msra.mxu0 %v3665_v13  ;;  %3641 = vmatpush1.bf16.msra.mxu1 %v3665_v13 }
  0x2b   :  { %565 = vmatprep.subr.bf16.mxu0 %v3781_v1  ;;  %3626 = vmatprep.subr.bf16.mxu1 %v3781_v1 }
  0x2e   :  { %566 = vmatpush1.bf16.msra.mxu0 %v3666_v14  ;;  %3642 = vmatpush1.bf16.msra.mxu1 %v3666_v14 }
  0x2f   :  { %567 = vmatprep.subr.bf16.mxu0 %v3781_v1  ;;  %3627 = vmatprep.subr.bf16.mxu1 %v3781_v1 }
  0x32   :  { %568 = vmatpush1.bf16.msra.mxu0 %v3667_v15  ;;  %3643 = vmatpush1.bf16.msra.mxu1 %v3667_v15 }
  0x33   :  { %569 = vmatprep.subr.bf16.mxu0 %v3781_v1  ;;  %3628 = vmatprep.subr.bf16.mxu1 %v3781_v1 }
  0x34   :  { %12 = vsyncpa [#allocation3], 0  ;;  %v3669_v17 = vld [vmem:[%s7511_s1 + $0x70] sm:$0xff]   ;;  %v3670_v18 = vld [vmem:[%s7511_s1 + $0x78] sm:$0xff]   ;;  %vm832_vm0 = vcmask 130048   ;;  %vm1761_vm1 = vcmask 125952  }
  0x35   :  { %v3671_v19 = vld [vmem:[%s7510_s0] ss:$8 sps:$4 sm:$0xff]   ;;  %v3674_v21 = vld [vmem:[%s7510_s0 + $0x14] ss:$8 sps:$4 sm:$0xff]   ;;  %v3676_v23 = vld [vmem:[%s7510_s0 + $0x10] ss:$8 sps:$4 sm:$0xff]  }
  0x36   :  { %570 = vmatpush1.bf16.msra.mxu0 %v3668_v16  ;;  %3644 = vmatpush1.bf16.msra.mxu1 %v3668_v16  ;;  %v3695_v20 = vld [vmem:[%s7510_s0 + $0x100] ss:$8 sps:$4 sm:$0xff]   ;;  %v3701_v22 = vld [vmem:[%s7510_s0 + $0x114] ss:$8 sps:$4 sm:$0xff]   ;;  %v3703_v24 = vld [vmem:[%s7510_s0 + $0x110] ss:$8 sps:$4 sm:$0xff]  }
  0x37   :  { %571 = vmatprep.subr.bf16.mxu0 %v3781_v1  ;;  %3629 = vmatprep.subr.bf16.mxu1 %v3781_v1  ;;  %v3677_v25 = vld [vmem:[%s7510_s0 + $0x24] ss:$8 sps:$4 sm:$0xff]   ;;  %v3679_v27 = vld [vmem:[%s7510_s0 + $0x20] ss:$8 sps:$4 sm:$0xff]   ;;  %v3680_v29 = vld [vmem:[%s7510_s0 + $0x34] ss:$8 sps:$4 sm:$0xff]  }
  0x38   :  { %v3707_v26 = vld [vmem:[%s7510_s0 + $0x124] ss:$8 sps:$4 sm:$0xff]   ;;  %v3709_v28 = vld [vmem:[%s7510_s0 + $0x120] ss:$8 sps:$4 sm:$0xff]   ;;  %v3713_v30 = vld [vmem:[%s7510_s0 + $0x134] ss:$8 sps:$4 sm:$0xff]  }
  0x39   :  { %v3682_v31 = vld [vmem:[%s7510_s0 + $0x30] ss:$8 sps:$4 sm:$0xff]   ;;  %v3683_v33 = vld [vmem:[%s7510_s0 + $0x44] ss:$8 sps:$4 sm:$0xff]   ;;  %v3685_v35 = vld [vmem:[%s7510_s0 + $0x40] ss:$8 sps:$4 sm:$0xff]  }
  0x3a   :  { %572 = vmatpush1.bf16.msra.mxu0 %v3669_v17  ;;  %3645 = vmatpush1.bf16.msra.mxu1 %v3669_v17  ;;  %v3715_v32 = vld [vmem:[%s7510_s0 + $0x130] ss:$8 sps:$4 sm:$0xff]   ;;  %v3719_v34 = vld [vmem:[%s7510_s0 + $0x144] ss:$8 sps:$4 sm:$0xff]   ;;  %v3721_v36 = vld [vmem:[%s7510_s0 + $0x140] ss:$8 sps:$4 sm:$0xff]  }
  0x3b   :  { %573 = vmatprep.subr.bf16.mxu0 %v3781_v1  ;;  %3630 = vmatprep.subr.bf16.mxu1 %v3781_v1  ;;  %v3686_v37 = vld [vmem:[%s7510_s0 + $0x54] ss:$8 sps:$4 sm:$0xff]   ;;  %v3688_v39 = vld [vmem:[%s7510_s0 + $0x50] ss:$8 sps:$4 sm:$0xff]   ;;  %v3689_v41 = vld [vmem:[%s7510_s0 + $0x64] ss:$8 sps:$4 sm:$0xff]  }
  0x3c   :  { %v3725_v38 = vld [vmem:[%s7510_s0 + $0x154] ss:$8 sps:$4 sm:$0xff]   ;;  %v3727_v40 = vld [vmem:[%s7510_s0 + $0x150] ss:$8 sps:$4 sm:$0xff]   ;;  %v3731_v42 = vld [vmem:[%s7510_s0 + $0x164] ss:$8 sps:$4 sm:$0xff]  }
  0x3d   :  { %v3691_v43 = vld [vmem:[%s7510_s0 + $0x60] ss:$8 sps:$4 sm:$0xff]   ;;  %v3692_v45 = vld [vmem:[%s7510_s0 + $0x74] ss:$8 sps:$4 sm:$0xff]   ;;  %v3694_v47 = vld [vmem:[%s7510_s0 + $0x70] ss:$8 sps:$4 sm:$0xff]  }
  0x3e   :  { %574 = vmatpush1.bf16.msra.mxu0 %v3670_v18  ;;  %3646 = vmatpush1.bf16.msra.mxu1 %v3670_v18  ;;  %v3733_v44 = vld [vmem:[%s7510_s0 + $0x160] ss:$8 sps:$4 sm:$0xff]   ;;  %v3737_v46 = vld [vmem:[%s7510_s0 + $0x174] ss:$8 sps:$4 sm:$0xff]   ;;  %v3739_v48 = vld [vmem:[%s7510_s0 + $0x170] ss:$8 sps:$4 sm:$0xff]  }
  0x3f   :  { %v3698_v49 = vld [vmem:[%s7510_s0 + $0x84] ss:$8 sps:$4 sm:$0xff]   ;;  %v3700_v51 = vld [vmem:[%s7510_s0 + $0x80] ss:$8 sps:$4 sm:$0xff]   ;;  %v3704_v53 = vld [vmem:[%s7510_s0 + $0x94] ss:$8 sps:$4 sm:$0xff]  }
  0x40   :  { %v3743_v50 = vld [vmem:[%s7510_s0 + $0x184] ss:$8 sps:$4 sm:$0xff]   ;;  %v3745_v52 = vld [vmem:[%s7510_s0 + $0x180] ss:$8 sps:$4 sm:$0xff]   ;;  %v3746_v54 = vld [vmem:[%s7510_s0 + $0x194] ss:$8 sps:$4 sm:$0xff]  }
  0x41   :  { %576 = vmatmul.mubr.bf16.vlgmr.msra.gmra.mrb[0].mxu0 %v3671_v19  ;;  %704 = vmatmul.mubr.bf16.vlgmr.msra.gmra.mrb[0].mxu1 %v3695_v20  ;;  %v3706_v55 = vld [vmem:[%s7510_s0 + $0x90] ss:$8 sps:$4 sm:$0xff]   ;;  %v3710_v57 = vld [vmem:[%s7510_s0 + $0xa4] ss:$8 sps:$4 sm:$0xff]   ;;  %v3712_v59 = vld [vmem:[%s7510_s0 + $0xa0] ss:$8 sps:$4 sm:$0xff]  }
  0x42   :  { %583 = vmatprep.mubr.bf16.mxu0 %v3674_v21  ;;  %711 = vmatprep.mubr.bf16.mxu1 %v3701_v22  ;;  %v3748_v56 = vld [vmem:[%s7510_s0 + $0x190] ss:$8 sps:$4 sm:$0xff]   ;;  %v3749_v58 = vld [vmem:[%s7510_s0 + $0x1a4] ss:$8 sps:$4 sm:$0xff]   ;;  %v3751_v60 = vld [vmem:[%s7510_s0 + $0x1a0] ss:$8 sps:$4 sm:$0xff]  }
  0x43   :  { %v3716_v61 = vld [vmem:[%s7510_s0 + $0xb4] ss:$8 sps:$4 sm:$0xff]   ;;  %v3718_v63 = vld [vmem:[%s7510_s0 + $0xb0] ss:$8 sps:$4 sm:$0xff]   ;;  %v3722_v1 = vld [vmem:[%s7510_s0 + $0xc4] ss:$8 sps:$4 sm:$0xff]  }
  0x44   :  { %v3752_v62 = vld [vmem:[%s7510_s0 + $0x1b4] ss:$8 sps:$4 sm:$0xff]   ;;  %v3754_v0 = vld [vmem:[%s7510_s0 + $0x1b0] ss:$8 sps:$4 sm:$0xff]   ;;  %v3755_v2 = vld [vmem:[%s7510_s0 + $0x1c4] ss:$8 sps:$4 sm:$0xff]  }
  0x45   :  { %v3724_v3 = vld [vmem:[%s7510_s0 + $0xc0] ss:$8 sps:$4 sm:$0xff]   ;;  %v3728_v5 = vld [vmem:[%s7510_s0 + $0xd4] ss:$8 sps:$4 sm:$0xff]   ;;  %v3730_v7 = vld [vmem:[%s7510_s0 + $0xd0] ss:$8 sps:$4 sm:$0xff]  }
  0x46   :  { %v3757_v4 = vld [vmem:[%s7510_s0 + $0x1c0] ss:$8 sps:$4 sm:$0xff]   ;;  %v3758_v6 = vld [vmem:[%s7510_s0 + $0x1d4] ss:$8 sps:$4 sm:$0xff]   ;;  %v3760_v8 = vld [vmem:[%s7510_s0 + $0x1d0] ss:$8 sps:$4 sm:$0xff]  }
  0x47   :  { %v3734_v9 = vld [vmem:[%s7510_s0 + $0xe4] ss:$8 sps:$4 sm:$0xff]   ;;  %v3736_v11 = vld [vmem:[%s7510_s0 + $0xe0] ss:$8 sps:$4 sm:$0xff]   ;;  %v3740_v13 = vld [vmem:[%s7510_s0 + $0xf4] ss:$8 sps:$4 sm:$0xff]  }
  0x48   :  { %v3761_v10 = vld [vmem:[%s7510_s0 + $0x1e4] ss:$8 sps:$4 sm:$0xff]   ;;  %v3763_v12 = vld [vmem:[%s7510_s0 + $0x1e0] ss:$8 sps:$4 sm:$0xff]   ;;  %v3764_v14 = vld [vmem:[%s7510_s0 + $0x1f4] ss:$8 sps:$4 sm:$0xff]  }
  0x49   :  { %584 = vmatmul.mubr.bf16.gmra.mrb[4].mxu0 %v3676_v23  ;;  %712 = vmatmul.mubr.bf16.gmra.mrb[4].mxu1 %v3703_v24  ;;  %v3742_v15 = vld [vmem:[%s7510_s0 + $0xf0] ss:$8 sps:$4 sm:$0xff]   ;;  %vm1826_vm2 = vcmask 64512   ;;  %vm2412_vm3 = vcmask 130112   ;;  %s3769_s27 = scalar_lea.hbm %s7516_s6, 16 }
  0x4a   :  { %591 = vmatprep.mubr.bf16.mxu0 %v3677_v25  ;;  %719 = vmatprep.mubr.bf16.mxu1 %v3707_v26  ;;  %v3766_v16 = vld [vmem:[%s7510_s0 + $0x1f0] ss:$8 sps:$4 sm:$0xff]   ;;  %p3770_p0 = scmp.ne.s32.totalorder %s7516_s6, %s3769_s27  ;;  %p3773_p1 = scmp.lt.u32.totalorder %s3769_s27, %s7516_s6 }
  0x4c   :  { %p3775_p2 = pnand %p3773_p1, %p3770_p0 }
  0x51   :  { %592 = vmatmul.mubr.bf16.gmra.mrb[8].mxu0 %v3679_v27  ;;  %720 = vmatmul.mubr.bf16.gmra.mrb[8].mxu1 %v3709_v28 }
  0x52   :  { %599 = vmatprep.mubr.bf16.mxu0 %v3680_v29  ;;  %727 = vmatprep.mubr.bf16.mxu1 %v3713_v30 }
  0x59   :  { %600 = vmatmul.mubr.bf16.gmra.mrb[12].mxu0 %v3682_v31  ;;  %728 = vmatmul.mubr.bf16.gmra.mrb[12].mxu1 %v3715_v32 }
  0x5a   :  { %607 = vmatprep.mubr.bf16.mxu0 %v3683_v33  ;;  %735 = vmatprep.mubr.bf16.mxu1 %v3719_v34 }
  0x61   :  { %608 = vmatmul.mubr.bf16.gmra.mrb[16].mxu0 %v3685_v35  ;;  %736 = vmatmul.mubr.bf16.gmra.mrb[16].mxu1 %v3721_v36 }
  0x62   :  { %615 = vmatprep.mubr.bf16.mxu0 %v3686_v37  ;;  %743 = vmatprep.mubr.bf16.mxu1 %v3725_v38 }
  0x69   :  { %616 = vmatmul.mubr.bf16.gmra.mrb[20].mxu0 %v3688_v39  ;;  %744 = vmatmul.mubr.bf16.gmra.mrb[20].mxu1 %v3727_v40 }
  0x6a   :  { %623 = vmatprep.mubr.bf16.mxu0 %v3689_v41  ;;  %751 = vmatprep.mubr.bf16.mxu1 %v3731_v42 }
  0x71   :  { %624 = vmatmul.mubr.bf16.gmra.mrb[24].mxu0 %v3691_v43  ;;  %752 = vmatmul.mubr.bf16.gmra.mrb[24].mxu1 %v3733_v44 }
  0x72   :  { %631 = vmatprep.mubr.bf16.mxu0 %v3692_v45  ;;  %759 = vmatprep.mubr.bf16.mxu1 %v3737_v46 }
  0x79   :  { %632 = vmatmul.mubr.bf16.gmra.mrb[28].mxu0 %v3694_v47  ;;  %760 = vmatmul.mubr.bf16.gmra.mrb[28].mxu1 %v3739_v48 }
  0x7a   :  { %639 = vmatprep.mubr.bf16.mxu0 %v3698_v49  ;;  %767 = vmatprep.mubr.bf16.mxu1 %v3743_v50  ;;  %v4111_v49 = vld [vmem:[%s7512_s2] ss:$0 sm:$0xff] }
  0x81   :  { %640 = vmatmul.mubr.bf16.gmra.mrb[32].mxu0 %v3700_v51  ;;  %768 = vmatmul.mubr.bf16.gmra.mrb[32].mxu1 %v3745_v52 }
  0x82   :  { %647 = vmatprep.mubr.bf16.mxu0 %v3704_v53  ;;  %775 = vmatprep.mubr.bf16.mxu1 %v3746_v54 }
  0x89   :  { %648 = vmatmul.mubr.bf16.gmra.mrb[36].mxu0 %v3706_v55  ;;  %776 = vmatmul.mubr.bf16.gmra.mrb[36].mxu1 %v3748_v56 }
  0x8a   :  { %655 = vmatprep.mubr.bf16.mxu0 %v3710_v57  ;;  %783 = vmatprep.mubr.bf16.mxu1 %v3749_v58 }
  0x91   :  { %656 = vmatmul.mubr.bf16.gmra.mrb[40].mxu0 %v3712_v59  ;;  %784 = vmatmul.mubr.bf16.gmra.mrb[40].mxu1 %v3751_v60 }
  0x92   :  { %663 = vmatprep.mubr.bf16.mxu0 %v3716_v61  ;;  %791 = vmatprep.mubr.bf16.mxu1 %v3752_v62 }
  0x99   :  { %664 = vmatmul.mubr.bf16.gmra.mrb[44].mxu0 %v3718_v63  ;;  %792 = vmatmul.mubr.bf16.gmra.mrb[44].mxu1 %v3754_v0 }
  0x9a   :  { %671 = vmatprep.mubr.bf16.mxu0 %v3722_v1  ;;  %799 = vmatprep.mubr.bf16.mxu1 %v3755_v2 }
  0xa1   :  { %672 = vmatmul.mubr.bf16.gmra.mrb[48].mxu0 %v3724_v3  ;;  %800 = vmatmul.mubr.bf16.gmra.mrb[48].mxu1 %v3757_v4 }
  0xa2   :  { %679 = vmatprep.mubr.bf16.mxu0 %v3728_v5  ;;  %807 = vmatprep.mubr.bf16.mxu1 %v3758_v6 }
  0xa9   :  { %680 = vmatmul.mubr.bf16.gmra.mrb[52].mxu0 %v3730_v7  ;;  %808 = vmatmul.mubr.bf16.gmra.mrb[52].mxu1 %v3760_v8 }
  0xaa   :  { %687 = vmatprep.mubr.bf16.mxu0 %v3734_v9  ;;  %815 = vmatprep.mubr.bf16.mxu1 %v3761_v10 }
  0xb1   :  { %688 = vmatmul.mubr.bf16.gmra.mrb[56].mxu0 %v3736_v11  ;;  %816 = vmatmul.mubr.bf16.gmra.mrb[56].mxu1 %v3763_v12 }
  0xb2   :  { %695 = vmatprep.mubr.bf16.mxu0 %v3740_v13  ;;  %823 = vmatprep.mubr.bf16.mxu1 %v3764_v14 }
  0xb9   :  { %696 = vmatmul.mubr.bf16.gmra.mrb[60].mxu0 %v3742_v15  ;;  %824 = vmatmul.mubr.bf16.gmra.mrb[60].mxu1 %v3766_v16 }
 0x114   :  { %v577_v17 = vpop.f32.mrb[0].mxu0  ;;  %v4092_v18 = vpop.f32.mrb[0].mxu1 }
 0x115   :  { %v579_v19 = vpop.f32.mrb[1].mxu0  ;;  %v707_v20 = vpop.f32.mrb[1].mxu1  ;;  %v4117_v51 = vadd.f32 %v4111_v49, %v577_v17 }
 0x116   :  { %v580_v21 = vpop.f32.mrb[2].mxu0  ;;  %v4094_v22 = vpop.f32.mrb[2].mxu1 }
 0x117   :  { %v582_v23 = vpop.f32.mrb[3].mxu0  ;;  %v710_v24 = vpop.f32.mrb[3].mxu1  ;;  %v4114_v50 = vadd.f32 %v4111_v49, %v580_v21  ;;  %v968_v60 = vmul.f32 %v4117_v51, %v4117_v51  ;;  %v833_v2 = vsel %vm832_vm0, %v4117_v51, 0.0 }
 0x119   :  { %v969_v55 = vmul.f32 %v4114_v50, %v4114_v50  ;;  %v834_v61 = vsel %vm832_vm0, %v4114_v50, 0.0  ;;  %v1032_v7 = vsel %vm832_vm0, %v968_v60, 0.0 }
 0x11a   :  { %v835_v6 = vadd.f32 %v834_v61, %v833_v2 }
 0x11b   :  { %v1033_v3 = vsel %vm832_vm0, %v969_v55, 0.0 }
 0x11c   :  { %v585_v25 = vpop.f32.mrb[4].mxu0  ;;  %v4096_v26 = vpop.f32.mrb[4].mxu1  ;;  %v1034_v10 = vadd.f32 %v1033_v3, %v1032_v7 }
 0x11d   :  { %v587_v27 = vpop.f32.mrb[5].mxu0  ;;  %v715_v28 = vpop.f32.mrb[5].mxu1  ;;  %v4120_v52 = vadd.f32 %v4111_v49, %v585_v25 }
 0x11e   :  { %v588_v29 = vpop.f32.mrb[6].mxu0  ;;  %v4098_v30 = vpop.f32.mrb[6].mxu1 }
 0x11f   :  { %v590_v31 = vpop.f32.mrb[7].mxu0  ;;  %v718_v32 = vpop.f32.mrb[7].mxu1  ;;  %v970_v62 = vmul.f32 %v4120_v52, %v4120_v52  ;;  %v4135_v63 = vadd.f32 %v4111_v49, %v588_v29  ;;  %v836_v4 = vsel %vm832_vm0, %v4120_v52, 0.0 }
 0x120   :  { %v837_v11 = vadd.f32 %v836_v4, %v835_v6 }
 0x121   :  { %v1035_v8 = vsel %vm832_vm0, %v970_v62, 0.0  ;;  %v971_v9 = vmul.f32 %v4135_v63, %v4135_v63  ;;  %v838_v14 = vsel %vm832_vm0, %v4135_v63, 0.0 }
 0x122   :  { %v1036_v20 = vadd.f32 %v1035_v8, %v1034_v10  ;;  %v839_v31 = vadd.f32 %v838_v14, %v837_v11 }
 0x123   :  { %v1037_v24 = vsel %vm832_vm0, %v971_v9, 0.0 }
 0x124   :  { %v593_v33 = vpop.f32.mrb[8].mxu0  ;;  %v4100_v34 = vpop.f32.mrb[8].mxu1 }
 0x125   :  { %v595_v35 = vpop.f32.mrb[9].mxu0  ;;  %v723_v36 = vpop.f32.mrb[9].mxu1  ;;  %v4143_v5 = vadd.f32 %v4111_v49, %v593_v33 }
 0x126   :  { %v596_v37 = vpop.f32.mrb[10].mxu0  ;;  %v4102_v38 = vpop.f32.mrb[10].mxu1  ;;  %v1038_v35 = vadd.f32 %v1037_v24, %v1036_v20 }
 0x127   :  { %v598_v39 = vpop.f32.mrb[11].mxu0  ;;  %v726_v40 = vpop.f32.mrb[11].mxu1  ;;  %v972_v15 = vmul.f32 %v4143_v5, %v4143_v5  ;;  %v4156_v16 = vadd.f32 %v4111_v49, %v596_v37  ;;  %v840_v25 = vsel %vm832_vm0, %v4143_v5, 0.0 }
 0x128   :  { %v841_v36 = vadd.f32 %v840_v25, %v839_v31 }
 0x129   :  { %v1039_v32 = vsel %vm832_vm0, %v972_v15, 0.0  ;;  %v973_v33 = vmul.f32 %v4156_v16, %v4156_v16  ;;  %v842_v37 = vsel %vm832_vm0, %v4156_v16, 0.0 }
 0x12a   :  { %v843_v60 = vadd.f32 %v842_v37, %v841_v36 }
 0x12c   :  { %v601_v41 = vpop.f32.mrb[12].mxu0  ;;  %v4104_v42 = vpop.f32.mrb[12].mxu1 }
 0x12d   :  { %v603_v43 = vpop.f32.mrb[13].mxu0  ;;  %v731_v44 = vpop.f32.mrb[13].mxu1  ;;  %v4164_v27 = vadd.f32 %v4111_v49, %v601_v41  ;;  %v1040_v41 = vadd.f32 %v1039_v32, %v1038_v35 }
 0x12e   :  { %v604_v45 = vpop.f32.mrb[14].mxu0  ;;  %v4106_v46 = vpop.f32.mrb[14].mxu1 }
 0x12f   :  { %v606_v47 = vpop.f32.mrb[15].mxu0  ;;  %v734_v48 = vpop.f32.mrb[15].mxu1  ;;  %v974_v39 = vmul.f32 %v4164_v27, %v4164_v27  ;;  %v4174_v40 = vadd.f32 %v4111_v49, %v604_v45 }
 0x130   :  { %v1041_v47 = vsel %vm832_vm0, %v973_v33, 0.0  ;;  %v844_v48 = vsel %vm832_vm0, %v4164_v27, 0.0 }
 0x131   :  { %v1043_v45 = vsel %vm832_vm0, %v974_v39, 0.0  ;;  %v1042_v3 = vadd.f32 %v1041_v47, %v1040_v41  ;;  %v845_v4 = vadd.f32 %v844_v48, %v843_v60  ;;  %v846_v6 = vsel %vm832_vm0, %v4174_v40, 0.0 }
 0x133   :  { %v1044_v8 = vadd.f32 %v1043_v45, %v1042_v3  ;;  %v847_v14 = vadd.f32 %v846_v6, %v845_v4 }
 0x134   :  { %v609_v53 = vpop.f32.mrb[16].mxu0  ;;  %v4122_v54 = vpop.f32.mrb[16].mxu1 }
 0x135   :  { %v611_v56 = vpop.f32.mrb[17].mxu0  ;;  %v739_v57 = vpop.f32.mrb[17].mxu1  ;;  %v4182_v55 = vadd.f32 %v4111_v49, %v609_v53 }
 0x136   :  { %v612_v58 = vpop.f32.mrb[18].mxu0  ;;  %v4126_v59 = vpop.f32.mrb[18].mxu1 }
 0x137   :  { %v614_v0 = vpop.f32.mrb[19].mxu0  ;;  %v742_v1 = vpop.f32.mrb[19].mxu1  ;;  %v976_v53 = vmul.f32 %v4182_v55, %v4182_v55  ;;  %v4194_v7 = vadd.f32 %v4111_v49, %v612_v58  ;;  %v848_v10 = vsel %vm832_vm0, %v4182_v55, 0.0 }
 0x138   :  { %v975_v0 = vmul.f32 %v4174_v40, %v4174_v40 }
 0x139   :  { %v977_v20 = vmul.f32 %v4194_v7, %v4194_v7 }
 0x13a   :  { %v1045_v9 = vsel %vm832_vm0, %v975_v0, 0.0 }
 0x13b   :  { %v1046_v25 = vadd.f32 %v1045_v9, %v1044_v8  ;;  %v1049_v39 = vsel %vm832_vm0, %v977_v20, 0.0 }
 0x13c   :  { %v617_v12 = vpop.f32.mrb[20].mxu0  ;;  %v4149_v13 = vpop.f32.mrb[20].mxu1 }
 0x13d   :  { %v619_v17 = vpop.f32.mrb[21].mxu0  ;;  %v747_v19 = vpop.f32.mrb[21].mxu1  ;;  %v4200_v11 = vadd.f32 %v4111_v49, %v617_v12  ;;  %v850_v12 = vsel %vm832_vm0, %v4194_v7, 0.0 }
 0x13e   :  { %v620_v21 = vpop.f32.mrb[22].mxu0  ;;  %v4158_v23 = vpop.f32.mrb[22].mxu1  ;;  %v1047_v19 = vsel %vm832_vm0, %v976_v53, 0.0 }
 0x13f   :  { %v622_v28 = vpop.f32.mrb[23].mxu0  ;;  %v750_v29 = vpop.f32.mrb[23].mxu1  ;;  %v978_v32 = vmul.f32 %v4200_v11, %v4200_v11  ;;  %v4214_v33 = vadd.f32 %v4111_v49, %v620_v21  ;;  %v1048_v37 = vadd.f32 %v1047_v19, %v1046_v25  ;;  %v852_v41 = vsel %vm832_vm0, %v4200_v11, 0.0 }
 0x140   :  { %v849_v28 = vadd.f32 %v848_v10, %v847_v14 }
 0x141   :  { %v1050_v60 = vadd.f32 %v1049_v39, %v1048_v37 }
 0x142   :  { %v851_v48 = vadd.f32 %v850_v12, %v849_v28 }
 0x144   :  { %v625_v43 = vpop.f32.mrb[24].mxu0  ;;  %v4176_v44 = vpop.f32.mrb[24].mxu1  ;;  %v853_v21 = vadd.f32 %v852_v41, %v851_v48 }
 0x145   :  { %v627_v56 = vpop.f32.mrb[25].mxu0  ;;  %v755_v57 = vpop.f32.mrb[25].mxu1  ;;  %v4220_v47 = vadd.f32 %v4111_v49, %v625_v43 }
 0x146   :  { %v628_v61 = vpop.f32.mrb[26].mxu0  ;;  %v4184_v62 = vpop.f32.mrb[26].mxu1  ;;  %v1051_v56 = vsel %vm832_vm0, %v978_v32, 0.0  ;;  %v979_v57 = vmul.f32 %v4214_v33, %v4214_v33 }
 0x147   :  { %v630_v1 = vpop.f32.mrb[27].mxu0  ;;  %v758_v2 = vpop.f32.mrb[27].mxu1  ;;  %v4232_v43 = vadd.f32 %v4111_v49, %v628_v61  ;;  %v1052_v6 = vadd.f32 %v1051_v56, %v1050_v60  ;;  %v856_v10 = vsel %vm832_vm0, %v4220_v47, 0.0 }
 0x148   :  { %v854_v1 = vsel %vm832_vm0, %v4214_v33, 0.0  ;;  %v980_v2 = vmul.f32 %v4220_v47, %v4220_v47  ;;  %v1053_v9 = vsel %vm832_vm0, %v979_v57, 0.0 }
 0x149   :  { %v1054_v25 = vadd.f32 %v1053_v9, %v1052_v6  ;;  %v858_v12 = vsel %vm832_vm0, %v4232_v43, 0.0 }
 0x14a   :  { %v1055_v61 = vsel %vm832_vm0, %v980_v2, 0.0 }
 0x14c   :  { %v633_v15 = vpop.f32.mrb[28].mxu0  ;;  %v4202_v17 = vpop.f32.mrb[28].mxu1 }
 0x14d   :  { %v635_v58 = vpop.f32.mrb[29].mxu0  ;;  %v763_v24 = vpop.f32.mrb[29].mxu1  ;;  %v4240_v14 = vadd.f32 %v4111_v49, %v633_v15  ;;  %v1056_v15 = vadd.f32 %v1055_v61, %v1054_v25 }
 0x14e   :  { %v636_v29 = vpop.f32.mrb[30].mxu0  ;;  %v4207_v31 = vpop.f32.mrb[30].mxu1  ;;  %v855_v58 = vadd.f32 %v854_v1, %v853_v21  ;;  %v981_v24 = vmul.f32 %v4232_v43, %v4232_v43 }
 0x14f   :  { %v638_v35 = vpop.f32.mrb[31].mxu0  ;;  %v766_v36 = vpop.f32.mrb[31].mxu1  ;;  %7680 = vst [vmem:[#allocation5_spill] sm:$0xff] %v4240_v14  ;;  %v982_v32 = vmul.f32 %v4240_v14, %v4240_v14  ;;  %v860_v41 = vsel %vm832_vm0, %v4240_v14, 0.0 }
 0x150   :  { %v857_v28 = vadd.f32 %v856_v10, %v855_v58  ;;  %v4250_v35 = vadd.f32 %v4111_v49, %v636_v29  ;;  %v1057_v39 = vsel %vm832_vm0, %v981_v24, 0.0 }
 0x151   :  { %v1059_v29 = vsel %vm832_vm0, %v982_v32, 0.0  ;;  %v1058_v6 = vadd.f32 %v1057_v39, %v1056_v15 }
 0x152   :  { %7681 = vst [vmem:[#allocation6_spill] sm:$0xff] %v4250_v35  ;;  %v859_v60 = vadd.f32 %v858_v12, %v857_v28  ;;  %v983_v2 = vmul.f32 %v4250_v35, %v4250_v35  ;;  %v862_v10 = vsel %vm832_vm0, %v4250_v35, 0.0 }
 0x154   :  { %v641_v45 = vpop.f32.mrb[32].mxu0  ;;  %v4225_v0 = vpop.f32.mrb[32].mxu1  ;;  %v861_v9 = vadd.f32 %v860_v41, %v859_v60  ;;  %v1061_v58 = vsel %vm832_vm0, %v983_v2, 0.0 }
 0x155   :  { %v643_v3 = vpop.f32.mrb[33].mxu0  ;;  %v771_v4 = vpop.f32.mrb[33].mxu1  ;;  %v4258_v48 = vadd.f32 %v4111_v49, %v641_v45 }
 0x156   :  { %v644_v53 = vpop.f32.mrb[34].mxu0  ;;  %v4234_v8 = vpop.f32.mrb[34].mxu1  ;;  %v863_v25 = vadd.f32 %v862_v10, %v861_v9 }
 0x157   :  { %v646_v19 = vpop.f32.mrb[35].mxu0  ;;  %v774_v20 = vpop.f32.mrb[35].mxu1  ;;  %7682 = vst [vmem:[#allocation7_spill] sm:$0xff] %v4258_v48  ;;  %v984_v45 = vmul.f32 %v4258_v48, %v4258_v48  ;;  %v864_v61 = vsel %vm832_vm0, %v4258_v48, 0.0 }
 0x158   :  { %v4270_v19 = vadd.f32 %v4111_v49, %v644_v53  ;;  %v1060_v20 = vadd.f32 %v1059_v29, %v1058_v6 }
 0x159   :  { %v1063_v32 = vsel %vm832_vm0, %v984_v45, 0.0 }
 0x15a   :  { %7683 = vst [vmem:[#allocation8_spill] sm:$0xff] %v4270_v19  ;;  %v985_v15 = vmul.f32 %v4270_v19, %v4270_v19  ;;  %v1062_v41 = vadd.f32 %v1061_v58, %v1060_v20 }
 0x15c   :  { %v649_v36 = vpop.f32.mrb[36].mxu0  ;;  %v4252_v37 = vpop.f32.mrb[36].mxu1  ;;  %v1064_v6 = vadd.f32 %v1063_v32, %v1062_v41  ;;  %v1065_v9 = vsel %vm832_vm0, %v985_v15, 0.0 }
 0x15d   :  { %v651_v56 = vpop.f32.mrb[37].mxu0  ;;  %v779_v57 = vpop.f32.mrb[37].mxu1  ;;  %v4276_v24 = vadd.f32 %v4111_v49, %v649_v36  ;;  %v866_v36 = vsel %vm832_vm0, %v4270_v19, 0.0 }
 0x15e   :  { %v652_v21 = vpop.f32.mrb[38].mxu0  ;;  %v4260_v1 = vpop.f32.mrb[38].mxu1  ;;  %v865_v56 = vadd.f32 %v864_v61, %v863_v25  ;;  %v1066_v25 = vadd.f32 %v1065_v9, %v1064_v6 }
 0x15f   :  { %v654_v3 = vpop.f32.mrb[39].mxu0  ;;  %v782_v4 = vpop.f32.mrb[39].mxu1  ;;  %7684 = vst [vmem:[#allocation9_spill] sm:$0xff] %v4276_v24  ;;  %v986_v29 = vmul.f32 %v4276_v24, %v4276_v24  ;;  %v4290_v2 = vadd.f32 %v4111_v49, %v652_v21  ;;  %v868_v10 = vsel %vm832_vm0, %v4276_v24, 0.0 }
 0x160   :  { %v867_v20 = vadd.f32 %v866_v36, %v865_v56 }
 0x161   :  { %7685 = vst [vmem:[#allocation10_spill] sm:$0xff] %v4290_v2  ;;  %v1067_v58 = vsel %vm832_vm0, %v986_v29, 0.0  ;;  %v987_v61 = vmul.f32 %v4290_v2, %v4290_v2  ;;  %v870_v32 = vsel %vm832_vm0, %v4290_v2, 0.0 }
 0x162   :  { %v869_v21 = vadd.f32 %v868_v10, %v867_v20  ;;  %v1068_v36 = vadd.f32 %v1067_v58, %v1066_v25 }
 0x164   :  { %v657_v28 = vpop.f32.mrb[40].mxu0  ;;  %v4278_v12 = vpop.f32.mrb[40].mxu1  ;;  %v871_v2 = vadd.f32 %v870_v32, %v869_v21 }
 0x165   :  { %v659_v53 = vpop.f32.mrb[41].mxu0  ;;  %v787_v39 = vpop.f32.mrb[41].mxu1  ;;  %v4296_v45 = vadd.f32 %v4111_v49, %v657_v28 }
 0x166   :  { %v660_v57 = vpop.f32.mrb[42].mxu0  ;;  %v4283_v60 = vpop.f32.mrb[42].mxu1 }
 0x167   :  { %v662_v3 = vpop.f32.mrb[43].mxu0  ;;  %v790_v4 = vpop.f32.mrb[43].mxu1  ;;  %7686 = vst [vmem:[#allocation11_spill] sm:$0xff] %v4296_v45  ;;  %v988_v15 = vmul.f32 %v4296_v45, %v4296_v45  ;;  %v4308_v28 = vadd.f32 %v4111_v49, %v660_v57  ;;  %v872_v6 = vsel %vm832_vm0, %v4296_v45, 0.0 }
 0x168   :  { %v1069_v4 = vsel %vm832_vm0, %v987_v61, 0.0  ;;  %v873_v25 = vadd.f32 %v872_v6, %v871_v2 }
 0x169   :  { %7687 = vst [vmem:[#allocation12_spill] sm:$0xff] %v4308_v28  ;;  %v1071_v57 = vsel %vm832_vm0, %v988_v15, 0.0  ;;  %v1070_v58 = vadd.f32 %v1069_v4, %v1068_v36 }
 0x16c   :  { %v665_v53 = vpop.f32.mrb[44].mxu0  ;;  %v4301_v39 = vpop.f32.mrb[44].mxu1 }
 0x16d   :  { %v667_v41 = vpop.f32.mrb[45].mxu0  ;;  %v795_v56 = vpop.f32.mrb[45].mxu1  ;;  %v4316_v9 = vadd.f32 %v4111_v49, %v665_v53  ;;  %v1072_v53 = vadd.f32 %v1071_v57, %v1070_v58 }
 0x16e   :  { %v668_v29 = vpop.f32.mrb[46].mxu0  ;;  %v4310_v3 = vpop.f32.mrb[46].mxu1  ;;  %v989_v41 = vmul.f32 %v4308_v28, %v4308_v28  ;;  %v874_v56 = vsel %vm832_vm0, %v4308_v28, 0.0 }
 0x16f   :  { %7688 = vst [vmem:[#allocation13_spill] sm:$0xff] %v4316_v9  ;;  %v670_v10 = vpop.f32.mrb[47].mxu0  ;;  %v798_v20 = vpop.f32.mrb[47].mxu1  ;;  %v990_v61 = vmul.f32 %v4316_v9, %v4316_v9  ;;  %v4326_v45 = vadd.f32 %v4111_v49, %v668_v29  ;;  %v876_v32 = vsel %vm832_vm0, %v4316_v9, 0.0  ;;  %v875_v4 = vadd.f32 %v874_v56, %v873_v25 }
 0x170   :  { %v1073_v21 = vsel %vm832_vm0, %v989_v41, 0.0 }
 0x171   :  { %7689 = vst [vmem:[#allocation14_spill] sm:$0xff] %v4326_v45  ;;  %v1075_v29 = vsel %vm832_vm0, %v990_v61, 0.0  ;;  %v991_v57 = vmul.f32 %v4326_v45, %v4326_v45  ;;  %v1074_v41 = vadd.f32 %v1073_v21, %v1072_v53  ;;  %v877_v19 = vadd.f32 %v876_v32, %v875_v4 }
 0x172   :  { %v878_v9 = vsel %vm832_vm0, %v4326_v45, 0.0 }
 0x173   :  { %v1076_v56 = vadd.f32 %v1075_v29, %v1074_v41 }
 0x174   :  { %v673_v10 = vpop.f32.mrb[48].mxu0  ;;  %v4328_v20 = vpop.f32.mrb[48].mxu1 }
 0x175   :  { %v4334_v2 = vadd.f32 %v4111_v49, %v673_v10  ;;  %v675_v15 = vpop.f32.mrb[49].mxu0  ;;  %v803_v36 = vpop.f32.mrb[49].mxu1 }
 0x176   :  { %v676_v6 = vpop.f32.mrb[50].mxu0  ;;  %v4336_v28 = vpop.f32.mrb[50].mxu1  ;;  %v1077_v15 = vsel %vm832_vm0, %v991_v57, 0.0  ;;  %v879_v36 = vadd.f32 %v878_v9, %v877_v19 }
 0x177   :  { %7690 = vst [vmem:[#allocation15_spill] sm:$0xff] %v4334_v2  ;;  %v678_v58 = vpop.f32.mrb[51].mxu0  ;;  %v806_v24 = vpop.f32.mrb[51].mxu1  ;;  %v992_v10 = vmul.f32 %v4334_v2, %v4334_v2  ;;  %v4346_v25 = vadd.f32 %v4111_v49, %v676_v6  ;;  %v880_v61 = vsel %vm832_vm0, %v4334_v2, 0.0  ;;  %v1078_v29 = vadd.f32 %v1077_v15, %v1076_v56 }
 0x178   :  { %v881_v41 = vadd.f32 %v880_v61, %v879_v36 }
 0x179   :  { %7691 = vst [vmem:[#allocation16_spill] sm:$0xff] %v4346_v25  ;;  %v1079_v53 = vsel %vm832_vm0, %v992_v10, 0.0  ;;  %v993_v21 = vmul.f32 %v4346_v25, %v4346_v25  ;;  %v882_v19 = vsel %vm832_vm0, %v4346_v25, 0.0 }
 0x17a   :  { %v883_v15 = vadd.f32 %v882_v19, %v881_v41 }
 0x17c   :  { %v681_v58 = vpop.f32.mrb[52].mxu0  ;;  %v4351_v24 = vpop.f32.mrb[52].mxu1 }
 0x17d   :  { %v4357_v32 = vadd.f32 %v4111_v49, %v681_v58  ;;  %v683_v4 = vpop.f32.mrb[53].mxu0  ;;  %v811_v6 = vpop.f32.mrb[53].mxu1  ;;  %v1080_v58 = vadd.f32 %v1079_v53, %v1078_v29 }
 0x17e   :  { %v684_v57 = vpop.f32.mrb[54].mxu0  ;;  %v4359_v45 = vpop.f32.mrb[54].mxu1  ;;  %v1081_v4 = vsel %vm832_vm0, %v993_v21, 0.0 }
 0x17f   :  { %7692 = vst [vmem:[#allocation17_spill] sm:$0xff] %v4357_v32  ;;  %v994_v9 = vmul.f32 %v4357_v32, %v4357_v32  ;;  %v4366_v10 = vadd.f32 %v4111_v49, %v684_v57  ;;  %v686_v2 = vpop.f32.mrb[55].mxu0  ;;  %v814_v48 = vpop.f32.mrb[55].mxu1  ;;  %v884_v56 = vsel %vm832_vm0, %v4357_v32, 0.0  ;;  %v1082_v6 = vadd.f32 %v1081_v4, %v1080_v58 }
 0x180   :  { %v885_v25 = vadd.f32 %v884_v56, %v883_v15 }
 0x181   :  { %7693 = vst [vmem:[#allocation18_spill] sm:$0xff] %v4366_v10  ;;  %v1083_v61 = vsel %vm832_vm0, %v994_v9, 0.0  ;;  %v995_v36 = vmul.f32 %v4366_v10, %v4366_v10  ;;  %v886_v48 = vsel %vm832_vm0, %v4366_v10, 0.0  ;;  %v4398_v10 = vadd.f32 %v4111_v49, %v4092_v18 }
 0x182   :  { %v1084_v29 = vadd.f32 %v1083_v61, %v1082_v6  ;;  %v887_v15 = vadd.f32 %v886_v48, %v885_v25 }
 0x183   :  { %v1085_v19 = vsel %vm832_vm0, %v995_v36, 0.0  ;;  %7695 = vst [vmem:[#allocation20_spill] sm:$0xff] %v4398_v10 }
 0x184   :  { %v689_v35 = vpop.f32.mrb[56].mxu0  ;;  %v4374_v14 = vpop.f32.mrb[56].mxu1  ;;  %v1086_v6 = vadd.f32 %v1085_v19, %v1084_v29 }
 0x185   :  { %v4379_v2 = vadd.f32 %v4111_v49, %v689_v35  ;;  %v691_v53 = vpop.f32.mrb[57].mxu0  ;;  %v819_v21 = vpop.f32.mrb[57].mxu1 }
 0x186   :  { %v692_v41 = vpop.f32.mrb[58].mxu0  ;;  %v4381_v57 = vpop.f32.mrb[58].mxu1 }
 0x187   :  { %7694 = vst [vmem:[#allocation19_spill] sm:$0xff] %v4379_v2  ;;  %v888_v9 = vsel %vm832_vm0, %v4379_v2, 0.0  ;;  %v996_v58 = vmul.f32 %v4379_v2, %v4379_v2  ;;  %v4389_v4 = vadd.f32 %v4111_v49, %v692_v41  ;;  %v694_v56 = vpop.f32.mrb[59].mxu0  ;;  %v822_v35 = vpop.f32.mrb[59].mxu1 }
 0x188   :  { %v889_v21 = vadd.f32 %v888_v9, %v887_v15  ;;  %v4410_v35 = vadd.f32 %v4111_v49, %v4094_v22  ;;  %v4423_v22 = vadd.f32 %v4111_v49, %v4096_v26  ;;  %v4436_v26 = vadd.f32 %v4111_v49, %v4098_v30 }
 0x189   :  { %v1087_v53 = vsel %vm832_vm0, %v996_v58, 0.0  ;;  %v997_v61 = vmul.f32 %v4389_v4, %v4389_v4  ;;  %v890_v36 = vsel %vm832_vm0, %v4389_v4, 0.0 }
 0x18a   :  { %v1088_v2 = vadd.f32 %v1087_v53, %v1086_v6  ;;  %v891_v29 = vadd.f32 %v890_v36, %v889_v21  ;;  %v1000_v21 = vmul.f32 %v4398_v10, %v4398_v10 }
 0x18b   :  { %v1089_v25 = vsel %vm832_vm0, %v997_v61, 0.0 }
 0x18c   :  { %v697_v41 = vpop.f32.mrb[60].mxu0  ;;  %v4400_v32 = vpop.f32.mrb[60].mxu1  ;;  %v1090_v36 = vadd.f32 %v1089_v25, %v1088_v2  ;;  %v1001_v2 = vmul.f32 %v4410_v35, %v4410_v35 }
 0x18d   :  { %v4404_v48 = vadd.f32 %v4111_v49, %v697_v41  ;;  %v699_v58 = vpop.f32.mrb[61].mxu0  ;;  %v827_v56 = vpop.f32.mrb[61].mxu1 }
 0x18e   :  { %v700_v19 = vpop.f32.mrb[62].mxu0  ;;  %v4406_v9 = vpop.f32.mrb[62].mxu1  ;;  %v1097_v30 = vsel %vm832_vm0, %v1001_v2, 0.0 }
 0x18f   :  { %7696 = vst [vmem:[#allocation21_spill] sm:$0xff] %v4404_v48  ;;  %v892_v18 = vsel %vm832_vm0, %v4404_v48, 0.0  ;;  %v998_v15 = vmul.f32 %v4404_v48, %v4404_v48  ;;  %v4417_v53 = vadd.f32 %v4111_v49, %v700_v19  ;;  %v702_v61 = vpop.f32.mrb[63].mxu0  ;;  %v830_v6 = vpop.f32.mrb[63].mxu1 }
 0x190   :  { %v893_v41 = vadd.f32 %v892_v18, %v891_v29  ;;  %v896_v6 = vsel %vm832_vm0, %v4398_v10, 0.0 }
 0x191   :  { %v1091_v58 = vsel %vm832_vm0, %v998_v15, 0.0  ;;  %v894_v56 = vsel %vm832_vm0, %v4417_v53, 0.0  ;;  %v999_v19 = vmul.f32 %v4417_v53, %v4417_v53  ;;  %v1095_v15 = vsel %vm832_vm0, %v1000_v21, 0.0 }
 0x192   :  { %v1092_v48 = vadd.f32 %v1091_v58, %v1090_v36  ;;  %v895_v61 = vadd.f32 %v894_v56, %v893_v41  ;;  %v898_v36 = vsel %vm832_vm0, %v4410_v35, 0.0  ;;  %v1002_v41 = vmul.f32 %v4423_v22, %v4423_v22 }
 0x193   :  { %v1093_v25 = vsel %vm832_vm0, %v999_v19, 0.0  ;;  %v4446_v58 = vadd.f32 %v4111_v49, %v4100_v34  ;;  %v900_v19 = vsel %vm832_vm0, %v4423_v22, 0.0  ;;  %v4455_v21 = vadd.f32 %v4111_v49, %v4102_v38 }
 0x194   :  { %v897_v29 = vadd.f32 %v896_v6, %v895_v61  ;;  %v1094_v18 = vadd.f32 %v1093_v25, %v1092_v48  ;;  %v1003_v48 = vmul.f32 %v4436_v26, %v4436_v26  ;;  %v1099_v25 = vsel %vm832_vm0, %v1002_v41, 0.0 }
 0x195   :  { %v902_v34 = vsel %vm832_vm0, %v4436_v26, 0.0  ;;  %v1004_v2 = vmul.f32 %v4446_v58, %v4446_v58  ;;  %v904_v38 = vsel %vm832_vm0, %v4446_v58, 0.0  ;;  %v4473_v41 = vadd.f32 %v4111_v49, %v4106_v46 }
 0x196   :  { %v899_v56 = vadd.f32 %v898_v36, %v897_v29  ;;  %v1096_v10 = vadd.f32 %v1095_v15, %v1094_v18  ;;  %v4464_v29 = vadd.f32 %v4111_v49, %v4104_v42  ;;  %v1101_v36 = vsel %vm832_vm0, %v1003_v48, 0.0 }
 0x197   :  { %v906_v42 = vsel %vm832_vm0, %v4455_v21, 0.0 }
 0x198   :  { %v901_v61 = vadd.f32 %v900_v19, %v899_v56  ;;  %v1098_v6 = vadd.f32 %v1097_v30, %v1096_v10  ;;  %v1005_v10 = vmul.f32 %v4455_v21, %v4455_v21  ;;  %v1103_v19 = vsel %vm832_vm0, %v1004_v2, 0.0 }
 0x199   :  { %v1006_v48 = vmul.f32 %v4464_v29, %v4464_v29  ;;  %v908_v46 = vsel %vm832_vm0, %v4464_v29, 0.0  ;;  %v1007_v2 = vmul.f32 %v4473_v41, %v4473_v41 }
 0x19a   :  { %v903_v18 = vadd.f32 %v902_v34, %v901_v61  ;;  %v1100_v15 = vadd.f32 %v1099_v25, %v1098_v6  ;;  %v4482_v61 = vadd.f32 %v4111_v49, %v4122_v54  ;;  %v1105_v34 = vsel %vm832_vm0, %v1005_v10, 0.0 }
 0x19b   :  { %v910_v54 = vsel %vm832_vm0, %v4473_v41, 0.0 }
 0x19c   :  { %v905_v56 = vadd.f32 %v904_v38, %v903_v18  ;;  %v1102_v30 = vadd.f32 %v1101_v36, %v1100_v15  ;;  %v4491_v18 = vadd.f32 %v4111_v49, %v4126_v59  ;;  %v1107_v38 = vsel %vm832_vm0, %v1006_v48, 0.0 }
 0x19d   :  { %v1008_v10 = vmul.f32 %v4482_v61, %v4482_v61  ;;  %v912_v59 = vsel %vm832_vm0, %v4482_v61, 0.0 }
 0x19e   :  { %v907_v6 = vadd.f32 %v906_v42, %v905_v56  ;;  %v1104_v25 = vadd.f32 %v1103_v19, %v1102_v30  ;;  %v4500_v56 = vadd.f32 %v4111_v49, %v4149_v13  ;;  %v1109_v42 = vsel %vm832_vm0, %v1007_v2, 0.0 }
 0x19f   :  { %v1009_v48 = vmul.f32 %v4491_v18, %v4491_v18  ;;  %v914_v13 = vsel %vm832_vm0, %v4491_v18, 0.0 }
 0x1a0   :  { %v909_v15 = vadd.f32 %v908_v46, %v907_v6  ;;  %v1106_v36 = vadd.f32 %v1105_v34, %v1104_v25  ;;  %v4509_v6 = vadd.f32 %v4111_v49, %v4158_v23  ;;  %v1111_v46 = vsel %vm832_vm0, %v1008_v10, 0.0 }
 0x1a1   :  { %v1010_v2 = vmul.f32 %v4500_v56, %v4500_v56  ;;  %v916_v23 = vsel %vm832_vm0, %v4500_v56, 0.0 }
 0x1a2   :  { %v911_v30 = vadd.f32 %v910_v54, %v909_v15  ;;  %v1108_v19 = vadd.f32 %v1107_v38, %v1106_v36  ;;  %v4518_v15 = vadd.f32 %v4111_v49, %v4176_v44  ;;  %v1113_v54 = vsel %vm832_vm0, %v1009_v48, 0.0 }
 0x1a3   :  { %v1011_v10 = vmul.f32 %v4509_v6, %v4509_v6  ;;  %v918_v44 = vsel %vm832_vm0, %v4509_v6, 0.0 }
 0x1a4   :  { %v1110_v25 = vadd.f32 %v1109_v42, %v1108_v19  ;;  %v913_v34 = vadd.f32 %v912_v59, %v911_v30  ;;  %v4527_v30 = vadd.f32 %v4111_v49, %v4184_v62  ;;  %v1115_v59 = vsel %vm832_vm0, %v1010_v2, 0.0 }
 0x1a5   :  { %v1012_v48 = vmul.f32 %v4518_v15, %v4518_v15  ;;  %v920_v62 = vsel %vm832_vm0, %v4518_v15, 0.0 }
 0x1a6   :  { %v915_v36 = vadd.f32 %v914_v13, %v913_v34  ;;  %v1112_v38 = vadd.f32 %v1111_v46, %v1110_v25  ;;  %v4536_v25 = vadd.f32 %v4111_v49, %v4202_v17  ;;  %v1117_v13 = vsel %vm832_vm0, %v1011_v10, 0.0 }
 0x1a7   :  { %v1013_v2 = vmul.f32 %v4527_v30, %v4527_v30  ;;  %v922_v17 = vsel %vm832_vm0, %v4527_v30, 0.0 }
 0x1a8   :  { %v917_v19 = vadd.f32 %v916_v23, %v915_v36  ;;  %v1114_v42 = vadd.f32 %v1113_v54, %v1112_v38  ;;  %v4545_v36 = vadd.f32 %v4111_v49, %v4207_v31  ;;  %v1119_v23 = vsel %vm832_vm0, %v1012_v48, 0.0 }
 0x1a9   :  { %v1014_v10 = vmul.f32 %v4536_v25, %v4536_v25  ;;  %v924_v31 = vsel %vm832_vm0, %v4536_v25, 0.0 }
 0x1aa   :  { %v919_v34 = vadd.f32 %v918_v44, %v917_v19  ;;  %v1116_v46 = vadd.f32 %v1115_v59, %v1114_v42  ;;  %v4554_v19 = vadd.f32 %v4111_v49, %v4225_v0  ;;  %v1121_v44 = vsel %vm832_vm0, %v1013_v2, 0.0 }
 0x1ab   :  { %v1015_v48 = vmul.f32 %v4545_v36, %v4545_v36  ;;  %v926_v0 = vsel %vm832_vm0, %v4545_v36, 0.0 }
 0x1ac   :  { %v921_v38 = vadd.f32 %v920_v62, %v919_v34  ;;  %v1118_v54 = vadd.f32 %v1117_v13, %v1116_v46  ;;  %v4563_v34 = vadd.f32 %v4111_v49, %v4234_v8  ;;  %v1123_v62 = vsel %vm832_vm0, %v1014_v10, 0.0 }
 0x1ad   :  { %v1016_v2 = vmul.f32 %v4554_v19, %v4554_v19  ;;  %v928_v8 = vsel %vm832_vm0, %v4554_v19, 0.0 }
 0x1ae   :  { %v923_v42 = vadd.f32 %v922_v17, %v921_v38  ;;  %v1120_v59 = vadd.f32 %v1119_v23, %v1118_v54  ;;  %7697 = vst [vmem:[#allocation22_spill] sm:$0xff] %v4563_v34  ;;  %v4572_v38 = vadd.f32 %v4111_v49, %v4252_v37  ;;  %v1125_v17 = vsel %vm832_vm0, %v1015_v48, 0.0 }
 0x1af   :  { %v1017_v10 = vmul.f32 %v4563_v34, %v4563_v34  ;;  %v930_v37 = vsel %vm832_vm0, %v4563_v34, 0.0 }
 0x1b0   :  { %v925_v46 = vadd.f32 %v924_v31, %v923_v42  ;;  %v1122_v13 = vadd.f32 %v1121_v44, %v1120_v59  ;;  %7698 = vst [vmem:[#allocation23_spill] sm:$0xff] %v4572_v38  ;;  %v4581_v42 = vadd.f32 %v4111_v49, %v4260_v1  ;;  %v1127_v31 = vsel %vm832_vm0, %v1016_v2, 0.0 }
 0x1b1   :  { %v1018_v48 = vmul.f32 %v4572_v38, %v4572_v38  ;;  %v932_v1 = vsel %vm832_vm0, %v4572_v38, 0.0 }
 0x1b2   :  { %v927_v54 = vadd.f32 %v926_v0, %v925_v46  ;;  %v1124_v23 = vadd.f32 %v1123_v62, %v1122_v13  ;;  %7699 = vst [vmem:[#allocation24_spill] sm:$0xff] %v4581_v42  ;;  %v4590_v46 = vadd.f32 %v4111_v49, %v4278_v12  ;;  %v1129_v0 = vsel %vm832_vm0, %v1017_v10, 0.0 }
 0x1b3   :  { %v1019_v2 = vmul.f32 %v4581_v42, %v4581_v42  ;;  %v934_v12 = vsel %vm832_vm0, %v4581_v42, 0.0 }
 0x1b4   :  { %v929_v59 = vadd.f32 %v928_v8, %v927_v54  ;;  %v1126_v44 = vadd.f32 %v1125_v17, %v1124_v23  ;;  %v4599_v54 = vadd.f32 %v4111_v49, %v4283_v60  ;;  %v1131_v8 = vsel %vm832_vm0, %v1018_v48, 0.0 }
 0x1b5   :  { %v1020_v10 = vmul.f32 %v4590_v46, %v4590_v46  ;;  %v936_v60 = vsel %vm832_vm0, %v4590_v46, 0.0 }
 0x1b6   :  { %v1128_v13 = vadd.f32 %v1127_v31, %v1126_v44  ;;  %v931_v62 = vadd.f32 %v930_v37, %v929_v59  ;;  %7700 = vst [vmem:[#allocation25_spill] sm:$0xff] %v4599_v54  ;;  %v4608_v59 = vadd.f32 %v4111_v49, %v4301_v39  ;;  %v1133_v37 = vsel %vm832_vm0, %v1019_v2, 0.0 }
 0x1b7   :  { %v1021_v48 = vmul.f32 %v4599_v54, %v4599_v54  ;;  %v938_v39 = vsel %vm832_vm0, %v4599_v54, 0.0 }
 0x1b8   :  { %v1130_v23 = vadd.f32 %v1129_v0, %v1128_v13  ;;  %v933_v17 = vadd.f32 %v932_v1, %v931_v62  ;;  %7701 = vst [vmem:[#allocation26_spill] sm:$0xff] %v4608_v59  ;;  %v4617_v13 = vadd.f32 %v4111_v49, %v4310_v3  ;;  %v1135_v1 = vsel %vm832_vm0, %v1020_v10, 0.0 }
 0x1b9   :  { %v1022_v2 = vmul.f32 %v4608_v59, %v4608_v59  ;;  %v940_v3 = vsel %vm832_vm0, %v4608_v59, 0.0 }
 0x1ba   :  { %v1132_v44 = vadd.f32 %v1131_v8, %v1130_v23  ;;  %v935_v31 = vadd.f32 %v934_v12, %v933_v17  ;;  %7702 = vst [vmem:[#allocation27_spill] sm:$0xff] %v4617_v13  ;;  %v4626_v23 = vadd.f32 %v4111_v49, %v4328_v20  ;;  %v1137_v12 = vsel %vm832_vm0, %v1021_v48, 0.0 }
 0x1bb   :  { %v1023_v10 = vmul.f32 %v4617_v13, %v4617_v13  ;;  %v942_v20 = vsel %vm832_vm0, %v4617_v13, 0.0 }
 0x1bc   :  { %v1134_v62 = vadd.f32 %v1133_v37, %v1132_v44  ;;  %v937_v0 = vadd.f32 %v936_v60, %v935_v31  ;;  %7703 = vst [vmem:[#allocation28_spill] sm:$0xff] %v4626_v23  ;;  %v4635_v44 = vadd.f32 %v4111_v49, %v4336_v28  ;;  %v1139_v60 = vsel %vm832_vm0, %v1022_v2, 0.0 }
 0x1bd   :  { %v1024_v48 = vmul.f32 %v4626_v23, %v4626_v23  ;;  %v4648_v28 = vadd.f32 %v4111_v49, %v4359_v45  ;;  %v944_v2 = vsel %vm832_vm0, %v4626_v23, 0.0  ;;  %v4662_v45 = vadd.f32 %v4111_v49, %v4374_v14 }
 0x1be   :  { %v1136_v17 = vadd.f32 %v1135_v1, %v1134_v62  ;;  %v939_v8 = vadd.f32 %v938_v39, %v937_v0  ;;  %7704 = vst [vmem:[#allocation29_spill] sm:$0xff] %v4635_v44  ;;  %v4644_v62 = vadd.f32 %v4111_v49, %v4351_v24  ;;  %v1141_v39 = vsel %vm832_vm0, %v1023_v10, 0.0 }
 0x1bf   :  { %7706 = vst [vmem:[#allocation31_spill] sm:$0xff] %v4648_v28  ;;  %v946_v24 = vsel %vm832_vm0, %v4635_v44, 0.0  ;;  %7707 = vst [vmem:[#allocation32_spill] sm:$0xff] %v4662_v45 }
 0x1c0   :  { %v1138_v31 = vadd.f32 %v1137_v12, %v1136_v17  ;;  %v941_v37 = vadd.f32 %v940_v3, %v939_v8  ;;  %7705 = vst [vmem:[#allocation30_spill] sm:$0xff] %v4644_v62  ;;  %v1025_v17 = vmul.f32 %v4635_v44, %v4635_v44  ;;  %v1143_v3 = vsel %vm832_vm0, %v1024_v48, 0.0 }
 0x1c1   :  { %v948_v48 = vsel %vm832_vm0, %v4644_v62, 0.0 }
 0x1c2   :  { %v1140_v0 = vadd.f32 %v1139_v60, %v1138_v31  ;;  %v943_v1 = vadd.f32 %v942_v20, %v941_v37  ;;  %v1026_v31 = vmul.f32 %v4644_v62, %v4644_v62  ;;  %v1027_v60 = vmul.f32 %v4648_v28, %v4648_v28 }
 0x1c3   :  { %v1145_v20 = vsel %vm832_vm0, %v1025_v17, 0.0  ;;  %v1028_v17 = vmul.f32 %v4662_v45, %v4662_v45 }
 0x1c4   :  { %v1142_v8 = vadd.f32 %v1141_v39, %v1140_v0  ;;  %v945_v12 = vadd.f32 %v944_v2, %v943_v1  ;;  %v4671_v0 = vadd.f32 %v4111_v49, %v4381_v57  ;;  %v4675_v1 = vadd.f32 %v4111_v49, %v4400_v32 }
 0x1c5   :  { %v1147_v2 = vsel %vm832_vm0, %v1026_v31, 0.0  ;;  %v952_v57 = vsel %vm832_vm0, %v4662_v45, 0.0  ;;  %v4691_v31 = vadd.f32 %v4111_v49, %v4406_v9 }
 0x1c6   :  { %v1144_v10 = vadd.f32 %v1143_v3, %v1142_v8  ;;  %v947_v37 = vadd.f32 %v946_v24, %v945_v12  ;;  %7708 = vst [vmem:[#allocation33_spill] sm:$0xff] %v4671_v0  ;;  %7709 = vst [vmem:[#allocation34_spill] sm:$0xff] %v4675_v1  ;;  %v950_v8 = vsel %vm832_vm0, %v4648_v28, 0.0  ;;  %v1149_v24 = vsel %vm832_vm0, %v1027_v60, 0.0 }
 0x1c7   :  { %v1029_v32 = vmul.f32 %v4671_v0, %v4671_v0  ;;  %v954_v60 = vsel %vm832_vm0, %v4671_v0, 0.0  ;;  %v1031_v49 = vmul.f32 %v4691_v31, %v4691_v31 }
 0x1c8   :  { %v1146_v14 = vadd.f32 %v1145_v20, %v1144_v10  ;;  %v949_v39 = vadd.f32 %v948_v48, %v947_v37  ;;  %v1030_v10 = vmul.f32 %v4675_v1, %v4675_v1  ;;  %v1151_v48 = vsel %vm832_vm0, %v1028_v17, 0.0 }
 0x1c9   :  { %v958_v17 = vsel %vm832_vm0, %v4691_v31, 0.0 }
 0x1ca   :  { %v1148_v12 = vadd.f32 %v1147_v2, %v1146_v14  ;;  %v951_v3 = vadd.f32 %v950_v8, %v949_v39  ;;  %v956_v14 = vsel %vm832_vm0, %v4675_v1, 0.0  ;;  %v1153_v8 = vsel %vm832_vm0, %v1029_v32, 0.0 }
 0x1cb   :  { %v1155_v45 = vsel %vm832_vm0, %v1030_v10, 0.0 }
 0x1cc   :  { %v1150_v37 = vadd.f32 %v1149_v24, %v1148_v12  ;;  %v953_v20 = vadd.f32 %v952_v57, %v951_v3  ;;  %v1157_v57 = vsel %vm832_vm0, %v1031_v49, 0.0 }
 0x1cd   :  { %v7731_v23 = vld [vmem:[#allocation33_spill] sm:$0xff] }
 0x1ce   :  { %v1152_v39 = vadd.f32 %v1151_v48, %v1150_v37  ;;  %v955_v2 = vadd.f32 %v954_v60, %v953_v20 }
 0x1d0   :  { %v1154_v9 = vadd.f32 %v1153_v8, %v1152_v39  ;;  %v957_v12 = vadd.f32 %v956_v14, %v955_v2 }
 0x1d2   :  { %v1156_v3 = vadd.f32 %v1155_v45, %v1154_v9  ;;  %v959_v24 = vadd.f32 %v958_v17, %v957_v12  ;;  %v7724_v12 = vld [vmem:[#allocation19_spill] sm:$0xff]  ;;  %v7726_v9 = vld [vmem:[#allocation20_spill] sm:$0xff] }
 0x1d4   :  { %v960_v0 = vrot.slane %v959_v24, 4  ;;  %v1158_v1 = vadd.f32 %v1157_v57, %v1156_v3  ;;  %v7720_v57 = vld [vmem:[#allocation15_spill] sm:$0xff]  ;;  %v7723_v3 = vld [vmem:[#allocation18_spill] sm:$0xff] }
 0x1d6   :  { %v961_v37 = vadd.f32 %v960_v0, %v959_v24  ;;  %v1159_v20 = vrot.slane %v1158_v1, 4  ;;  %v4834_v24 = vld [vmem:[%s7513_s3] ss:$0 sm:$0xff] }
 0x1d8   :  { %v962_v48 = vrot.slane %v961_v37, 2  ;;  %v1160_v32 = vadd.f32 %v1159_v20, %v1158_v1  ;;  %v7713_v20 = vld [vmem:[#allocation8_spill] sm:$0xff] }
 0x1da   :  { %v963_v60 = vadd.f32 %v962_v48, %v961_v37  ;;  %v1161_v10 = vrot.slane %v1160_v32, 2  ;;  %v7714_v48 = vld [vmem:[#allocation9_spill] sm:$0xff] }
 0x1dc   :  { %v964_v28 = vrot.slane %v963_v60, 1  ;;  %v1162_v62 = vadd.f32 %v1161_v10, %v1160_v32  ;;  %v7716_v10 = vld [vmem:[#allocation11_spill] sm:$0xff] }
 0x1dd   :  { %v7729_v32 = vld [vmem:[#allocation31_spill] sm:$0xff] }
 0x1de   :  { %v965_v44 = vadd.f32 %v964_v28, %v963_v60  ;;  %v1163_v39 = vrot.slane %v1162_v62, 1  ;;  %v7730_v28 = vld [vmem:[#allocation32_spill] sm:$0xff] }
 0x1e0   :  { %v4705_v14 = vmul.f32 0.001953125, %v965_v44  ;;  %v1164_v2 = vadd.f32 %v1163_v39, %v1162_v62  ;;  %v7710_v39 = vld [vmem:[#allocation5_spill] sm:$0xff]  ;;  %v7732_v62 = vld [vmem:[#allocation34_spill] sm:$0xff] }
 0x1e1   :  { %v7725_v44 = vld [vmem:[#allocation21_spill] sm:$0xff] }
 0x1e2   :  { %v1165_v8 = vmul.f32 0.001953125, %v1164_v2  ;;  %v1166_v45 = vmul.f32 %v4705_v14, %v4705_v14  ;;  %v7717_v2 = vld [vmem:[#allocation12_spill] sm:$0xff]  ;;  %v7733_v37 = vsub.f32 %v4691_v31, %v4705_v14  ;;  %v7734_v59 = vsub.f32 %v4117_v51, %v4705_v14  ;;  %v4869_v31 = vld [vmem:[%s7514_s4] ss:$0 sm:$0xff] }
 0x1e3   :  { %v7735_v0 = vsub.f32 %v4114_v50, %v4705_v14  ;;  %v7736_v42 = vsub.f32 %v4120_v52, %v4705_v14  ;;  %v7737_v51 = vsub.f32 %v4135_v63, %v4705_v14  ;;  %v7738_v50 = vsub.f32 %v4143_v5, %v4705_v14 }
 0x1e4   :  { %v1167_v49 = vsub.f32 %v1165_v8, %v1166_v45  ;;  %v7711_v8 = vld [vmem:[#allocation6_spill] sm:$0xff]  ;;  %v7718_v45 = vld [vmem:[#allocation13_spill] sm:$0xff]  ;;  %v7739_v52 = vsub.f32 %v4156_v16, %v4705_v14  ;;  %v7741_v5 = vsub.f32 %v4174_v40, %v4705_v14  ;;  %v7742_v16 = vsub.f32 %v4182_v55, %v4705_v14 }
 0x1e6   :  { %v1168_v17 = vmax.f32 %v1167_v49, 0.0  ;;  %v7712_v49 = vld [vmem:[#allocation7_spill] sm:$0xff] }
 0x1e8   :  { %v1233_v60 = vadd.f32 1e-05, %v1168_v17  ;;  %v7715_v17 = vld [vmem:[#allocation10_spill] sm:$0xff] }
 0x1ea   :  { %3767 = vrsqrt.f32 %v1233_v60  ;;  %v7722_v60 = vld [vmem:[#allocation17_spill] sm:$0xff] }
 0x1f4   :  { %v4829_v34 = vpop.eup %3767 }
 0x1f5   :  { %v1298_v13 = vmul.f32 %v4829_v34, %v7733_v37  ;;  %v4852_v54 = vmul.f32 %v4829_v34, %v7734_v59  ;;  %v4858_v1 = vmul.f32 %v4829_v34, %v7735_v0  ;;  %v4864_v38 = vmul.f32 %v4829_v34, %v7736_v42 }
 0x1f6   :  { %v4875_v59 = vmul.f32 %v4829_v34, %v7737_v51  ;;  %v4881_v0 = vmul.f32 %v4829_v34, %v7738_v50  ;;  %v4887_v42 = vmul.f32 %v4829_v34, %v7739_v52  ;;  %v7740_v37 = vsub.f32 %v4164_v27, %v4705_v14 }
 0x1f7   :  { %v1369_v51 = vmul.f32 %v4834_v24, %v1298_v13  ;;  %v4900_v50 = vmul.f32 %v4829_v34, %v7741_v5  ;;  %v4906_v52 = vmul.f32 %v4829_v34, %v7742_v16  ;;  %v7743_v27 = vsub.f32 %v4194_v7, %v4705_v14 }
 0x1f8   :  { %v4893_v63 = vmul.f32 %v4829_v34, %v7740_v37  ;;  %v7744_v13 = vsub.f32 %v4200_v11, %v4705_v14  ;;  %v7745_v5 = vsub.f32 %v4214_v33, %v4705_v14  ;;  %v7746_v16 = vsub.f32 %v4220_v47, %v4705_v14 }
 0x1f9   :  { %v4912_v37 = vmul.f32 %v4829_v34, %v7743_v27  ;;  %v7747_v27 = vsub.f32 %v4232_v43, %v4705_v14  ;;  %v7748_v33 = vsub.f32 %v7710_v39, %v4705_v14  ;;  %v7749_v47 = vsub.f32 %v7711_v8, %v4705_v14 }
 0x1fa   :  { %v4918_v40 = vmul.f32 %v4829_v34, %v7744_v13  ;;  %v4924_v55 = vmul.f32 %v4829_v34, %v7745_v5  ;;  %v4930_v7 = vmul.f32 %v4829_v34, %v7746_v16  ;;  %v1440_v13 = vadd.f32 %v4869_v31, %v1369_v51 }
 0x1fb   :  { %v4936_v11 = vmul.f32 %v4829_v34, %v7747_v27  ;;  %v4943_v5 = vmul.f32 %v4829_v34, %v7748_v33  ;;  %v4949_v16 = vmul.f32 %v4829_v34, %v7749_v47  ;;  %v7750_v43 = vsub.f32 %v7712_v49, %v4705_v14 }
 0x1fc   :  { %v7751_v51 = vsub.f32 %v7713_v20, %v4705_v14  ;;  %v7752_v33 = vsub.f32 %v7714_v48, %v4705_v14  ;;  %v7753_v47 = vsub.f32 %v7715_v17, %v4705_v14  ;;  %v7757_v48 = vsub.f32 %v7717_v2, %v4705_v14 }
 0x1fd   :  { %v4955_v27 = vmul.f32 %v4829_v34, %v7750_v43  ;;  %v7755_v43 = vsub.f32 %v7716_v10, %v4705_v14  ;;  %v7759_v17 = vsub.f32 %v7718_v45, %v4705_v14 }
 0x1fe   :  { %v4961_v39 = vmul.f32 %v4829_v34, %v7751_v51  ;;  %v4967_v8 = vmul.f32 %v4829_v34, %v7752_v33  ;;  %v4973_v49 = vmul.f32 %v4829_v34, %v7753_v47  ;;  %v4981_v51 = vmax.f32 %v1440_v13, 0.0 }
 0x1ff   :  { %v4979_v20 = vmul.f32 %v4829_v34, %v7755_v43  ;;  %v4987_v33 = vmul.f32 %v4829_v34, %v7757_v48  ;;  %v4993_v47 = vmul.f32 %v4829_v34, %v7759_v17  ;;  %v7762_v13 = vsub.f32 %v7720_v57, %v4705_v14  ;;  %v7763_v48 = vld [vmem:[#allocation16_spill] sm:$0xff] }
 0x200   :  { %7754 = vst [vmem:[#allocation5_spill] sm:$0xff] %v4973_v49  ;;  %7756 = vst [vmem:[#allocation6_spill] sm:$0xff] %v4981_v51  ;;  %v7760_v49 = vld [vmem:[#allocation14_spill] sm:$0xff]  ;;  %v7765_v17 = vsub.f32 %v7722_v60, %v4705_v14  ;;  %v7768_v60 = vsub.f32 %v4389_v4, %v4705_v14 }
 0x201   :  { %7758 = vst [vmem:[#allocation7_spill] sm:$0xff] %v4987_v33  ;;  %v7761_v10 = vsub.f32 %v7760_v49, %v4705_v14  ;;  %v5005_v2 = vmul.f32 %v4829_v34, %v7762_v13  ;;  %v7764_v33 = vsub.f32 %v7763_v48, %v4705_v14  ;;  %v3614_v13 = vpack.c.bf16 %v4981_v51, %v4981_v51 }
 0x202   :  { %v5017_v49 = vmul.f32 %v4829_v34, %v7765_v17  ;;  %v7767_v48 = vsub.f32 %v7724_v12, %v4705_v14  ;;  %v5037_v17 = vmul.f32 %v4829_v34, %v7768_v60  ;;  %v7770_v51 = vsub.f32 %v4417_v53, %v4705_v14 }
 0x203   :  { %v4999_v43 = vmul.f32 %v4829_v34, %v7761_v10  ;;  %v5011_v45 = vmul.f32 %v4829_v34, %v7764_v33  ;;  %v7766_v10 = vsub.f32 %v7723_v3, %v4705_v14  ;;  %v7769_v3 = vsub.f32 %v7725_v44, %v4705_v14  ;;  %1825 = vst.msk [vmem:[%s7515_s5 + $0xfc] sm:$0xf] %vm1761_vm1, %v3614_v13 }
 0x204   :  { %v5031_v33 = vmul.f32 %v4829_v34, %v7767_v48  ;;  %v5049_v12 = vmul.f32 %v4829_v34, %v7770_v51  ;;  %v7771_v48 = vsub.f32 %v7726_v9, %v4705_v14  ;;  %v7772_v60 = vsub.f32 %v4410_v35, %v4705_v14 }
 0x205   :  { %v5023_v57 = vmul.f32 %v4829_v34, %v7766_v10  ;;  %v5043_v10 = vmul.f32 %v4829_v34, %v7769_v3  ;;  %v7773_v3 = vsub.f32 %v4423_v22, %v4705_v14  ;;  %v7774_v9 = vsub.f32 %v4436_v26, %v4705_v14 }
 0x206   :  { %v5055_v4 = vmul.f32 %v4829_v34, %v7771_v48  ;;  %v5061_v44 = vmul.f32 %v4829_v34, %v7772_v60  ;;  %v7775_v35 = vsub.f32 %v4446_v58, %v4705_v14  ;;  %v7776_v22 = vsub.f32 %v4455_v21, %v4705_v14 }
 0x207   :  { %v5067_v53 = vmul.f32 %v4829_v34, %v7773_v3  ;;  %v5077_v51 = vmul.f32 %v4829_v34, %v7774_v9  ;;  %v7777_v13 = vsub.f32 %v4464_v29, %v4705_v14  ;;  %v7778_v3 = vsub.f32 %v4473_v41, %v4705_v14 }
 0x208   :  { %v5083_v48 = vmul.f32 %v4829_v34, %v7775_v35  ;;  %v5089_v60 = vmul.f32 %v4829_v34, %v7776_v22  ;;  %v7779_v9 = vsub.f32 %v4482_v61, %v4705_v14  ;;  %v7780_v35 = vsub.f32 %v4491_v18, %v4705_v14 }
 0x209   :  { %v5095_v26 = vmul.f32 %v4829_v34, %v7777_v13  ;;  %v5101_v58 = vmul.f32 %v4829_v34, %v7778_v3  ;;  %v7781_v22 = vsub.f32 %v4500_v56, %v4705_v14  ;;  %v7782_v13 = vsub.f32 %v4509_v6, %v4705_v14 }
 0x20a   :  { %v5107_v21 = vmul.f32 %v4829_v34, %v7779_v9  ;;  %v5113_v29 = vmul.f32 %v4829_v34, %v7780_v35  ;;  %v7783_v3 = vsub.f32 %v4518_v15, %v4705_v14  ;;  %v7784_v9 = vsub.f32 %v4527_v30, %v4705_v14 }
 0x20b   :  { %v5119_v41 = vmul.f32 %v4829_v34, %v7781_v22  ;;  %v5125_v61 = vmul.f32 %v4829_v34, %v7782_v13  ;;  %v7785_v35 = vsub.f32 %v4536_v25, %v4705_v14  ;;  %v7787_v22 = vsub.f32 %v4545_v36, %v4705_v14 }
 0x20c   :  { %v5131_v18 = vmul.f32 %v4829_v34, %v7783_v3  ;;  %v5137_v56 = vmul.f32 %v4829_v34, %v7784_v9  ;;  %v7789_v13 = vsub.f32 %v4554_v19, %v4705_v14  ;;  %v7790_v3 = vld [vmem:[#allocation22_spill] sm:$0xff] }
 0x20d   :  { %v5143_v6 = vmul.f32 %v4829_v34, %v7785_v35  ;;  %v5149_v15 = vmul.f32 %v4829_v34, %v7787_v22  ;;  %v7791_v9 = vsub.f32 %v7790_v3, %v4705_v14  ;;  %v7793_v35 = vld [vmem:[#allocation23_spill] sm:$0xff]  ;;  %v7796_v22 = vld [vmem:[#allocation24_spill] sm:$0xff] }
 0x20e   :  { %v5155_v30 = vmul.f32 %v4829_v34, %v7789_v13  ;;  %v7799_v13 = vsub.f32 %v4590_v46, %v4705_v14 }
 0x20f   :  { %7786 = vst [vmem:[#allocation8_spill] sm:$0xff] %v5143_v6  ;;  %7788 = vst [vmem:[#allocation9_spill] sm:$0xff] %v5149_v15  ;;  %v5161_v25 = vmul.f32 %v4829_v34, %v7791_v9  ;;  %v7794_v6 = vsub.f32 %v7793_v35, %v4705_v14  ;;  %v7797_v15 = vsub.f32 %v7796_v22, %v4705_v14  ;;  %v7801_v9 = vld [vmem:[#allocation25_spill] sm:$0xff] }
 0x210   :  { %v5179_v3 = vmul.f32 %v4829_v34, %v7799_v13  ;;  %v7809_v13 = vld [vmem:[#allocation28_spill] sm:$0xff] }
 0x211   :  { %7792 = vst [vmem:[#allocation10_spill] sm:$0xff] %v5161_v25  ;;  %v5167_v36 = vmul.f32 %v4829_v34, %v7794_v6  ;;  %v5173_v19 = vmul.f32 %v4829_v34, %v7797_v15  ;;  %v7802_v25 = vsub.f32 %v7801_v9, %v4705_v14  ;;  %v7804_v6 = vld [vmem:[#allocation26_spill] sm:$0xff]  ;;  %v7807_v15 = vld [vmem:[#allocation27_spill] sm:$0xff] }
 0x212   :  { %7800 = vst [vmem:[#allocation13_spill] sm:$0xff] %v5179_v3  ;;  %v7810_v3 = vsub.f32 %v7809_v13, %v4705_v14 }
 0x213   :  { %7795 = vst [vmem:[#allocation11_spill] sm:$0xff] %v5167_v36  ;;  %7798 = vst [vmem:[#allocation12_spill] sm:$0xff] %v5173_v19  ;;  %v5185_v35 = vmul.f32 %v4829_v34, %v7802_v25  ;;  %v7805_v36 = vsub.f32 %v7804_v6, %v4705_v14  ;;  %v7808_v19 = vsub.f32 %v7807_v15, %v4705_v14  ;;  %v7811_v25 = vld [vmem:[#allocation29_spill] sm:$0xff] }
 0x214   :  { %v5203_v9 = vmul.f32 %v4829_v34, %v7810_v3  ;;  %v7816_v3 = vsub.f32 %v7730_v28, %v4705_v14  ;;  %v5245_v28 = vmul.f32 %v4834_v24, %v4852_v54  ;;  %v5269_v54 = vmul.f32 %v4834_v24, %v4900_v50 }
 0x215   :  { %7803 = vst [vmem:[#allocation15_spill] sm:$0xff] %v5185_v35  ;;  %v5191_v22 = vmul.f32 %v4829_v34, %v7805_v36  ;;  %v5197_v46 = vmul.f32 %v4829_v34, %v7808_v19  ;;  %v7812_v35 = vsub.f32 %v7811_v25, %v4705_v14  ;;  %v7813_v36 = vld [vmem:[#allocation30_spill] sm:$0xff]  ;;  %v7815_v19 = vsub.f32 %v7729_v32, %v4705_v14 }
 0x216   :  { %v5227_v25 = vmul.f32 %v4829_v34, %v7816_v3  ;;  %v5249_v3 = vmul.f32 %v4834_v24, %v4858_v1  ;;  %v5294_v50 = vmul.f32 %v4834_v24, %v4936_v11  ;;  %v5316_v11 = vmul.f32 %v4834_v24, %v4967_v8 }
 0x217   :  { %7806 = vst [vmem:[#allocation17_spill] sm:$0xff] %v5191_v22  ;;  %v5209_v6 = vmul.f32 %v4829_v34, %v7812_v35  ;;  %v7814_v22 = vsub.f32 %v7813_v36, %v4705_v14  ;;  %v5221_v13 = vmul.f32 %v4829_v34, %v7815_v19  ;;  %v7817_v35 = vsub.f32 %v7731_v23, %v4705_v14 }
 0x218   :  { %v1308_v19 = vmul.f32 %v4834_v24, %v4864_v38  ;;  %v5253_v23 = vmul.f32 %v4834_v24, %v4875_v59  ;;  %v5265_v38 = vmul.f32 %v4834_v24, %v4893_v63  ;;  %v5278_v59 = vmul.f32 %v4834_v24, %v4912_v37 }
 0x219   :  { %v5215_v15 = vmul.f32 %v4829_v34, %v7814_v22  ;;  %v5233_v36 = vmul.f32 %v4829_v34, %v7817_v35  ;;  %v7818_v22 = vsub.f32 %v7732_v62, %v4705_v14  ;;  %v5257_v14 = vmul.f32 %v4834_v24, %v4881_v0 }
 0x21a   :  { %v1379_v1 = vadd.f32 %v4869_v31, %v1308_v19  ;;  %v5274_v62 = vmul.f32 %v4834_v24, %v4906_v52  ;;  %v5282_v0 = vmul.f32 %v4834_v24, %v4918_v40  ;;  %v5290_v63 = vmul.f32 %v4834_v24, %v4930_v7 }
 0x21b   :  { %v5239_v32 = vmul.f32 %v4829_v34, %v7818_v22  ;;  %v5261_v34 = vmul.f32 %v4834_v24, %v4887_v42  ;;  %v5286_v42 = vmul.f32 %v4834_v24, %v4924_v55  ;;  %v5298_v52 = vmul.f32 %v4834_v24, %v4943_v5  ;;  %v7820_v5 = vld [vmem:[#allocation5_spill] sm:$0xff]  ;;  %v7821_v22 = vld [vmem:[#allocation7_spill] sm:$0xff] }
 0x21c   :  { %v5300_v37 = vmax.f32 %v1379_v1, 0.0  ;;  %v5304_v40 = vmul.f32 %v4834_v24, %v4949_v16  ;;  %v5308_v55 = vmul.f32 %v4834_v24, %v4955_v27  ;;  %v5312_v7 = vmul.f32 %v4834_v24, %v4961_v39 }
 0x21d   :  { %v5320_v35 = vmul.f32 %v4834_v24, %v7820_v5  ;;  %v5324_v16 = vmul.f32 %v4834_v24, %v4979_v20  ;;  %v5328_v27 = vmul.f32 %v4834_v24, %v7821_v22  ;;  %v5334_v19 = vmul.f32 %v4834_v24, %v4993_v47  ;;  %v7825_v22 = vld [vmem:[#allocation8_spill] sm:$0xff] }
 0x21e   :  { %7819 = vst [vmem:[#allocation18_spill] sm:$0xff] %v5300_v37  ;;  %v1833_v39 = vsel %vm1826_vm2, %v5300_v37, -inf  ;;  %v5338_v8 = vmul.f32 %v4834_v24, %v4999_v43  ;;  %v5342_v1 = vmul.f32 %v4834_v24, %v5005_v2  ;;  %v5346_v20 = vmul.f32 %v4834_v24, %v5011_v45 }
 0x21f   :  { %1834 = vmax.xlane.f32.xlu1 %v1833_v39  ;;  %v5350_v5 = vmul.f32 %v4834_v24, %v5017_v49  ;;  %v5354_v47 = vmul.f32 %v4834_v24, %v5023_v57  ;;  %v5358_v43 = vmul.f32 %v4834_v24, %v5031_v33  ;;  %v5362_v2 = vmul.f32 %v4834_v24, %v5037_v17  ;;  %v7827_v39 = vld [vmem:[#allocation9_spill] sm:$0xff] }
 0x220   :  { %v5366_v45 = vmul.f32 %v4834_v24, %v5043_v10  ;;  %v5370_v49 = vmul.f32 %v4834_v24, %v5049_v12  ;;  %v5374_v57 = vmul.f32 %v4834_v24, %v5055_v4  ;;  %v5378_v33 = vmul.f32 %v4834_v24, %v5061_v44 }
 0x221   :  { %v5382_v17 = vmul.f32 %v4834_v24, %v5067_v53  ;;  %v5386_v10 = vmul.f32 %v4834_v24, %v5077_v51  ;;  %v5390_v12 = vmul.f32 %v4834_v24, %v5083_v48  ;;  %v5394_v4 = vmul.f32 %v4834_v24, %v5089_v60 }
 0x222   :  { %v5398_v44 = vmul.f32 %v4834_v24, %v5095_v26  ;;  %v5402_v53 = vmul.f32 %v4834_v24, %v5101_v58  ;;  %v5406_v51 = vmul.f32 %v4834_v24, %v5107_v21  ;;  %v5410_v48 = vmul.f32 %v4834_v24, %v5113_v29 }
 0x223   :  { %v5414_v60 = vmul.f32 %v4834_v24, %v5119_v41  ;;  %v5418_v26 = vmul.f32 %v4834_v24, %v5125_v61  ;;  %v5422_v58 = vmul.f32 %v4834_v24, %v5131_v18  ;;  %v5426_v21 = vmul.f32 %v4834_v24, %v5137_v56 }
 0x224   :  { %v5430_v29 = vmul.f32 %v4834_v24, %v7825_v22  ;;  %v5434_v41 = vmul.f32 %v4834_v24, %v7827_v39  ;;  %v5438_v61 = vmul.f32 %v4834_v24, %v5155_v30 }
 0x225   :  { %7822 = vst [vmem:[#allocation19_spill] sm:$0xff] %v5418_v26  ;;  %7823 = vst [vmem:[#allocation21_spill] sm:$0xff] %v5422_v58  ;;  %v7830_v26 = vld [vmem:[#allocation10_spill] sm:$0xff]  ;;  %v7831_v58 = vld [vmem:[#allocation11_spill] sm:$0xff] }
 0x226   :  { %7824 = vst [vmem:[#allocation20_spill] sm:$0xff] %v5426_v21  ;;  %7826 = vst [vmem:[#allocation31_spill] sm:$0xff] %v5430_v29  ;;  %v5442_v18 = vmul.f32 %v4834_v24, %v7830_v26  ;;  %v5446_v56 = vmul.f32 %v4834_v24, %v7831_v58  ;;  %v7832_v21 = vld [vmem:[#allocation12_spill] sm:$0xff]  ;;  %v7833_v29 = vld [vmem:[#allocation13_spill] sm:$0xff]  ;;  %v5466_v58 = vmul.f32 %v4834_v24, %v5197_v46 }
 0x227   :  { %7828 = vst [vmem:[#allocation32_spill] sm:$0xff] %v5434_v41  ;;  %7829 = vst [vmem:[#allocation33_spill] sm:$0xff] %v5438_v61  ;;  %v5450_v22 = vmul.f32 %v4834_v24, %v7832_v21  ;;  %v5454_v39 = vmul.f32 %v4834_v24, %v7833_v29  ;;  %v7834_v41 = vld [vmem:[#allocation15_spill] sm:$0xff]  ;;  %v7835_v61 = vld [vmem:[#allocation17_spill] sm:$0xff]  ;;  %v5470_v21 = vmul.f32 %v4834_v24, %v5203_v9 }
 0x228   :  { %v5458_v30 = vmul.f32 %v4834_v24, %v7834_v41  ;;  %v5462_v26 = vmul.f32 %v4834_v24, %v7835_v61  ;;  %v5474_v29 = vmul.f32 %v4834_v24, %v5209_v6  ;;  %v5478_v41 = vmul.f32 %v4834_v24, %v5215_v15 }
 0x229   :  { %v5482_v61 = vmul.f32 %v4834_v24, %v5221_v13  ;;  %v5486_v46 = vmul.f32 %v4834_v24, %v5227_v25  ;;  %v5490_v9 = vmul.f32 %v4834_v24, %v5233_v36  ;;  %v5494_v6 = vmul.f32 %v4834_v24, %v5239_v32 }
 0x22a   :  { %7836 = vst [vmem:[#allocation34_spill] sm:$0xff] %v5478_v41  ;;  %v3553_v15 = vpack.c.bf16 %v5300_v37, %v5300_v37  ;;  %v1377_v41 = vadd.f32 %v4869_v31, %v5245_v28  ;;  %v5502_v13 = vadd.f32 %v4869_v31, %v5249_v3  ;;  %v5506_v25 = vadd.f32 %v4869_v31, %v5253_v23 }
 0x22b   :  { %v5510_v36 = vadd.f32 %v4869_v31, %v5257_v14  ;;  %v5514_v24 = vadd.f32 %v4869_v31, %v5261_v34  ;;  %v5520_v28 = vadd.f32 %v4869_v31, %v5265_v38  ;;  %v5524_v3 = vadd.f32 %v4869_v31, %v5269_v54 }
 0x22c   :  { %v5516_v32 = vmax.f32 %v1377_v41, 0.0  ;;  %v5528_v23 = vadd.f32 %v4869_v31, %v5274_v62  ;;  %1764 = vst.msk [vmem:[%s7515_s5 + $0x8] sm:$0xf] %vm1761_vm1, %v3553_v15  ;;  %v5536_v14 = vadd.f32 %v4869_v31, %v5278_v59  ;;  %v5540_v34 = vadd.f32 %v4869_v31, %v5282_v0  ;;  %v7841_v15 = vld [vmem:[#allocation19_spill] sm:$0xff] }
 0x22d   :  { %v5544_v38 = vadd.f32 %v4869_v31, %v5286_v42  ;;  %v5548_v54 = vadd.f32 %v4869_v31, %v5290_v63  ;;  %v5554_v41 = vadd.f32 %v4869_v31, %v5294_v50  ;;  %v5558_v59 = vadd.f32 %v4869_v31, %v5298_v52  ;;  %v7843_v37 = vld [vmem:[#allocation20_spill] sm:$0xff] }
 0x22e   :  { %7837 = vst [vmem:[#allocation14_spill] sm:$0xff] %v5516_v32  ;;  %v1827_v62 = vsel %vm1826_vm2, %v5516_v32, -inf  ;;  %v5562_v0 = vadd.f32 %v4869_v31, %v5304_v40  ;;  %v5566_v42 = vadd.f32 %v4869_v31, %v5308_v55  ;;  %v5570_v63 = vadd.f32 %v4869_v31, %v5312_v7 }
 0x22f   :  { %1828 = vmax.xlane.f32.xlu0 %v1827_v62  ;;  %v5574_v50 = vadd.f32 %v4869_v31, %v5316_v11  ;;  %v5578_v52 = vadd.f32 %v4869_v31, %v5320_v35  ;;  %v5582_v40 = vadd.f32 %v4869_v31, %v5324_v16  ;;  %v5586_v55 = vadd.f32 %v4869_v31, %v5328_v27  ;;  %v7842_v62 = vld [vmem:[#allocation21_spill] sm:$0xff] }
 0x230   :  { %v5590_v7 = vadd.f32 %v4869_v31, %v5334_v19  ;;  %v5594_v11 = vadd.f32 %v4869_v31, %v5338_v8  ;;  %v5598_v35 = vadd.f32 %v4869_v31, %v5342_v1  ;;  %v5602_v16 = vadd.f32 %v4869_v31, %v5346_v20 }
 0x231   :  { %v5606_v27 = vadd.f32 %v4869_v31, %v5350_v5  ;;  %v5610_v19 = vadd.f32 %v4869_v31, %v5354_v47  ;;  %v5614_v8 = vadd.f32 %v4869_v31, %v5358_v43  ;;  %v5618_v1 = vadd.f32 %v4869_v31, %v5362_v2 }
 0x232   :  { %v5622_v20 = vadd.f32 %v4869_v31, %v5366_v45  ;;  %v5626_v5 = vadd.f32 %v4869_v31, %v5370_v49  ;;  %v5630_v47 = vadd.f32 %v4869_v31, %v5374_v57  ;;  %v5634_v43 = vadd.f32 %v4869_v31, %v5378_v33 }
 0x233   :  { %v5638_v2 = vadd.f32 %v4869_v31, %v5382_v17  ;;  %v5642_v45 = vadd.f32 %v4869_v31, %v5386_v10  ;;  %v5646_v49 = vadd.f32 %v4869_v31, %v5390_v12  ;;  %v5650_v57 = vadd.f32 %v4869_v31, %v5394_v4 }
 0x234   :  { %v5654_v33 = vadd.f32 %v4869_v31, %v5398_v44  ;;  %v5658_v17 = vadd.f32 %v4869_v31, %v5402_v53  ;;  %v5662_v10 = vadd.f32 %v4869_v31, %v5406_v51  ;;  %v5666_v12 = vadd.f32 %v4869_v31, %v5410_v48 }
 0x235   :  { %v5670_v4 = vadd.f32 %v4869_v31, %v5414_v60  ;;  %v5674_v44 = vadd.f32 %v4869_v31, %v7841_v15  ;;  %v5678_v53 = vadd.f32 %v4869_v31, %v7842_v62  ;;  %v5682_v51 = vadd.f32 %v4869_v31, %v7843_v37 }
 0x236   :  { %7838 = vst [vmem:[#allocation16_spill] sm:$0xff] %v5662_v10  ;;  %7839 = vst [vmem:[#allocation22_spill] sm:$0xff] %v5666_v12  ;;  %v7844_v10 = vld [vmem:[#allocation31_spill] sm:$0xff]  ;;  %v7845_v12 = vld [vmem:[#allocation32_spill] sm:$0xff]  ;;  %v5698_v62 = vadd.f32 %v4869_v31, %v5442_v18  ;;  %v5702_v37 = vadd.f32 %v4869_v31, %v5446_v56  ;;  %v5718_v18 = vadd.f32 %v4869_v31, %v5462_v26 }
 0x237   :  { %7840 = vst [vmem:[#allocation23_spill] sm:$0xff] %v5670_v4  ;;  %v5686_v48 = vadd.f32 %v4869_v31, %v7844_v10  ;;  %v5690_v60 = vadd.f32 %v4869_v31, %v7845_v12  ;;  %v7846_v4 = vld [vmem:[#allocation33_spill] sm:$0xff]  ;;  %v5706_v10 = vadd.f32 %v4869_v31, %v5450_v22  ;;  %v5710_v12 = vadd.f32 %v4869_v31, %v5454_v39 }
 0x238   :  { %v5694_v15 = vadd.f32 %v4869_v31, %v7846_v4  ;;  %v5714_v4 = vadd.f32 %v4869_v31, %v5458_v30  ;;  %v5722_v56 = vadd.f32 %v4869_v31, %v5466_v58  ;;  %v5726_v22 = vadd.f32 %v4869_v31, %v5470_v21 }
 0x239   :  { %7847 = vst [vmem:[#allocation24_spill] sm:$0xff] %v5710_v12  ;;  %v5730_v39 = vadd.f32 %v4869_v31, %v5474_v29  ;;  %v7848_v12 = vld [vmem:[#allocation34_spill] sm:$0xff]  ;;  %v5738_v26 = vadd.f32 %v4869_v31, %v5482_v61  ;;  %v5742_v58 = vadd.f32 %v4869_v31, %v5486_v46  ;;  %v5746_v21 = vadd.f32 %v4869_v31, %v5490_v9 }
 0x23a   :  { %v5734_v30 = vadd.f32 %v4869_v31, %v7848_v12  ;;  %v5750_v29 = vadd.f32 %v4869_v31, %v5494_v6  ;;  %v3551_v12 = vpack.c.bf16 %v5516_v32, %v5516_v32  ;;  %v5758_v61 = vmax.f32 %v5502_v13, 0.0 }
 0x23b   :  { %7850 = vst [vmem:[#allocation26_spill] sm:$0xff] %v5742_v58  ;;  %v5761_v46 = vmax.f32 %v5510_v36, 0.0  ;;  %v5764_v58 = vmax.f32 %v5514_v24, 0.0  ;;  %v5767_v9 = vmax.f32 %v5520_v28, 0.0  ;;  %v5770_v31 = vmax.f32 %v5524_v3, 0.0 }
 0x23c   :  { %7849 = vst [vmem:[#allocation25_spill] sm:$0xff] %v5734_v30  ;;  %v5755_v30 = vmax.f32 %v5506_v25, 0.0  ;;  %7852 = vst [vmem:[#allocation28_spill] sm:$0xff] %v5758_v61  ;;  %v5773_v6 = vmax.f32 %v5528_v23, 0.0  ;;  %v5776_v25 = vmax.f32 %v5536_v14, 0.0  ;;  %v5785_v36 = vmax.f32 %v5540_v34, 0.0 }
 0x23d   :  { %7853 = vst [vmem:[#allocation29_spill] sm:$0xff] %v5767_v9  ;;  %7854 = vst [vmem:[#allocation30_spill] sm:$0xff] %v5770_v31  ;;  %v5788_v24 = vmax.f32 %v5544_v38, 0.0  ;;  %v5791_v28 = vmax.f32 %v5548_v54, 0.0  ;;  %v5794_v3 = vmax.f32 %v5554_v41, 0.0  ;;  %v5797_v23 = vmax.f32 %v5558_v59, 0.0 }
 0x23e   :  { %7851 = vst [vmem:[#allocation27_spill] sm:$0xff] %v5755_v30  ;;  %7855 = vst [vmem:[#allocation5_spill] sm:$0xff] %v5773_v6  ;;  %v1836_v13 = vsel %vm1826_vm2, %v5755_v30, -inf  ;;  %v5800_v14 = vmax.f32 %v5562_v0, 0.0  ;;  %v5806_v34 = vmax.f32 %v5570_v63, 0.0  ;;  %v5809_v38 = vmax.f32 %v5574_v50, 0.0 }
 0x23f   :  { %7856 = vst [vmem:[#allocation7_spill] sm:$0xff] %v5776_v25  ;;  %1762 = vst.msk [vmem:[%s7515_s5] sm:$0xf] %vm1761_vm1, %v3551_v12  ;;  %1837 = vmax.xlane.f32.xlu1 %v1836_v13  ;;  %v5803_v12 = vmax.f32 %v5566_v42, 0.0  ;;  %v5812_v54 = vmax.f32 %v5578_v52, 0.0  ;;  %v5815_v41 = vmax.f32 %v5582_v40, 0.0 }
 0x240   :  { %7857 = vst [vmem:[#allocation8_spill] sm:$0xff] %v5797_v23  ;;  %v5818_v59 = vmax.f32 %v5586_v55, 0.0  ;;  %v5821_v0 = vmax.f32 %v5590_v7, 0.0  ;;  %v5824_v42 = vmax.f32 %v5594_v11, 0.0  ;;  %v5827_v63 = vmax.f32 %v5598_v35, 0.0 }
 0x241   :  { %7858 = vst [vmem:[#allocation9_spill] sm:$0xff] %v5815_v41  ;;  %v5830_v50 = vmax.f32 %v5602_v16, 0.0  ;;  %v5833_v52 = vmax.f32 %v5606_v27, 0.0  ;;  %v5836_v40 = vmax.f32 %v5610_v19, 0.0  ;;  %v5839_v55 = vmax.f32 %v5614_v8, 0.0 }
 0x242   :  { %7859 = vst [vmem:[#allocation10_spill] sm:$0xff] %v5818_v59  ;;  %7860 = vst [vmem:[#allocation11_spill] sm:$0xff] %v5821_v0  ;;  %v5842_v7 = vmax.f32 %v5618_v1, 0.0  ;;  %v5845_v11 = vmax.f32 %v5622_v20, 0.0  ;;  %v5848_v35 = vmax.f32 %v5626_v5, 0.0  ;;  %v5851_v16 = vmax.f32 %v5630_v47, 0.0 }
 0x243   :  { %7861 = vst [vmem:[#allocation12_spill] sm:$0xff] %v5824_v42  ;;  %7862 = vst [vmem:[#allocation13_spill] sm:$0xff] %v5833_v52  ;;  %v5854_v27 = vmax.f32 %v5634_v43, 0.0  ;;  %v5857_v19 = vmax.f32 %v5638_v2, 0.0  ;;  %v5860_v8 = vmax.f32 %v5642_v45, 0.0  ;;  %v5863_v1 = vmax.f32 %v5646_v49, 0.0 }
 0x244   :  { %7863 = vst [vmem:[#allocation15_spill] sm:$0xff] %v5836_v40  ;;  %7864 = vst [vmem:[#allocation17_spill] sm:$0xff] %v5839_v55  ;;  %v5866_v20 = vmax.f32 %v5650_v57, 0.0  ;;  %v5869_v5 = vmax.f32 %v5654_v33, 0.0  ;;  %v5872_v47 = vmax.f32 %v5658_v17, 0.0  ;;  %v7875_v43 = vld [vmem:[#allocation16_spill] sm:$0xff] }
 0x245   :  { %7865 = vst [vmem:[#allocation19_spill] sm:$0xff] %v5842_v7  ;;  %7866 = vst [vmem:[#allocation21_spill] sm:$0xff] %v5845_v11  ;;  %v5875_v13 = vmax.f32 %v7875_v43, 0.0  ;;  %v7877_v2 = vld [vmem:[#allocation22_spill] sm:$0xff]  ;;  %v7879_v45 = vld [vmem:[#allocation23_spill] sm:$0xff]  ;;  %v5884_v49 = vmax.f32 %v5674_v44, 0.0 }
 0x246   :  { %7867 = vst [vmem:[#allocation20_spill] sm:$0xff] %v5848_v35  ;;  %7868 = vst [vmem:[#allocation31_spill] sm:$0xff] %v5851_v16  ;;  %v5878_v32 = vmax.f32 %v7877_v2, 0.0  ;;  %v5887_v57 = vmax.f32 %v5678_v53, 0.0  ;;  %v5890_v33 = vmax.f32 %v5682_v51, 0.0  ;;  %v5893_v17 = vmax.f32 %v5686_v48, 0.0 }
 0x247   :  { %7869 = vst [vmem:[#allocation32_spill] sm:$0xff] %v5857_v19  ;;  %7870 = vst [vmem:[#allocation33_spill] sm:$0xff] %v5860_v8  ;;  %v5881_v8 = vmax.f32 %v7879_v45, 0.0  ;;  %v5896_v43 = vmax.f32 %v5690_v60, 0.0  ;;  %v5899_v2 = vmax.f32 %v5694_v15, 0.0  ;;  %v5902_v45 = vmax.f32 %v5698_v62, 0.0 }
 0x248   :  { %7871 = vst [vmem:[#allocation34_spill] sm:$0xff] %v5863_v1  ;;  %7872 = vst [vmem:[#allocation35_spill] sm:$0xff] %v5866_v20  ;;  %v5905_v44 = vmax.f32 %v5702_v37, 0.0  ;;  %v5908_v53 = vmax.f32 %v5706_v10, 0.0  ;;  %v7890_v51 = vld [vmem:[#allocation24_spill] sm:$0xff]  ;;  %v5914_v48 = vmax.f32 %v5714_v4, 0.0 }
 0x249   :  { %7873 = vst [vmem:[#allocation36_spill] sm:$0xff] %v5869_v5  ;;  %7874 = vst [vmem:[#allocation37_spill] sm:$0xff] %v5872_v47  ;;  %v5917_v60 = vmax.f32 %v5718_v18, 0.0  ;;  %v5920_v15 = vmax.f32 %v5722_v56, 0.0  ;;  %v5923_v62 = vmax.f32 %v5726_v22, 0.0  ;;  %v5926_v37 = vmax.f32 %v5730_v39, 0.0 }
 0x24a   :  { %7876 = vst [vmem:[#allocation16_spill] sm:$0xff] %v5875_v13  ;;  %7878 = vst [vmem:[#allocation22_spill] sm:$0xff] %v5878_v32  ;;  %v7897_v10 = vld [vmem:[#allocation25_spill] sm:$0xff]  ;;  %v7900_v4 = vld [vmem:[#allocation26_spill] sm:$0xff]  ;;  %v5938_v18 = vmax.f32 %v5746_v21, 0.0  ;;  %v5941_v56 = vmax.f32 %v5750_v29, 0.0  ;;  %v3554_v22 = vpack.c.bf16 %v5755_v30, %v5755_v30  ;;  %v3556_v21 = vpack.c.bf16 %v5764_v58, %v5764_v58 }
 0x24b   :  { %7880 = vst [vmem:[#allocation23_spill] sm:$0xff] %v5881_v8  ;;  %7881 = vst [vmem:[#allocation38_spill] sm:$0xff] %v5884_v49  ;;  %v1830_v39 = vsel %vm1826_vm2, %v5758_v61, -inf  ;;  %v3557_v29 = vpack.c.bf16 %v5767_v9, %v5767_v9  ;;  %v3559_v30 = vpack.c.bf16 %v5773_v6, %v5773_v6  ;;  %v3562_v9 = vpack.c.bf16 %v5788_v24, %v5788_v24 }
 0x24c   :  { %7882 = vst [vmem:[#allocation39_spill] sm:$0xff] %v5887_v57  ;;  %7883 = vst [vmem:[#allocation40_spill] sm:$0xff] %v5890_v33  ;;  %v5911_v33 = vmax.f32 %v7890_v51, 0.0  ;;  %v5932_v51 = vmax.f32 %v5738_v26, 0.0  ;;  %1831 = vmax.xlane.f32.xlu0 %v1830_v39  ;;  %v3552_v26 = vpack.c.bf16 %v5758_v61, %v5758_v61  ;;  %v3560_v39 = vpack.c.bf16 %v5776_v25, %v5776_v25 }
 0x24d   :  { %7884 = vst [vmem:[#allocation41_spill] sm:$0xff] %v5893_v17  ;;  %7885 = vst [vmem:[#allocation42_spill] sm:$0xff] %v5896_v43  ;;  %v3561_v61 = vpack.c.bf16 %v5785_v36, %v5785_v36  ;;  %v3564_v6 = vpack.c.bf16 %v5794_v3, %v5794_v3  ;;  %v3565_v25 = vpack.c.bf16 %v5797_v23, %v5797_v23 }
 0x24e   :  { %7886 = vst [vmem:[#allocation43_spill] sm:$0xff] %v5899_v2  ;;  %7887 = vst [vmem:[#allocation44_spill] sm:$0xff] %v5902_v45  ;;  %v3568_v23 = vpack.c.bf16 %v5806_v34, %v5806_v34 }
 0x24f   :  { %7888 = vst [vmem:[#allocation45_spill] sm:$0xff] %v5905_v44  ;;  %7889 = vst [vmem:[#allocation46_spill] sm:$0xff] %v5908_v53  ;;  %v5929_v53 = vmax.f32 %v7897_v10, 0.0  ;;  %v3555_v10 = vpack.c.bf16 %v5761_v46, %v5761_v46 }
 0x250   :  { %7891 = vst [vmem:[#allocation24_spill] sm:$0xff] %v5911_v33  ;;  %7892 = vst [vmem:[#allocation47_spill] sm:$0xff] %v5914_v48  ;;  %v5935_v48 = vmax.f32 %v7900_v4, 0.0  ;;  %v3558_v4 = vpack.c.bf16 %v5770_v31, %v5770_v31  ;;  %v3563_v31 = vpack.c.bf16 %v5791_v28, %v5791_v28 }
 0x251   :  { %7893 = vst [vmem:[#allocation48_spill] sm:$0xff] %v5917_v60  ;;  %7894 = vst [vmem:[#allocation49_spill] sm:$0xff] %v5920_v15 }
 0x252   :  { %7895 = vst [vmem:[#allocation50_spill] sm:$0xff] %v5923_v62  ;;  %7896 = vst [vmem:[#allocation51_spill] sm:$0xff] %v5926_v37 }
 0x253   :  { %7898 = vst [vmem:[#allocation25_spill] sm:$0xff] %v5929_v53  ;;  %7899 = vst [vmem:[#allocation52_spill] sm:$0xff] %v5932_v51 }
 0x254   :  { %7901 = vst [vmem:[#allocation26_spill] sm:$0xff] %v5935_v48  ;;  %7902 = vst [vmem:[#allocation53_spill] sm:$0xff] %v5938_v18 }
 0x255   :  { %7903 = vst [vmem:[#allocation54_spill] sm:$0xff] %v5941_v56  ;;  %1765 = vst.msk [vmem:[%s7515_s5 + $0xc] sm:$0xf] %vm1761_vm1, %v3554_v22  ;;  %v3566_v22 = vpack.c.bf16 %v5800_v14, %v5800_v14 }
 0x256   :  { %1763 = vst.msk [vmem:[%s7515_s5 + $0x4] sm:$0xf] %vm1761_vm1, %v3552_v26  ;;  %1766 = vst.msk [vmem:[%s7515_s5 + $0x10] sm:$0xf] %vm1761_vm1, %v3555_v10  ;;  %v3567_v26 = vpack.c.bf16 %v5803_v12, %v5803_v12  ;;  %v3569_v10 = vpack.c.bf16 %v5809_v38, %v5809_v38 }
 0x257   :  { %1767 = vst.msk [vmem:[%s7515_s5 + $0x14] sm:$0xf] %vm1761_vm1, %v3556_v21  ;;  %1768 = vst.msk [vmem:[%s7515_s5 + $0x18] sm:$0xf] %vm1761_vm1, %v3557_v29  ;;  %v3570_v21 = vpack.c.bf16 %v5812_v54, %v5812_v54  ;;  %v3571_v29 = vpack.c.bf16 %v5815_v41, %v5815_v41 }
 0x258   :  { %1769 = vst.msk [vmem:[%s7515_s5 + $0x1c] sm:$0xf] %vm1761_vm1, %v3558_v4  ;;  %1770 = vst.msk [vmem:[%s7515_s5 + $0x20] sm:$0xf] %vm1761_vm1, %v3559_v30  ;;  %v3572_v4 = vpack.c.bf16 %v5818_v59, %v5818_v59  ;;  %v3573_v30 = vpack.c.bf16 %v5821_v0, %v5821_v0 }
 0x259   :  { %1771 = vst.msk [vmem:[%s7515_s5 + $0x24] sm:$0xf] %vm1761_vm1, %v3560_v39  ;;  %1772 = vst.msk [vmem:[%s7515_s5 + $0x28] sm:$0xf] %vm1761_vm1, %v3561_v61  ;;  %v3574_v61 = vpack.c.bf16 %v5824_v42, %v5824_v42  ;;  %v3576_v39 = vpack.c.bf16 %v5830_v50, %v5830_v50 }
 0x25a   :  { %1773 = vst.msk [vmem:[%s7515_s5 + $0x2c] sm:$0xf] %vm1761_vm1, %v3562_v9  ;;  %1774 = vst.msk [vmem:[%s7515_s5 + $0x30] sm:$0xf] %vm1761_vm1, %v3563_v31  ;;  %v3575_v9 = vpack.c.bf16 %v5827_v63, %v5827_v63  ;;  %v3577_v31 = vpack.c.bf16 %v5833_v52, %v5833_v52 }
 0x25b   :  { %1775 = vst.msk [vmem:[%s7515_s5 + $0x34] sm:$0xf] %vm1761_vm1, %v3564_v6  ;;  %1776 = vst.msk [vmem:[%s7515_s5 + $0x38] sm:$0xf] %vm1761_vm1, %v3565_v25  ;;  %v3578_v6 = vpack.c.bf16 %v5836_v40, %v5836_v40  ;;  %v3579_v25 = vpack.c.bf16 %v5839_v55, %v5839_v55 }
 0x25c   :  { %1777 = vst.msk [vmem:[%s7515_s5 + $0x3c] sm:$0xf] %vm1761_vm1, %v3566_v22  ;;  %1778 = vst.msk [vmem:[%s7515_s5 + $0x40] sm:$0xf] %vm1761_vm1, %v3567_v26  ;;  %v3580_v22 = vpack.c.bf16 %v5842_v7, %v5842_v7  ;;  %v3581_v26 = vpack.c.bf16 %v5845_v11, %v5845_v11 }
 0x25d   :  { %1779 = vst.msk [vmem:[%s7515_s5 + $0x44] sm:$0xf] %vm1761_vm1, %v3568_v23  ;;  %1780 = vst.msk [vmem:[%s7515_s5 + $0x48] sm:$0xf] %vm1761_vm1, %v3569_v10  ;;  %v3582_v23 = vpack.c.bf16 %v5848_v35, %v5848_v35  ;;  %v3583_v10 = vpack.c.bf16 %v5851_v16, %v5851_v16 }
 0x25e   :  { %1781 = vst.msk [vmem:[%s7515_s5 + $0x4c] sm:$0xf] %vm1761_vm1, %v3570_v21  ;;  %1782 = vst.msk [vmem:[%s7515_s5 + $0x50] sm:$0xf] %vm1761_vm1, %v3571_v29  ;;  %v3584_v21 = vpack.c.bf16 %v5854_v27, %v5854_v27  ;;  %v3585_v29 = vpack.c.bf16 %v5857_v19, %v5857_v19  ;;  %v3588_v19 = vpack.c.bf16 %v5866_v20, %v5866_v20 }
 0x25f   :  { %1783 = vst.msk [vmem:[%s7515_s5 + $0x54] sm:$0xf] %vm1761_vm1, %v3572_v4  ;;  %1784 = vst.msk [vmem:[%s7515_s5 + $0x58] sm:$0xf] %vm1761_vm1, %v3573_v30  ;;  %v7904_v4 = vld [vmem:[#allocation33_spill] sm:$0xff] }
 0x260   :  { %1785 = vst.msk [vmem:[%s7515_s5 + $0x5c] sm:$0xf] %vm1761_vm1, %v3574_v61  ;;  %1786 = vst.msk [vmem:[%s7515_s5 + $0x60] sm:$0xf] %vm1761_vm1, %v3575_v9  ;;  %v3586_v30 = vpack.c.bf16 %v7904_v4, %v7904_v4  ;;  %v3587_v61 = vpack.c.bf16 %v5863_v1, %v5863_v1  ;;  %v3589_v9 = vpack.c.bf16 %v5869_v5, %v5869_v5 }
 0x261   :  { %1787 = vst.msk [vmem:[%s7515_s5 + $0x64] sm:$0xf] %vm1761_vm1, %v3576_v39  ;;  %1788 = vst.msk [vmem:[%s7515_s5 + $0x68] sm:$0xf] %vm1761_vm1, %v3577_v31  ;;  %v3590_v39 = vpack.c.bf16 %v5872_v47, %v5872_v47  ;;  %v3591_v31 = vpack.c.bf16 %v5875_v13, %v5875_v13 }
 0x262   :  { %1789 = vst.msk [vmem:[%s7515_s5 + $0x6c] sm:$0xf] %vm1761_vm1, %v3578_v6  ;;  %1790 = vst.msk [vmem:[%s7515_s5 + $0x70] sm:$0xf] %vm1761_vm1, %v3579_v25  ;;  %v3592_v6 = vpack.c.bf16 %v5878_v32, %v5878_v32  ;;  %v3593_v25 = vpack.c.bf16 %v5881_v8, %v5881_v8 }
 0x263   :  { %1791 = vst.msk [vmem:[%s7515_s5 + $0x74] sm:$0xf] %vm1761_vm1, %v3580_v22  ;;  %1792 = vst.msk [vmem:[%s7515_s5 + $0x78] sm:$0xf] %vm1761_vm1, %v3581_v26  ;;  %v3594_v22 = vpack.c.bf16 %v5884_v49, %v5884_v49  ;;  %v3595_v26 = vpack.c.bf16 %v5887_v57, %v5887_v57 }
 0x264   :  { %1793 = vst.msk [vmem:[%s7515_s5 + $0x7c] sm:$0xf] %vm1761_vm1, %v3582_v23  ;;  %1794 = vst.msk [vmem:[%s7515_s5 + $0x80] sm:$0xf] %vm1761_vm1, %v3583_v10  ;;  %v7905_v23 = vld [vmem:[#allocation40_spill] sm:$0xff]  ;;  %v3597_v10 = vpack.c.bf16 %v5893_v17, %v5893_v17 }
 0x265   :  { %1795 = vst.msk [vmem:[%s7515_s5 + $0x84] sm:$0xf] %vm1761_vm1, %v3584_v21  ;;  %1796 = vst.msk [vmem:[%s7515_s5 + $0x88] sm:$0xf] %vm1761_vm1, %v3585_v29  ;;  %v3596_v8 = vpack.c.bf16 %v7905_v23, %v7905_v23  ;;  %v3598_v21 = vpack.c.bf16 %v5896_v43, %v5896_v43  ;;  %v3599_v29 = vpack.c.bf16 %v5899_v2, %v5899_v2 }
 0x266   :  { %1797 = vst.msk [vmem:[%s7515_s5 + $0x8c] sm:$0xf] %vm1761_vm1, %v3586_v30  ;;  %1798 = vst.msk [vmem:[%s7515_s5 + $0x90] sm:$0xf] %vm1761_vm1, %v3587_v61  ;;  %v3600_v30 = vpack.c.bf16 %v5902_v45, %v5902_v45  ;;  %v3601_v61 = vpack.c.bf16 %v5905_v44, %v5905_v44  ;;  %v7907_v44 = vld [vmem:[#allocation47_spill] sm:$0xff] }
 0x267   :  { %1799 = vst.msk [vmem:[%s7515_s5 + $0x94] sm:$0xf] %vm1761_vm1, %v3588_v19  ;;  %1800 = vst.msk [vmem:[%s7515_s5 + $0x98] sm:$0xf] %vm1761_vm1, %v3589_v9  ;;  %v7906_v19 = vld [vmem:[#allocation46_spill] sm:$0xff]  ;;  %v3604_v45 = vpack.c.bf16 %v7907_v44, %v7907_v44 }
 0x268   :  { %1801 = vst.msk [vmem:[%s7515_s5 + $0x9c] sm:$0xf] %vm1761_vm1, %v3590_v39  ;;  %1802 = vst.msk [vmem:[%s7515_s5 + $0xa0] sm:$0xf] %vm1761_vm1, %v3591_v31  ;;  %v3602_v9 = vpack.c.bf16 %v7906_v19, %v7906_v19  ;;  %v3603_v39 = vpack.c.bf16 %v5911_v33, %v5911_v33  ;;  %v3605_v31 = vpack.c.bf16 %v5917_v60, %v5917_v60 }
 0x269   :  { %1803 = vst.msk [vmem:[%s7515_s5 + $0xa4] sm:$0xf] %vm1761_vm1, %v3592_v6  ;;  %1804 = vst.msk [vmem:[%s7515_s5 + $0xa8] sm:$0xf] %vm1761_vm1, %v3593_v25  ;;  %v3606_v6 = vpack.c.bf16 %v5920_v15, %v5920_v15  ;;  %v3607_v25 = vpack.c.bf16 %v5923_v62, %v5923_v62 }
 0x26a   :  { %1805 = vst.msk [vmem:[%s7515_s5 + $0xac] sm:$0xf] %vm1761_vm1, %v3594_v22  ;;  %1806 = vst.msk [vmem:[%s7515_s5 + $0xb0] sm:$0xf] %vm1761_vm1, %v3595_v26  ;;  %v3608_v22 = vpack.c.bf16 %v5926_v37, %v5926_v37  ;;  %v3609_v26 = vpack.c.bf16 %v5929_v53, %v5929_v53 }
 0x26b   :  { %1807 = vst.msk [vmem:[%s7515_s5 + $0xb4] sm:$0xf] %vm1761_vm1, %v3596_v8  ;;  %1808 = vst.msk [vmem:[%s7515_s5 + $0xb8] sm:$0xf] %vm1761_vm1, %v3597_v10  ;;  %v3610_v8 = vpack.c.bf16 %v5932_v51, %v5932_v51  ;;  %v3611_v10 = vpack.c.bf16 %v5935_v48, %v5935_v48 }
 0x26c   :  { %1809 = vst.msk [vmem:[%s7515_s5 + $0xbc] sm:$0xf] %vm1761_vm1, %v3598_v21  ;;  %1810 = vst.msk [vmem:[%s7515_s5 + $0xc0] sm:$0xf] %vm1761_vm1, %v3599_v29  ;;  %v3612_v21 = vpack.c.bf16 %v5938_v18, %v5938_v18  ;;  %v3613_v29 = vpack.c.bf16 %v5941_v56, %v5941_v56 }
 0x26d   :  { %1811 = vst.msk [vmem:[%s7515_s5 + $0xc4] sm:$0xf] %vm1761_vm1, %v3600_v30  ;;  %1812 = vst.msk [vmem:[%s7515_s5 + $0xc8] sm:$0xf] %vm1761_vm1, %v3601_v61  ;;  %v1842_v30 = vsel %vm1826_vm2, %v5764_v58, -inf  ;;  %v7908_v61 = vld [vmem:[#allocation28_spill] sm:$0xff] }
 0x26e   :  { %1813 = vst.msk [vmem:[%s7515_s5 + $0xcc] sm:$0xf] %vm1761_vm1, %v3602_v9  ;;  %1814 = vst.msk [vmem:[%s7515_s5 + $0xd0] sm:$0xf] %vm1761_vm1, %v3603_v39  ;;  %1843 = vmax.xlane.f32.xlu1 %v1842_v30  ;;  %v2416_v9 = vsel %vm2412_vm3, %v7908_v61, -inf  ;;  %v7909_v39 = vld [vmem:[#allocation14_spill] sm:$0xff] }
 0x26f   :  { %1815 = vst.msk [vmem:[%s7515_s5 + $0xd4] sm:$0xf] %vm1761_vm1, %v3604_v45  ;;  %1816 = vst.msk [vmem:[%s7515_s5 + $0xd8] sm:$0xf] %vm1761_vm1, %v3605_v31  ;;  %v1839_v45 = vsel %vm1826_vm2, %v5761_v46, -inf  ;;  %v2413_v31 = vsel %vm2412_vm3, %v7909_v39, -inf }
 0x270   :  { %1817 = vst.msk [vmem:[%s7515_s5 + $0xdc] sm:$0xf] %vm1761_vm1, %v3606_v6  ;;  %1818 = vst.msk [vmem:[%s7515_s5 + $0xe0] sm:$0xf] %vm1761_vm1, %v3607_v25  ;;  %1840 = vmax.xlane.f32.xlu0 %v1839_v45  ;;  %v7910_v6 = vld [vmem:[#allocation27_spill] sm:$0xff]  ;;  %v7913_v30 = vld [vmem:[#allocation29_spill] sm:$0xff] }
 0x271   :  { %1819 = vst.msk [vmem:[%s7515_s5 + $0xe4] sm:$0xf] %vm1761_vm1, %v3608_v22  ;;  %1820 = vst.msk [vmem:[%s7515_s5 + $0xe8] sm:$0xf] %vm1761_vm1, %v3609_v26  ;;  %v2422_v25 = vsel %vm2412_vm3, %v7910_v6, -inf  ;;  %v7911_v22 = vld [vmem:[#allocation18_spill] sm:$0xff] }
 0x272   :  { %1821 = vst.msk [vmem:[%s7515_s5 + $0xec] sm:$0xf] %vm1761_vm1, %v3610_v8  ;;  %1822 = vst.msk [vmem:[%s7515_s5 + $0xf0] sm:$0xf] %vm1761_vm1, %v3611_v10  ;;  %2417 = vmax.xlane.f32.xlu1 %v2416_v9  ;;  %v2419_v26 = vsel %vm2412_vm3, %v7911_v22, -inf  ;;  %v2428_v8 = vsel %vm2412_vm3, %v5764_v58, -inf }
 0x273   :  { %1823 = vst.msk [vmem:[%s7515_s5 + $0xf4] sm:$0xf] %vm1761_vm1, %v3612_v21  ;;  %1824 = vst.msk [vmem:[%s7515_s5 + $0xf8] sm:$0xf] %vm1761_vm1, %v3613_v29  ;;  %v2425_v10 = vsel %vm2412_vm3, %v5761_v46, -inf  ;;  %v7912_v21 = vld [vmem:[#allocation30_spill] sm:$0xff] }
 0x274   :  { %2414 = vmax.xlane.f32.xlu0 %v2413_v31  ;;  %v2434_v29 = vsel %vm2412_vm3, %v7912_v21, -inf  ;;  %v2431_v45 = vsel %vm2412_vm3, %v7913_v30, -inf  ;;  %v7914_v9 = vld [vmem:[#allocation7_spill] sm:$0xff]  ;;  %s3783_s5 = smov 120  }
 0x275   :  { %v2440_v31 = vsel %vm2412_vm3, %v7914_v9, -inf }
 0x276   :  { %2423 = vmax.xlane.f32.xlu1 %v2422_v25  ;;  %v7915_v25 = vld [vmem:[#allocation5_spill] sm:$0xff] }
 0x278   :  { %2420 = vmax.xlane.f32.xlu0 %v2419_v26  ;;  %v2437_v26 = vsel %vm2412_vm3, %v7915_v25, -inf }
 0x27a   :  { %2429 = vmax.xlane.f32.xlu1 %v2428_v8  ;;  %v2446_v8 = vsel %vm2412_vm3, %v5788_v24, -inf }
 0x27c   :  { %2426 = vmax.xlane.f32.xlu0 %v2425_v10  ;;  %v2443_v10 = vsel %vm2412_vm3, %v5785_v36, -inf }
 0x27e   :  { %2435 = vmax.xlane.f32.xlu1 %v2434_v29  ;;  %v2452_v29 = vsel %vm2412_vm3, %v5794_v3, -inf }
 0x280   :  { %2432 = vmax.xlane.f32.xlu0 %v2431_v45  ;;  %v2449_v45 = vsel %vm2412_vm3, %v5791_v28, -inf }
 0x282   :  { %2441 = vmax.xlane.f32.xlu1 %v2440_v31  ;;  %v2458_v31 = vsel %vm2412_vm3, %v5800_v14, -inf }
 0x284   :  { %2438 = vmax.xlane.f32.xlu0 %v2437_v26  ;;  %v7916_v26 = vld [vmem:[#allocation8_spill] sm:$0xff] }
 0x285   :  { %v2455_v56 = vsel %vm2412_vm3, %v7916_v26, -inf }
 0x286   :  { %2447 = vmax.xlane.f32.xlu1 %v2446_v8  ;;  %v2464_v8 = vsel %vm2412_vm3, %v5806_v34, -inf }
 0x288   :  { %2444 = vmax.xlane.f32.xlu0 %v2443_v10  ;;  %v2461_v10 = vsel %vm2412_vm3, %v5803_v12, -inf }
 0x28a   :  { %2453 = vmax.xlane.f32.xlu1 %v2452_v29  ;;  %v2470_v29 = vsel %vm2412_vm3, %v5812_v54, -inf }
 0x28c   :  { %2450 = vmax.xlane.f32.xlu0 %v2449_v45  ;;  %v2467_v45 = vsel %vm2412_vm3, %v5809_v38, -inf }
 0x28e   :  { %2459 = vmax.xlane.f32.xlu1 %v2458_v31  ;;  %v2476_v31 = vsel %vm2412_vm3, %v5818_v59, -inf }
 0x290   :  { %2456 = vmax.xlane.f32.xlu0 %v2455_v56  ;;  %v2473_v56 = vsel %vm2412_vm3, %v5815_v41, -inf }
 0x292   :  { %2465 = vmax.xlane.f32.xlu1 %v2464_v8  ;;  %v2482_v8 = vsel %vm2412_vm3, %v5824_v42, -inf }
 0x294   :  { %2462 = vmax.xlane.f32.xlu0 %v2461_v10  ;;  %v2479_v10 = vsel %vm2412_vm3, %v5821_v0, -inf }
 0x296   :  { %2471 = vmax.xlane.f32.xlu1 %v2470_v29  ;;  %v2488_v29 = vsel %vm2412_vm3, %v5830_v50, -inf }
 0x298   :  { %2468 = vmax.xlane.f32.xlu0 %v2467_v45  ;;  %v2485_v45 = vsel %vm2412_vm3, %v5827_v63, -inf }
 0x29a   :  { %2477 = vmax.xlane.f32.xlu1 %v2476_v31  ;;  %v2494_v31 = vsel %vm2412_vm3, %v5836_v40, -inf }
 0x29c   :  { %2474 = vmax.xlane.f32.xlu0 %v2473_v56  ;;  %v2491_v56 = vsel %vm2412_vm3, %v5833_v52, -inf }
 0x29e   :  { %2483 = vmax.xlane.f32.xlu1 %v2482_v8  ;;  %v2500_v8 = vsel %vm2412_vm3, %v5842_v7, -inf }
 0x2a0   :  { %2480 = vmax.xlane.f32.xlu0 %v2479_v10  ;;  %v2497_v10 = vsel %vm2412_vm3, %v5839_v55, -inf }
 0x2a2   :  { %2489 = vmax.xlane.f32.xlu1 %v2488_v29  ;;  %v2506_v29 = vsel %vm2412_vm3, %v5848_v35, -inf }
 0x2a4   :  { %2486 = vmax.xlane.f32.xlu0 %v2485_v45  ;;  %v2503_v45 = vsel %vm2412_vm3, %v5845_v11, -inf }
 0x2a6   :  { %2495 = vmax.xlane.f32.xlu1 %v2494_v31  ;;  %v2512_v31 = vsel %vm2412_vm3, %v5854_v27, -inf }
 0x2a8   :  { %2492 = vmax.xlane.f32.xlu0 %v2491_v56  ;;  %v2509_v56 = vsel %vm2412_vm3, %v5851_v16, -inf }
 0x2aa   :  { %2501 = vmax.xlane.f32.xlu1 %v2500_v8  ;;  %v1845_v8 = vsel %vm1826_vm2, %v7913_v30, -inf }
 0x2ac   :  { %2498 = vmax.xlane.f32.xlu0 %v2497_v10  ;;  %v7917_v10 = vld [vmem:[#allocation32_spill] sm:$0xff] }
 0x2ad   :  { %v2515_v18 = vsel %vm2412_vm3, %v7917_v10, -inf }
 0x2ae   :  { %2507 = vmax.xlane.f32.xlu1 %v2506_v29  ;;  %v1848_v29 = vsel %vm1826_vm2, %v7912_v21, -inf }
 0x2b0   :  { %2504 = vmax.xlane.f32.xlu0 %v2503_v45  ;;  %v2518_v45 = vsel %vm2412_vm3, %v7904_v4, -inf }
 0x2b2   :  { %2513 = vmax.xlane.f32.xlu1 %v2512_v31  ;;  %v1851_v31 = vsel %vm1826_vm2, %v7915_v25, -inf }
 0x2b4   :  { %2510 = vmax.xlane.f32.xlu0 %v2509_v56  ;;  %v2521_v56 = vsel %vm2412_vm3, %v5863_v1, -inf  ;;  %v1911_v1 = vsel %vm1826_vm2, %v5839_v55, -inf }
 0x2b6   :  { %1846 = vmax.xlane.f32.xlu1 %v1845_v8  ;;  %v1854_v8 = vsel %vm1826_vm2, %v7914_v9, -inf }
 0x2b8   :  { %2516 = vmax.xlane.f32.xlu0 %v2515_v18  ;;  %v2524_v18 = vsel %vm2412_vm3, %v5866_v20, -inf }
 0x2ba   :  { %1849 = vmax.xlane.f32.xlu1 %v1848_v29  ;;  %v1857_v29 = vsel %vm1826_vm2, %v5785_v36, -inf }
 0x2bc   :  { %2519 = vmax.xlane.f32.xlu0 %v2518_v45  ;;  %v2527_v45 = vsel %vm2412_vm3, %v5869_v5, -inf }
 0x2be   :  { %1852 = vmax.xlane.f32.xlu1 %v1851_v31  ;;  %v1860_v31 = vsel %vm1826_vm2, %v5788_v24, -inf }
 0x2c0   :  { %2522 = vmax.xlane.f32.xlu0 %v2521_v56  ;;  %v2530_v56 = vsel %vm2412_vm3, %v5872_v47, -inf }
 0x2c2   :  { %1855 = vmax.xlane.f32.xlu1 %v1854_v8  ;;  %v1866_v8 = vsel %vm1826_vm2, %v5794_v3, -inf }
 0x2c4   :  { %2525 = vmax.xlane.f32.xlu0 %v2524_v18  ;;  %v2533_v18 = vsel %vm2412_vm3, %v5875_v13, -inf }
 0x2c6   :  { %1858 = vmax.xlane.f32.xlu1 %v1857_v29  ;;  %v2545_v29 = vsel %vm2412_vm3, %v5887_v57, -inf }
 0x2c8   :  { %2528 = vmax.xlane.f32.xlu0 %v2527_v45  ;;  %v1863_v45 = vsel %vm1826_vm2, %v5791_v28, -inf }
 0x2ca   :  { %1861 = vmax.xlane.f32.xlu1 %v1860_v31  ;;  %v2548_v31 = vsel %vm2412_vm3, %v7905_v23, -inf }
 0x2cc   :  { %2531 = vmax.xlane.f32.xlu0 %v2530_v56  ;;  %v2536_v56 = vsel %vm2412_vm3, %v5878_v32, -inf }
 0x2ce   :  { %1867 = vmax.xlane.f32.xlu1 %v1866_v8  ;;  %v2551_v8 = vsel %vm2412_vm3, %v5893_v17, -inf  ;;  %v7919_v17 = vld [vmem:[#allocation44_spill] sm:$0xff] }
 0x2d0   :  { %2534 = vmax.xlane.f32.xlu0 %v2533_v18  ;;  %v7918_v18 = vld [vmem:[#allocation23_spill] sm:$0xff] }
 0x2d1   :  { %v2539_v13 = vsel %vm2412_vm3, %v7918_v18, -inf }
 0x2d2   :  { %2546 = vmax.xlane.f32.xlu1 %v2545_v29  ;;  %v2554_v29 = vsel %vm2412_vm3, %v5896_v43, -inf  ;;  %v7920_v43 = vld [vmem:[#allocation45_spill] sm:$0xff] }
 0x2d4   :  { %1864 = vmax.xlane.f32.xlu0 %v1863_v45  ;;  %v1869_v45 = vsel %vm1826_vm2, %v7916_v26, -inf }
 0x2d6   :  { %2549 = vmax.xlane.f32.xlu1 %v2548_v31  ;;  %v2557_v31 = vsel %vm2412_vm3, %v5899_v2, -inf  ;;  %v1890_v2 = vsel %vm1826_vm2, %v5818_v59, -inf }
 0x2d8   :  { %2537 = vmax.xlane.f32.xlu0 %v2536_v56  ;;  %v2542_v56 = vsel %vm2412_vm3, %v5884_v49, -inf }
 0x2da   :  { %2552 = vmax.xlane.f32.xlu1 %v2551_v8  ;;  %v2560_v8 = vsel %vm2412_vm3, %v7919_v17, -inf  ;;  %v6443_v17 = vpop.xlane.xlu1 %1834 }
 0x2dc   :  { %2540 = vmax.xlane.f32.xlu0 %v2539_v13  ;;  %v1872_v13 = vsel %vm1826_vm2, %v5800_v14, -inf }
 0x2de   :  { %2555 = vmax.xlane.f32.xlu1 %v2554_v29  ;;  %v2563_v29 = vsel %vm2412_vm3, %v7920_v43, -inf  ;;  %v1881_v43 = vsel %vm1826_vm2, %v5809_v38, -inf }
 0x2e0   :  { %1870 = vmax.xlane.f32.xlu0 %v1869_v45  ;;  %v1875_v45 = vsel %vm1826_vm2, %v5803_v12, -inf }
 0x2e2   :  { %2558 = vmax.xlane.f32.xlu1 %v2557_v31  ;;  %v2566_v31 = vsel %vm2412_vm3, %v7906_v19, -inf  ;;  %v1887_v19 = vsel %vm1826_vm2, %v5815_v41, -inf }
 0x2e4   :  { %2543 = vmax.xlane.f32.xlu0 %v2542_v56  ;;  %v1878_v56 = vsel %vm1826_vm2, %v5806_v34, -inf }
 0x2e6   :  { %2561 = vmax.xlane.f32.xlu1 %v2560_v8  ;;  %v6445_v8 = vpop.xlane.xlu0 %1828 }
 0x2e8   :  { %1873 = vmax.xlane.f32.xlu0 %v1872_v13  ;;  %v2569_v13 = vsel %vm2412_vm3, %v5911_v33, -inf  ;;  %v2575_v33 = vsel %vm2412_vm3, %v5917_v60, -inf  ;;  %v2581_v60 = vsel %vm2412_vm3, %v5923_v62, -inf  ;;  %v1899_v62 = vsel %vm1826_vm2, %v5827_v63, -inf }
 0x2ea   :  { %2564 = vmax.xlane.f32.xlu1 %v2563_v29  ;;  %v2572_v29 = vsel %vm2412_vm3, %v7907_v44, -inf  ;;  %v2578_v44 = vsel %vm2412_vm3, %v5920_v15, -inf  ;;  %v2584_v15 = vsel %vm2412_vm3, %v5926_v37, -inf }
 0x2ec   :  { %1876 = vmax.xlane.f32.xlu0 %v1875_v45  ;;  %v1884_v45 = vsel %vm1826_vm2, %v5812_v54, -inf }
 0x2ee   :  { %2567 = vmax.xlane.f32.xlu1 %v2566_v31  ;;  %v6455_v31 = vpop.xlane.xlu1 %1837 }
 0x2f0   :  { %1879 = vmax.xlane.f32.xlu0 %v1878_v56  ;;  %v6457_v56 = vpop.xlane.xlu0 %1831 }
 0x2f2   :  { %2570 = vmax.xlane.f32.xlu1 %v2569_v13 }
 0x2f4   :  { %1882 = vmax.xlane.f32.xlu0 %v1881_v43 }
 0x2f6   :  { %2573 = vmax.xlane.f32.xlu1 %v2572_v29 }
 0x2f8   :  { %1885 = vmax.xlane.f32.xlu0 %v1884_v45 }
 0x2fa   :  { %2576 = vmax.xlane.f32.xlu1 %v2575_v33  ;;  %v1893_v33 = vsel %vm1826_vm2, %v5821_v0, -inf }
 0x2fb   :  { %v6463_v43 = vpop.xlane.xlu1 %1843 }
 0x2fc   :  { %1888 = vmax.xlane.f32.xlu0 %v1887_v19 }
 0x2fd   :  { %v6465_v13 = vpop.xlane.xlu0 %1840 }
 0x2fe   :  { %2579 = vmax.xlane.f32.xlu1 %v2578_v44 }
 0x2ff   :  { %v6471_v29 = vpop.xlane.xlu1 %2417 }
 0x300   :  { %1891 = vmax.xlane.f32.xlu0 %v1890_v2  ;;  %v1896_v2 = vsel %vm1826_vm2, %v5824_v42, -inf  ;;  %vm2606_vm12 = vcmp.ne.f32.partialorder %v6471_v29, %v7908_v61 }
 0x301   :  { %v2415_v45 = vpop.xlane.xlu0 %2414 }
 0x302   :  { %2582 = vmax.xlane.f32.xlu1 %v2581_v60  ;;  %vm2605_vm4 = vcmp.ne.f32.partialorder %v2415_v45, %v7909_v39  ;;  %v1908_v45 = vsel %vm1826_vm2, %v5836_v40, -inf }
 0x303   :  { %v6477_v19 = vpop.xlane.xlu1 %2423 }
 0x304   :  { %1894 = vmax.xlane.f32.xlu0 %v1893_v33  ;;  %v1902_v33 = vsel %vm1826_vm2, %v5830_v50, -inf  ;;  %vm2608_vm14 = vcmp.ne.f32.partialorder %v6477_v19, %v7910_v6 }
 0x305   :  { %v2421_v23 = vpop.xlane.xlu0 %2420 }
 0x306   :  { %2585 = vmax.xlane.f32.xlu1 %v2584_v15  ;;  %v1905_v15 = vsel %vm1826_vm2, %v5833_v52, -inf  ;;  %vm2607_vm5 = vcmp.ne.f32.partialorder %v2421_v23, %v7911_v22 }
 0x307   :  { %v2430_v44 = vpop.xlane.xlu1 %2429 }
 0x308   :  { %1897 = vmax.xlane.f32.xlu0 %v1896_v2  ;;  %v7650_v2 = vmov 0.0   ;;  %vm2610_vm7 = vcmp.ne.f32.partialorder %v2430_v44, %v5764_v58 }
 0x309   :  { %v2427_v57 = vpop.xlane.xlu0 %2426  ;;  %v3487_v32 = vsel %vm2605_vm4, 1.0, %v7650_v2  ;;  %v3488_v10 = vsel %vm2606_vm12, 1.0, %v7650_v2  ;;  %v3490_v52 = vsel %vm2608_vm14, 1.0, %v7650_v2  ;;  %vm2020_vm14 = vcmp.ne.f32.partialorder %v6457_v56, %v7908_v61 }
 0x30a   :  { %v2797_v5 = vmul.f32 %v3487_v32, %v7909_v39  ;;  %vm2609_vm6 = vcmp.ne.f32.partialorder %v2427_v57, %v5761_v46  ;;  %v2798_v29 = vmul.f32 %v3488_v10, %v7908_v61  ;;  %v2800_v10 = vmul.f32 %v3490_v52, %v7910_v6 }
 0x30b   :  { %v2436_v49 = vpop.xlane.xlu1 %2435  ;;  %v3491_v32 = vsel %vm2609_vm6, 1.0, %v7650_v2 }
 0x30c   :  { %1900 = vmax.xlane.f32.xlu0 %v1899_v62  ;;  %vm2612_vm8 = vcmp.ne.f32.partialorder %v2436_v49, %v7912_v21 }
 0x30d   :  { %v6485_v60 = vpop.xlane.xlu0 %2432 }
 0x30e   :  { %vm2611_vm0 = vcmp.ne.f32.partialorder %v6485_v60, %v7913_v30 }
 0x30f   :  { %v2442_v37 = vpop.xlane.xlu1 %2441 }
 0x310   :  { %1903 = vmax.xlane.f32.xlu0 %v1902_v33  ;;  %v3489_v33 = vsel %vm2607_vm5, 1.0, %v7650_v2  ;;  %vm2614_vm9 = vcmp.ne.f32.partialorder %v2442_v37, %v7914_v9 }
 0x311   :  { %v6490_v18 = vpop.xlane.xlu0 %2438  ;;  %v2799_v23 = vmul.f32 %v3489_v33, %v7911_v22  ;;  %v3492_v33 = vsel %vm2610_vm7, 1.0, %v7650_v2  ;;  %v3496_v49 = vsel %vm2614_vm9, 1.0, %v7650_v2 }
 0x312   :  { %v2802_v44 = vmul.f32 %v3492_v33, %v5764_v58  ;;  %v2806_v40 = vmul.f32 %v3496_v49, %v7914_v9  ;;  %vm2613_vm4 = vcmp.ne.f32.partialorder %v6490_v18, %v7915_v25 }
 0x313   :  { %v2448_v62 = vpop.xlane.xlu1 %2447 }
 0x314   :  { %1906 = vmax.xlane.f32.xlu0 %v1905_v15  ;;  %vm2616_vm10 = vcmp.ne.f32.partialorder %v2448_v62, %v5788_v24 }
 0x315   :  { %v6496_v47 = vpop.xlane.xlu0 %2444  ;;  %v3498_v37 = vsel %vm2616_vm10, 1.0, %v7650_v2 }
 0x316   :  { %v2808_v62 = vmul.f32 %v3498_v37, %v5788_v24  ;;  %vm2615_vm5 = vcmp.ne.f32.partialorder %v6496_v47, %v5785_v36 }
 0x317   :  { %v2454_v20 = vpop.xlane.xlu1 %2453  ;;  %2925 = vrot.lane.b32.xlu1 %v2797_v5, %s3783_s5  ;;  %v1914_v5 = vsel %vm1826_vm2, %v5842_v7, -inf }
 0x318   :  { %1909 = vmax.xlane.f32.xlu0 %v1908_v45  ;;  %v2801_v45 = vmul.f32 %v3491_v32, %v5761_v46  ;;  %vm2618_vm11 = vcmp.ne.f32.partialorder %v2454_v20, %v5794_v3 }
 0x319   :  { %v6504_v15 = vpop.xlane.xlu0 %2450 }
 0x31a   :  { %vm2617_vm6 = vcmp.ne.f32.partialorder %v6504_v15, %v5791_v28 }
 0x31b   :  { %v2460_v4 = vpop.xlane.xlu1 %2459  ;;  %2929 = vrot.lane.b32.xlu1 %v2799_v23, %s3783_s5  ;;  %v3494_v23 = vsel %vm2612_vm8, 1.0, %v7650_v2 }
 0x31c   :  { %1912 = vmax.xlane.f32.xlu0 %v1911_v1  ;;  %vm2620_vm13 = vcmp.ne.f32.partialorder %v2460_v4, %v5800_v14 }
 0x31d   :  { %v6512_v57 = vpop.xlane.xlu0 %2456  ;;  %v3502_v37 = vsel %vm2620_vm13, 1.0, %v7650_v2 }
 0x31e   :  { %v2812_v19 = vmul.f32 %v3502_v37, %v5800_v14  ;;  %v3495_v37 = vsel %vm2613_vm4, 1.0, %v7650_v2  ;;  %vm2619_vm7 = vcmp.ne.f32.partialorder %v6512_v57, %v7916_v26  ;;  %vm2022_vm4 = vcmp.ne.f32.partialorder %v6455_v31, %v7910_v6 }
 0x31f   :  { %v2466_v55 = vpop.xlane.xlu1 %2465  ;;  %2933 = vrot.lane.b32.xlu1 %v2801_v45, %s3783_s5 }
 0x320   :  { %1915 = vmax.xlane.f32.xlu0 %v1914_v5  ;;  %v2804_v5 = vmul.f32 %v3494_v23, %v7912_v21  ;;  %vm2622_vm15 = vcmp.ne.f32.partialorder %v2466_v55, %v5806_v34 }
 0x321   :  { %v6520_v1 = vpop.xlane.xlu0 %2462 }
 0x322   :  { %vm2621_vm8 = vcmp.ne.f32.partialorder %v6520_v1, %v5803_v12 }
 0x323   :  { %v2472_v32 = vpop.xlane.xlu1 %2471  ;;  %2935 = vrot.lane.b32.xlu1 %v2802_v44, %s3783_s5 }
 0x324   :  { %vm2624_vm1 = vcmp.ne.f32.partialorder %v2472_v32, %v5812_v54 }
 0x325   :  { %v6526_v7 = vpop.xlane.xlu0 %2468 }
 0x326   :  { %vm2623_vm9 = vcmp.ne.f32.partialorder %v6526_v7, %v5809_v38 }
 0x327   :  { %v6531_v45 = vpop.xlane.xlu1 %2477  ;;  %2939 = vrot.lane.b32.xlu1 %v2804_v5, %s3783_s5  ;;  %v3500_v5 = vsel %vm2618_vm11, 1.0, %v7650_v2 }
 0x328   :  { %vm2626_vm11 = vcmp.ne.f32.partialorder %v6531_v45, %v5818_v59  ;;  %v1920_v45 = vsel %vm1826_vm2, %v5848_v35, -inf }
 0x329   :  { %v6534_v33 = vpop.xlane.xlu0 %2474 }
 0x32a   :  { %vm2625_vm10 = vcmp.ne.f32.partialorder %v6534_v33, %v5815_v41 }
 0x32b   :  { %v6539_v44 = vpop.xlane.xlu1 %2483  ;;  %2943 = vrot.lane.b32.xlu1 %v2806_v40, %s3783_s5  ;;  %v2810_v40 = vmul.f32 %v3500_v5, %v5794_v3  ;;  %v3504_v5 = vsel %vm2622_vm15, 1.0, %v7650_v2  ;;  %vm2019_vm15 = vcmp.ne.f32.partialorder %v6445_v8, %v7909_v39 }
 0x32c   :  { %v2814_v60 = vmul.f32 %v3504_v5, %v5806_v34  ;;  %vm2628_vm13 = vcmp.ne.f32.partialorder %v6539_v44, %v5824_v42 }
 0x32d   :  { %v6542_v23 = vpop.xlane.xlu0 %2480 }
 0x32e   :  { %vm2627_vm12 = vcmp.ne.f32.partialorder %v6542_v23, %v5821_v0 }
 0x32f   :  { %v6550_v49 = vpop.xlane.xlu1 %2489  ;;  %2947 = vrot.lane.b32.xlu1 %v2808_v62, %s3783_s5 }
 0x330   :  { %7921 = vst [vmem:[#allocation28_spill] sm:$0xff] %v6550_v49  ;;  %v3493_v49 = vsel %vm2611_vm0, 1.0, %v7650_v2  ;;  %vm2021_vm0 = vcmp.ne.f32.partialorder %v6443_v17, %v7911_v22 }
 0x331   :  { %v6553_v20 = vpop.xlane.xlu0 %2486  ;;  %v2803_v52 = vmul.f32 %v3493_v49, %v7913_v30  ;;  %v3497_v49 = vsel %vm2615_vm5, 1.0, %v7650_v2  ;;  %vm2023_vm5 = vcmp.ne.f32.partialorder %v6465_v13, %v5761_v46 }
 0x332   :  { %v2807_v47 = vmul.f32 %v3497_v49, %v5785_v36 }
 0x333   :  { %v6562_v4 = vpop.xlane.xlu1 %2495  ;;  %2951 = vrot.lane.b32.xlu1 %v2810_v40, %s3783_s5 }
 0x334   :  { %7922 = vst [vmem:[#allocation14_spill] sm:$0xff] %v6562_v4 }
 0x335   :  { %v6565_v62 = vpop.xlane.xlu0 %2492 }
 0x336   :  { %2927 = vrot.lane.b32.xlu0 %v2798_v29, %s3783_s5  ;;  %v3506_v29 = vsel %vm2624_vm1, 1.0, %v7650_v2  ;;  %vm2629_vm1 = vcmp.ne.f32.partialorder %v6553_v20, %v5827_v63 }
 0x337   :  { %v6575_v55 = vpop.xlane.xlu1 %2501  ;;  %2955 = vrot.lane.b32.xlu1 %v2812_v19, %s3783_s5  ;;  %v2816_v18 = vmul.f32 %v3506_v29, %v5812_v54 }
 0x338   :  { %7923 = vst [vmem:[#allocation27_spill] sm:$0xff] %v6575_v55 }
 0x339   :  { %v6578_v40 = vpop.xlane.xlu0 %2498 }
 0x33a   :  { %7924 = vst [vmem:[#allocation18_spill] sm:$0xff] %v6578_v40  ;;  %2931 = vrot.lane.b32.xlu0 %v2800_v10, %s3783_s5  ;;  %v2805_v10 = vmul.f32 %v3495_v37, %v7915_v25 }
 0x33b   :  { %v6587_v32 = vpop.xlane.xlu1 %2507  ;;  %2959 = vrot.lane.b32.xlu1 %v2814_v60, %s3783_s5  ;;  %v3499_v60 = vsel %vm2617_vm6, 1.0, %v7650_v2  ;;  %vm2024_vm6 = vcmp.ne.f32.partialorder %v6463_v43, %v5764_v58 }
 0x33c   :  { %7925 = vst [vmem:[#allocation30_spill] sm:$0xff] %v6587_v32  ;;  %v2809_v37 = vmul.f32 %v3499_v60, %v5791_v28 }
 0x33d   :  { %v6590_v19 = vpop.xlane.xlu0 %2504 }
 0x33e   :  { %7926 = vst [vmem:[#allocation29_spill] sm:$0xff] %v6590_v19  ;;  %2937 = vrot.lane.b32.xlu0 %v2803_v52, %s3783_s5 }
 0x33f   :  { %v6598_v5 = vpop.xlane.xlu1 %2513  ;;  %2963 = vrot.lane.b32.xlu1 %v2816_v18, %s3783_s5  ;;  %v3501_v18 = vsel %vm2619_vm7, 1.0, %v7650_v2 }
 0x340   :  { %7927 = vst [vmem:[#allocation7_spill] sm:$0xff] %v6598_v5  ;;  %v2811_v49 = vmul.f32 %v3501_v18, %v7916_v26 }
 0x341   :  { %v6601_v32 = vpop.xlane.xlu0 %2510 }
 0x342   :  { %7928 = vst [vmem:[#allocation5_spill] sm:$0xff] %v6601_v32  ;;  %2941 = vrot.lane.b32.xlu0 %v2805_v10, %s3783_s5 }
 0x343   :  { %v6608_v52 = vpop.xlane.xlu1 %1846 }
 0x344   :  { %vm2025_vm7 = vcmp.ne.f32.partialorder %v6608_v52, %v7913_v30 }
 0x345   :  { %v6610_v29 = vpop.xlane.xlu0 %2516 }
 0x346   :  { %7929 = vst [vmem:[#allocation8_spill] sm:$0xff] %v6610_v29  ;;  %2945 = vrot.lane.b32.xlu0 %v2807_v47, %s3783_s5  ;;  %v3503_v29 = vsel %vm2621_vm8, 1.0, %v7650_v2 }
 0x347   :  { %v6617_v15 = vpop.xlane.xlu1 %1849  ;;  %v2813_v60 = vmul.f32 %v3503_v29, %v5803_v12 }
 0x348   :  { %vm2026_vm8 = vcmp.ne.f32.partialorder %v6617_v15, %v7912_v21 }
 0x349   :  { %v6619_v10 = vpop.xlane.xlu0 %2519 }
 0x34a   :  { %7930 = vst [vmem:[#allocation55_spill] sm:$0xff] %v6619_v10  ;;  %2949 = vrot.lane.b32.xlu0 %v2809_v37, %s3783_s5  ;;  %v3505_v10 = vsel %vm2623_vm9, 1.0, %v7650_v2 }
 0x34b   :  { %v6626_v57 = vpop.xlane.xlu1 %1852  ;;  %v2815_v18 = vmul.f32 %v3505_v10, %v5809_v38 }
 0x34c   :  { %vm2027_vm9 = vcmp.ne.f32.partialorder %v6626_v57, %v7915_v25 }
 0x34d   :  { %v6628_v47 = vpop.xlane.xlu0 %2522 }
 0x34e   :  { %7931 = vst [vmem:[#allocation56_spill] sm:$0xff] %v6628_v47  ;;  %2953 = vrot.lane.b32.xlu0 %v2811_v49, %s3783_s5  ;;  %v3507_v47 = vsel %vm2625_vm10, 1.0, %v7650_v2 }
 0x34f   :  { %v6635_v1 = vpop.xlane.xlu1 %1855  ;;  %v2817_v29 = vmul.f32 %v3507_v47, %v5815_v41 }
 0x350   :  { %vm2028_vm10 = vcmp.ne.f32.partialorder %v6635_v1, %v7914_v9 }
 0x351   :  { %v6637_v37 = vpop.xlane.xlu0 %2525 }
 0x352   :  { %7932 = vst [vmem:[#allocation57_spill] sm:$0xff] %v6637_v37  ;;  %2957 = vrot.lane.b32.xlu0 %v2813_v60, %s3783_s5 }
 0x353   :  { %v6644_v7 = vpop.xlane.xlu1 %1858 }
 0x355   :  { %v6646_v49 = vpop.xlane.xlu0 %2528 }
 0x356   :  { %7933 = vst [vmem:[#allocation58_spill] sm:$0xff] %v6646_v49  ;;  %2961 = vrot.lane.b32.xlu0 %v2815_v18, %s3783_s5  ;;  %v2587_v49 = vsel %vm2412_vm3, %v5929_v53, -inf }
 0x357   :  { %v6650_v5 = vpop.xlane.xlu1 %1861 }
 0x359   :  { %v6652_v37 = vpop.xlane.xlu0 %2531 }
 0x35a   :  { %7934 = vst [vmem:[#allocation59_spill] sm:$0xff] %v6652_v37  ;;  %2965 = vrot.lane.b32.xlu0 %v2817_v29, %s3783_s5  ;;  %v2590_v37 = vsel %vm2412_vm3, %v5932_v51, -inf }
 0x35b   :  { %v6655_v33 = vpop.xlane.xlu1 %1867 }
 0x35d   :  { %v6657_v60 = vpop.xlane.xlu0 %2534 }
 0x35e   :  { %7935 = vst [vmem:[#allocation60_spill] sm:$0xff] %v6657_v60 }
 0x35f   :  { %v6659_v10 = vpop.xlane.xlu1 %2546 }
 0x360   :  { %7936 = vst [vmem:[#allocation61_spill] sm:$0xff] %v6659_v10 }
 0x361   :  { %v6661_v2 = vpop.xlane.xlu0 %1864 }
 0x363   :  { %v6665_v18 = vpop.xlane.xlu1 %2549  ;;  %2588 = vmax.xlane.f32.xlu1 %v2587_v49  ;;  %v7944_v49 = vmov 0.0  }
 0x364   :  { %7937 = vst [vmem:[#allocation62_spill] sm:$0xff] %v6665_v18  ;;  %v3508_v18 = vsel %vm2626_vm11, 1.0, %v7944_v49  ;;  %v3431_v57 = vsel %vm2027_vm9, 1.0, %v7944_v49  ;;  %vm2029_vm11 = vcmp.ne.f32.partialorder %v6644_v7, %v5785_v36  ;;  %v3432_v1 = vsel %vm2028_vm10, 1.0, %v7944_v49 }
 0x365   :  { %v6667_v47 = vpop.xlane.xlu0 %2537  ;;  %v3433_v7 = vsel %vm2029_vm11, 1.0, %v7944_v49 }
 0x366   :  { %7938 = vst [vmem:[#allocation63_spill] sm:$0xff] %v6667_v47 }
 0x367   :  { %v6671_v29 = vpop.xlane.xlu1 %2552  ;;  %2591 = vmax.xlane.f32.xlu1 %v2590_v37  ;;  %v2818_v37 = vmul.f32 %v3508_v18, %v5818_v59 }
 0x368   :  { %7939 = vst [vmem:[#allocation64_spill] sm:$0xff] %v6671_v29 }
 0x369   :  { %v6673_v32 = vpop.xlane.xlu0 %2540 }
 0x36a   :  { %7940 = vst [vmem:[#allocation65_spill] sm:$0xff] %v6673_v32 }
 0x36b   :  { %v6675_v60 = vpop.xlane.xlu1 %2555 }
 0x36c   :  { %7941 = vst [vmem:[#allocation66_spill] sm:$0xff] %v6675_v60  ;;  %v1917_v60 = vsel %vm1826_vm2, %v5845_v11, -inf }
 0x36d   :  { %v6677_v10 = vpop.xlane.xlu0 %1870 }
 0x36f   :  { %v6679_v19 = vpop.xlane.xlu1 %2558 }
 0x370   :  { %7942 = vst [vmem:[#allocation67_spill] sm:$0xff] %v6679_v19 }
 0x371   :  { %v6681_v53 = vpop.xlane.xlu0 %2543 }
 0x372   :  { %7943 = vst [vmem:[#allocation68_spill] sm:$0xff] %v6681_v53 }
 0x373   :  { %v6686_v47 = vpop.xlane.xlu1 %2561 }
 0x374   :  { %7945 = vst [vmem:[#allocation69_spill] sm:$0xff] %v6686_v47 }
 0x375   :  { %v6688_v51 = vpop.xlane.xlu0 %1873 }
 0x377   :  { %v6693_v29 = vpop.xlane.xlu1 %2564 }
 0x378   :  { %7946 = vst [vmem:[#allocation70_spill] sm:$0xff] %v6693_v29  ;;  %2967 = vrot.lane.b32.xlu1 %v2818_v37, %s3783_s5 }
 0x379   :  { %1918 = vmax.xlane.f32.xlu0 %v1917_v60  ;;  %v6695_v19 = vpop.xlane.xlu0 %1876 }
 0x37b   :  { %v6700_v53 = vpop.xlane.xlu1 %2567 }
 0x37c   :  { %7947 = vst [vmem:[#allocation71_spill] sm:$0xff] %v6700_v53  ;;  %v3509_v53 = vsel %vm2627_vm12, 1.0, %v7944_v49  ;;  %vm2030_vm12 = vcmp.ne.f32.partialorder %v6650_v5, %v5788_v24 }
 0x37d   :  { %1921 = vmax.xlane.f32.xlu0 %v1920_v45  ;;  %v6702_v47 = vpop.xlane.xlu0 %1879 }
 0x37f   :  { %v6704_v32 = vpop.xlane.xlu1 %2570 }
 0x380   :  { %7948 = vst [vmem:[#allocation72_spill] sm:$0xff] %v6704_v32  ;;  %v2819_v32 = vmul.f32 %v3509_v53, %v5821_v0 }
 0x381   :  { %v6706_v18 = vpop.xlane.xlu0 %1882 }
 0x383   :  { %v6708_v11 = vpop.xlane.xlu1 %2573 }
 0x384   :  { %7949 = vst [vmem:[#allocation73_spill] sm:$0xff] %v6708_v11 }
 0x385   :  { %v6710_v29 = vpop.xlane.xlu0 %1885 }
 0x386   :  { %7950 = vst [vmem:[#allocation74_spill] sm:$0xff] %v6710_v29 }
 0x387   :  { %v6712_v60 = vpop.xlane.xlu1 %2576 }
 0x388   :  { %7951 = vst [vmem:[#allocation75_spill] sm:$0xff] %v6712_v60 }
 0x389   :  { %v6714_v55 = vpop.xlane.xlu0 %1888 }
 0x38a   :  { %7952 = vst [vmem:[#allocation76_spill] sm:$0xff] %v6714_v55 }
 0x38b   :  { %v6718_v37 = vpop.xlane.xlu1 %2579 }
 0x38c   :  { %7953 = vst [vmem:[#allocation77_spill] sm:$0xff] %v6718_v37 }
 0x38d   :  { %v6720_v45 = vpop.xlane.xlu0 %1891 }
 0x38e   :  { %7954 = vst [vmem:[#allocation78_spill] sm:$0xff] %v6720_v45  ;;  %v2593_v45 = vsel %vm2412_vm3, %v5935_v48, -inf  ;;  %v3510_v48 = vsel %vm2628_vm13, 1.0, %v7944_v49  ;;  %vm2031_vm13 = vcmp.ne.f32.partialorder %v6661_v2, %v5791_v28 }
 0x38f   :  { %v6724_v35 = vpop.xlane.xlu1 %2582 }
 0x390   :  { %7955 = vst [vmem:[#allocation79_spill] sm:$0xff] %v6724_v35  ;;  %v7962_v35 = vld [vmem:[#allocation53_spill] sm:$0xff] }
 0x391   :  { %v6726_v11 = vpop.xlane.xlu0 %1894 }
 0x392   :  { %7956 = vst [vmem:[#allocation80_spill] sm:$0xff] %v6726_v11  ;;  %v2596_v11 = vsel %vm2412_vm3, %v7962_v35, -inf }
 0x393   :  { %2969 = vrot.lane.b32.xlu0 %v2819_v32, %s3783_s5  ;;  %v6729_v60 = vpop.xlane.xlu1 %2585 }
 0x394   :  { %7957 = vst [vmem:[#allocation81_spill] sm:$0xff] %v6729_v60 }
 0x395   :  { %v6731_v40 = vpop.xlane.xlu0 %1897 }
 0x396   :  { %7958 = vst [vmem:[#allocation82_spill] sm:$0xff] %v6731_v40 }
 0x397   :  { %v2926_v59 = vpop.permute.xlu1 %2925 }
 0x398   :  { %v3117_v35 = vsel %vm1826_vm2, %v2926_v59, 0.0 }
 0x399   :  { %v6733_v23 = vpop.xlane.xlu0 %1900 }
 0x39a   :  { %7959 = vst [vmem:[#allocation83_spill] sm:$0xff] %v6733_v23 }
 0x39b   :  { %v2930_v37 = vpop.permute.xlu1 %2929 }
 0x39c   :  { %2594 = vmax.xlane.f32.xlu1 %v2593_v45  ;;  %v3120_v44 = vsel %vm1826_vm2, %v2930_v37, 0.0 }
 0x39d   :  { %v6735_v55 = vpop.xlane.xlu0 %1903 }
 0x39e   :  { %7960 = vst [vmem:[#allocation84_spill] sm:$0xff] %v6735_v55 }
 0x39f   :  { %v2934_v32 = vpop.permute.xlu1 %2933 }
 0x3a0   :  { %2597 = vmax.xlane.f32.xlu1 %v2596_v11  ;;  %v1923_v11 = vsel %vm1826_vm2, %v5851_v16, -inf  ;;  %v3124_v59 = vsel %vm1826_vm2, %v2934_v32, 0.0  ;;  %v3423_v32 = vsel %vm2019_vm15, 1.0, %v7944_v49 }
 0x3a1   :  { %v6739_v53 = vpop.xlane.xlu0 %1906 }
 0x3a2   :  { %7961 = vst [vmem:[#allocation85_spill] sm:$0xff] %v6739_v53  ;;  %v2820_v53 = vmul.f32 %v3510_v48, %v5824_v42  ;;  %v1926_v48 = vsel %vm1826_vm2, %v5854_v27, -inf }
 0x3a3   :  { %v2936_v40 = vpop.permute.xlu1 %2935 }
 0x3a5   :  { %v6743_v60 = vpop.xlane.xlu0 %1909 }
 0x3a6   :  { %7963 = vst [vmem:[#allocation86_spill] sm:$0xff] %v6743_v60 }
 0x3a7   :  { %v2940_v45 = vpop.permute.xlu1 %2939 }
 0x3a9   :  { %v6745_v0 = vpop.xlane.xlu0 %1912 }
 0x3aa   :  { %7964 = vst [vmem:[#allocation87_spill] sm:$0xff] %v6745_v0 }
 0x3ad   :  { %v6749_v55 = vpop.xlane.xlu0 %1915 }
 0x3ae   :  { %7965 = vst [vmem:[#allocation88_spill] sm:$0xff] %v6749_v55  ;;  %v2944_v55 = vpop.permute.xlu1 %2943 }
 0x3b1   :  { %v2928_v23 = vpop.permute.xlu0 %2927  ;;  %2971 = vrot.lane.b32.xlu1 %v2820_v53, %s3783_s5 }
 0x3b2   :  { %v3118_v60 = vsel %vm1826_vm2, %v2928_v23, 0.0  ;;  %1924 = vmax.xlane.f32.xlu0 %v1923_v11 }
 0x3b3   :  { %v3119_v0 = vadd.f32 %v3118_v60, %v3117_v35  ;;  %v3126_v35 = vsel %vm1826_vm2, %v2936_v40, 0.0  ;;  %v2948_v60 = vpop.permute.xlu1 %2947 }
 0x3b5   :  { %v3121_v41 = vadd.f32 %v3120_v44, %v3119_v0  ;;  %v2932_v4 = vpop.permute.xlu0 %2931  ;;  %v3130_v44 = vsel %vm1826_vm2, %v2940_v45, 0.0 }
 0x3b6   :  { %v3122_v42 = vsel %vm1826_vm2, %v2932_v4, 0.0  ;;  %1927 = vmax.xlane.f32.xlu0 %v1926_v48  ;;  %v3134_v48 = vsel %vm1826_vm2, %v2944_v55, 0.0  ;;  %v3138_v55 = vsel %vm1826_vm2, %v2948_v60, 0.0 }
 0x3b7   :  { %v3123_v16 = vadd.f32 %v3122_v42, %v3121_v41  ;;  %v3424_v42 = vsel %vm2020_vm14, 1.0, %v7944_v49  ;;  %v2952_v4 = vpop.permute.xlu1 %2951  ;;  %vm2033_vm14 = vcmp.ne.f32.partialorder %v6677_v10, %v7916_v26 }
 0x3b8   :  { %v2212_v56 = vmul.f32 %v3424_v42, %v7908_v61  ;;  %v3511_v61 = vsel %vm2629_vm1, 1.0, %v7944_v49  ;;  %v3142_v60 = vsel %vm1826_vm2, %v2952_v4, 0.0  ;;  %v3427_v4 = vsel %vm2023_vm5, 1.0, %v7944_v49 }
 0x3b9   :  { %v3125_v29 = vadd.f32 %v3124_v59, %v3123_v16  ;;  %v2938_v23 = vpop.permute.xlu0 %2937  ;;  %v2211_v59 = vmul.f32 %v3423_v32, %v7909_v39  ;;  %v2821_v31 = vmul.f32 %v3511_v61, %v5827_v63  ;;  %v3429_v61 = vsel %vm2025_vm7, 1.0, %v7944_v49 }
 0x3ba   :  { %v3128_v37 = vsel %vm1826_vm2, %v2938_v23, 0.0  ;;  %v2276_v17 = vsel %vm1826_vm2, %v2212_v56, 0.0  ;;  %vm2035_vm1 = vcmp.ne.f32.partialorder %v6695_v19, %v5803_v12  ;;  %vm2036_vm5 = vcmp.ne.f32.partialorder %v6702_v47, %v5806_v34 }
 0x3bb   :  { %v3127_v53 = vadd.f32 %v3126_v35, %v3125_v29  ;;  %v2275_v39 = vsel %vm1826_vm2, %v2211_v59, 0.0 }
 0x3bd   :  { %v3129_v0 = vadd.f32 %v3128_v37, %v3127_v53  ;;  %v2942_v11 = vpop.permute.xlu0 %2941  ;;  %v3425_v53 = vsel %vm2021_vm0, 1.0, %v7944_v49  ;;  %v2956_v37 = vpop.permute.xlu1 %2955  ;;  %vm2034_vm0 = vcmp.ne.f32.partialorder %v6688_v51, %v5800_v14 }
 0x3be   :  { %v3132_v16 = vsel %vm1826_vm2, %v2942_v11, 0.0  ;;  %v2213_v11 = vmul.f32 %v3425_v53, %v7911_v22  ;;  %v3146_v13 = vsel %vm1826_vm2, %v2956_v37, 0.0  ;;  %v2215_v53 = vmul.f32 %v3427_v4, %v5761_v46 }
 0x3bf   :  { %v3131_v41 = vadd.f32 %v3130_v44, %v3129_v0  ;;  %v3426_v44 = vsel %vm2022_vm4, 1.0, %v7944_v49  ;;  %v2220_v4 = vmul.f32 %v3432_v1, %v7914_v9 }
 0x3c0   :  { %v2278_v22 = vsel %vm1826_vm2, %v2213_v11, 0.0  ;;  %v3430_v11 = vsel %vm2026_vm8, 1.0, %v7944_v49  ;;  %v2282_v15 = vsel %vm1826_vm2, %v2215_v53, 0.0 }
 0x3c1   :  { %v3133_v40 = vadd.f32 %v3132_v16, %v3131_v41  ;;  %v2946_v29 = vpop.permute.xlu0 %2945  ;;  %v2277_v16 = vadd.f32 %v2276_v17, %v2275_v39  ;;  %v2217_v39 = vmul.f32 %v3429_v61, %v7913_v30 }
 0x3c2   :  { %v3136_v8 = vsel %vm1826_vm2, %v2946_v29, 0.0  ;;  %v2214_v29 = vmul.f32 %v3426_v44, %v7910_v6 }
 0x3c3   :  { %v3135_v45 = vadd.f32 %v3134_v48, %v3133_v40  ;;  %v2960_v48 = vpop.permute.xlu1 %2959 }
 0x3c4   :  { %v2280_v59 = vsel %vm1826_vm2, %v2214_v29, 0.0  ;;  %v3150_v37 = vsel %vm1826_vm2, %v2960_v48, 0.0 }
 0x3c5   :  { %v3137_v23 = vadd.f32 %v3136_v8, %v3135_v45  ;;  %v2950_v35 = vpop.permute.xlu0 %2949  ;;  %v2279_v8 = vadd.f32 %v2278_v22, %v2277_v16  ;;  %v2219_v22 = vmul.f32 %v3431_v57, %v7915_v25 }
 0x3c6   :  { %v3140_v20 = vsel %vm1826_vm2, %v2950_v35, 0.0  ;;  %v3428_v35 = vsel %vm2024_vm6, 1.0, %v7944_v49  ;;  %vm2037_vm6 = vcmp.ne.f32.partialorder %v6706_v18, %v5809_v38  ;;  %v7972_v18 = vld [vmem:[#allocation15_spill] sm:$0xff] }
 0x3c7   :  { %v3139_v0 = vadd.f32 %v3138_v55, %v3137_v23  ;;  %v2281_v17 = vadd.f32 %v2280_v59, %v2279_v8  ;;  %v2964_v52 = vpop.permute.xlu1 %2963  ;;  %v2290_v5 = vsel %vm1826_vm2, %v2219_v22, 0.0 }
 0x3c8   :  { %v3154_v16 = vsel %vm1826_vm2, %v2964_v52, 0.0  ;;  %v3438_v52 = vsel %vm2034_vm0, 1.0, %v7944_v49 }
 0x3c9   :  { %v3141_v41 = vadd.f32 %v3140_v20, %v3139_v0  ;;  %v2954_v42 = vpop.permute.xlu0 %2953  ;;  %v2216_v20 = vmul.f32 %v3428_v35, %v5764_v58  ;;  %v2292_v35 = vsel %vm1826_vm2, %v2220_v4, 0.0  ;;  %v2226_v19 = vmul.f32 %v3438_v52, %v5800_v14  ;;  %v7971_v14 = vld [vmem:[#allocation74_spill] sm:$0xff] }
 0x3ca   :  { %v3144_v32 = vsel %vm1826_vm2, %v2954_v42, 0.0  ;;  %v2283_v42 = vadd.f32 %v2282_v15, %v2281_v17  ;;  %vm2038_vm7 = vcmp.ne.f32.partialorder %v7971_v14, %v5812_v54  ;;  %v7978_v4 = vld [vmem:[#allocation78_spill] sm:$0xff] }
 0x3cb   :  { %v3143_v40 = vadd.f32 %v3142_v60, %v3141_v41  ;;  %v2218_v60 = vmul.f32 %v3430_v11, %v7912_v21  ;;  %v2284_v30 = vsel %vm1826_vm2, %v2216_v20, 0.0 }
 0x3cc   :  { %2973 = vrot.lane.b32.xlu0 %v2821_v31, %s3783_s5  ;;  %v7966_v31 = vld [vmem:[#allocation54_spill] sm:$0xff]  ;;  %v2285_v21 = vadd.f32 %v2284_v30, %v2283_v42  ;;  %v7975_v30 = vld [vmem:[#allocation76_spill] sm:$0xff] }
 0x3cd   :  { %v3145_v56 = vadd.f32 %v3144_v32, %v3143_v40  ;;  %v2958_v45 = vpop.permute.xlu0 %2957  ;;  %v2599_v58 = vsel %vm2412_vm3, %v7966_v31, -inf  ;;  %v2286_v32 = vsel %vm1826_vm2, %v2217_v39, 0.0  ;;  %v2288_v8 = vsel %vm1826_vm2, %v2218_v60, 0.0  ;;  %v7973_v42 = vld [vmem:[#allocation14_spill] sm:$0xff] }
 0x3ce   :  { %v3148_v23 = vsel %vm1826_vm2, %v2958_v45, 0.0  ;;  %v2287_v25 = vadd.f32 %v2286_v32, %v2285_v21  ;;  %vm2632_vm8 = vcmp.ne.f32.partialorder %v7973_v42, %v7972_v18  ;;  %v7976_v32 = vld [vmem:[#allocation33_spill] sm:$0xff]  ;;  %v7992_v42 = vld [vmem:[#allocation84_spill] sm:$0xff] }
 0x3cf   :  { %v3147_v6 = vadd.f32 %v3146_v13, %v3145_v56  ;;  %v7967_v56 = vld [vmem:[#allocation6_spill] sm:$0xff]  ;;  %v3434_v13 = vsel %vm2030_vm12, 1.0, %v7944_v49  ;;  %v1932_v22 = vsel %vm1826_vm2, %v7976_v32, -inf  ;;  %v3514_v21 = vsel %vm2632_vm8, 1.0, %v7944_v49 }
 0x3d0   :  { %v2602_v45 = vsel %vm2412_vm3, %v7967_v56, -inf  ;;  %v2289_v59 = vadd.f32 %v2288_v8, %v2287_v25  ;;  %v2222_v53 = vmul.f32 %v3434_v13, %v5788_v24  ;;  %vm2032_vm3 = vcmp.ne.f32.partialorder %v6655_v33, %v5794_v3  ;;  %v7977_v8 = vld [vmem:[#allocation10_spill] sm:$0xff] }
 0x3d1   :  { %v3149_v43 = vadd.f32 %v3148_v23, %v3147_v6  ;;  %v2962_v55 = vpop.permute.xlu0 %2961  ;;  %v2221_v6 = vmul.f32 %v3433_v7, %v5785_v36  ;;  %v3435_v23 = vsel %vm2031_vm13, 1.0, %v7944_v49  ;;  %v7968_v36 = vld [vmem:[#allocation28_spill] sm:$0xff]  ;;  %v3436_v61 = vsel %vm2032_vm3, 1.0, %v7944_v49  ;;  %v7980_v25 = vld [vmem:[#allocation18_spill] sm:$0xff] }
 0x3d2   :  { %v3152_v46 = vsel %vm1826_vm2, %v2962_v55, 0.0  ;;  %v2223_v2 = vmul.f32 %v3435_v23, %v5791_v28  ;;  %vm2630_vm15 = vcmp.ne.f32.partialorder %v7968_v36, %v5830_v50  ;;  %v2296_v17 = vsel %vm1826_vm2, %v2222_v53, 0.0  ;;  %v7981_v23 = vld [vmem:[#allocation11_spill] sm:$0xff] }
 0x3d3   :  { %v3151_v0 = vadd.f32 %v3150_v37, %v3149_v43  ;;  %v2291_v43 = vadd.f32 %v2290_v5, %v2289_v59  ;;  %v2294_v9 = vsel %vm1826_vm2, %v2221_v6, 0.0  ;;  %v3437_v37 = vsel %vm2033_vm14, 1.0, %v7944_v49 }
 0x3d4   :  { %v2298_v33 = vsel %vm1826_vm2, %v2223_v2, 0.0  ;;  %v3512_v28 = vsel %vm2630_vm15, 1.0, %v7944_v49  ;;  %v2224_v51 = vmul.f32 %v3436_v61, %v5794_v3  ;;  %v2225_v20 = vmul.f32 %v3437_v37, %v7916_v26  ;;  %v7970_v3 = vld [vmem:[#allocation32_spill] sm:$0xff]  ;;  %v7985_v2 = vld [vmem:[#allocation27_spill] sm:$0xff] }
 0x3d5   :  { %v3153_v44 = vadd.f32 %v3152_v46, %v3151_v0  ;;  %v2966_v41 = vpop.permute.xlu0 %2965  ;;  %2600 = vmax.xlane.f32.xlu1 %v2599_v58  ;;  %v2293_v55 = vadd.f32 %v2292_v35, %v2291_v43  ;;  %v7969_v0 = vld [vmem:[#allocation13_spill] sm:$0xff]  ;;  %v3439_v46 = vsel %vm2035_vm1, 1.0, %v7944_v49  ;;  %v2822_v15 = vmul.f32 %v3512_v28, %v5830_v50  ;;  %v7982_v35 = vld [vmem:[#allocation80_spill] sm:$0xff] }
 0x3d6   :  { %v3156_v29 = vsel %vm1826_vm2, %v2966_v41, 0.0  ;;  %vm2631_vm4 = vcmp.ne.f32.partialorder %v6565_v62, %v7969_v0  ;;  %v3440_v62 = vsel %vm2036_vm5, 1.0, %v7944_v49  ;;  %v1929_v26 = vsel %vm1826_vm2, %v7970_v3, -inf  ;;  %v7986_v37 = vld [vmem:[#allocation12_spill] sm:$0xff] }
 0x3d7   :  { %v3155_v40 = vadd.f32 %v3154_v16, %v3153_v44  ;;  %v2295_v24 = vadd.f32 %v2294_v9, %v2293_v55  ;;  %v3513_v39 = vsel %vm2631_vm4, 1.0, %v7944_v49  ;;  %v2300_v44 = vsel %vm1826_vm2, %v2224_v51, 0.0  ;;  %v7984_v9 = vld [vmem:[#allocation19_spill] sm:$0xff] }
 0x3d8   :  { %v2302_v47 = vsel %vm1826_vm2, %v2225_v20, 0.0  ;;  %v2227_v41 = vmul.f32 %v3439_v46, %v5803_v12  ;;  %v3441_v16 = vsel %vm2037_vm6, 1.0, %v7944_v49  ;;  %v2304_v58 = vsel %vm1826_vm2, %v2226_v19, 0.0  ;;  %v7988_v20 = vld [vmem:[#allocation83_spill] sm:$0xff] }
 0x3d9   :  { %v6836_v48 = vadd.f32 %v3156_v29, %v3155_v40  ;;  %2603 = vmax.xlane.f32.xlu1 %v2602_v45  ;;  %v2297_v10 = vadd.f32 %v2296_v17, %v2295_v24  ;;  %v2228_v60 = vmul.f32 %v3440_v62, %v5806_v34  ;;  %v7974_v40 = vld [vmem:[#allocation9_spill] sm:$0xff]  ;;  %v2823_v12 = vmul.f32 %v3513_v39, %v7969_v0 }
 0x3da   :  { %vm2039_vm9 = vcmp.ne.f32.partialorder %v7975_v30, %v7974_v40  ;;  %v3442_v29 = vsel %vm2038_vm7, 1.0, %v7944_v49  ;;  %v2306_v7 = vsel %vm1826_vm2, %v2227_v41, 0.0  ;;  %v2229_v45 = vmul.f32 %v3441_v16, %v5809_v38  ;;  %v7979_v34 = vld [vmem:[#allocation17_spill] sm:$0xff]  ;;  %v7983_v38 = vld [vmem:[#allocation34_spill] sm:$0xff]  ;;  %v7994_v30 = vld [vmem:[#allocation36_spill] sm:$0xff] }
 0x3db   :  { %v2299_v11 = vadd.f32 %v2298_v33, %v2297_v10  ;;  %vm2040_vm10 = vcmp.ne.f32.partialorder %v7978_v4, %v7977_v8  ;;  %vm2633_vm11 = vcmp.ne.f32.partialorder %v7980_v25, %v7979_v34  ;;  %v3443_v5 = vsel %vm2039_vm9, 1.0, %v7944_v49  ;;  %v7987_v33 = vld [vmem:[#allocation82_spill] sm:$0xff] }
 0x3dc   :  { %v2308_v6 = vsel %vm1826_vm2, %v2228_v60, 0.0  ;;  %v2230_v59 = vmul.f32 %v3442_v29, %v5812_v54  ;;  %vm2041_vm12 = vcmp.ne.f32.partialorder %v7982_v35, %v7981_v23  ;;  %v1935_v53 = vsel %vm1826_vm2, %v7983_v38, -inf  ;;  %v7995_v4 = vld [vmem:[#allocation86_spill] sm:$0xff] }
 0x3dd   :  { %v2301_v57 = vadd.f32 %v2300_v44, %v2299_v11  ;;  %v2824_v43 = vmul.f32 %v3514_v21, %v7972_v18  ;;  %vm2634_vm13 = vcmp.ne.f32.partialorder %v7985_v2, %v7984_v9  ;;  %v3444_v36 = vsel %vm2040_vm10, 1.0, %v7944_v49  ;;  %v7989_v11 = vld [vmem:[#allocation35_spill] sm:$0xff]  ;;  %v7990_v44 = vld [vmem:[#allocation21_spill] sm:$0xff] }
 0x3de   :  { %v3515_v24 = vsel %vm2633_vm11, 1.0, %v7944_v49  ;;  %v2310_v54 = vsel %vm1826_vm2, %v2229_v45, 0.0  ;;  %v2231_v61 = vmul.f32 %v3443_v5, %v7974_v40  ;;  %vm2042_vm3 = vcmp.ne.f32.partialorder %v7987_v33, %v7986_v37  ;;  %v7993_v40 = vld [vmem:[#allocation85_spill] sm:$0xff]  ;;  %v7997_v5 = vld [vmem:[#allocation30_spill] sm:$0xff] }
 0x3df   :  { %v2303_v1 = vadd.f32 %v2302_v47, %v2301_v57  ;;  %v3445_v10 = vsel %vm2041_vm12, 1.0, %v7944_v49  ;;  %v2312_v52 = vsel %vm1826_vm2, %v2230_v59, 0.0  ;;  %v2232_v51 = vmul.f32 %v3444_v36, %v7977_v8  ;;  %v7991_v47 = vld [vmem:[#allocation29_spill] sm:$0xff] }
 0x3e0   :  { %vm2043_vm14 = vcmp.ne.f32.partialorder %v7988_v20, %v5827_v63  ;;  %v1938_v46 = vsel %vm1826_vm2, %v7989_v11, -inf  ;;  %v3516_v19 = vsel %vm2634_vm13, 1.0, %v7944_v49  ;;  %v3446_v62 = vsel %vm2042_vm3, 1.0, %v7944_v49  ;;  %v7999_v36 = vld [vmem:[#allocation37_spill] sm:$0xff] }
 0x3e1   :  { %v2305_v13 = vadd.f32 %v2304_v58, %v2303_v1  ;;  %vm2635_vm15 = vcmp.ne.f32.partialorder %v7991_v47, %v7990_v44  ;;  %v2314_v41 = vsel %vm1826_vm2, %v2231_v61, 0.0  ;;  %v2233_v14 = vmul.f32 %v3445_v10, %v7981_v23  ;;  %v8002_v33 = vld [vmem:[#allocation5_spill] sm:$0xff] }
 0x3e2   :  { %vm2044_vm0 = vcmp.ne.f32.partialorder %v7992_v42, %v5830_v50  ;;  %v3447_v16 = vsel %vm2043_vm14, 1.0, %v7944_v49  ;;  %v2316_v58 = vsel %vm1826_vm2, %v2232_v51, 0.0  ;;  %v2234_v60 = vmul.f32 %v3446_v62, %v7986_v37  ;;  %v8000_v37 = vld [vmem:[#allocation88_spill] sm:$0xff] }
 0x3e3   :  { %v2307_v55 = vadd.f32 %v2306_v7, %v2305_v13  ;;  %vm2045_vm1 = vcmp.ne.f32.partialorder %v7993_v40, %v7969_v0  ;;  %v2826_v1 = vmul.f32 %v3516_v19, %v7984_v9  ;;  %v3517_v29 = vsel %vm2635_vm15, 1.0, %v7944_v49  ;;  %v7996_v13 = vld [vmem:[#allocation20_spill] sm:$0xff] }
 0x3e4   :  { %v3448_v21 = vsel %vm2044_vm0, 1.0, %v7944_v49  ;;  %v2318_v45 = vsel %vm1826_vm2, %v2233_v14, 0.0  ;;  %v2235_v8 = vmul.f32 %v3447_v16, %v5827_v63  ;;  %vm2046_vm4 = vcmp.ne.f32.partialorder %v7995_v4, %v7972_v18  ;;  %v8003_v19 = vld [vmem:[#allocation16_spill] sm:$0xff]  ;;  %v8007_v4 = vld [vmem:[#allocation23_spill] sm:$0xff] }
 0x3e5   :  { %v2309_v28 = vadd.f32 %v2308_v6, %v2307_v55  ;;  %vm2636_vm5 = vcmp.ne.f32.partialorder %v7997_v5, %v7996_v13  ;;  %v3449_v59 = vsel %vm2045_vm1, 1.0, %v7944_v49  ;;  %v2320_v35 = vsel %vm1826_vm2, %v2234_v60, 0.0  ;;  %v8005_v60 = vld [vmem:[#allocation22_spill] sm:$0xff] }
 0x3e6   :  { %v2236_v63 = vmul.f32 %v3448_v21, %v5830_v50  ;;  %v3450_v55 = vsel %vm2046_vm4, 1.0, %v7944_v49  ;;  %v2237_v61 = vmul.f32 %v3449_v59, %v7969_v0  ;;  %vm2048_vm7 = vcmp.ne.f32.partialorder %v8000_v37, %v7984_v9  ;;  %v8001_v50 = vld [vmem:[#allocation31_spill] sm:$0xff]  ;;  %v8010_v37 = vld [vmem:[#allocation56_spill] sm:$0xff] }
 0x3e7   :  { %v2311_v39 = vadd.f32 %v2310_v54, %v2309_v28  ;;  %v2322_v54 = vsel %vm1826_vm2, %v2235_v8, 0.0  ;;  %vm2637_vm8 = vcmp.ne.f32.partialorder %v8002_v33, %v8001_v50  ;;  %v2238_v51 = vmul.f32 %v3450_v55, %v7972_v18  ;;  %v8008_v59 = vld [vmem:[#allocation55_spill] sm:$0xff]  ;;  %v8009_v55 = vld [vmem:[#allocation38_spill] sm:$0xff] }
 0x3e8   :  { %v3452_v0 = vsel %vm2048_vm7, 1.0, %v7944_v49  ;;  %v2326_v62 = vsel %vm1826_vm2, %v2237_v61, 0.0  ;;  %v1950_v40 = vsel %vm1826_vm2, %v8005_v60, -inf  ;;  %vm2640_vm13 = vcmp.ne.f32.partialorder %v8008_v59, %v7976_v32 }
 0x3e9   :  { %v2313_v57 = vadd.f32 %v2312_v52, %v2311_v39  ;;  %v2324_v52 = vsel %vm1826_vm2, %v2236_v63, 0.0  ;;  %v3519_v39 = vsel %vm2637_vm8, 1.0, %v7944_v49  ;;  %v2328_v18 = vsel %vm1826_vm2, %v2238_v51, 0.0 }
 0x3ea   :  { %2975 = vrot.lane.b32.xlu1 %v2822_v15, %s3783_s5  ;;  %v2825_v15 = vmul.f32 %v3515_v24, %v7979_v34  ;;  %v1944_v24 = vsel %vm1826_vm2, %v7999_v36, -inf  ;;  %v2240_v42 = vmul.f32 %v3452_v0, %v7984_v9  ;;  %vm2641_vm3 = vcmp.ne.f32.partialorder %v8010_v37, %v7983_v38  ;;  %v8013_v0 = vld [vmem:[#allocation40_spill] sm:$0xff] }
 0x3eb   :  { %1930 = vmax.xlane.f32.xlu0 %v1929_v26  ;;  %v3523_v51 = vsel %vm2641_vm3, 1.0, %v7944_v49 }
 0x3ee   :  { %2977 = vrot.lane.b32.xlu1 %v2823_v12, %s3783_s5  ;;  %v1941_v12 = vsel %vm1826_vm2, %v7994_v30, -inf }
 0x3ef   :  { %1933 = vmax.xlane.f32.xlu0 %v1932_v22  ;;  %v2315_v22 = vadd.f32 %v2314_v41, %v2313_v57  ;;  %v8004_v41 = vld [vmem:[#allocation7_spill] sm:$0xff]  ;;  %v2829_v57 = vmul.f32 %v3519_v39, %v8001_v50  ;;  %v8014_v39 = vld [vmem:[#allocation58_spill] sm:$0xff] }
 0x3f0   :  { %v6920_v17 = vpop.xlane.xlu1 %2588  ;;  %vm2638_vm9 = vcmp.ne.f32.partialorder %v8004_v41, %v5854_v27  ;;  %vm2643_vm15 = vcmp.ne.f32.partialorder %v8014_v39, %v7994_v30 }
 0x3f1   :  { %v2317_v6 = vadd.f32 %v2316_v58, %v2315_v22  ;;  %v2332_v22 = vsel %vm1826_vm2, %v2240_v42, 0.0 }
 0x3f2   :  { %2979 = vrot.lane.b32.xlu1 %v2824_v43, %s3783_s5  ;;  %v2827_v43 = vmul.f32 %v3517_v29, %v7990_v44 }
 0x3f3   :  { %1936 = vmax.xlane.f32.xlu0 %v1935_v53  ;;  %v7998_v53 = vld [vmem:[#allocation87_spill] sm:$0xff]  ;;  %v2319_v2 = vadd.f32 %v2318_v45, %v2317_v6 }
 0x3f4   :  { %v6941_v26 = vpop.xlane.xlu1 %2591  ;;  %vm2047_vm6 = vcmp.ne.f32.partialorder %v7998_v53, %v7979_v34 }
 0x3f5   :  { %v2321_v28 = vadd.f32 %v2320_v35, %v2319_v2  ;;  %v3451_v10 = vsel %vm2047_vm6, 1.0, %v7944_v49 }
 0x3f6   :  { %2981 = vrot.lane.b32.xlu1 %v2825_v15, %s3783_s5  ;;  %v1947_v15 = vsel %vm1826_vm2, %v8003_v19, -inf  ;;  %v2239_v47 = vmul.f32 %v3451_v10, %v7979_v34  ;;  %v3520_v34 = vsel %vm2638_vm9, 1.0, %v7944_v49  ;;  %v8011_v10 = vld [vmem:[#allocation39_spill] sm:$0xff] }
 0x3f7   :  { %1939 = vmax.xlane.f32.xlu0 %v1938_v46  ;;  %v2323_v46 = vadd.f32 %v2322_v54, %v2321_v28 }
 0x3f8   :  { %v2968_v7 = vpop.permute.xlu1 %2967 }
 0x3f9   :  { %v3158_v25 = vsel %vm1826_vm2, %v2968_v7, 0.0  ;;  %v2325_v14 = vadd.f32 %v2324_v52, %v2323_v46  ;;  %v2830_v7 = vmul.f32 %v3520_v34, %v5854_v27  ;;  %v1959_v52 = vsel %vm1826_vm2, %v8011_v10, -inf }
 0x3fa   :  { %v6969_v23 = vadd.f32 %v3158_v25, %v6836_v48  ;;  %2983 = vrot.lane.b32.xlu1 %v2826_v1, %s3783_s5  ;;  %v3518_v48 = vsel %vm2636_vm5, 1.0, %v7944_v49  ;;  %v8006_v1 = vld [vmem:[#allocation8_spill] sm:$0xff]  ;;  %v1953_v25 = vsel %vm1826_vm2, %v8007_v4, -inf  ;;  %v2833_v46 = vmul.f32 %v3523_v51, %v7983_v38  ;;  %v8028_v51 = vld [vmem:[#allocation62_spill] sm:$0xff] }
 0x3fb   :  { %1942 = vmax.xlane.f32.xlu0 %v1941_v12  ;;  %v2828_v20 = vmul.f32 %v3518_v48, %v7996_v13  ;;  %v2327_v16 = vadd.f32 %v2326_v62, %v2325_v14  ;;  %v2330_v12 = vsel %vm1826_vm2, %v2239_v47, 0.0  ;;  %vm2639_vm11 = vcmp.ne.f32.partialorder %v8006_v1, %v7970_v3  ;;  %v8015_v47 = vld [vmem:[#allocation41_spill] sm:$0xff] }
 0x3fc   :  { %v3521_v5 = vsel %vm2639_vm11, 1.0, %v7944_v49  ;;  %v3522_v48 = vsel %vm2640_vm13, 1.0, %v7944_v49  ;;  %v1965_v41 = vsel %vm1826_vm2, %v8015_v47, -inf  ;;  %v3525_v14 = vsel %vm2643_vm15, 1.0, %v7944_v49 }
 0x3fd   :  { %v2329_v29 = vadd.f32 %v2328_v18, %v2327_v16  ;;  %v2831_v53 = vmul.f32 %v3521_v5, %v7970_v3  ;;  %v2832_v28 = vmul.f32 %v3522_v48, %v7976_v32  ;;  %v8016_v18 = vld [vmem:[#allocation59_spill] sm:$0xff]  ;;  %v2835_v42 = vmul.f32 %v3525_v14, %v7994_v30  ;;  %v8023_v5 = vld [vmem:[#allocation45_spill] sm:$0xff] }
 0x3fe   :  { %2985 = vrot.lane.b32.xlu1 %v2827_v43, %s3783_s5  ;;  %vm2644_vm0 = vcmp.ne.f32.partialorder %v8016_v18, %v7999_v36  ;;  %v8026_v48 = vld [vmem:[#allocation61_spill] sm:$0xff]  ;;  %vm2650_vm8 = vcmp.ne.f32.partialorder %v8028_v51, %v8013_v0  ;;  %v8031_v18 = vld [vmem:[#allocation48_spill] sm:$0xff] }
 0x3ff   :  { %1945 = vmax.xlane.f32.xlu0 %v1944_v24  ;;  %v2331_v45 = vadd.f32 %v2330_v12, %v2329_v29  ;;  %v1956_v24 = vsel %vm1826_vm2, %v8009_v55, -inf  ;;  %v8019_v12 = vld [vmem:[#allocation43_spill] sm:$0xff]  ;;  %vm2649_vm7 = vcmp.ne.f32.partialorder %v8026_v48, %v8011_v10 }
 0x400   :  { %v1971_v1 = vsel %vm1826_vm2, %v8019_v12, -inf }
 0x401   :  { %v2333_v35 = vadd.f32 %v2332_v22, %v2331_v45 }
 0x402   :  { %2987 = vrot.lane.b32.xlu1 %v2828_v20, %s3783_s5  ;;  %v8012_v20 = vld [vmem:[#allocation57_spill] sm:$0xff] }
 0x403   :  { %1948 = vmax.xlane.f32.xlu0 %v1947_v15  ;;  %vm2642_vm14 = vcmp.ne.f32.partialorder %v8012_v20, %v7989_v11 }
 0x404   :  { %v3524_v15 = vsel %vm2642_vm14, 1.0, %v7944_v49 }
 0x405   :  { %v2834_v62 = vmul.f32 %v3524_v15, %v7989_v11  ;;  %v8029_v15 = vld [vmem:[#allocation47_spill] sm:$0xff] }
 0x406   :  { %v1919_v58 = vpop.xlane.xlu0 %1918  ;;  %2989 = vrot.lane.b32.xlu1 %v2829_v57, %s3783_s5  ;;  %v8017_v57 = vld [vmem:[#allocation42_spill] sm:$0xff]  ;;  %v1986_v39 = vsel %vm1826_vm2, %v8029_v15, -inf }
 0x407   :  { %vm2049_vm10 = vcmp.ne.f32.partialorder %v1919_v58, %v7990_v44  ;;  %1951 = vmax.xlane.f32.xlu0 %v1950_v40  ;;  %v1968_v16 = vsel %vm1826_vm2, %v8017_v57, -inf  ;;  %v3526_v58 = vsel %vm2644_vm0, 1.0, %v7944_v49  ;;  %v8018_v40 = vld [vmem:[#allocation60_spill] sm:$0xff] }
 0x408   :  { %v3453_v9 = vsel %vm2049_vm10, 1.0, %v7944_v49  ;;  %vm2645_vm1 = vcmp.ne.f32.partialorder %v8018_v40, %v8003_v19  ;;  %v2836_v34 = vmul.f32 %v3526_v58, %v7999_v36  ;;  %v8033_v40 = vld [vmem:[#allocation49_spill] sm:$0xff] }
 0x409   :  { %v2241_v21 = vmul.f32 %v3453_v9, %v7990_v44  ;;  %v3527_v29 = vsel %vm2645_vm1, 1.0, %v7944_v49  ;;  %v8020_v9 = vld [vmem:[#allocation63_spill] sm:$0xff] }
 0x40a   :  { %v1922_v8 = vpop.xlane.xlu0 %1921  ;;  %2991 = vrot.lane.b32.xlu1 %v2830_v7, %s3783_s5  ;;  %vm2646_vm4 = vcmp.ne.f32.partialorder %v8020_v9, %v8005_v60  ;;  %v2837_v22 = vmul.f32 %v3527_v29, %v8003_v19  ;;  %v8034_v9 = vld [vmem:[#allocation67_spill] sm:$0xff] }
 0x40b   :  { %v2334_v6 = vsel %vm1826_vm2, %v2241_v21, 0.0  ;;  %vm2050_vm12 = vcmp.ne.f32.partialorder %v1922_v8, %v7996_v13  ;;  %1954 = vmax.xlane.f32.xlu0 %v1953_v25  ;;  %v8021_v21 = vld [vmem:[#allocation44_spill] sm:$0xff]  ;;  %v3528_v45 = vsel %vm2646_vm4, 1.0, %v7944_v49  ;;  %v8022_v8 = vld [vmem:[#allocation65_spill] sm:$0xff]  ;;  %vm2653_vm11 = vcmp.ne.f32.partialorder %v8034_v9, %v8019_v12 }
 0x40c   :  { %v3454_v44 = vsel %vm2050_vm12, 1.0, %v7944_v49  ;;  %v2335_v43 = vadd.f32 %v2334_v6, %v2333_v35  ;;  %v1974_v7 = vsel %vm1826_vm2, %v8021_v21, -inf  ;;  %vm2647_vm5 = vcmp.ne.f32.partialorder %v8022_v8, %v8007_v4  ;;  %v8035_v8 = vld [vmem:[#allocation50_spill] sm:$0xff]  ;;  %v8044_v9 = vld [vmem:[#allocation73_spill] sm:$0xff] }
 0x40d   :  { %v2242_v63 = vmul.f32 %v3454_v44, %v7996_v13  ;;  %v2838_v25 = vmul.f32 %v3528_v45, %v8005_v60  ;;  %v1977_v6 = vsel %vm1826_vm2, %v8023_v5, -inf  ;;  %v3529_v59 = vsel %vm2647_vm5, 1.0, %v7944_v49  ;;  %v8024_v44 = vld [vmem:[#allocation68_spill] sm:$0xff] }
 0x40e   :  { %v2970_v2 = vpop.permute.xlu0 %2969  ;;  %2993 = vrot.lane.b32.xlu1 %v2831_v53, %s3783_s5  ;;  %vm2648_vm6 = vcmp.ne.f32.partialorder %v8024_v44, %v8009_v55  ;;  %v8025_v53 = vld [vmem:[#allocation46_spill] sm:$0xff]  ;;  %v8036_v44 = vld [vmem:[#allocation69_spill] sm:$0xff]  ;;  %vm2658_vm1 = vcmp.ne.f32.partialorder %v8044_v9, %v8029_v15 }
 0x40f   :  { %v2336_v54 = vsel %vm1826_vm2, %v2242_v63, 0.0  ;;  %v3160_v61 = vsel %vm1826_vm2, %v2970_v2, 0.0  ;;  %1957 = vmax.xlane.f32.xlu0 %v1956_v24  ;;  %v2839_v63 = vmul.f32 %v3529_v59, %v8007_v4  ;;  %v3530_v2 = vsel %vm2648_vm6, 1.0, %v7944_v49 }
 0x410   :  { %v7034_v33 = vadd.f32 %v2336_v54, %v2335_v43  ;;  %v3161_v13 = vadd.f32 %v3160_v61, %v6969_v23  ;;  %v1962_v23 = vsel %vm1826_vm2, %v8013_v0, -inf  ;;  %v1980_v43 = vsel %vm1826_vm2, %v8025_v53, -inf  ;;  %v8027_v61 = vld [vmem:[#allocation24_spill] sm:$0xff] }
 0x411   :  { %v2840_v54 = vmul.f32 %v3530_v2, %v8009_v55  ;;  %v1983_v37 = vsel %vm1826_vm2, %v8027_v61, -inf  ;;  %vm2654_vm13 = vcmp.ne.f32.partialorder %v8036_v44, %v8021_v21  ;;  %v2013_v44 = vsel %vm1826_vm2, %v7966_v31, -inf }
 0x412   :  { %2995 = vrot.lane.b32.xlu1 %v2832_v28, %s3783_s5  ;;  %v3531_v28 = vsel %vm2649_vm7, 1.0, %v7944_v49 }
 0x413   :  { %1960 = vmax.xlane.f32.xlu0 %v1959_v52 }
 0x416   :  { %2997 = vrot.lane.b32.xlu1 %v2833_v46, %s3783_s5 }
 0x417   :  { %1963 = vmax.xlane.f32.xlu0 %v1962_v23  ;;  %v2841_v23 = vmul.f32 %v3531_v28, %v8011_v10  ;;  %v3536_v28 = vsel %vm2654_vm13, 1.0, %v7944_v49 }
 0x41a   :  { %2999 = vrot.lane.b32.xlu1 %v2834_v62, %s3783_s5  ;;  %v3532_v62 = vsel %vm2650_vm8, 1.0, %v7944_v49 }
 0x41b   :  { %1966 = vmax.xlane.f32.xlu0 %v1965_v41  ;;  %v8030_v41 = vld [vmem:[#allocation64_spill] sm:$0xff]  ;;  %v2842_v14 = vmul.f32 %v3532_v62, %v8013_v0  ;;  %v8040_v62 = vld [vmem:[#allocation71_spill] sm:$0xff] }
 0x41c   :  { %vm2651_vm9 = vcmp.ne.f32.partialorder %v8030_v41, %v8015_v47  ;;  %vm2656_vm15 = vcmp.ne.f32.partialorder %v8040_v62, %v8025_v53 }
 0x41e   :  { %3001 = vrot.lane.b32.xlu1 %v2835_v42, %s3783_s5  ;;  %v1989_v42 = vsel %vm1826_vm2, %v8031_v18, -inf }
 0x41f   :  { %1969 = vmax.xlane.f32.xlu0 %v1968_v16  ;;  %v8032_v16 = vld [vmem:[#allocation66_spill] sm:$0xff] }
 0x420   :  { %vm2652_vm10 = vcmp.ne.f32.partialorder %v8032_v16, %v8017_v57  ;;  %v8042_v16 = vld [vmem:[#allocation72_spill] sm:$0xff] }
 0x421   :  { %vm2657_vm0 = vcmp.ne.f32.partialorder %v8042_v16, %v8027_v61 }
 0x422   :  { %3003 = vrot.lane.b32.xlu1 %v2836_v34, %s3783_s5  ;;  %v1992_v34 = vsel %vm1826_vm2, %v8033_v40, -inf }
 0x423   :  { %1972 = vmax.xlane.f32.xlu0 %v1971_v1  ;;  %v3534_v1 = vsel %vm2652_vm10, 1.0, %v7944_v49 }
 0x426   :  { %3005 = vrot.lane.b32.xlu1 %v2837_v22, %s3783_s5 }
 0x427   :  { %1975 = vmax.xlane.f32.xlu0 %v1974_v7  ;;  %v2844_v7 = vmul.f32 %v3534_v1, %v8017_v57 }
 0x429   :  { %v7084_v35 = vpop.xlane.xlu1 %2594 }
 0x42a   :  { %3007 = vrot.lane.b32.xlu1 %v2838_v25, %s3783_s5  ;;  %v1995_v25 = vsel %vm1826_vm2, %v8035_v8, -inf }
 0x42b   :  { %1978 = vmax.xlane.f32.xlu0 %v1977_v6  ;;  %v3535_v6 = vsel %vm2653_vm11, 1.0, %v7944_v49 }
 0x42c   :  { %v2845_v2 = vmul.f32 %v3535_v6, %v8019_v12  ;;  %v8046_v6 = vld [vmem:[#allocation75_spill] sm:$0xff] }
 0x42d   :  { %v7093_v24 = vpop.xlane.xlu1 %2597  ;;  %vm2659_vm4 = vcmp.ne.f32.partialorder %v8046_v6, %v8031_v18 }
 0x42e   :  { %3009 = vrot.lane.b32.xlu1 %v2839_v63, %s3783_s5 }
 0x42f   :  { %1981 = vmax.xlane.f32.xlu0 %v1980_v43 }
 0x431   :  { %v2972_v52 = vpop.permute.xlu1 %2971 }
 0x432   :  { %v3162_v20 = vsel %vm1826_vm2, %v2972_v52, 0.0  ;;  %3011 = vrot.lane.b32.xlu1 %v2840_v54, %s3783_s5  ;;  %v8037_v54 = vld [vmem:[#allocation51_spill] sm:$0xff]  ;;  %v8038_v52 = vld [vmem:[#allocation70_spill] sm:$0xff] }
 0x433   :  { %1984 = vmax.xlane.f32.xlu0 %v1983_v37  ;;  %v7106_v46 = vadd.f32 %v3162_v20, %v3161_v13  ;;  %v3533_v13 = vsel %vm2651_vm9, 1.0, %v7944_v49  ;;  %v1998_v37 = vsel %vm1826_vm2, %v8037_v54, -inf  ;;  %vm2655_vm14 = vcmp.ne.f32.partialorder %v8038_v52, %v8023_v5 }
 0x434   :  { %v2843_v58 = vmul.f32 %v3533_v13, %v8015_v47  ;;  %v2846_v20 = vmul.f32 %v3536_v28, %v8021_v21  ;;  %v3538_v13 = vsel %vm2656_vm15, 1.0, %v7944_v49 }
 0x436   :  { %3013 = vrot.lane.b32.xlu1 %v2841_v23, %s3783_s5  ;;  %v8039_v23 = vld [vmem:[#allocation25_spill] sm:$0xff] }
 0x437   :  { %1987 = vmax.xlane.f32.xlu0 %v1986_v39  ;;  %v3537_v39 = vsel %vm2655_vm14, 1.0, %v7944_v49  ;;  %vm2663_vm7 = vcmp.ne.f32.partialorder %v6920_v17, %v8039_v23 }
 0x438   :  { %v2847_v41 = vmul.f32 %v3537_v39, %v8023_v5  ;;  %v3545_v39 = vsel %vm2663_vm7, 1.0, %v7944_v49 }
 0x43a   :  { %3015 = vrot.lane.b32.xlu1 %v2842_v14, %s3783_s5  ;;  %v8041_v14 = vld [vmem:[#allocation52_spill] sm:$0xff] }
 0x43b   :  { %1990 = vmax.xlane.f32.xlu0 %v1989_v42  ;;  %v2004_v42 = vsel %vm1826_vm2, %v8041_v14, -inf  ;;  %vm2664_vm8 = vcmp.ne.f32.partialorder %v6941_v26, %v8041_v14 }
 0x43c   :  { %v3546_v17 = vsel %vm2664_vm8, 1.0, %v7944_v49 }
 0x43e   :  { %3017 = vrot.lane.b32.xlu1 %v2843_v58, %s3783_s5  ;;  %v2848_v58 = vmul.f32 %v3538_v13, %v8025_v53 }
 0x43f   :  { %1993 = vmax.xlane.f32.xlu0 %v1992_v34  ;;  %v1925_v29 = vpop.xlane.xlu0 %1924  ;;  %v8043_v34 = vld [vmem:[#allocation26_spill] sm:$0xff] }
 0x440   :  { %vm2051_vm12 = vcmp.ne.f32.partialorder %v1925_v29, %v8001_v50  ;;  %v2007_v1 = vsel %vm1826_vm2, %v8043_v34, -inf  ;;  %v3539_v29 = vsel %vm2657_vm0, 1.0, %v7944_v49  ;;  %vm2665_vm9 = vcmp.ne.f32.partialorder %v7084_v35, %v8043_v34 }
 0x441   :  { %v3455_v22 = vsel %vm2051_vm12, 1.0, %v7944_v49  ;;  %v3547_v9 = vsel %vm2665_vm9, 1.0, %v7944_v49 }
 0x442   :  { %v2243_v45 = vmul.f32 %v3455_v22, %v8001_v50  ;;  %3019 = vrot.lane.b32.xlu1 %v2844_v7, %s3783_s5  ;;  %v2849_v22 = vmul.f32 %v3539_v29, %v8027_v61  ;;  %v8045_v7 = vld [vmem:[#allocation53_spill] sm:$0xff] }
 0x443   :  { %1996 = vmax.xlane.f32.xlu0 %v1995_v25  ;;  %v1928_v59 = vpop.xlane.xlu0 %1927  ;;  %v3540_v25 = vsel %vm2658_vm1, 1.0, %v7944_v49  ;;  %vm2666_vm11 = vcmp.ne.f32.partialorder %v7093_v24, %v8045_v7 }
 0x444   :  { %v2338_v63 = vsel %vm1826_vm2, %v2243_v45, 0.0  ;;  %vm2052_vm3 = vcmp.ne.f32.partialorder %v1928_v59, %v5854_v27  ;;  %v2010_v45 = vsel %vm1826_vm2, %v8045_v7, -inf  ;;  %v2850_v59 = vmul.f32 %v3540_v25, %v8029_v15 }
 0x445   :  { %v2339_v43 = vadd.f32 %v2338_v63, %v7034_v33  ;;  %v3456_v50 = vsel %vm2052_vm3, 1.0, %v7944_v49  ;;  %v3541_v63 = vsel %vm2659_vm4, 1.0, %v7944_v49 }
 0x446   :  { %v2244_v48 = vmul.f32 %v3456_v50, %v5854_v27  ;;  %3021 = vrot.lane.b32.xlu1 %v2845_v2, %s3783_s5  ;;  %v2001_v27 = vsel %vm1826_vm2, %v8039_v23, -inf  ;;  %v2851_v50 = vmul.f32 %v3541_v63, %v8031_v18  ;;  %v2016_v2 = vsel %vm1826_vm2, %v7967_v56, -inf }
 0x447   :  { %1999 = vmax.xlane.f32.xlu0 %v1998_v37  ;;  %v8048_v37 = vld [vmem:[#allocation81_spill] sm:$0xff] }
 0x448   :  { %v2340_v51 = vsel %vm1826_vm2, %v2244_v48, 0.0  ;;  %vm2662_vm6 = vcmp.ne.f32.partialorder %v8048_v37, %v8037_v54 }
 0x449   :  { %v7152_v33 = vadd.f32 %v2340_v51, %v2339_v43  ;;  %v8047_v43 = vld [vmem:[#allocation79_spill] sm:$0xff]  ;;  %v3544_v52 = vsel %vm2662_vm6, 1.0, %v7944_v49 }
 0x44a   :  { %3023 = vrot.lane.b32.xlu1 %v2846_v20, %s3783_s5  ;;  %vm2661_vm5 = vcmp.ne.f32.partialorder %v8047_v43, %v8035_v8  ;;  %v2854_v20 = vmul.f32 %v3544_v52, %v8037_v54 }
 0x44b   :  { %2002 = vmax.xlane.f32.xlu0 %v2001_v27  ;;  %v3543_v48 = vsel %vm2661_vm5, 1.0, %v7944_v49  ;;  %v2974_v27 = vpop.permute.xlu0 %2973 }
 0x44c   :  { %v2853_v28 = vmul.f32 %v3543_v48, %v8035_v8 }
 0x44e   :  { %3025 = vrot.lane.b32.xlu1 %v2847_v41, %s3783_s5  ;;  %v3164_v41 = vsel %vm1826_vm2, %v2974_v27, 0.0 }
 0x44f   :  { %2005 = vmax.xlane.f32.xlu0 %v2004_v42  ;;  %v2855_v42 = vmul.f32 %v3545_v39, %v8039_v23  ;;  %v3165_v13 = vadd.f32 %v3164_v41, %v7106_v46 }
 0x452   :  { %3027 = vrot.lane.b32.xlu1 %v2848_v58, %s3783_s5  ;;  %v8049_v58 = vld [vmem:[#allocation77_spill] sm:$0xff] }
 0x453   :  { %2008 = vmax.xlane.f32.xlu0 %v2007_v1  ;;  %vm2660_vm10 = vcmp.ne.f32.partialorder %v8049_v58, %v8033_v40  ;;  %v2856_v1 = vmul.f32 %v3546_v17, %v8041_v14 }
 0x456   :  { %3029 = vrot.lane.b32.xlu1 %v2849_v22, %s3783_s5  ;;  %v3542_v22 = vsel %vm2660_vm10, 1.0, %v7944_v49 }
 0x457   :  { %2011 = vmax.xlane.f32.xlu0 %v2010_v45  ;;  %v2857_v45 = vmul.f32 %v3547_v9, %v8043_v34  ;;  %v2852_v6 = vmul.f32 %v3542_v22, %v8033_v40 }
 0x45a   :  { %3031 = vrot.lane.b32.xlu1 %v2850_v59, %s3783_s5  ;;  %v3548_v59 = vsel %vm2666_vm11, 1.0, %v7944_v49 }
 0x45b   :  { %2014 = vmax.xlane.f32.xlu0 %v2013_v44  ;;  %v2858_v43 = vmul.f32 %v3548_v59, %v8045_v7 }
 0x45e   :  { %3033 = vrot.lane.b32.xlu1 %v2851_v50, %s3783_s5 }
 0x45f   :  { %2017 = vmax.xlane.f32.xlu0 %v2016_v2 }
 0x462   :  { %v2601_v51 = vpop.xlane.xlu1 %2600  ;;  %3037 = vrot.lane.b32.xlu1 %v2853_v28, %s3783_s5 }
 0x463   :  { %vm2667_vm12 = vcmp.ne.f32.partialorder %v2601_v51, %v7966_v31 }
 0x464   :  { %v3549_v44 = vsel %vm2667_vm12, 1.0, %v7944_v49 }
 0x465   :  { %v2859_v2 = vmul.f32 %v3549_v44, %v7966_v31 }
 0x466   :  { %v2604_v62 = vpop.xlane.xlu1 %2603  ;;  %3039 = vrot.lane.b32.xlu1 %v2854_v20, %s3783_s5 }
 0x467   :  { %vm2668_vm13 = vcmp.ne.f32.partialorder %v2604_v62, %v7967_v56 }
 0x468   :  { %v3550_v48 = vsel %vm2668_vm13, 1.0, %v7944_v49 }
 0x469   :  { %v2860_v52 = vmul.f32 %v3550_v48, %v7967_v56 }
 0x46a   :  { %v2976_v16 = vpop.permute.xlu1 %2975  ;;  %3041 = vrot.lane.b32.xlu1 %v2855_v42, %s3783_s5 }
 0x46b   :  { %v3166_v26 = vsel %vm1826_vm2, %v2976_v16, 0.0 }
 0x46c   :  { %v3167_v29 = vadd.f32 %v3166_v26, %v3165_v13 }
 0x46e   :  { %v2978_v35 = vpop.permute.xlu1 %2977  ;;  %3043 = vrot.lane.b32.xlu1 %v2856_v1, %s3783_s5 }
 0x46f   :  { %v3168_v46 = vsel %vm1826_vm2, %v2978_v35, 0.0 }
 0x470   :  { %v3169_v25 = vadd.f32 %v3168_v46, %v3167_v29 }
 0x472   :  { %v2980_v63 = vpop.permute.xlu1 %2979  ;;  %3045 = vrot.lane.b32.xlu1 %v2857_v45, %s3783_s5 }
 0x473   :  { %v3170_v24 = vsel %vm1826_vm2, %v2980_v63, 0.0 }
 0x474   :  { %v7233_v50 = vadd.f32 %v3170_v24, %v3169_v25 }
 0x475   :  { %3035 = vrot.lane.b32.xlu0 %v2852_v6, %s3783_s5 }
 0x476   :  { %v2982_v37 = vpop.permute.xlu1 %2981  ;;  %3047 = vrot.lane.b32.xlu1 %v2858_v43, %s3783_s5 }
 0x478   :  { %v1931_v28 = vpop.xlane.xlu0 %1930 }
 0x479   :  { %3049 = vrot.lane.b32.xlu0 %v2859_v2, %s3783_s5  ;;  %vm2053_vm3 = vcmp.ne.f32.partialorder %v1931_v28, %v7970_v3 }
 0x47a   :  { %v2984_v51 = vpop.permute.xlu1 %2983  ;;  %3051 = vrot.lane.b32.xlu1 %v2860_v52, %s3783_s5  ;;  %v3457_v2 = vsel %vm2053_vm3, 1.0, %v7944_v49 }
 0x47b   :  { %v2245_v31 = vmul.f32 %v3457_v2, %v7970_v3 }
 0x47c   :  { %v1934_v20 = vpop.xlane.xlu0 %1933 }
 0x47d   :  { %vm2054_vm14 = vcmp.ne.f32.partialorder %v1934_v20, %v7976_v32  ;;  %v2342_v14 = vsel %vm1826_vm2, %v2245_v31, 0.0  ;;  %v3172_v31 = vsel %vm1826_vm2, %v2982_v37, 0.0 }
 0x47e   :  { %v7241_v27 = vpop.permute.xlu1 %2985  ;;  %v3458_v48 = vsel %vm2054_vm14, 1.0, %v7944_v49 }
 0x47f   :  { %v2246_v7 = vmul.f32 %v3458_v48, %v7976_v32 }
 0x480   :  { %v1937_v39 = vpop.xlane.xlu0 %1936 }
 0x481   :  { %vm2055_vm15 = vcmp.ne.f32.partialorder %v1937_v39, %v7983_v38 }
 0x482   :  { %v7243_v62 = vpop.permute.xlu1 %2987  ;;  %v3459_v28 = vsel %vm2055_vm15, 1.0, %v7944_v49 }
 0x483   :  { %v2247_v23 = vmul.f32 %v3459_v28, %v7983_v38  ;;  %v3173_v28 = vadd.f32 %v3172_v31, %v7233_v50 }
 0x484   :  { %v1940_v41 = vpop.xlane.xlu0 %1939 }
 0x485   :  { %vm2056_vm0 = vcmp.ne.f32.partialorder %v1940_v41, %v7989_v11  ;;  %v2344_v41 = vsel %vm1826_vm2, %v2246_v7, 0.0  ;;  %v2346_v38 = vsel %vm1826_vm2, %v2247_v23, 0.0 }
 0x486   :  { %v7245_v42 = vpop.permute.xlu1 %2989  ;;  %v3460_v20 = vsel %vm2056_vm0, 1.0, %v7944_v49 }
 0x487   :  { %v2248_v32 = vmul.f32 %v3460_v20, %v7989_v11 }
 0x488   :  { %v1943_v17 = vpop.xlane.xlu0 %1942 }
 0x489   :  { %vm2057_vm1 = vcmp.ne.f32.partialorder %v1943_v17, %v7994_v30  ;;  %v2343_v17 = vadd.f32 %v2342_v14, %v7152_v33  ;;  %v2348_v33 = vsel %vm1826_vm2, %v2248_v32, 0.0 }
 0x48a   :  { %v7247_v13 = vpop.permute.xlu1 %2991  ;;  %v3461_v3 = vsel %vm2057_vm1, 1.0, %v7944_v49 }
 0x48b   :  { %v2345_v7 = vadd.f32 %v2344_v41, %v2343_v17  ;;  %v3178_v41 = vsel %vm1826_vm2, %v7243_v62, 0.0 }
 0x48c   :  { %v1946_v16 = vpop.xlane.xlu0 %1945 }
 0x48d   :  { %vm2058_vm4 = vcmp.ne.f32.partialorder %v1946_v16, %v7999_v36  ;;  %v2249_v16 = vmul.f32 %v3461_v3, %v7994_v30  ;;  %v2347_v37 = vadd.f32 %v2346_v38, %v2345_v7  ;;  %v3180_v38 = vsel %vm1826_vm2, %v7245_v42, 0.0 }
 0x48e   :  { %v7249_v58 = vpop.permute.xlu1 %2993  ;;  %v3462_v2 = vsel %vm2058_vm4, 1.0, %v7944_v49 }
 0x48f   :  { %v2250_v14 = vmul.f32 %v3462_v2, %v7999_v36 }
 0x490   :  { %v1949_v26 = vpop.xlane.xlu0 %1948 }
 0x491   :  { %vm2059_vm5 = vcmp.ne.f32.partialorder %v1949_v26, %v8003_v19  ;;  %v3174_v26 = vsel %vm1826_vm2, %v2984_v51, 0.0  ;;  %v2350_v51 = vsel %vm1826_vm2, %v2249_v16, 0.0  ;;  %v2352_v32 = vsel %vm1826_vm2, %v2250_v14, 0.0 }
 0x492   :  { %v7251_v1 = vpop.permute.xlu1 %2995  ;;  %v3463_v11 = vsel %vm2059_vm5, 1.0, %v7944_v49  ;;  %v3175_v36 = vadd.f32 %v3174_v26, %v3173_v28 }
 0x493   :  { %v2251_v3 = vmul.f32 %v3463_v11, %v8003_v19  ;;  %v3182_v11 = vsel %vm1826_vm2, %v7247_v13, 0.0 }
 0x494   :  { %v1952_v29 = vpop.xlane.xlu0 %1951 }
 0x495   :  { %vm2060_vm6 = vcmp.ne.f32.partialorder %v1952_v29, %v8005_v60  ;;  %v3176_v29 = vsel %vm1826_vm2, %v7241_v27, 0.0  ;;  %v2354_v62 = vsel %vm1826_vm2, %v2251_v3, 0.0 }
 0x496   :  { %v7253_v9 = vpop.permute.xlu1 %2997  ;;  %v3464_v23 = vsel %vm2060_vm6, 1.0, %v7944_v49  ;;  %v3177_v27 = vadd.f32 %v3176_v29, %v3175_v36 }
 0x497   :  { %v2252_v17 = vmul.f32 %v3464_v23, %v8005_v60 }
 0x498   :  { %v1955_v22 = vpop.xlane.xlu0 %1954  ;;  %v3179_v60 = vadd.f32 %v3178_v41, %v3177_v27  ;;  %v3188_v41 = vsel %vm1826_vm2, %v7253_v9, 0.0 }
 0x499   :  { %vm2061_vm7 = vcmp.ne.f32.partialorder %v1955_v22, %v8007_v4  ;;  %v2349_v22 = vadd.f32 %v2348_v33, %v2347_v37  ;;  %v2356_v26 = vsel %vm1826_vm2, %v2252_v17, 0.0  ;;  %v3184_v37 = vsel %vm1826_vm2, %v7249_v58, 0.0 }
 0x49a   :  { %v7255_v35 = vpop.permute.xlu1 %2999  ;;  %v3465_v50 = vsel %vm2061_vm7, 1.0, %v7944_v49  ;;  %v3181_v42 = vadd.f32 %v3180_v38, %v3179_v60 }
 0x49b   :  { %v2351_v2 = vadd.f32 %v2350_v51, %v2349_v22  ;;  %v2253_v16 = vmul.f32 %v3465_v50, %v8007_v4  ;;  %v3186_v51 = vsel %vm1826_vm2, %v7251_v1, 0.0  ;;  %v3190_v27 = vsel %vm1826_vm2, %v7255_v35, 0.0 }
 0x49c   :  { %v7257_v46 = vpop.xlane.xlu0 %1957 }
 0x49d   :  { %vm2062_vm8 = vcmp.ne.f32.partialorder %v7257_v46, %v8009_v55  ;;  %v2358_v13 = vsel %vm1826_vm2, %v2253_v16, 0.0 }
 0x49e   :  { %v7259_v45 = vpop.permute.xlu1 %3001  ;;  %v3466_v19 = vsel %vm2062_vm8, 1.0, %v7944_v49 }
 0x49f   :  { %v2254_v33 = vmul.f32 %v3466_v19, %v8009_v55  ;;  %v3183_v55 = vadd.f32 %v3182_v11, %v3181_v42  ;;  %v3192_v16 = vsel %vm1826_vm2, %v7259_v45, 0.0 }
 0x4a0   :  { %v7261_v25 = vpop.xlane.xlu0 %1960 }
 0x4a1   :  { %vm2063_vm9 = vcmp.ne.f32.partialorder %v7261_v25, %v8011_v10  ;;  %v2353_v25 = vadd.f32 %v2352_v32, %v2351_v2  ;;  %v2360_v3 = vsel %vm1826_vm2, %v2254_v33, 0.0  ;;  %v3185_v58 = vadd.f32 %v3184_v37, %v3183_v55 }
 0x4a2   :  { %v7263_v6 = vpop.permute.xlu1 %3003  ;;  %v3467_v7 = vsel %vm2063_vm9, 1.0, %v7944_v49 }
 0x4a3   :  { %v2355_v14 = vadd.f32 %v2354_v62, %v2353_v25  ;;  %v2255_v23 = vmul.f32 %v3467_v7, %v8011_v10  ;;  %v3194_v7 = vsel %vm1826_vm2, %v7263_v6, 0.0 }
 0x4a4   :  { %v7265_v59 = vpop.xlane.xlu0 %1963 }
 0x4a5   :  { %vm2064_vm10 = vcmp.ne.f32.partialorder %v7265_v59, %v8013_v0  ;;  %v2362_v32 = vsel %vm1826_vm2, %v2255_v23, 0.0 }
 0x4a6   :  { %v7267_v44 = vpop.permute.xlu1 %3005  ;;  %v3468_v4 = vsel %vm2064_vm10, 1.0, %v7944_v49 }
 0x4a7   :  { %v2256_v36 = vmul.f32 %v3468_v4, %v8013_v0  ;;  %v3187_v0 = vadd.f32 %v3186_v51, %v3185_v58 }
 0x4a8   :  { %v7269_v63 = vpop.xlane.xlu0 %1966 }
 0x4a9   :  { %vm2065_vm11 = vcmp.ne.f32.partialorder %v7269_v63, %v8015_v47  ;;  %v2357_v63 = vadd.f32 %v2356_v26, %v2355_v14  ;;  %v2364_v2 = vsel %vm1826_vm2, %v2256_v36, 0.0  ;;  %v3189_v9 = vadd.f32 %v3188_v41, %v3187_v0 }
 0x4aa   :  { %v7272_v24 = vpop.permute.xlu1 %3007  ;;  %v3469_v29 = vsel %vm2065_vm11, 1.0, %v7944_v49  ;;  %v3196_v14 = vsel %vm1826_vm2, %v7267_v44, 0.0 }
 0x4ab   :  { %v2359_v22 = vadd.f32 %v2358_v13, %v2357_v63  ;;  %v2257_v1 = vmul.f32 %v3469_v29, %v8015_v47  ;;  %v3198_v13 = vsel %vm1826_vm2, %v7272_v24, 0.0 }
 0x4ac   :  { %v7274_v43 = vpop.xlane.xlu0 %1969 }
 0x4ad   :  { %vm2066_vm12 = vcmp.ne.f32.partialorder %v7274_v43, %v8017_v57  ;;  %v2361_v17 = vadd.f32 %v2360_v3, %v2359_v22  ;;  %v2366_v60 = vsel %vm1826_vm2, %v2257_v1, 0.0 }
 0x4ae   :  { %v7280_v52 = vpop.permute.xlu1 %3009  ;;  %v3470_v10 = vsel %vm2066_vm12, 1.0, %v7944_v49 }
 0x4af   :  { %v2258_v19 = vmul.f32 %v3470_v10, %v8017_v57  ;;  %v2363_v38 = vadd.f32 %v2362_v32, %v2361_v17  ;;  %v3191_v57 = vadd.f32 %v3190_v27, %v3189_v9  ;;  %v3200_v51 = vsel %vm1826_vm2, %v7280_v52, 0.0 }
 0x4b0   :  { %v7282_v56 = vpop.xlane.xlu0 %1972 }
 0x4b1   :  { %vm2067_vm13 = vcmp.ne.f32.partialorder %v7282_v56, %v8019_v12  ;;  %v2365_v25 = vadd.f32 %v2364_v2, %v2363_v38  ;;  %v2368_v11 = vsel %vm1826_vm2, %v2258_v19, 0.0  ;;  %v3193_v45 = vadd.f32 %v3192_v16, %v3191_v57 }
 0x4b2   :  { %v7290_v34 = vpop.permute.xlu1 %3011  ;;  %v3471_v56 = vsel %vm2067_vm13, 1.0, %v7944_v49 }
 0x4b3   :  { %v2259_v35 = vmul.f32 %v3471_v56, %v8019_v12  ;;  %v2367_v33 = vadd.f32 %v2366_v60, %v2365_v25  ;;  %v3202_v22 = vsel %vm1826_vm2, %v7290_v34, 0.0  ;;  %v8050_v34 = vld [vmem:[#allocation51_spill] sm:$0xff] }
 0x4b4   :  { %v7292_v39 = vpop.xlane.xlu0 %1975 }
 0x4b5   :  { %vm2068_vm3 = vcmp.ne.f32.partialorder %v7292_v39, %v8021_v21  ;;  %v2370_v4 = vsel %vm1826_vm2, %v2259_v35, 0.0  ;;  %v2369_v37 = vadd.f32 %v2368_v11, %v2367_v33 }
 0x4b6   :  { %v7303_v48 = vpop.permute.xlu1 %3013  ;;  %v3472_v47 = vsel %vm2068_vm3, 1.0, %v7944_v49 }
 0x4b7   :  { %v2260_v26 = vmul.f32 %v3472_v47, %v8021_v21  ;;  %v3195_v21 = vadd.f32 %v3194_v7, %v3193_v45  ;;  %v2371_v63 = vadd.f32 %v2370_v4, %v2369_v37  ;;  %v3204_v0 = vsel %vm1826_vm2, %v7303_v48, 0.0  ;;  %v8051_v47 = vld [vmem:[#allocation25_spill] sm:$0xff] }
 0x4b8   :  { %v7305_v54 = vpop.xlane.xlu0 %1978 }
 0x4b9   :  { %vm2069_vm14 = vcmp.ne.f32.partialorder %v7305_v54, %v8023_v5  ;;  %v2372_v23 = vsel %vm1826_vm2, %v2260_v26, 0.0  ;;  %v3197_v44 = vadd.f32 %v3196_v14, %v3195_v21  ;;  %v8053_v21 = vld [vmem:[#allocation26_spill] sm:$0xff] }
 0x4ba   :  { %v7318_v20 = vpop.permute.xlu1 %3015  ;;  %v3473_v54 = vsel %vm2069_vm14, 1.0, %v7944_v49 }
 0x4bb   :  { %v2261_v6 = vmul.f32 %v3473_v54, %v8023_v5  ;;  %v3199_v36 = vadd.f32 %v3198_v13, %v3197_v44  ;;  %v3206_v19 = vsel %vm1826_vm2, %v7318_v20, 0.0  ;;  %v8052_v20 = vld [vmem:[#allocation52_spill] sm:$0xff] }
 0x4bc   :  { %v7320_v30 = vpop.xlane.xlu0 %1981 }
 0x4bd   :  { %vm2070_vm15 = vcmp.ne.f32.partialorder %v7320_v30, %v8025_v53  ;;  %v2374_v3 = vsel %vm1826_vm2, %v2261_v6, 0.0  ;;  %v3201_v52 = vadd.f32 %v3200_v51, %v3199_v36 }
 0x4be   :  { %v7336_v31 = vpop.permute.xlu1 %3017  ;;  %v3474_v12 = vsel %vm2070_vm15, 1.0, %v7944_v49 }
 0x4bf   :  { %v2262_v55 = vmul.f32 %v3474_v12, %v8025_v53  ;;  %v2373_v53 = vadd.f32 %v2372_v23, %v2371_v63  ;;  %v3203_v27 = vadd.f32 %v3202_v22, %v3201_v52  ;;  %v3208_v35 = vsel %vm1826_vm2, %v7336_v31, 0.0 }
 0x4c0   :  { %v7338_v46 = vpop.xlane.xlu0 %1984 }
 0x4c1   :  { %vm2071_vm0 = vcmp.ne.f32.partialorder %v7338_v46, %v8027_v61  ;;  %v2376_v10 = vsel %vm1826_vm2, %v2262_v55, 0.0  ;;  %v2375_v41 = vadd.f32 %v2374_v3, %v2373_v53  ;;  %v3205_v48 = vadd.f32 %v3204_v0, %v3203_v27  ;;  %v8055_v0 = vld [vmem:[#allocation54_spill] sm:$0xff] }
 0x4c2   :  { %v7354_v28 = vpop.permute.xlu1 %3019  ;;  %v3475_v46 = vsel %vm2071_vm0, 1.0, %v7944_v49 }
 0x4c3   :  { %v2263_v24 = vmul.f32 %v3475_v46, %v8027_v61  ;;  %v2377_v2 = vadd.f32 %v2376_v10, %v2375_v41  ;;  %v3207_v54 = vadd.f32 %v3206_v19, %v3205_v48  ;;  %v3210_v11 = vsel %vm1826_vm2, %v7354_v28, 0.0  ;;  %v8056_v48 = vld [vmem:[#allocation6_spill] sm:$0xff] }
 0x4c4   :  { %v7356_v59 = vpop.xlane.xlu0 %1987 }
 0x4c5   :  { %vm2072_vm1 = vcmp.ne.f32.partialorder %v7356_v59, %v8029_v15  ;;  %v2378_v17 = vsel %vm1826_vm2, %v2263_v24, 0.0  ;;  %v3209_v33 = vadd.f32 %v3208_v35, %v3207_v54  ;;  %v8054_v24 = vld [vmem:[#allocation53_spill] sm:$0xff] }
 0x4c6   :  { %v7372_v50 = vpop.permute.xlu1 %3021  ;;  %v3476_v5 = vsel %vm2072_vm1, 1.0, %v7944_v49 }
 0x4c7   :  { %v3211_v28 = vadd.f32 %v3210_v11, %v3209_v33 }
 0x4c8   :  { %v1991_v43 = vpop.xlane.xlu0 %1990 }
 0x4c9   :  { %vm2073_vm4 = vcmp.ne.f32.partialorder %v1991_v43, %v8031_v18  ;;  %v2264_v43 = vmul.f32 %v3476_v5, %v8029_v15 }
 0x4ca   :  { %v7388_v62 = vpop.permute.xlu1 %3023  ;;  %v3477_v58 = vsel %vm2073_vm4, 1.0, %v7944_v49 }
 0x4cb   :  { %v2265_v56 = vmul.f32 %v3477_v58, %v8031_v18  ;;  %v2380_v9 = vsel %vm1826_vm2, %v2264_v43, 0.0  ;;  %v3214_v13 = vsel %vm1826_vm2, %v7388_v62, 0.0 }
 0x4cc   :  { %v1994_v39 = vpop.xlane.xlu0 %1993 }
 0x4cd   :  { %vm2074_vm5 = vcmp.ne.f32.partialorder %v1994_v39, %v8033_v40  ;;  %v2379_v39 = vadd.f32 %v2378_v17, %v2377_v2  ;;  %v2382_v57 = vsel %vm1826_vm2, %v2265_v56, 0.0 }
 0x4ce   :  { %v7404_v42 = vpop.permute.xlu1 %3025  ;;  %v3478_v32 = vsel %vm2074_vm5, 1.0, %v7944_v49 }
 0x4cf   :  { %v2266_v38 = vmul.f32 %v3478_v32, %v8033_v40  ;;  %v2381_v7 = vadd.f32 %v2380_v9, %v2379_v39 }
 0x4d0   :  { %v1997_v30 = vpop.xlane.xlu0 %1996 }
 0x4d1   :  { %vm2075_vm6 = vcmp.ne.f32.partialorder %v1997_v30, %v8035_v8  ;;  %v2384_v26 = vsel %vm1826_vm2, %v2266_v38, 0.0  ;;  %v2383_v12 = vadd.f32 %v2382_v57, %v2381_v7 }
 0x4d2   :  { %v7419_v29 = vpop.permute.xlu1 %3027  ;;  %v3479_v15 = vsel %vm2075_vm6, 1.0, %v7944_v49 }
 0x4d3   :  { %v2267_v25 = vmul.f32 %v3479_v15, %v8035_v8  ;;  %v3212_v8 = vsel %vm1826_vm2, %v7372_v50, 0.0  ;;  %v2385_v37 = vadd.f32 %v2384_v26, %v2383_v12  ;;  %v3218_v58 = vsel %vm1826_vm2, %v7419_v29, 0.0 }
 0x4d4   :  { %v2000_v59 = vpop.xlane.xlu0 %1999  ;;  %v3213_v44 = vadd.f32 %v3212_v8, %v3211_v28 }
 0x4d5   :  { %vm2076_vm7 = vcmp.ne.f32.partialorder %v2000_v59, %v8050_v34  ;;  %v2386_v4 = vsel %vm1826_vm2, %v2267_v25, 0.0  ;;  %v3216_v59 = vsel %vm1826_vm2, %v7404_v42, 0.0 }
 0x4d6   :  { %v3030_v61 = vpop.permute.xlu1 %3029  ;;  %v3480_v16 = vsel %vm2076_vm7, 1.0, %v7944_v49  ;;  %v2387_v63 = vadd.f32 %v2386_v4, %v2385_v37  ;;  %v3215_v36 = vadd.f32 %v3214_v13, %v3213_v44 }
 0x4d7   :  { %v2268_v45 = vmul.f32 %v3480_v16, %v8050_v34  ;;  %v3220_v32 = vsel %vm1826_vm2, %v3030_v61, 0.0 }
 0x4d8   :  { %v2003_v1 = vpop.xlane.xlu0 %2002  ;;  %v3217_v43 = vadd.f32 %v3216_v59, %v3215_v36 }
 0x4d9   :  { %vm2077_vm8 = vcmp.ne.f32.partialorder %v2003_v1, %v8051_v47  ;;  %v2388_v23 = vsel %vm1826_vm2, %v2268_v45, 0.0 }
 0x4da   :  { %v3032_v18 = vpop.permute.xlu1 %3031  ;;  %v3481_v40 = vsel %vm2077_vm8, 1.0, %v7944_v49  ;;  %v2389_v53 = vadd.f32 %v2388_v23, %v2387_v63  ;;  %v3219_v17 = vadd.f32 %v3218_v58, %v3217_v43 }
 0x4db   :  { %v2269_v6 = vmul.f32 %v3481_v40, %v8051_v47  ;;  %v3222_v29 = vsel %vm1826_vm2, %v3032_v18, 0.0 }
 0x4dc   :  { %v2006_v60 = vpop.xlane.xlu0 %2005  ;;  %v3221_v15 = vadd.f32 %v3220_v32, %v3219_v17 }
 0x4dd   :  { %vm2078_vm9 = vcmp.ne.f32.partialorder %v2006_v60, %v8052_v20  ;;  %v2390_v51 = vsel %vm1826_vm2, %v2269_v6, 0.0 }
 0x4de   :  { %v3482_v31 = vsel %vm2078_vm9, 1.0, %v7944_v49  ;;  %v3034_v30 = vpop.permute.xlu1 %3033  ;;  %v2391_v52 = vadd.f32 %v2390_v51, %v2389_v53  ;;  %v3223_v39 = vadd.f32 %v3222_v29, %v3221_v15 }
 0x4df   :  { %v2270_v55 = vmul.f32 %v3482_v31, %v8052_v20  ;;  %v3224_v61 = vsel %vm1826_vm2, %v3034_v30, 0.0 }
 0x4e0   :  { %v2009_v14 = vpop.xlane.xlu0 %2008  ;;  %v3225_v35 = vadd.f32 %v3224_v61, %v3223_v39 }
 0x4e1   :  { %vm2079_vm10 = vcmp.ne.f32.partialorder %v2009_v14, %v8053_v21  ;;  %v2392_v22 = vsel %vm1826_vm2, %v2270_v55, 0.0 }
 0x4e2   :  { %v3483_v46 = vsel %vm2079_vm10, 1.0, %v7944_v49  ;;  %v3038_v50 = vpop.permute.xlu1 %3037  ;;  %v2393_v56 = vadd.f32 %v2392_v22, %v2391_v52 }
 0x4e3   :  { %v2271_v3 = vmul.f32 %v3483_v46, %v8053_v21  ;;  %v3228_v26 = vsel %vm1826_vm2, %v3038_v50, 0.0 }
 0x4e4   :  { %v2012_v5 = vpop.xlane.xlu0 %2011 }
 0x4e5   :  { %vm2080_vm11 = vcmp.ne.f32.partialorder %v2012_v5, %v8054_v24  ;;  %v2394_v1 = vsel %vm1826_vm2, %v2271_v3, 0.0 }
 0x4e6   :  { %v3484_v62 = vsel %vm2080_vm11, 1.0, %v7944_v49  ;;  %v3040_v42 = vpop.permute.xlu1 %3039  ;;  %v2395_v19 = vadd.f32 %v2394_v1, %v2393_v56 }
 0x4e7   :  { %v2272_v10 = vmul.f32 %v3484_v62, %v8054_v24  ;;  %v3230_v12 = vsel %vm1826_vm2, %v3040_v42, 0.0 }
 0x4e8   :  { %v2015_v41 = vpop.xlane.xlu0 %2014 }
 0x4e9   :  { %vm2081_vm12 = vcmp.ne.f32.partialorder %v2015_v41, %v8055_v0  ;;  %v2396_v27 = vsel %vm1826_vm2, %v2272_v10, 0.0 }
 0x4ea   :  { %v3485_v34 = vsel %vm2081_vm12, 1.0, %v7944_v49  ;;  %v3042_v9 = vpop.permute.xlu1 %3041  ;;  %v2397_v16 = vadd.f32 %v2396_v27, %v2395_v19 }
 0x4eb   :  { %v2273_v2 = vmul.f32 %v3485_v34, %v8055_v0  ;;  %v3232_v31 = vsel %vm1826_vm2, %v3042_v9, 0.0 }
 0x4ec   :  { %v2018_v38 = vpop.xlane.xlu0 %2017 }
 0x4ed   :  { %v2398_v47 = vsel %vm1826_vm2, %v2273_v2, 0.0  ;;  %vm2082_vm13 = vcmp.ne.f32.partialorder %v2018_v38, %v8056_v48 }
 0x4ee   :  { %v3486_v60 = vsel %vm2082_vm13, 1.0, %v7944_v49  ;;  %v2399_v57 = vadd.f32 %v2398_v47, %v2397_v16  ;;  %v3044_v25 = vpop.permute.xlu1 %3043 }
 0x4ef   :  { %v2274_v18 = vmul.f32 %v3486_v60, %v8056_v48  ;;  %v3234_v8 = vsel %vm1826_vm2, %v3044_v25, 0.0 }
 0x4f0   :  { %v3036_v20 = vpop.permute.xlu0 %3035 }
 0x4f1   :  { %v2400_v54 = vsel %vm1826_vm2, %v2274_v18, 0.0  ;;  %v3226_v7 = vsel %vm1826_vm2, %v3036_v20, 0.0 }
 0x4f2   :  { %v3227_v40 = vadd.f32 %v3226_v7, %v3225_v35  ;;  %v2401_v11 = vadd.f32 %v2400_v54, %v2399_v57  ;;  %v3046_v33 = vpop.permute.xlu1 %3045 }
 0x4f3   :  { %v3236_v6 = vsel %vm1826_vm2, %v3046_v33, 0.0 }
 0x4f4   :  { %v3229_v45 = vadd.f32 %v3228_v26, %v3227_v40  ;;  %2402 = vadd.xlane.f32.xlu0 %v2401_v11  ;;  %v3050_v28 = vpop.permute.xlu0 %3049 }
 0x4f5   :  { %v3240_v23 = vsel %vm1826_vm2, %v3050_v28, 0.0 }
 0x4f6   :  { %v3231_v49 = vadd.f32 %v3230_v12, %v3229_v45  ;;  %v3048_v14 = vpop.permute.xlu1 %3047 }
 0x4f7   :  { %v3238_v37 = vsel %vm1826_vm2, %v3048_v14, 0.0 }
 0x4f8   :  { %v3233_v30 = vadd.f32 %v3232_v31, %v3231_v49 }
 0x4fa   :  { %v3235_v4 = vadd.f32 %v3234_v8, %v3233_v30  ;;  %v3052_v13 = vpop.permute.xlu1 %3051 }
 0x4fb   :  { %v3242_v44 = vsel %vm1826_vm2, %v3052_v13, 0.0 }
 0x4fc   :  { %v3237_v21 = vadd.f32 %v3236_v6, %v3235_v4 }
 0x4fe   :  { %v3239_v46 = vadd.f32 %v3238_v37, %v3237_v21 }
 0x500   :  { %v3241_v55 = vadd.f32 %v3240_v23, %v3239_v46 }
 0x502   :  { %v3243_v63 = vadd.f32 %v3242_v44, %v3241_v55 }
 0x504   :  { %3244 = vadd.xlane.f32.xlu1 %v3243_v63 }
 0x581   :  { %v2403_v50 = vpop.xlane.xlu0 %2402 }
 0x582   :  { %v2404_v5 = vrot.slane %v2403_v50, 4 }
 0x584   :  { %v2405_v59 = vadd.f32 %v2404_v5, %v2403_v50 }
 0x586   :  { %v2406_v51 = vrot.slane %v2405_v59, 2 }
 0x588   :  { %v2407_v3 = vadd.f32 %v2406_v51, %v2405_v59 }
 0x58a   :  { %v2408_v24 = vrot.slane %v2407_v3, 1 }
 0x58c   :  { %v2409_v36 = vadd.f32 %v2408_v24, %v2407_v3 }
 0x58e   :  { %3647 = vpush %v2409_v36 }
 0x591   :  { %v3245_v53 = vpop.xlane.xlu1 %3244 }
 0x592   :  { %v3246_v62 = vrot.slane %v3245_v53, 4 }
 0x594   :  { %v3247_v58 = vadd.f32 %v3246_v62, %v3245_v53 }
 0x596   :  { %v3248_v22 = vrot.slane %v3247_v58, 2 }
 0x598   :  { %v3249_v10 = vadd.f32 %v3248_v22, %v3247_v58 }
 0x59a   :  { %v3250_v43 = vrot.slane %v3249_v10, 1 }
 0x59c   :  { %v3251_v52 = vadd.f32 %v3250_v43, %v3249_v10 }
 0x59e   :  { %3649 = vpush %v3251_v52 }
 0x5bf   :  { %s3648_s21 = spop %3647 }
 0x5cf   :  { %s3650_s22 = spop %3649 }
 0x5d0   :  { %s3253_s23 = sadd.f32 %s3650_s22, %s3648_s21 }
 0x5d2   :  { %s3256_s24 = smul.f32 0.00012207031, %s3253_s23 }
 0x5d4   :  { %3258 = sst [smem:[#allocation2]] %s3256_s24 }
 0x5d5   :  { %3778 = shalt.err (!%p3775_p2)
}
 0x5d6   :  { %s3784_s0 = smov [#allocation2]  }
 0x5d7   :  { %3268 = dma.smem_to_hbm %s3784_s0, 16, %s7516_s6, [#allocation3]  }
 0x5d8   :  { %3779 = dma.done.wait [#allocation3], 16  }
 0x5d9   :  { %3780 = vsyncadd [#allocation3], 4294967280 }
 0x5da   :  { %3274 = sfence }
 0x5db   :  { %3275 = vsyncpa [#allocation3], 1 }

// kernel: forward.9
= control target key start
LH: loop header
LB: loop body
LE: loop exit
PB: predicated region body
PF: predicated region fallthrough
CT: control target
= control target key end

     0   :  { %vm574_vm0 = vcmask 261120   ;;  %vm831_vm1 = vcmask 257024   ;;  %s1516_s1 = inlined_call_operand.vmem [shape: bf16[384,32], index: 1, kind: input, shape index: {}]   ;;  %s1517_s0 = inlined_call_operand.vmem [shape: bf16[128,384], index: 0, kind: input, shape index: {}]   ;;  %s1518_s2 = inlined_call_operand.vmem [shape: f32[1,32], index: 2, kind: input, shape index: {}]   ;;  %s1519_s3 = inlined_call_operand.vmem [shape: f32[1,32], index: 3, kind: input, shape index: {}]   ;;  %s1520_s4 = inlined_call_operand.vmem [shape: f32[1,32], index: 4, kind: input, shape index: {}]   ;;  %s1521_s5 = inlined_call_operand.vmem [shape: bf16[128,32], index: 5, kind: output, shape index: {}]  }
   0x1   :  { %v1047_v0 = vld [vmem:[%s1516_s1 + $0x40] sm:$0xff]   ;;  %v1049_v2 = vld [vmem:[%s1516_s1 + $0x48] sm:$0xff]   ;;  %v1052_v5 = vld [vmem:[%s1516_s1 + $0x50] sm:$0xff]  }
   0x2   :  { %v1048_v1 = vld [vmem:[%s1516_s1] sm:$0xff]   ;;  %935 = vmatprep.subr.bf16.mxu0 %v1047_v0  ;;  %v1051_v4 = vld [vmem:[%s1516_s1 + $0x8] sm:$0xff]   ;;  %v1054_v7 = vld [vmem:[%s1516_s1 + $0x10] sm:$0xff]  }
   0x3   :  { %936 = vmatpush3.bf16.msra.mxu0 %v1048_v1  ;;  %v1050_v3 = vld [vmem:[%s1516_s1 + $0x80] sm:$0xff]   ;;  %v1053_v6 = vld [vmem:[%s1516_s1 + $0x88] sm:$0xff]   ;;  %v1055_v8 = vld [vmem:[%s1516_s1 + $0x58] sm:$0xff]  }
   0x4   :  { %937 = vmatprep.subr.bf16.mxu0 %v1049_v2  ;;  %1015 = vmatprep.subr.bf16.mxu1 %v1050_v3  ;;  %v1056_v9 = vld [vmem:[%s1516_s1 + $0x90] sm:$0xff]   ;;  %v1057_v10 = vld [vmem:[%s1516_s1 + $0x18] sm:$0xff]   ;;  %v1058_v11 = vld [vmem:[%s1516_s1 + $0x60] sm:$0xff]  }
   0x5   :  { %1016 = vmatpush3.bf16.msra.mxu1 %v1050_v3  ;;  %v1059_v12 = vld [vmem:[%s1516_s1 + $0x98] sm:$0xff]   ;;  %v1060_v13 = vld [vmem:[%s1516_s1 + $0x20] sm:$0xff]   ;;  %v1061_v15 = vld [vmem:[%s1516_s1 + $0x68] sm:$0xff]  }
   0x6   :  { %1017 = vmatprep.subr.bf16.mxu1 %v1053_v6  ;;  %v1062_v14 = vld [vmem:[%s1516_s1 + $0xa0] sm:$0xff]   ;;  %v1063_v16 = vld [vmem:[%s1516_s1 + $0x28] sm:$0xff]   ;;  %v1064_v18 = vld [vmem:[%s1516_s1 + $0x70] sm:$0xff]  }
   0x7   :  { %938 = vmatpush3.bf16.msra.mxu0 %v1051_v4  ;;  %v1065_v17 = vld [vmem:[%s1516_s1 + $0xa8] sm:$0xff]   ;;  %v1066_v19 = vld [vmem:[%s1516_s1 + $0x30] sm:$0xff]   ;;  %v1067_v20 = vld [vmem:[%s1516_s1 + $0x78] sm:$0xff]  }
   0x8   :  { %939 = vmatprep.subr.bf16.mxu0 %v1052_v5  ;;  %v1068_v21 = vld [vmem:[%s1516_s1 + $0xb0] sm:$0xff]   ;;  %v1069_v23 = vld [vmem:[%s1516_s1 + $0x38] sm:$0xff]   ;;  %v1070_v26 = vld [vmem:[%s1517_s0] ss:$12 sps:$4 sm:$0xff]  }
   0x9   :  { %1018 = vmatpush3.bf16.msra.mxu1 %v1053_v6  ;;  %v1072_v22 = vld [vmem:[%s1517_s0 + $0x4] ss:$12 sps:$4 sm:$0xff]   ;;  %v1074_v24 = vld [vmem:[%s1517_s0 + $0x8] ss:$12 sps:$4 sm:$0xff]   ;;  %v1073_v25 = vld [vmem:[%s1516_s1 + $0xb8] sm:$0xff]  }
   0xa   :  { %1019 = vmatprep.subr.bf16.mxu1 %v1056_v9  ;;  %412 = vmatprep.mubr.bf16.mxu0 %v1072_v22  ;;  %v1076_v27 = vld [vmem:[%s1517_s0 + $0x1c] ss:$12 sps:$4 sm:$0xff]   ;;  %v1075_v28 = vld [vmem:[%s1517_s0 + $0x20] ss:$12 sps:$4 sm:$0xff]   ;;  %v1082_v29 = vld [vmem:[%s1517_s0 + $0x38] ss:$12 sps:$4 sm:$0xff]  }
   0xb   :  { %940 = vmatpush3.bf16.msra.mxu0 %v1054_v7  ;;  %1031 = vmatprep.mubr.bf16.mxu1 %v1074_v24  ;;  %v1078_v30 = vld [vmem:[%s1517_s0 + $0x18] ss:$12 sps:$4 sm:$0xff]   ;;  %v1079_v31 = vld [vmem:[%s1517_s0 + $0x34] ss:$12 sps:$4 sm:$0xff]   ;;  %v1083_v32 = vld [vmem:[%s1517_s0 + $0x50] ss:$12 sps:$4 sm:$0xff]  }
   0xc   :  { %941 = vmatprep.subr.bf16.mxu0 %v1055_v8  ;;  %v1090_v33 = vld [vmem:[%s1517_s0 + $0x68] ss:$12 sps:$4 sm:$0xff]   ;;  %v1081_v34 = vld [vmem:[%s1517_s0 + $0x30] ss:$12 sps:$4 sm:$0xff]   ;;  %v1084_v35 = vld [vmem:[%s1517_s0 + $0x4c] ss:$12 sps:$4 sm:$0xff]  }
   0xd   :  { %1020 = vmatpush3.bf16.msra.mxu1 %v1056_v9  ;;  %v1091_v36 = vld [vmem:[%s1517_s0 + $0x80] ss:$12 sps:$4 sm:$0xff]   ;;  %v1098_v37 = vld [vmem:[%s1517_s0 + $0x98] ss:$12 sps:$4 sm:$0xff]   ;;  %v1086_v38 = vld [vmem:[%s1517_s0 + $0x48] ss:$12 sps:$4 sm:$0xff]  }
   0xe   :  { %1021 = vmatprep.subr.bf16.mxu1 %v1059_v12  ;;  %v1087_v39 = vld [vmem:[%s1517_s0 + $0x64] ss:$12 sps:$4 sm:$0xff]   ;;  %v1089_v41 = vld [vmem:[%s1517_s0 + $0x60] ss:$12 sps:$4 sm:$0xff]   ;;  %v1092_v42 = vld [vmem:[%s1517_s0 + $0x7c] ss:$12 sps:$4 sm:$0xff]  }
   0xf   :  { %942 = vmatpush3.bf16.msra.mxu0 %v1057_v10  ;;  %v1099_v40 = vld [vmem:[%s1517_s0 + $0xb0] ss:$12 sps:$4 sm:$0xff]   ;;  %v1094_v43 = vld [vmem:[%s1517_s0 + $0x78] ss:$12 sps:$4 sm:$0xff]   ;;  %v1095_v44 = vld [vmem:[%s1517_s0 + $0x94] ss:$12 sps:$4 sm:$0xff]  }
  0x10   :  { %943 = vmatprep.subr.bf16.mxu0 %v1058_v11  ;;  %v1097_v45 = vld [vmem:[%s1517_s0 + $0x90] ss:$12 sps:$4 sm:$0xff]   ;;  %v1100_v46 = vld [vmem:[%s1517_s0 + $0xac] ss:$12 sps:$4 sm:$0xff]   ;;  %v1102_v47 = vld [vmem:[%s1517_s0 + $0xa8] ss:$12 sps:$4 sm:$0xff]  }
  0x11   :  { %1022 = vmatpush3.bf16.msra.mxu1 %v1059_v12  ;;  %v1282_v50 = vld [vmem:[%s1518_s2] ss:$0 sm:$0xff] }
  0x12   :  { %1023 = vmatprep.subr.bf16.mxu1 %v1062_v14 }
  0x13   :  { %944 = vmatpush3.bf16.msra.mxu0 %v1060_v13 }
  0x14   :  { %945 = vmatprep.subr.bf16.mxu0 %v1061_v15 }
  0x15   :  { %1024 = vmatpush3.bf16.msra.mxu1 %v1062_v14 }
  0x16   :  { %1025 = vmatprep.subr.bf16.mxu1 %v1065_v17 }
  0x17   :  { %946 = vmatpush3.bf16.msra.mxu0 %v1063_v16 }
  0x18   :  { %947 = vmatprep.subr.bf16.mxu0 %v1064_v18 }
  0x19   :  { %1026 = vmatpush3.bf16.msra.mxu1 %v1065_v17 }
  0x1a   :  { %1027 = vmatprep.subr.bf16.mxu1 %v1068_v21 }
  0x1b   :  { %948 = vmatpush3.bf16.msra.mxu0 %v1066_v19 }
  0x1c   :  { %949 = vmatprep.subr.bf16.mxu0 %v1067_v20 }
  0x1d   :  { %1028 = vmatpush3.bf16.msra.mxu1 %v1068_v21 }
  0x1e   :  { %1029 = vmatprep.subr.bf16.mxu1 %v1073_v25 }
  0x1f   :  { %950 = vmatpush3.bf16.msra.mxu0 %v1069_v23 }
  0x21   :  { %1030 = vmatpush3.bf16.msra.mxu1 %v1073_v25 }
  0x22   :  { %413 = vmatmul.mubr.bf16.vlgmr.msra.gmra.mrb[0].mxu0 %v1070_v26 }
  0x23   :  { %420 = vmatprep.mubr.bf16.mxu0 %v1076_v27 }
  0x24   :  { %1032 = vmatmul.mubr.bf16.vlgmr.msra.gmra.mrb[0].mxu1 %v1075_v28 }
  0x25   :  { %1035 = vmatprep.mubr.bf16.mxu1 %v1082_v29 }
  0x2a   :  { %421 = vmatmul.mubr.bf16.gmra.mrb[4].mxu0 %v1078_v30 }
  0x2b   :  { %428 = vmatprep.mubr.bf16.mxu0 %v1079_v31 }
  0x2c   :  { %1036 = vmatmul.mubr.bf16.gmra.mrb[4].mxu1 %v1083_v32 }
  0x2d   :  { %1039 = vmatprep.mubr.bf16.mxu1 %v1090_v33 }
  0x32   :  { %429 = vmatmul.mubr.bf16.gmra.mrb[8].mxu0 %v1081_v34 }
  0x33   :  { %436 = vmatprep.mubr.bf16.mxu0 %v1084_v35 }
  0x34   :  { %1040 = vmatmul.mubr.bf16.gmra.mrb[8].mxu1 %v1091_v36 }
  0x35   :  { %1043 = vmatprep.mubr.bf16.mxu1 %v1098_v37 }
  0x3a   :  { %437 = vmatmul.mubr.bf16.gmra.mrb[12].mxu0 %v1086_v38 }
  0x3b   :  { %444 = vmatprep.mubr.bf16.mxu0 %v1087_v39 }
  0x3c   :  { %1044 = vmatmul.mubr.bf16.gmra.mrb[12].mxu1 %v1099_v40 }
  0x42   :  { %445 = vmatmul.mubr.bf16.gmra.mrb[16].mxu0 %v1089_v41 }
  0x43   :  { %452 = vmatprep.mubr.bf16.mxu0 %v1092_v42 }
  0x4a   :  { %453 = vmatmul.mubr.bf16.gmra.mrb[20].mxu0 %v1094_v43 }
  0x4b   :  { %460 = vmatprep.mubr.bf16.mxu0 %v1095_v44 }
  0x52   :  { %461 = vmatmul.mubr.bf16.gmra.mrb[24].mxu0 %v1097_v45 }
  0x53   :  { %468 = vmatprep.mubr.bf16.mxu0 %v1100_v46 }
  0x5a   :  { %469 = vmatmul.mubr.bf16.gmra.mrb[28].mxu0 %v1102_v47 }
  0xf5   :  { %v951_v48 = vpop.f32.mrb[0].mxu0 }
  0xf6   :  { %v952_v49 = vpop.f32.mrb[1].mxu0 }
  0xf7   :  { %v953_v51 = vadd.f32 %v952_v49, %v951_v48  ;;  %v954_v52 = vpop.f32.mrb[2].mxu0  ;;  %v1033_v54 = vpop.f32.mrb[0].mxu1 }
  0xf8   :  { %v955_v53 = vpop.f32.mrb[3].mxu0  ;;  %v511_v57 = vpop.f32.mrb[1].mxu1 }
  0xf9   :  { %v956_v55 = vadd.f32 %v955_v53, %v954_v52  ;;  %v415_v56 = vadd.f32 %v953_v51, %v1282_v50  ;;  %v1034_v58 = vpop.f32.mrb[2].mxu1 }
  0xfa   :  { %v514_v61 = vpop.f32.mrb[3].mxu1 }
  0xfb   :  { %v1285_v59 = vadd.f32 %v511_v57, %v415_v56  ;;  %v418_v60 = vadd.f32 %v956_v55, %v1282_v50 }
  0xfd   :  { %v614_v62 = vmul.f32 %v1285_v59, %v1285_v59  ;;  %v1290_v63 = vadd.f32 %v514_v61, %v418_v60  ;;  %v957_v0 = vpop.f32.mrb[4].mxu0  ;;  %v575_v2 = vsel %vm574_vm0, %v1285_v59, 0.0 }
  0xfe   :  { %v958_v1 = vpop.f32.mrb[5].mxu0 }
  0xff   :  { %v576_v3 = vsel %vm574_vm0, %v1290_v63, 0.0  ;;  %v615_v4 = vmul.f32 %v1290_v63, %v1290_v63  ;;  %v959_v5 = vadd.f32 %v958_v1, %v957_v0  ;;  %v960_v6 = vpop.f32.mrb[6].mxu0  ;;  %v1037_v9 = vpop.f32.mrb[4].mxu1  ;;  %v630_v10 = vsel %vm574_vm0, %v614_v62, 0.0 }
 0x100   :  { %v577_v7 = vadd.f32 %v576_v3, %v575_v2  ;;  %v961_v8 = vpop.f32.mrb[7].mxu0  ;;  %v527_v14 = vpop.f32.mrb[5].mxu1 }
 0x101   :  { %v631_v11 = vsel %vm574_vm0, %v615_v4, 0.0  ;;  %v423_v12 = vadd.f32 %v959_v5, %v1282_v50  ;;  %v962_v13 = vadd.f32 %v961_v8, %v960_v6  ;;  %v1038_v16 = vpop.f32.mrb[6].mxu1 }
 0x102   :  { %v632_v15 = vadd.f32 %v631_v11, %v630_v10  ;;  %v530_v19 = vpop.f32.mrb[7].mxu1 }
 0x103   :  { %v1301_v17 = vadd.f32 %v1033_v54, %v423_v12  ;;  %v426_v18 = vadd.f32 %v962_v13, %v1282_v50 }
 0x105   :  { %v578_v20 = vsel %vm574_vm0, %v1301_v17, 0.0  ;;  %v616_v21 = vmul.f32 %v1301_v17, %v1301_v17  ;;  %v1308_v22 = vadd.f32 %v1034_v58, %v426_v18  ;;  %v963_v23 = vpop.f32.mrb[8].mxu0 }
 0x106   :  { %v964_v24 = vpop.f32.mrb[9].mxu0  ;;  %v579_v25 = vadd.f32 %v578_v20, %v577_v7 }
 0x107   :  { %v633_v26 = vsel %vm574_vm0, %v616_v21, 0.0  ;;  %v617_v27 = vmul.f32 %v1308_v22, %v1308_v22  ;;  %v965_v28 = vadd.f32 %v964_v24, %v963_v23  ;;  %v966_v29 = vpop.f32.mrb[10].mxu0  ;;  %v580_v30 = vsel %vm574_vm0, %v1308_v22, 0.0  ;;  %v1315_v34 = vpop.f32.mrb[8].mxu1 }
 0x108   :  { %v967_v31 = vpop.f32.mrb[11].mxu0  ;;  %v581_v32 = vadd.f32 %v580_v30, %v579_v25  ;;  %v634_v33 = vadd.f32 %v633_v26, %v632_v15  ;;  %v543_v38 = vpop.f32.mrb[9].mxu1 }
 0x109   :  { %v968_v35 = vadd.f32 %v967_v31, %v966_v29  ;;  %v431_v36 = vadd.f32 %v965_v28, %v1282_v50  ;;  %v635_v37 = vsel %vm574_vm0, %v617_v27, 0.0  ;;  %v1319_v40 = vpop.f32.mrb[10].mxu1 }
 0x10a   :  { %v636_v39 = vadd.f32 %v635_v37, %v634_v33  ;;  %v546_v43 = vpop.f32.mrb[11].mxu1 }
 0x10b   :  { %v1321_v41 = vadd.f32 %v527_v14, %v431_v36  ;;  %v434_v42 = vadd.f32 %v968_v35, %v1282_v50 }
 0x10d   :  { %v582_v44 = vsel %vm574_vm0, %v1321_v41, 0.0  ;;  %v618_v45 = vmul.f32 %v1321_v41, %v1321_v41  ;;  %v1328_v46 = vadd.f32 %v530_v19, %v434_v42  ;;  %v969_v47 = vpop.f32.mrb[12].mxu0 }
 0x10e   :  { %v583_v48 = vadd.f32 %v582_v44, %v581_v32  ;;  %v970_v49 = vpop.f32.mrb[13].mxu0 }
 0x10f   :  { %v637_v51 = vsel %vm574_vm0, %v618_v45, 0.0  ;;  %v584_v52 = vsel %vm574_vm0, %v1328_v46, 0.0  ;;  %v619_v53 = vmul.f32 %v1328_v46, %v1328_v46  ;;  %v971_v54 = vadd.f32 %v970_v49, %v969_v47  ;;  %v972_v55 = vpop.f32.mrb[14].mxu0  ;;  %v1335_v60 = vpop.f32.mrb[12].mxu1 }
 0x110   :  { %v638_v56 = vadd.f32 %v637_v51, %v636_v39  ;;  %v585_v57 = vadd.f32 %v584_v52, %v583_v48  ;;  %v973_v58 = vpop.f32.mrb[15].mxu0  ;;  %v1339_v1 = vpop.f32.mrb[13].mxu1 }
 0x111   :  { %v639_v61 = vsel %vm574_vm0, %v619_v53, 0.0  ;;  %v439_v62 = vadd.f32 %v971_v54, %v1282_v50  ;;  %v974_v0 = vadd.f32 %v973_v58, %v972_v55  ;;  %v1341_v3 = vpop.f32.mrb[14].mxu1 }
 0x112   :  { %v640_v2 = vadd.f32 %v639_v61, %v638_v56  ;;  %v1346_v6 = vpop.f32.mrb[15].mxu1 }
 0x113   :  { %v1343_v4 = vadd.f32 %v1037_v9, %v439_v62  ;;  %v442_v5 = vadd.f32 %v974_v0, %v1282_v50 }
 0x115   :  { %v586_v7 = vsel %vm574_vm0, %v1343_v4, 0.0  ;;  %v620_v8 = vmul.f32 %v1343_v4, %v1343_v4  ;;  %v1352_v10 = vadd.f32 %v1038_v16, %v442_v5  ;;  %v975_v11 = vpop.f32.mrb[16].mxu0 }
 0x116   :  { %v976_v12 = vpop.f32.mrb[17].mxu0  ;;  %v587_v13 = vadd.f32 %v586_v7, %v585_v57 }
 0x117   :  { %v641_v14 = vsel %vm574_vm0, %v620_v8, 0.0  ;;  %v621_v9 = vmul.f32 %v1352_v10, %v1352_v10  ;;  %v977_v15 = vadd.f32 %v976_v12, %v975_v11  ;;  %v978_v18 = vpop.f32.mrb[18].mxu0  ;;  %v588_v19 = vsel %vm574_vm0, %v1352_v10, 0.0 }
 0x118   :  { %v979_v20 = vpop.f32.mrb[19].mxu0  ;;  %v589_v21 = vadd.f32 %v588_v19, %v587_v13  ;;  %v642_v23 = vadd.f32 %v641_v14, %v640_v2 }
 0x119   :  { %v980_v24 = vadd.f32 %v979_v20, %v978_v18  ;;  %v447_v16 = vadd.f32 %v977_v15, %v1282_v50  ;;  %v643_v25 = vsel %vm574_vm0, %v621_v9, 0.0 }
 0x11a   :  { %v644_v26 = vadd.f32 %v643_v25, %v642_v23 }
 0x11b   :  { %v1361_v27 = vadd.f32 %v543_v38, %v447_v16  ;;  %v450_v28 = vadd.f32 %v980_v24, %v1282_v50 }
 0x11d   :  { %v590_v29 = vsel %vm574_vm0, %v1361_v27, 0.0  ;;  %v622_v30 = vmul.f32 %v1361_v27, %v1361_v27  ;;  %v1368_v31 = vadd.f32 %v546_v43, %v450_v28  ;;  %v981_v32 = vpop.f32.mrb[20].mxu0 }
 0x11e   :  { %v591_v33 = vadd.f32 %v590_v29, %v589_v21  ;;  %v982_v35 = vpop.f32.mrb[21].mxu0 }
 0x11f   :  { %v645_v36 = vsel %vm574_vm0, %v622_v30, 0.0  ;;  %v592_v37 = vsel %vm574_vm0, %v1368_v31, 0.0  ;;  %v623_v38 = vmul.f32 %v1368_v31, %v1368_v31  ;;  %v983_v39 = vadd.f32 %v982_v35, %v981_v32  ;;  %v984_v42 = vpop.f32.mrb[22].mxu0 }
 0x120   :  { %v646_v44 = vadd.f32 %v645_v36, %v644_v26  ;;  %v593_v45 = vadd.f32 %v592_v37, %v591_v33  ;;  %v985_v47 = vpop.f32.mrb[23].mxu0 }
 0x121   :  { %v647_v48 = vsel %vm574_vm0, %v623_v38, 0.0  ;;  %v455_v43 = vadd.f32 %v983_v39, %v1282_v50  ;;  %v986_v49 = vadd.f32 %v985_v47, %v984_v42 }
 0x122   :  { %v648_v51 = vadd.f32 %v647_v48, %v646_v44 }
 0x123   :  { %v1378_v52 = vadd.f32 %v1315_v34, %v455_v43  ;;  %v458_v53 = vadd.f32 %v986_v49, %v1282_v50 }
 0x125   :  { %v594_v54 = vsel %vm574_vm0, %v1378_v52, 0.0  ;;  %v624_v55 = vmul.f32 %v1378_v52, %v1378_v52  ;;  %v1386_v56 = vadd.f32 %v1319_v40, %v458_v53  ;;  %v987_v57 = vpop.f32.mrb[24].mxu0 }
 0x126   :  { %v988_v58 = vpop.f32.mrb[25].mxu0  ;;  %v595_v61 = vadd.f32 %v594_v54, %v593_v45 }
 0x127   :  { %v649_v62 = vsel %vm574_vm0, %v624_v55, 0.0  ;;  %v625_v34 = vmul.f32 %v1386_v56, %v1386_v56  ;;  %v989_v0 = vadd.f32 %v988_v58, %v987_v57  ;;  %v990_v2 = vpop.f32.mrb[26].mxu0  ;;  %v596_v5 = vsel %vm574_vm0, %v1386_v56, 0.0 }
 0x128   :  { %v991_v7 = vpop.f32.mrb[27].mxu0  ;;  %v597_v8 = vadd.f32 %v596_v5, %v595_v61  ;;  %v650_v11 = vadd.f32 %v649_v62, %v648_v51 }
 0x129   :  { %v992_v12 = vadd.f32 %v991_v7, %v990_v2  ;;  %v463_v40 = vadd.f32 %v989_v0, %v1282_v50  ;;  %v651_v13 = vsel %vm574_vm0, %v625_v34, 0.0 }
 0x12a   :  { %v652_v14 = vadd.f32 %v651_v13, %v650_v11 }
 0x12b   :  { %v1396_v9 = vadd.f32 %v1339_v1, %v463_v40  ;;  %v466_v15 = vadd.f32 %v992_v12, %v1282_v50 }
 0x12d   :  { %v598_v18 = vsel %vm574_vm0, %v1396_v9, 0.0  ;;  %v626_v19 = vmul.f32 %v1396_v9, %v1396_v9  ;;  %v1404_v20 = vadd.f32 %v1346_v6, %v466_v15  ;;  %v993_v21 = vpop.f32.mrb[28].mxu0 }
 0x12e   :  { %v599_v23 = vadd.f32 %v598_v18, %v597_v8  ;;  %v994_v24 = vpop.f32.mrb[29].mxu0 }
 0x12f   :  { %v653_v16 = vsel %vm574_vm0, %v626_v19, 0.0  ;;  %v600_v1 = vsel %vm574_vm0, %v1404_v20, 0.0  ;;  %v627_v25 = vmul.f32 %v1404_v20, %v1404_v20  ;;  %v995_v26 = vadd.f32 %v994_v24, %v993_v21  ;;  %v996_v28 = vpop.f32.mrb[30].mxu0 }
 0x130   :  { %v654_v29 = vadd.f32 %v653_v16, %v652_v14  ;;  %v601_v30 = vadd.f32 %v600_v1, %v599_v23  ;;  %v997_v32 = vpop.f32.mrb[31].mxu0 }
 0x131   :  { %v655_v33 = vsel %vm574_vm0, %v627_v25, 0.0  ;;  %v471_v6 = vadd.f32 %v995_v26, %v1282_v50  ;;  %v998_v35 = vadd.f32 %v997_v32, %v996_v28 }
 0x132   :  { %v656_v36 = vadd.f32 %v655_v33, %v654_v29 }
 0x133   :  { %v1414_v37 = vadd.f32 %v1335_v60, %v471_v6  ;;  %v474_v38 = vadd.f32 %v998_v35, %v1282_v50 }
 0x135   :  { %v602_v39 = vsel %vm574_vm0, %v1414_v37, 0.0  ;;  %v628_v42 = vmul.f32 %v1414_v37, %v1414_v37  ;;  %v1422_v44 = vadd.f32 %v1341_v3, %v474_v38 }
 0x136   :  { %v603_v45 = vadd.f32 %v602_v39, %v601_v30 }
 0x137   :  { %v657_v47 = vsel %vm574_vm0, %v628_v42, 0.0  ;;  %v604_v48 = vsel %vm574_vm0, %v1422_v44, 0.0  ;;  %v629_v60 = vmul.f32 %v1422_v44, %v1422_v44 }
 0x138   :  { %v658_v43 = vadd.f32 %v657_v47, %v656_v36  ;;  %v605_v50 = vadd.f32 %v604_v48, %v603_v45 }
 0x139   :  { %v659_v49 = vsel %vm574_vm0, %v629_v60, 0.0 }
 0x13a   :  { %v606_v51 = vrot.slane %v605_v50, 4  ;;  %v660_v53 = vadd.f32 %v659_v49, %v658_v43  ;;  %v902_v43 = vld [vmem:[%s1520_s4] ss:$0 sm:$0xff] }
 0x13c   :  { %v607_v54 = vadd.f32 %v606_v51, %v605_v50  ;;  %v661_v55 = vrot.slane %v660_v53, 4 }
 0x13e   :  { %v608_v57 = vrot.slane %v607_v54, 2  ;;  %v662_v3 = vadd.f32 %v661_v55, %v660_v53 }
 0x140   :  { %v609_v58 = vadd.f32 %v608_v57, %v607_v54  ;;  %v663_v61 = vrot.slane %v662_v3, 2 }
 0x142   :  { %v610_v62 = vrot.slane %v609_v58, 1  ;;  %v664_v34 = vadd.f32 %v663_v61, %v662_v3 }
 0x144   :  { %v611_v0 = vadd.f32 %v610_v62, %v609_v58  ;;  %v665_v2 = vrot.slane %v664_v34, 1 }
 0x146   :  { %v613_v5 = vmul.f32 0.0078125, %v611_v0  ;;  %v666_v7 = vadd.f32 %v665_v2, %v664_v34 }
 0x148   :  { %v667_v8 = vmul.f32 0.0078125, %v666_v7  ;;  %v668_v11 = vmul.f32 %v613_v5, %v613_v5  ;;  %v671_v12 = vsub.f32 %v1285_v59, %v613_v5  ;;  %v672_v40 = vsub.f32 %v1290_v63, %v613_v5 }
 0x149   :  { %v673_v13 = vsub.f32 %v1301_v17, %v613_v5  ;;  %v674_v14 = vsub.f32 %v1308_v22, %v613_v5  ;;  %v675_v15 = vsub.f32 %v1321_v41, %v613_v5  ;;  %v676_v18 = vsub.f32 %v1328_v46, %v613_v5 }
 0x14a   :  { %v669_v19 = vsub.f32 %v667_v8, %v668_v11  ;;  %v677_v21 = vsub.f32 %v1343_v4, %v613_v5  ;;  %v678_v23 = vsub.f32 %v1352_v10, %v613_v5  ;;  %v679_v24 = vsub.f32 %v1361_v27, %v613_v5 }
 0x14b   :  { %v680_v16 = vsub.f32 %v1368_v31, %v613_v5  ;;  %v681_v59 = vsub.f32 %v1378_v52, %v613_v5  ;;  %v682_v63 = vsub.f32 %v1386_v56, %v613_v5  ;;  %v683_v17 = vsub.f32 %v1396_v9, %v613_v5  ;;  %v901_v9 = vld [vmem:[%s1519_s3] ss:$0 sm:$0xff] }
 0x14c   :  { %v670_v22 = vmax.f32 %v669_v19, 0.0  ;;  %v684_v41 = vsub.f32 %v1404_v20, %v613_v5  ;;  %v685_v46 = vsub.f32 %v1414_v37, %v613_v5  ;;  %v686_v1 = vsub.f32 %v1422_v44, %v613_v5 }
 0x14e   :  { %v687_v4 = vadd.f32 1e-05, %v670_v22 }
 0x150   :  { %1103 = vrsqrt.f32 %v687_v4 }
 0x15a   :  { %v1104_v10 = vpop.eup %1103 }
 0x15b   :  { %v689_v25 = vmul.f32 %v1104_v10, %v671_v12  ;;  %v690_v27 = vmul.f32 %v1104_v10, %v672_v40  ;;  %v691_v26 = vmul.f32 %v1104_v10, %v673_v13  ;;  %v692_v31 = vmul.f32 %v1104_v10, %v674_v14 }
 0x15c   :  { %v693_v28 = vmul.f32 %v1104_v10, %v675_v15  ;;  %v694_v52 = vmul.f32 %v1104_v10, %v676_v18  ;;  %v695_v29 = vmul.f32 %v1104_v10, %v677_v21  ;;  %v696_v56 = vmul.f32 %v1104_v10, %v678_v23 }
 0x15d   :  { %v697_v20 = vmul.f32 %v1104_v10, %v679_v24  ;;  %v698_v30 = vmul.f32 %v1104_v10, %v680_v16  ;;  %v699_v32 = vmul.f32 %v1104_v10, %v681_v59  ;;  %v700_v33 = vmul.f32 %v1104_v10, %v682_v63 }
 0x15e   :  { %v701_v6 = vmul.f32 %v1104_v10, %v683_v17  ;;  %v702_v35 = vmul.f32 %v1104_v10, %v684_v41  ;;  %v703_v36 = vmul.f32 %v1104_v10, %v685_v46  ;;  %v704_v37 = vmul.f32 %v1104_v10, %v686_v1 }
 0x15f   :  { %v712_v38 = vmul.f32 %v901_v9, %v689_v25  ;;  %v713_v39 = vmul.f32 %v901_v9, %v690_v27  ;;  %v714_v42 = vmul.f32 %v901_v9, %v691_v26  ;;  %v715_v44 = vmul.f32 %v901_v9, %v692_v31 }
 0x160   :  { %v716_v45 = vmul.f32 %v901_v9, %v693_v28  ;;  %v717_v47 = vmul.f32 %v901_v9, %v694_v52  ;;  %v718_v48 = vmul.f32 %v901_v9, %v695_v29  ;;  %v719_v60 = vmul.f32 %v901_v9, %v696_v56 }
 0x161   :  { %v720_v50 = vmul.f32 %v901_v9, %v697_v20  ;;  %v721_v49 = vmul.f32 %v901_v9, %v698_v30  ;;  %v722_v51 = vmul.f32 %v901_v9, %v699_v32  ;;  %v723_v53 = vmul.f32 %v901_v9, %v700_v33 }
 0x162   :  { %v724_v54 = vmul.f32 %v901_v9, %v701_v6  ;;  %v725_v55 = vmul.f32 %v901_v9, %v702_v35  ;;  %v726_v57 = vmul.f32 %v901_v9, %v703_v36  ;;  %v727_v3 = vmul.f32 %v901_v9, %v704_v37 }
 0x163   :  { %v735_v58 = vadd.f32 %v902_v43, %v712_v38  ;;  %v736_v61 = vadd.f32 %v902_v43, %v713_v39  ;;  %v737_v62 = vadd.f32 %v902_v43, %v714_v42  ;;  %v738_v34 = vadd.f32 %v902_v43, %v715_v44 }
 0x164   :  { %v739_v0 = vadd.f32 %v902_v43, %v716_v45  ;;  %v740_v2 = vadd.f32 %v902_v43, %v717_v47  ;;  %v741_v5 = vadd.f32 %v902_v43, %v718_v48  ;;  %v742_v7 = vadd.f32 %v902_v43, %v719_v60 }
 0x165   :  { %v743_v8 = vadd.f32 %v902_v43, %v720_v50  ;;  %v744_v11 = vadd.f32 %v902_v43, %v721_v49  ;;  %v745_v12 = vadd.f32 %v902_v43, %v722_v51  ;;  %v746_v40 = vadd.f32 %v902_v43, %v723_v53 }
 0x166   :  { %v747_v13 = vadd.f32 %v902_v43, %v724_v54  ;;  %v748_v14 = vadd.f32 %v902_v43, %v725_v55  ;;  %v749_v15 = vadd.f32 %v902_v43, %v726_v57  ;;  %v750_v18 = vadd.f32 %v902_v43, %v727_v3 }
 0x167   :  { %v751_v19 = vmax.f32 %v735_v58, 0.0  ;;  %v752_v21 = vmax.f32 %v736_v61, 0.0  ;;  %v753_v23 = vmax.f32 %v737_v62, 0.0  ;;  %v754_v24 = vmax.f32 %v738_v34, 0.0 }
 0x168   :  { %v755_v16 = vmax.f32 %v739_v0, 0.0  ;;  %v756_v59 = vmax.f32 %v740_v2, 0.0  ;;  %v757_v63 = vmax.f32 %v741_v5, 0.0  ;;  %v758_v17 = vmax.f32 %v742_v7, 0.0 }
 0x169   :  { %v759_v22 = vmax.f32 %v743_v8, 0.0  ;;  %v760_v41 = vmax.f32 %v744_v11, 0.0  ;;  %v761_v46 = vmax.f32 %v745_v12, 0.0  ;;  %v762_v1 = vmax.f32 %v746_v40, 0.0 }
 0x16a   :  { %v763_v4 = vmax.f32 %v747_v13, 0.0  ;;  %v764_v10 = vmax.f32 %v748_v14, 0.0  ;;  %v765_v25 = vmax.f32 %v749_v15, 0.0  ;;  %v766_v27 = vmax.f32 %v750_v18, 0.0 }
 0x16b   :  { %v919_v26 = vpack.c.bf16 %v751_v19, %v751_v19  ;;  %v920_v31 = vpack.c.bf16 %v752_v21, %v752_v21  ;;  %v921_v28 = vpack.c.bf16 %v753_v23, %v753_v23  ;;  %v922_v52 = vpack.c.bf16 %v754_v24, %v754_v24 }
 0x16c   :  { %v923_v29 = vpack.c.bf16 %v755_v16, %v755_v16  ;;  %v924_v56 = vpack.c.bf16 %v756_v59, %v756_v59  ;;  %v925_v9 = vpack.c.bf16 %v757_v63, %v757_v63  ;;  %v926_v20 = vpack.c.bf16 %v758_v17, %v758_v17 }
 0x16d   :  { %v927_v30 = vpack.c.bf16 %v759_v22, %v759_v22  ;;  %v928_v32 = vpack.c.bf16 %v760_v41, %v760_v41  ;;  %v929_v33 = vpack.c.bf16 %v761_v46, %v761_v46  ;;  %v930_v6 = vpack.c.bf16 %v762_v1, %v762_v1  ;;  %832 = vst.msk [vmem:[%s1521_s5] sm:$0xf] %vm831_vm1, %v919_v26 }
 0x16e   :  { %833 = vst.msk [vmem:[%s1521_s5 + $0x4] sm:$0xf] %vm831_vm1, %v920_v31  ;;  %834 = vst.msk [vmem:[%s1521_s5 + $0x8] sm:$0xf] %vm831_vm1, %v921_v28  ;;  %v931_v35 = vpack.c.bf16 %v763_v4, %v763_v4  ;;  %v932_v36 = vpack.c.bf16 %v764_v10, %v764_v10  ;;  %v933_v37 = vpack.c.bf16 %v765_v25, %v765_v25 }
 0x16f   :  { %835 = vst.msk [vmem:[%s1521_s5 + $0xc] sm:$0xf] %vm831_vm1, %v922_v52  ;;  %v934_v38 = vpack.c.bf16 %v766_v27, %v766_v27  ;;  %836 = vst.msk [vmem:[%s1521_s5 + $0x10] sm:$0xf] %vm831_vm1, %v923_v29 }
 0x170   :  { %837 = vst.msk [vmem:[%s1521_s5 + $0x14] sm:$0xf] %vm831_vm1, %v924_v56  ;;  %838 = vst.msk [vmem:[%s1521_s5 + $0x18] sm:$0xf] %vm831_vm1, %v925_v9 }
 0x171   :  { %839 = vst.msk [vmem:[%s1521_s5 + $0x1c] sm:$0xf] %vm831_vm1, %v926_v20  ;;  %840 = vst.msk [vmem:[%s1521_s5 + $0x20] sm:$0xf] %vm831_vm1, %v927_v30 }
 0x172   :  { %841 = vst.msk [vmem:[%s1521_s5 + $0x24] sm:$0xf] %vm831_vm1, %v928_v32  ;;  %842 = vst.msk [vmem:[%s1521_s5 + $0x28] sm:$0xf] %vm831_vm1, %v929_v33 }
 0x173   :  { %843 = vst.msk [vmem:[%s1521_s5 + $0x2c] sm:$0xf] %vm831_vm1, %v930_v6  ;;  %844 = vst.msk [vmem:[%s1521_s5 + $0x30] sm:$0xf] %vm831_vm1, %v931_v35 }
 0x174   :  { %845 = vst.msk [vmem:[%s1521_s5 + $0x34] sm:$0xf] %vm831_vm1, %v932_v36  ;;  %846 = vst.msk [vmem:[%s1521_s5 + $0x38] sm:$0xf] %vm831_vm1, %v933_v37 }
 0x175   :  { %847 = vst.msk [vmem:[%s1521_s5 + $0x3c] sm:$0xf] %vm831_vm1, %v934_v38 }

// kernel: forward.10
= control target key start
LH: loop header
LB: loop body
LE: loop exit
PB: predicated region body
PF: predicated region fallthrough
CT: control target
= control target key end

     0   :  { %vm358_vm0 = vcmask 523264   ;;  %vm447_vm1 = vcmask 519168   ;;  %s738_s1 = inlined_call_operand.vmem [shape: bf16[384,64], index: 1, kind: input, shape index: {}]   ;;  %s739_s0 = inlined_call_operand.vmem [shape: bf16[32,384], index: 0, kind: input, shape index: {}]   ;;  %s740_s2 = inlined_call_operand.vmem [shape: f32[1,64], index: 2, kind: input, shape index: {}]   ;;  %s741_s3 = inlined_call_operand.vmem [shape: f32[1,64], index: 3, kind: input, shape index: {}]   ;;  %s742_s4 = inlined_call_operand.vmem [shape: f32[1,64], index: 4, kind: input, shape index: {}]   ;;  %s743_s5 = inlined_call_operand.vmem [shape: bf16[32,64], index: 5, kind: output, shape index: {}]  }
   0x1   :  { %v555_v0 = vld [vmem:[%s738_s1 + $0x40] sm:$0xff]   ;;  %v557_v2 = vld [vmem:[%s738_s1 + $0x48] sm:$0xff]   ;;  %v560_v5 = vld [vmem:[%s738_s1 + $0x50] sm:$0xff]  }
   0x2   :  { %v556_v1 = vld [vmem:[%s738_s1] sm:$0xff]   ;;  %497 = vmatprep.subr.bf16.mxu0 %v555_v0  ;;  %v559_v4 = vld [vmem:[%s738_s1 + $0x8] sm:$0xff]   ;;  %v562_v7 = vld [vmem:[%s738_s1 + $0x10] sm:$0xff]  }
   0x3   :  { %498 = vmatpush3.bf16.msra.mxu0 %v556_v1  ;;  %v558_v3 = vld [vmem:[%s738_s1 + $0x80] sm:$0xff]   ;;  %v561_v6 = vld [vmem:[%s738_s1 + $0x88] sm:$0xff]   ;;  %v563_v8 = vld [vmem:[%s738_s1 + $0x58] sm:$0xff]  }
   0x4   :  { %499 = vmatprep.subr.bf16.mxu0 %v557_v2  ;;  %535 = vmatprep.subr.bf16.mxu1 %v558_v3  ;;  %v564_v9 = vld [vmem:[%s738_s1 + $0x90] sm:$0xff]   ;;  %v565_v10 = vld [vmem:[%s738_s1 + $0x18] sm:$0xff]   ;;  %v566_v11 = vld [vmem:[%s738_s1 + $0x60] sm:$0xff]  }
   0x5   :  { %536 = vmatpush3.bf16.msra.mxu1 %v558_v3  ;;  %v567_v12 = vld [vmem:[%s738_s1 + $0x98] sm:$0xff]   ;;  %v568_v13 = vld [vmem:[%s738_s1 + $0x20] sm:$0xff]   ;;  %v569_v15 = vld [vmem:[%s738_s1 + $0x68] sm:$0xff]  }
   0x6   :  { %537 = vmatprep.subr.bf16.mxu1 %v561_v6  ;;  %v570_v14 = vld [vmem:[%s738_s1 + $0xa0] sm:$0xff]   ;;  %v571_v16 = vld [vmem:[%s738_s1 + $0x28] sm:$0xff]   ;;  %v572_v18 = vld [vmem:[%s738_s1 + $0x70] sm:$0xff]  }
   0x7   :  { %500 = vmatpush3.bf16.msra.mxu0 %v559_v4  ;;  %v573_v17 = vld [vmem:[%s738_s1 + $0xa8] sm:$0xff]   ;;  %v574_v19 = vld [vmem:[%s738_s1 + $0x30] sm:$0xff]   ;;  %v575_v20 = vld [vmem:[%s738_s1 + $0x78] sm:$0xff]  }
   0x8   :  { %501 = vmatprep.subr.bf16.mxu0 %v560_v5  ;;  %v576_v21 = vld [vmem:[%s738_s1 + $0xb0] sm:$0xff]   ;;  %v577_v23 = vld [vmem:[%s738_s1 + $0x38] sm:$0xff]   ;;  %v578_v26 = vld [vmem:[%s739_s0] ss:$12 sps:$4 sm:$0xff]  }
   0x9   :  { %538 = vmatpush3.bf16.msra.mxu1 %v561_v6  ;;  %v580_v22 = vld [vmem:[%s739_s0 + $0x4] ss:$12 sps:$4 sm:$0xff]   ;;  %v582_v24 = vld [vmem:[%s739_s0 + $0x8] ss:$12 sps:$4 sm:$0xff]   ;;  %v581_v25 = vld [vmem:[%s738_s1 + $0xb8] sm:$0xff]  }
   0xa   :  { %539 = vmatprep.subr.bf16.mxu1 %v564_v9  ;;  %292 = vmatprep.mubr.bf16.mxu0 %v580_v22  ;;  %v584_v27 = vld [vmem:[%s739_s0 + $0x1c] ss:$12 sps:$4 sm:$0xff]   ;;  %v583_v28 = vld [vmem:[%s739_s0 + $0x20] ss:$12 sps:$4 sm:$0xff]   ;;  %v586_v29 = vld [vmem:[%s739_s0 + $0x18] ss:$12 sps:$4 sm:$0xff]  }
   0xb   :  { %502 = vmatpush3.bf16.msra.mxu0 %v562_v7  ;;  %551 = vmatprep.mubr.bf16.mxu1 %v582_v24  ;;  %v456_v32 = vld [vmem:[%s740_s2] ss:$0 sm:$0xff] }
   0xc   :  { %503 = vmatprep.subr.bf16.mxu0 %v563_v8 }
   0xd   :  { %540 = vmatpush3.bf16.msra.mxu1 %v564_v9 }
   0xe   :  { %541 = vmatprep.subr.bf16.mxu1 %v567_v12 }
   0xf   :  { %504 = vmatpush3.bf16.msra.mxu0 %v565_v10 }
  0x10   :  { %505 = vmatprep.subr.bf16.mxu0 %v566_v11 }
  0x11   :  { %542 = vmatpush3.bf16.msra.mxu1 %v567_v12 }
  0x12   :  { %543 = vmatprep.subr.bf16.mxu1 %v570_v14 }
  0x13   :  { %506 = vmatpush3.bf16.msra.mxu0 %v568_v13 }
  0x14   :  { %507 = vmatprep.subr.bf16.mxu0 %v569_v15 }
  0x15   :  { %544 = vmatpush3.bf16.msra.mxu1 %v570_v14 }
  0x16   :  { %545 = vmatprep.subr.bf16.mxu1 %v573_v17 }
  0x17   :  { %508 = vmatpush3.bf16.msra.mxu0 %v571_v16 }
  0x18   :  { %509 = vmatprep.subr.bf16.mxu0 %v572_v18 }
  0x19   :  { %546 = vmatpush3.bf16.msra.mxu1 %v573_v17 }
  0x1a   :  { %547 = vmatprep.subr.bf16.mxu1 %v576_v21 }
  0x1b   :  { %510 = vmatpush3.bf16.msra.mxu0 %v574_v19 }
  0x1c   :  { %511 = vmatprep.subr.bf16.mxu0 %v575_v20 }
  0x1d   :  { %548 = vmatpush3.bf16.msra.mxu1 %v576_v21 }
  0x1e   :  { %549 = vmatprep.subr.bf16.mxu1 %v581_v25 }
  0x1f   :  { %512 = vmatpush3.bf16.msra.mxu0 %v577_v23 }
  0x21   :  { %550 = vmatpush3.bf16.msra.mxu1 %v581_v25 }
  0x22   :  { %293 = vmatmul.mubr.bf16.vlgmr.msra.gmra.mrb[0].mxu0 %v578_v26 }
  0x23   :  { %300 = vmatprep.mubr.bf16.mxu0 %v584_v27 }
  0x24   :  { %552 = vmatmul.mubr.bf16.vlgmr.msra.gmra.mrb[0].mxu1 %v583_v28 }
  0x2a   :  { %301 = vmatmul.mubr.bf16.gmra.mrb[4].mxu0 %v586_v29 }
  0xf5   :  { %v513_v30 = vpop.f32.mrb[0].mxu0 }
  0xf6   :  { %v514_v31 = vpop.f32.mrb[1].mxu0 }
  0xf7   :  { %v515_v33 = vadd.f32 %v514_v31, %v513_v30  ;;  %v516_v34 = vpop.f32.mrb[2].mxu0  ;;  %v553_v36 = vpop.f32.mrb[0].mxu1 }
  0xf8   :  { %v517_v35 = vpop.f32.mrb[3].mxu0  ;;  %v343_v39 = vpop.f32.mrb[1].mxu1 }
  0xf9   :  { %v518_v37 = vadd.f32 %v517_v35, %v516_v34  ;;  %v295_v38 = vadd.f32 %v515_v33, %v456_v32  ;;  %v554_v40 = vpop.f32.mrb[2].mxu1 }
  0xfa   :  { %v346_v43 = vpop.f32.mrb[3].mxu1 }
  0xfb   :  { %v344_v41 = vadd.f32 %v343_v39, %v295_v38  ;;  %v298_v42 = vadd.f32 %v518_v37, %v456_v32  ;;  %v488_v37 = vld [vmem:[%s742_s4] ss:$0 sm:$0xff] }
  0xfd   :  { %v374_v44 = vmul.f32 %v344_v41, %v344_v41  ;;  %v347_v45 = vadd.f32 %v346_v43, %v298_v42  ;;  %v519_v46 = vpop.f32.mrb[4].mxu0  ;;  %v359_v48 = vsel %vm358_vm0, %v344_v41, 0.0 }
  0xfe   :  { %v520_v47 = vpop.f32.mrb[5].mxu0 }
  0xff   :  { %v360_v49 = vsel %vm358_vm0, %v347_v45, 0.0  ;;  %v375_v50 = vmul.f32 %v347_v45, %v347_v45  ;;  %v521_v51 = vadd.f32 %v520_v47, %v519_v46  ;;  %v522_v52 = vpop.f32.mrb[6].mxu0  ;;  %v378_v55 = vsel %vm358_vm0, %v374_v44, 0.0 }
 0x100   :  { %v361_v53 = vadd.f32 %v360_v49, %v359_v48  ;;  %v523_v54 = vpop.f32.mrb[7].mxu0 }
 0x101   :  { %v379_v56 = vsel %vm358_vm0, %v375_v50, 0.0  ;;  %v303_v57 = vadd.f32 %v521_v51, %v456_v32  ;;  %v524_v58 = vadd.f32 %v523_v54, %v522_v52 }
 0x102   :  { %v380_v59 = vadd.f32 %v379_v56, %v378_v55 }
 0x103   :  { %v352_v60 = vadd.f32 %v553_v36, %v303_v57  ;;  %v306_v61 = vadd.f32 %v524_v58, %v456_v32  ;;  %v487_v32 = vld [vmem:[%s741_s3] ss:$0 sm:$0xff] }
 0x105   :  { %v362_v62 = vsel %vm358_vm0, %v352_v60, 0.0  ;;  %v376_v63 = vmul.f32 %v352_v60, %v352_v60  ;;  %v355_v0 = vadd.f32 %v554_v40, %v306_v61 }
 0x106   :  { %v363_v1 = vadd.f32 %v362_v62, %v361_v53 }
 0x107   :  { %v381_v2 = vsel %vm358_vm0, %v376_v63, 0.0  ;;  %v364_v3 = vsel %vm358_vm0, %v355_v0, 0.0  ;;  %v377_v4 = vmul.f32 %v355_v0, %v355_v0 }
 0x108   :  { %v382_v5 = vadd.f32 %v381_v2, %v380_v59  ;;  %v365_v6 = vadd.f32 %v364_v3, %v363_v1 }
 0x109   :  { %v383_v7 = vsel %vm358_vm0, %v377_v4, 0.0 }
 0x10a   :  { %v366_v8 = vrot.slane %v365_v6, 4  ;;  %v384_v9 = vadd.f32 %v383_v7, %v382_v5 }
 0x10c   :  { %v367_v10 = vadd.f32 %v366_v8, %v365_v6  ;;  %v385_v11 = vrot.slane %v384_v9, 4 }
 0x10e   :  { %v368_v12 = vrot.slane %v367_v10, 2  ;;  %v386_v13 = vadd.f32 %v385_v11, %v384_v9 }
 0x110   :  { %v369_v14 = vadd.f32 %v368_v12, %v367_v10  ;;  %v387_v15 = vrot.slane %v386_v13, 2 }
 0x112   :  { %v370_v16 = vrot.slane %v369_v14, 1  ;;  %v388_v17 = vadd.f32 %v387_v15, %v386_v13 }
 0x114   :  { %v371_v18 = vadd.f32 %v370_v16, %v369_v14  ;;  %v389_v19 = vrot.slane %v388_v17, 1 }
 0x116   :  { %v373_v20 = vmul.f32 0.03125, %v371_v18  ;;  %v390_v21 = vadd.f32 %v389_v19, %v388_v17 }
 0x118   :  { %v391_v22 = vmul.f32 0.03125, %v390_v21  ;;  %v392_v23 = vmul.f32 %v373_v20, %v373_v20  ;;  %v395_v24 = vsub.f32 %v344_v41, %v373_v20  ;;  %v396_v25 = vsub.f32 %v347_v45, %v373_v20 }
 0x119   :  { %v397_v26 = vsub.f32 %v352_v60, %v373_v20  ;;  %v398_v27 = vsub.f32 %v355_v0, %v373_v20 }
 0x11a   :  { %v393_v28 = vsub.f32 %v391_v22, %v392_v23 }
 0x11c   :  { %v394_v29 = vmax.f32 %v393_v28, 0.0 }
 0x11e   :  { %v399_v30 = vadd.f32 1e-05, %v394_v29 }
 0x120   :  { %587 = vrsqrt.f32 %v399_v30 }
 0x12a   :  { %v588_v31 = vpop.eup %587 }
 0x12b   :  { %v401_v33 = vmul.f32 %v588_v31, %v395_v24  ;;  %v402_v34 = vmul.f32 %v588_v31, %v396_v25  ;;  %v403_v35 = vmul.f32 %v588_v31, %v397_v26  ;;  %v404_v36 = vmul.f32 %v588_v31, %v398_v27 }
 0x12d   :  { %v412_v38 = vmul.f32 %v487_v32, %v401_v33  ;;  %v413_v39 = vmul.f32 %v487_v32, %v402_v34  ;;  %v414_v40 = vmul.f32 %v487_v32, %v403_v35  ;;  %v415_v41 = vmul.f32 %v487_v32, %v404_v36 }
 0x12f   :  { %v423_v42 = vadd.f32 %v488_v37, %v412_v38  ;;  %v424_v43 = vadd.f32 %v488_v37, %v413_v39  ;;  %v425_v44 = vadd.f32 %v488_v37, %v414_v40  ;;  %v426_v45 = vadd.f32 %v488_v37, %v415_v41 }
 0x131   :  { %v427_v46 = vmax.f32 %v423_v42, 0.0  ;;  %v428_v47 = vmax.f32 %v424_v43, 0.0  ;;  %v429_v48 = vmax.f32 %v425_v44, 0.0  ;;  %v430_v49 = vmax.f32 %v426_v45, 0.0 }
 0x133   :  { %v493_v50 = vpack.c.bf16 %v427_v46, %v427_v46  ;;  %v494_v51 = vpack.c.bf16 %v428_v47, %v428_v47  ;;  %v495_v52 = vpack.c.bf16 %v429_v48, %v429_v48  ;;  %v496_v53 = vpack.c.bf16 %v430_v49, %v430_v49 }
 0x135   :  { %448 = vst.msk [vmem:[%s743_s5] sm:$0xf] %vm447_vm1, %v493_v50  ;;  %449 = vst.msk [vmem:[%s743_s5 + $0x4] sm:$0xf] %vm447_vm1, %v494_v51 }
 0x136   :  { %450 = vst.msk [vmem:[%s743_s5 + $0x8] sm:$0xf] %vm447_vm1, %v495_v52  ;;  %451 = vst.msk [vmem:[%s743_s5 + $0xc] sm:$0xf] %vm447_vm1, %v496_v53 }

// kernel: forward.11
= control target key start
LH: loop header
LB: loop body
LE: loop exit
PB: predicated region body
PF: predicated region fallthrough
CT: control target
= control target key end

     0   :  { %vm553_vm0 = vcmask 80896   ;;  %s938_s1 = inlined_call_operand.vmem [shape: bf16[640,10], index: 1, kind: input, shape index: {}]   ;;  %s939_s0 = inlined_call_operand.vmem [shape: bf16[32,640], index: 0, kind: input, shape index: {}]   ;;  %s940_s2 = inlined_call_operand.vmem [shape: f32[1,10], index: 2, kind: input, shape index: {}]   ;;  %s941_s3 = inlined_call_operand.vmem [shape: f32[32,10], index: 3, kind: output, shape index: {}]  }
   0x1   :  { %v699_v0 = vld [vmem:[%s938_s1 + $0x40] sm:$0xff]   ;;  %v703_v4 = vld [vmem:[%s938_s1 + $0x48] sm:$0xff]   ;;  %v707_v8 = vld [vmem:[%s938_s1 + $0x50] sm:$0xff]  }
   0x2   :  { %v700_v1 = vld [vmem:[%s938_s1] sm:$0xff]   ;;  %613 = vmatprep.subr.bf16.mxu0 %v699_v0  ;;  %v704_v5 = vld [vmem:[%s938_s1 + $0x8] sm:$0xff]   ;;  %v708_v9 = vld [vmem:[%s938_s1 + $0x10] sm:$0xff]  }
   0x3   :  { %v701_v2 = vld [vmem:[%s938_s1 + $0xc0] sm:$0xff]   ;;  %614 = vmatpush3.bf16.msra.mxu0 %v700_v1  ;;  %v705_v6 = vld [vmem:[%s938_s1 + $0xc8] sm:$0xff]   ;;  %v709_v10 = vld [vmem:[%s938_s1 + $0xd0] sm:$0xff]  }
   0x4   :  { %v702_v3 = vld [vmem:[%s938_s1 + $0x80] sm:$0xff]   ;;  %641 = vmatprep.subr.bf16.mxu1 %v701_v2  ;;  %615 = vmatprep.subr.bf16.mxu0 %v703_v4  ;;  %v706_v7 = vld [vmem:[%s938_s1 + $0x88] sm:$0xff]   ;;  %v710_v11 = vld [vmem:[%s938_s1 + $0x90] sm:$0xff]  }
   0x5   :  { %642 = vmatpush3.bf16.msra.mxu1 %v702_v3  ;;  %v711_v12 = vld [vmem:[%s938_s1 + $0x58] sm:$0xff]   ;;  %v715_v16 = vld [vmem:[%s938_s1 + $0x60] sm:$0xff]   ;;  %v719_v20 = vld [vmem:[%s938_s1 + $0x68] sm:$0xff]  }
   0x6   :  { %643 = vmatprep.subr.bf16.mxu1 %v705_v6  ;;  %v712_v13 = vld [vmem:[%s938_s1 + $0x18] sm:$0xff]   ;;  %v716_v17 = vld [vmem:[%s938_s1 + $0x20] sm:$0xff]   ;;  %v720_v21 = vld [vmem:[%s938_s1 + $0x28] sm:$0xff]  }
   0x7   :  { %616 = vmatpush3.bf16.msra.mxu0 %v704_v5  ;;  %v713_v14 = vld [vmem:[%s938_s1 + $0xd8] sm:$0xff]   ;;  %v717_v18 = vld [vmem:[%s938_s1 + $0xe0] sm:$0xff]   ;;  %v721_v22 = vld [vmem:[%s938_s1 + $0xe8] sm:$0xff]  }
   0x8   :  { %617 = vmatprep.subr.bf16.mxu0 %v707_v8  ;;  %v714_v15 = vld [vmem:[%s938_s1 + $0x98] sm:$0xff]   ;;  %v718_v19 = vld [vmem:[%s938_s1 + $0xa0] sm:$0xff]   ;;  %v722_v23 = vld [vmem:[%s938_s1 + $0xa8] sm:$0xff]  }
   0x9   :  { %644 = vmatpush3.bf16.msra.mxu1 %v706_v7  ;;  %v723_v24 = vld [vmem:[%s938_s1 + $0x70] sm:$0xff]   ;;  %v727_v28 = vld [vmem:[%s938_s1 + $0x78] sm:$0xff]   ;;  %v734_v34 = vld [vmem:[%s938_s1 + $0x100] sm:$0xff]  }
   0xa   :  { %645 = vmatprep.subr.bf16.mxu1 %v709_v10  ;;  %v724_v25 = vld [vmem:[%s938_s1 + $0x30] sm:$0xff]   ;;  %v728_v29 = vld [vmem:[%s938_s1 + $0x38] sm:$0xff]   ;;  %v737_v36 = vld [vmem:[%s939_s0 + $0xc] ss:$20 sps:$4 sm:$0xff]  }
   0xb   :  { %618 = vmatpush3.bf16.msra.mxu0 %v708_v9  ;;  %v725_v26 = vld [vmem:[%s938_s1 + $0xf0] sm:$0xff]   ;;  %v729_v30 = vld [vmem:[%s938_s1 + $0xf8] sm:$0xff]   ;;  %v738_v37 = vld [vmem:[%s938_s1 + $0x108] sm:$0xff]   ;;  %487 = vmatprep.mubr.bf16.mxu1 %v737_v36 }
   0xc   :  { %619 = vmatprep.subr.bf16.mxu0 %v711_v12  ;;  %v726_v27 = vld [vmem:[%s938_s1 + $0xb0] sm:$0xff]   ;;  %v732_v32 = vld [vmem:[%s939_s0 + $0x4] ss:$20 sps:$4 sm:$0xff]   ;;  %v735_v35 = vld [vmem:[%s939_s0 + $0x8] ss:$20 sps:$4 sm:$0xff]  }
   0xd   :  { %646 = vmatpush3.bf16.msra.mxu1 %v710_v11  ;;  %v730_v31 = vld [vmem:[%s939_s0] ss:$20 sps:$4 sm:$0xff]   ;;  %v733_v33 = vld [vmem:[%s938_s1 + $0xb8] sm:$0xff]   ;;  %438 = vmatprep.mubr.bf16.mxu0 %v732_v32  ;;  %v748_v43 = vld [vmem:[%s939_s0 + $0x30] ss:$20 sps:$4 sm:$0xff]  }
   0xe   :  { %647 = vmatprep.subr.bf16.mxu1 %v713_v14  ;;  %v739_v38 = vld [vmem:[%s938_s1 + $0x110] sm:$0xff]   ;;  %v742_v39 = vld [vmem:[%s939_s0 + $0x2c] ss:$20 sps:$4 sm:$0xff]   ;;  %v740_v40 = vld [vmem:[%s938_s1 + $0x118] sm:$0xff]  }
   0xf   :  { %620 = vmatpush3.bf16.msra.mxu0 %v712_v13  ;;  %v745_v41 = vld [vmem:[%s939_s0 + $0x28] ss:$20 sps:$4 sm:$0xff]   ;;  %v741_v44 = vld [vmem:[%s938_s1 + $0x120] sm:$0xff]   ;;  %v749_v47 = vld [vmem:[%s938_s1 + $0x130] sm:$0xff]  }
  0x10   :  { %621 = vmatprep.subr.bf16.mxu0 %v715_v16  ;;  %v746_v42 = vld [vmem:[%s939_s0 + $0x34] ss:$20 sps:$4 sm:$0xff]   ;;  %v751_v45 = vld [vmem:[%s939_s0 + $0x10] ss:$20 sps:$4 sm:$0xff]   ;;  %v750_v48 = vld [vmem:[%s938_s1 + $0x138] sm:$0xff]  }
  0x11   :  { %648 = vmatpush3.bf16.msra.mxu1 %v714_v15  ;;  %v744_v46 = vld [vmem:[%s938_s1 + $0x128] sm:$0xff]   ;;  %v562_v51 = vld [vmem:[%s940_s2] ss:$0 sm:$0xff] }
  0x12   :  { %649 = vmatprep.subr.bf16.mxu1 %v717_v18  ;;  %v752_v49 = vld [vmem:[%s939_s0 + $0x38] ss:$20 sps:$4 sm:$0xff]  }
  0x13   :  { %622 = vmatpush3.bf16.msra.mxu0 %v716_v17 }
  0x14   :  { %623 = vmatprep.subr.bf16.mxu0 %v719_v20 }
  0x15   :  { %650 = vmatpush3.bf16.msra.mxu1 %v718_v19 }
  0x16   :  { %651 = vmatprep.subr.bf16.mxu1 %v721_v22 }
  0x17   :  { %624 = vmatpush3.bf16.msra.mxu0 %v720_v21 }
  0x18   :  { %625 = vmatprep.subr.bf16.mxu0 %v723_v24 }
  0x19   :  { %652 = vmatpush3.bf16.msra.mxu1 %v722_v23 }
  0x1a   :  { %653 = vmatprep.subr.bf16.mxu1 %v725_v26 }
  0x1b   :  { %626 = vmatpush3.bf16.msra.mxu0 %v724_v25 }
  0x1c   :  { %627 = vmatprep.subr.bf16.mxu0 %v727_v28 }
  0x1d   :  { %654 = vmatpush3.bf16.msra.mxu1 %v726_v27 }
  0x1e   :  { %655 = vmatprep.subr.bf16.mxu1 %v729_v30 }
  0x1f   :  { %628 = vmatpush3.bf16.msra.mxu0 %v728_v29 }
  0x20   :  { %679 = vmatprep.subr.bf16.mxu0 %v734_v34 }
  0x21   :  { %656 = vmatpush3.bf16.msra.mxu1 %v733_v33 }
  0x22   :  { %439 = vmatmul.mubr.bf16.vlgmr.msra.gmra.mrb[0].mxu0 %v730_v31 }
  0x23   :  { %680 = vmatpush3.bf16.msra.mxu0 %v734_v34  ;;  %446 = vmatprep.mubr.bf16.mxu0 %v742_v39 }
  0x24   :  { %488 = vmatmul.mubr.bf16.vlgmr.msra.gmra.mrb[0].mxu1 %v735_v35  ;;  %681 = vmatprep.subr.bf16.mxu0 %v738_v37 }
  0x25   :  { %495 = vmatprep.mubr.bf16.mxu1 %v746_v42 }
  0x27   :  { %682 = vmatpush3.bf16.msra.mxu0 %v738_v37 }
  0x28   :  { %683 = vmatprep.subr.bf16.mxu0 %v739_v38 }
  0x2a   :  { %447 = vmatmul.mubr.bf16.gmra.mrb[4].mxu0 %v745_v41 }
  0x2b   :  { %684 = vmatpush3.bf16.msra.mxu0 %v739_v38  ;;  %695 = vmatprep.mubr.bf16.mxu0 %v751_v45 }
  0x2c   :  { %685 = vmatprep.subr.bf16.mxu0 %v740_v40  ;;  %496 = vmatmul.mubr.bf16.gmra.mrb[4].mxu1 %v748_v43 }
  0x2f   :  { %686 = vmatpush3.bf16.msra.mxu0 %v740_v40 }
  0x30   :  { %687 = vmatprep.subr.bf16.mxu0 %v741_v44 }
  0x33   :  { %688 = vmatpush3.bf16.msra.mxu0 %v741_v44 }
  0x34   :  { %689 = vmatprep.subr.bf16.mxu0 %v744_v46 }
  0x37   :  { %690 = vmatpush3.bf16.msra.mxu0 %v744_v46 }
  0x38   :  { %691 = vmatprep.subr.bf16.mxu0 %v749_v47 }
  0x3b   :  { %692 = vmatpush3.bf16.msra.mxu0 %v749_v47 }
  0x3c   :  { %693 = vmatprep.subr.bf16.mxu0 %v750_v48 }
  0x3f   :  { %694 = vmatpush3.bf16.msra.mxu0 %v750_v48 }
  0x42   :  { %696 = vmatmul.mubr.bf16.vlgmr.msra.gmra.mrb[8].mxu0 %v752_v49 }
  0xf5   :  { %v629_v50 = vpop.f32.mrb[0].mxu0 }
  0xf6   :  { %v630_v52 = vpop.f32.mrb[1].mxu0 }
  0xf7   :  { %v631_v53 = vadd.f32 %v630_v52, %v629_v50  ;;  %v632_v54 = vpop.f32.mrb[2].mxu0  ;;  %v657_v55 = vpop.f32.mrb[0].mxu1 }
  0xf8   :  { %v633_v56 = vpop.f32.mrb[3].mxu0  ;;  %v658_v59 = vpop.f32.mrb[1].mxu1 }
  0xf9   :  { %v441_v57 = vadd.f32 %v631_v53, %v562_v51  ;;  %v634_v58 = vadd.f32 %v633_v56, %v632_v54  ;;  %v659_v60 = vadd.f32 %v658_v59, %v657_v55  ;;  %v660_v61 = vpop.f32.mrb[2].mxu1 }
  0xfa   :  { %v661_v63 = vpop.f32.mrb[3].mxu1 }
  0xfb   :  { %v444_v62 = vadd.f32 %v634_v58, %v562_v51  ;;  %v662_v0 = vadd.f32 %v661_v63, %v660_v61  ;;  %v490_v1 = vadd.f32 %v659_v60, %v441_v57 }
  0xfd   :  { %v635_v2 = vpop.f32.mrb[4].mxu0  ;;  %v493_v4 = vadd.f32 %v662_v0, %v444_v62 }
  0xfe   :  { %v636_v3 = vpop.f32.mrb[5].mxu0 }
  0xff   :  { %v637_v5 = vadd.f32 %v636_v3, %v635_v2  ;;  %v638_v6 = vpop.f32.mrb[6].mxu0  ;;  %v663_v7 = vpop.f32.mrb[4].mxu1 }
 0x100   :  { %v639_v8 = vpop.f32.mrb[7].mxu0  ;;  %v664_v11 = vpop.f32.mrb[5].mxu1 }
 0x101   :  { %v449_v9 = vadd.f32 %v637_v5, %v562_v51  ;;  %v640_v10 = vadd.f32 %v639_v8, %v638_v6  ;;  %v665_v12 = vadd.f32 %v664_v11, %v663_v7  ;;  %v666_v13 = vpop.f32.mrb[6].mxu1 }
 0x102   :  { %v667_v15 = vpop.f32.mrb[7].mxu1 }
 0x103   :  { %v452_v14 = vadd.f32 %v640_v10, %v562_v51  ;;  %v668_v16 = vadd.f32 %v667_v15, %v666_v13  ;;  %v498_v17 = vadd.f32 %v665_v12, %v449_v9 }
 0x105   :  { %v501_v18 = vadd.f32 %v668_v16, %v452_v14 }
 0x115   :  { %v697_v19 = vpop.f32.mrb[8].mxu0 }
 0x116   :  { %v547_v20 = vadd.f32 %v697_v19, %v498_v17  ;;  %v538_v21 = vpop.f32.mrb[9].mxu0 }
 0x117   :  { %v539_v22 = vadd.f32 %v538_v21, %v490_v1  ;;  %v698_v23 = vpop.f32.mrb[10].mxu0 }
 0x118   :  { %556 = vst.msk [vmem:[%s941_s3 + $0x10] sm:$0xff] %vm553_vm0, %v547_v20  ;;  %v550_v24 = vadd.f32 %v698_v23, %v501_v18  ;;  %v541_v25 = vpop.f32.mrb[11].mxu0 }
 0x119   :  { %554 = vst.msk [vmem:[%s941_s3] sm:$0xff] %vm553_vm0, %v539_v22  ;;  %v542_v26 = vadd.f32 %v541_v25, %v493_v4 }
 0x11a   :  { %557 = vst.msk [vmem:[%s941_s3 + $0x18] sm:$0xff] %vm553_vm0, %v550_v24 }
 0x11b   :  { %555 = vst.msk [vmem:[%s941_s3 + $0x8] sm:$0xff] %vm553_vm0, %v542_v26 }

</bundles_post_ra>
